<compile_context>
chip_gen: v5e
topology: v5e:2x2
jax: 0.10.0
libtpu: 0.0.40
codegen_flags: <defaults>
</compile_context>

<pallas_src>
import jax
import jax.numpy as jnp
from jax.experimental import pallas as pl
from jax.experimental.pallas import tpu as pltpu


def _make_basic_block_kernel(wp, w_img):
    """Fused BasicBlock kernel for padded row width `wp` and image width `w_img`."""
    OFF = 7  # leading zero elements: interior / residual start at wp + 8 (aligned)

    def kernel(x_ref, w1_ref, b1_ref, w2_ref, b2_ref, o_ref, mid_ref):
        # x_ref  : (Lp, C)    bf16  flat zero-padded input (Lp = (H+3)*wp + 8)
        # w1_ref : (9, C, P)  bf16  conv1 weights (per-tap), BN1 scale folded in
        # b1_ref : (1, P)     f32   folded BN1 bias
        # w2_ref : (9, P, P)  bf16  conv2 weights (per-tap), BN2 scale folded in
        # b2_ref : (1, P)     f32   folded BN2 bias
        # o_ref  : (M, P)     f32   flat output rows (M = H*wp, junk cols kept)
        # mid_ref: (Lp, P)    bf16  scratch: padded conv1 output (conv2 input)
        M, P = o_ref.shape
        lp = mid_ref.shape[0]
        h_img = M // wp
        interior = wp + 8          # == OFF + wp + 1, multiple of 8

        # Column-validity mask generated in-kernel: 1 for real image columns,
        # 0 for right-pad / junk columns of each wp-wide flat row.
        col = jax.lax.broadcasted_iota(jnp.int32, (M, 1), 0) % wp
        mask = (col < w_img).astype(jnp.float32)

        def conv3x3(src_ref, w_ref):
            # 3x3 / pad-1 conv as 9 accumulating bf16 MXU matmuls over the
            # contiguous tap slices of the flat padded image (tap (dy, dx)
            # starts at OFF + dy*wp + dx).  No im2col patch scratch needed.
            acc = None
            for dy in range(3):
                for dx in range(3):
                    s = OFF + dy * wp + dx           # static slice start
                    part = jnp.dot(src_ref[s:s + M, :], w_ref[dy * 3 + dx],
                                   preferred_element_type=jnp.float32)
                    acc = part if acc is None else acc + part
            return acc

        # Re-zero only the halo of the conv2-input scratch (top pad region and
        # bottom pad region).  The interior [interior, interior+M) is fully
        # overwritten below on every step; the halo is re-zeroed every step
        # (not under program_id==0) so the kernel stays correct when the
        # "parallel" batch axis is split across TensorCores.
        mid_ref[0:interior, :] = jnp.zeros((interior, P), mid_ref.dtype)
        tail = (h_img + 1) * wp + 8
        mid_ref[tail:, :] = jnp.zeros((lp - tail, P), mid_ref.dtype)

        # ---- conv1 (+ folded BN1 + ReLU): 9 accumulating MXU matmuls ----
        h1 = jnp.maximum(conv3x3(x_ref, w1_ref) + b1_ref[...], 0.0) * mask
        mid_ref[interior:interior + M, :] = h1.astype(mid_ref.dtype)  # bf16 store

        # ---- conv2 (+ folded BN2) ----
        acc2 = conv3x3(mid_ref, w2_ref)

        # ---- identity residual + final ReLU (f32 epilogue) ----
        res = x_ref[interior:interior + M, :].astype(jnp.float32)
        o_ref[...] = jnp.maximum(acc2 + b2_ref[...] + res, 0.0)

    return kernel


def _vmem_limit_bytes():
    """Scoped VMEM budget: ~80% of physical, capped at 100 MiB (v5e/v6e)."""
    try:
        cap = pltpu.get_tpu_info().vmem_capacity_bytes
    except Exception:  # pragma: no cover - conservative fallback
        cap = 128 * 1024 * 1024
    return int(min(100 * 1024 * 1024, (cap * 4) // 5))


def basic_block_forward(x_nchw, params, eps=1e-5):
    """x_nchw: (N, C, H, W) f32; returns (N, P, H, W) f32."""
    N, C, H, W = x_nchw.shape
    P = params["w1"].shape[0]
    assert C == P, "identity residual requires inplanes == planes (stride=1)"

    Wp = pl.cdiv(W + 2, 8) * 8          # padded row width (sublane aligned)
    Lp = (H + 3) * Wp + 8               # flat padded rows per image (incl. +7/+1 rebase)
    M = H * Wp                          # flat output rows per image

    # NCHW -> NHWC -> flat padded-row layout, rebased by 7 leading zeros so the
    # interior starts at Wp+8 (sublane aligned).  DMA'd to the kernel as bf16.
    x_nhwc = jnp.transpose(x_nchw, (0, 2, 3, 1)).astype(jnp.bfloat16)
    xpad = jnp.pad(x_nhwc, ((0, 0), (1, 2), (1, Wp - W - 1), (0, 0)))
    xflat = jnp.pad(xpad.reshape(N, (H + 3) * Wp, C), ((0, 0), (7, 1), (0, 0)))

    # Fold eval-mode BN into the conv weights (scale) + bias; per-tap bf16 layout.
    def fold(w, g, b, m, v):
        s = g / jnp.sqrt(v + eps)
        bias = (b - m * s).reshape(1, -1).astype(jnp.float32)
        wm = (jnp.transpose(w * s[:, None, None, None], (2, 3, 1, 0))
              .reshape(9, w.shape[1], w.shape[0]).astype(jnp.bfloat16))
        return wm, bias

    w1m, b1f = fold(params["w1"], params["g1"], params["b1"], params["m1"], params["v1"])
    w2m, b2f = fold(params["w2"], params["g2"], params["b2"], params["m2"], params["v2"])

    # Grid-invariant blocks: never re-DMA'd between steps, so single-buffer them.
    winv = pl.Buffered(1)

    out_flat = pl.pallas_call(
        _make_basic_block_kernel(Wp, W),
        out_shape=jax.ShapeDtypeStruct((N, M, P), jnp.float32),
        grid_spec=pltpu.PrefetchScalarGridSpec(
            num_scalar_prefetch=0,
            grid=(N,),
            in_specs=[
                pl.BlockSpec((None, Lp, C), lambda n: (n, 0, 0)),
                pl.BlockSpec((9, C, P), lambda n: (0, 0, 0), pipeline_mode=winv),
                pl.BlockSpec((1, P), lambda n: (0, 0), pipeline_mode=winv),
                pl.BlockSpec((9, P, P), lambda n: (0, 0, 0), pipeline_mode=winv),
                pl.BlockSpec((1, P), lambda n: (0, 0), pipeline_mode=winv),
            ],
            out_specs=pl.BlockSpec((None, M, P), lambda n: (n, 0, 0)),
            scratch_shapes=[
                pltpu.VMEM((Lp, P), jnp.bfloat16),   # padded conv1 output (bf16)
            ],
        ),
        compiler_params=pltpu.CompilerParams(
            dimension_semantics=("parallel",),
            vmem_limit_bytes=_vmem_limit_bytes(),
        ),
    )(xflat, w1m, b1f, w2m, b2f)

    out = out_flat.reshape(N, H, Wp, P)[:, :, :W, :]   # drop pad/junk columns
    return jnp.transpose(out, (0, 3, 1, 2))            # back to NCHW


# ------------------------- pure-JAX f32 reference -----------------------------
def _conv3x3_ref(x, w):  # NCHW, OIHW, stride 1, pad 1
    return jax.lax.conv_general_dilated(
        x, w, window_strides=(1, 1), padding=[(1, 1), (1, 1)],
        dimension_numbers=("NCHW", "OIHW", "NCHW"))


def _bn_ref(x, gamma, beta, mean, var, eps=1e-5):
    sh = (1, -1, 1, 1)
    return (x - mean.reshape(sh)) / jnp.sqrt(var.reshape(sh) + eps) \
        * gamma.reshape(sh) + beta.reshape(sh)


def basic_block_ref(x, p):
    out = jax.nn.relu(_bn_ref(_conv3x3_ref(x, p["w1"]), p["g1"], p["b1"], p["m1"], p["v1"]))
    out = _bn_ref(_conv3x3_ref(out, p["w2"]), p["g2"], p["b2"], p["m2"], p["v2"])
    return jax.nn.relu(out + x)


# -------------------------------- main -----------------------------------------
if __name__ == "__main__":
    key = jax.random.PRNGKey(0)
    N, C, H, W = 2, 8, 16, 16          # inplanes = planes = 8, stride=1, dilation=1
    P = C

    ks = jax.random.split(key, 12)
    x = jax.random.normal(ks[0], (N, C, H, W), jnp.float32)

    params = {
        # conv weights in torch OIHW layout, no bias
        "w1": 0.1 * jax.random.normal(ks[1], (P, C, 3, 3), jnp.float32),
        "w2": 0.1 * jax.random.normal(ks[2], (P, P, 3, 3), jnp.float32),
        # BN1 (eval-mode running stats)
        "g1": 1.0 + 0.1 * jax.random.normal(ks[3], (P,), jnp.float32),
        "b1": 0.1 * jax.random.normal(ks[4], (P,), jnp.float32),
        "m1": 0.1 * jax.random.normal(ks[5], (P,), jnp.float32),
        "v1": jax.random.uniform(ks[6], (P,), jnp.float32, 0.5, 1.5),
        # BN2
        "g2": 1.0 + 0.1 * jax.random.normal(ks[7], (P,), jnp.float32),
        "b2": 0.1 * jax.random.normal(ks[8], (P,), jnp.float32),
        "m2": 0.1 * jax.random.normal(ks[9], (P,), jnp.float32),
        "v2": jax.random.uniform(ks[10], (P,), jnp.float32, 0.5, 1.5),
    }

    fwd = jax.jit(basic_block_forward)
    out = jax.block_until_ready(fwd(x, params))
    ref = jax.block_until_ready(basic_block_ref(x, params))

    assert out.shape == (N, P, H, W)
    # bf16 MXU operands + bf16 input/residual (f32 accumulation / epilogue)
    # -> loosened tolerance vs the f32 reference.
    assert jnp.allclose(out, ref, atol=5e-2, rtol=5e-2), \
        f"max abs err = {jnp.max(jnp.abs(out - ref))}"
    print("KERNEL_OK")
</pallas_src>

<mosaic_0001>
module attributes {stable_mosaic.version = 11 : i64} {
  func.func @kernel(%arg0: i32, %arg1: memref<1x464x8xbf16, #tpu.memory_space<vmem>>, %arg2: memref<9x8x8xbf16, #tpu.memory_space<vmem>>, %arg3: memref<1x8xf32, #tpu.memory_space<vmem>>, %arg4: memref<9x8x8xbf16, #tpu.memory_space<vmem>>, %arg5: memref<1x8xf32, #tpu.memory_space<vmem>>, %arg6: memref<1x384x8xf32, #tpu.memory_space<vmem>>, %arg7: memref<464x8xbf16, #tpu.memory_space<vmem>>) attributes {dimension_semantics = [#tpu.dimension_semantics<parallel>], iteration_bounds = array<i64: 2>, scalar_prefetch = 0 : i64, scratch_operands = 1 : i64, tpu.core_type = #tpu.core_type<tc>, window_params = [{transform_indices = @transform_0, window_bounds = array<i64: 1, 464, 8>}, {pipeline_mode = #tpu.pipeline_mode<synchronous>, transform_indices = @transform_1, window_bounds = array<i64: 9, 8, 8>}, {pipeline_mode = #tpu.pipeline_mode<synchronous>, transform_indices = @transform_2, window_bounds = array<i64: 1, 8>}, {pipeline_mode = #tpu.pipeline_mode<synchronous>, transform_indices = @transform_3, window_bounds = array<i64: 9, 8, 8>}, {pipeline_mode = #tpu.pipeline_mode<synchronous>, transform_indices = @transform_4, window_bounds = array<i64: 1, 8>}, {transform_indices = @transform_5, window_bounds = array<i64: 1, 384, 8>}]} {
    %0 = tpu.iota {dimensions = array<i32: 0>} : vector<384x1xi32>
    %c24_i32 = arith.constant 24 : i32
    %c0_i32 = arith.constant 0 : i32
    %1 = arith.cmpi eq, %c24_i32, %c0_i32 : i32
    %c1_i32 = arith.constant 1 : i32
    %2 = arith.select %1, %c1_i32, %c24_i32 : i32
    %3 = vector.broadcast %2 : i32 to vector<384x1xi32>
    %4 = arith.remsi %0, %3 : vector<384x1xi32>
    %c0_i32_0 = arith.constant 0 : i32
    %5 = vector.broadcast %c0_i32_0 : i32 to vector<384x1xi32>
    %6 = arith.cmpi ne, %4, %5 : vector<384x1xi32>
    %c0_i32_1 = arith.constant 0 : i32
    %7 = vector.broadcast %c0_i32_1 : i32 to vector<384x1xi32>
    %8 = arith.cmpi slt, %4, %7 : vector<384x1xi32>
    %c0_i32_2 = arith.constant 0 : i32
    %9 = arith.cmpi slt, %2, %c0_i32_2 : i32
    %10 = vector.broadcast %9 : i1 to vector<384x1xi1>
    %11 = vector.broadcast %10 : vector<384x1xi1> to vector<384x1xi1>
    %12 = arith.xori %8, %11 : vector<384x1xi1>
    %13 = arith.andi %12, %6 : vector<384x1xi1>
    %14 = vector.broadcast %2 : i32 to vector<384x1xi32>
    %15 = arith.addi %4, %14 : vector<384x1xi32>
    %16 = arith.select %13, %15, %4 : vector<384x1xi1>, vector<384x1xi32>
    %c16_i32 = arith.constant 16 : i32
    %17 = vector.broadcast %c16_i32 : i32 to vector<384x1xi32>
    %18 = arith.cmpi slt, %16, %17 : vector<384x1xi32>
    %19 = arith.extui %18 : vector<384x1xi1> to vector<384x1xi32>
    %20 = arith.sitofp %19 : vector<384x1xi32> to vector<384x1xf32>
    %cst = arith.constant 0.000000e+00 : bf16
    %21 = vector.broadcast %cst : bf16 to vector<32x8xbf16>
    %c0 = arith.constant 0 : index
    %c0_3 = arith.constant 0 : index
    %22 = vector.load %arg7[%c0, %c0_3] : memref<464x8xbf16, #tpu.memory_space<vmem>>, vector<32x8xbf16>
    tpu.vector_store %arg7[%c0, %c0_3], %21 {strides = array<i32>} : memref<464x8xbf16, #tpu.memory_space<vmem>>, vector<32x8xbf16>,
    %cst_4 = arith.constant 0.000000e+00 : bf16
    %23 = vector.broadcast %cst_4 : bf16 to vector<48x8xbf16>
    %c416 = arith.constant 416 : index
    %c0_5 = arith.constant 0 : index
    %24 = vector.load %arg7[%c416, %c0_5] : memref<464x8xbf16, #tpu.memory_space<vmem>>, vector<48x8xbf16>
    tpu.vector_store %arg7[%c416, %c0_5], %23 {strides = array<i32>} : memref<464x8xbf16, #tpu.memory_space<vmem>>, vector<48x8xbf16>,
    %c0_6 = arith.constant 0 : index
    %c7 = arith.constant 7 : index
    %c0_7 = arith.constant 0 : index
    %25 = vector.load %arg1[%c0_6, %c7, %c0_7] : memref<1x464x8xbf16, #tpu.memory_space<vmem>>, vector<1x384x8xbf16>
    %26 = vector.shape_cast %25 : vector<1x384x8xbf16> to vector<384x8xbf16>
    %c0_8 = arith.constant 0 : index
    %c0_9 = arith.constant 0 : index
    %c0_10 = arith.constant 0 : index
    %27 = vector.load %arg2[%c0_8, %c0_9, %c0_10] : memref<9x8x8xbf16, #tpu.memory_space<vmem>>, vector<1x8x8xbf16>
    %28 = vector.shape_cast %27 : vector<1x8x8xbf16> to vector<8x8xbf16>
    %cst_11 = arith.constant dense<0.000000e+00> : vector<384x8xf32>
    %29 = tpu.matmul %26, %28, %cst_11 {dimension_numbers = #tpu.dot_dimension_numbers<[1], [0], [0], [1], [0, 0, 1, 1], [], []>} : vector<384x8xbf16>, vector<8x8xbf16>, vector<384x8xf32> -> vector<384x8xf32>
    %c0_12 = arith.constant 0 : index
    %c8 = arith.constant 8 : index
    %c0_13 = arith.constant 0 : index
    %30 = vector.load %arg1[%c0_12, %c8, %c0_13] : memref<1x464x8xbf16, #tpu.memory_space<vmem>>, vector<1x384x8xbf16>
    %31 = vector.shape_cast %30 : vector<1x384x8xbf16> to vector<384x8xbf16>
    %c1 = arith.constant 1 : index
    %c0_14 = arith.constant 0 : index
    %c0_15 = arith.constant 0 : index
    %32 = vector.load %arg2[%c1, %c0_14, %c0_15] : memref<9x8x8xbf16, #tpu.memory_space<vmem>>, vector<1x8x8xbf16>
    %33 = vector.shape_cast %32 : vector<1x8x8xbf16> to vector<8x8xbf16>
    %cst_16 = arith.constant dense<0.000000e+00> : vector<384x8xf32>
    %34 = tpu.matmul %31, %33, %cst_16 {dimension_numbers = #tpu.dot_dimension_numbers<[1], [0], [0], [1], [0, 0, 1, 1], [], []>} : vector<384x8xbf16>, vector<8x8xbf16>, vector<384x8xf32> -> vector<384x8xf32>
    %35 = arith.addf %29, %34 : vector<384x8xf32>
    %c0_17 = arith.constant 0 : index
    %c9 = arith.constant 9 : index
    %c0_18 = arith.constant 0 : index
    %36 = vector.load %arg1[%c0_17, %c9, %c0_18] : memref<1x464x8xbf16, #tpu.memory_space<vmem>>, vector<1x384x8xbf16>
    %37 = vector.shape_cast %36 : vector<1x384x8xbf16> to vector<384x8xbf16>
    %c2 = arith.constant 2 : index
    %c0_19 = arith.constant 0 : index
    %c0_20 = arith.constant 0 : index
    %38 = vector.load %arg2[%c2, %c0_19, %c0_20] : memref<9x8x8xbf16, #tpu.memory_space<vmem>>, vector<1x8x8xbf16>
    %39 = vector.shape_cast %38 : vector<1x8x8xbf16> to vector<8x8xbf16>
    %cst_21 = arith.constant dense<0.000000e+00> : vector<384x8xf32>
    %40 = tpu.matmul %37, %39, %cst_21 {dimension_numbers = #tpu.dot_dimension_numbers<[1], [0], [0], [1], [0, 0, 1, 1], [], []>} : vector<384x8xbf16>, vector<8x8xbf16>, vector<384x8xf32> -> vector<384x8xf32>
    %41 = arith.addf %35, %40 : vector<384x8xf32>
    %c0_22 = arith.constant 0 : index
    %c31 = arith.constant 31 : index
    %c0_23 = arith.constant 0 : index
    %42 = vector.load %arg1[%c0_22, %c31, %c0_23] : memref<1x464x8xbf16, #tpu.memory_space<vmem>>, vector<1x384x8xbf16>
    %43 = vector.shape_cast %42 : vector<1x384x8xbf16> to vector<384x8xbf16>
    %c3 = arith.constant 3 : index
    %c0_24 = arith.constant 0 : index
    %c0_25 = arith.constant 0 : index
    %44 = vector.load %arg2[%c3, %c0_24, %c0_25] : memref<9x8x8xbf16, #tpu.memory_space<vmem>>, vector<1x8x8xbf16>
    %45 = vector.shape_cast %44 : vector<1x8x8xbf16> to vector<8x8xbf16>
    %cst_26 = arith.constant dense<0.000000e+00> : vector<384x8xf32>
    %46 = tpu.matmul %43, %45, %cst_26 {dimension_numbers = #tpu.dot_dimension_numbers<[1], [0], [0], [1], [0, 0, 1, 1], [], []>} : vector<384x8xbf16>, vector<8x8xbf16>, vector<384x8xf32> -> vector<384x8xf32>
    %47 = arith.addf %41, %46 : vector<384x8xf32>
    %c0_27 = arith.constant 0 : index
    %c32 = arith.constant 32 : index
    %c0_28 = arith.constant 0 : index
    %48 = vector.load %arg1[%c0_27, %c32, %c0_28] : memref<1x464x8xbf16, #tpu.memory_space<vmem>>, vector<1x384x8xbf16>
    %49 = vector.shape_cast %48 : vector<1x384x8xbf16> to vector<384x8xbf16>
    %c4 = arith.constant 4 : index
    %c0_29 = arith.constant 0 : index
    %c0_30 = arith.constant 0 : index
    %50 = vector.load %arg2[%c4, %c0_29, %c0_30] : memref<9x8x8xbf16, #tpu.memory_space<vmem>>, vector<1x8x8xbf16>
    %51 = vector.shape_cast %50 : vector<1x8x8xbf16> to vector<8x8xbf16>
    %cst_31 = arith.constant dense<0.000000e+00> : vector<384x8xf32>
    %52 = tpu.matmul %49, %51, %cst_31 {dimension_numbers = #tpu.dot_dimension_numbers<[1], [0], [0], [1], [0, 0, 1, 1], [], []>} : vector<384x8xbf16>, vector<8x8xbf16>, vector<384x8xf32> -> vector<384x8xf32>
    %53 = arith.addf %47, %52 : vector<384x8xf32>
    %c0_32 = arith.constant 0 : index
    %c33 = arith.constant 33 : index
    %c0_33 = arith.constant 0 : index
    %54 = vector.load %arg1[%c0_32, %c33, %c0_33] : memref<1x464x8xbf16, #tpu.memory_space<vmem>>, vector<1x384x8xbf16>
    %55 = vector.shape_cast %54 : vector<1x384x8xbf16> to vector<384x8xbf16>
    %c5 = arith.constant 5 : index
    %c0_34 = arith.constant 0 : index
    %c0_35 = arith.constant 0 : index
    %56 = vector.load %arg2[%c5, %c0_34, %c0_35] : memref<9x8x8xbf16, #tpu.memory_space<vmem>>, vector<1x8x8xbf16>
    %57 = vector.shape_cast %56 : vector<1x8x8xbf16> to vector<8x8xbf16>
    %cst_36 = arith.constant dense<0.000000e+00> : vector<384x8xf32>
    %58 = tpu.matmul %55, %57, %cst_36 {dimension_numbers = #tpu.dot_dimension_numbers<[1], [0], [0], [1], [0, 0, 1, 1], [], []>} : vector<384x8xbf16>, vector<8x8xbf16>, vector<384x8xf32> -> vector<384x8xf32>
    %59 = arith.addf %53, %58 : vector<384x8xf32>
    %c0_37 = arith.constant 0 : index
    %c55 = arith.constant 55 : index
    %c0_38 = arith.constant 0 : index
    %60 = vector.load %arg1[%c0_37, %c55, %c0_38] : memref<1x464x8xbf16, #tpu.memory_space<vmem>>, vector<1x384x8xbf16>
    %61 = vector.shape_cast %60 : vector<1x384x8xbf16> to vector<384x8xbf16>
    %c6 = arith.constant 6 : index
    %c0_39 = arith.constant 0 : index
    %c0_40 = arith.constant 0 : index
    %62 = vector.load %arg2[%c6, %c0_39, %c0_40] : memref<9x8x8xbf16, #tpu.memory_space<vmem>>, vector<1x8x8xbf16>
    %63 = vector.shape_cast %62 : vector<1x8x8xbf16> to vector<8x8xbf16>
    %cst_41 = arith.constant dense<0.000000e+00> : vector<384x8xf32>
    %64 = tpu.matmul %61, %63, %cst_41 {dimension_numbers = #tpu.dot_dimension_numbers<[1], [0], [0], [1], [0, 0, 1, 1], [], []>} : vector<384x8xbf16>, vector<8x8xbf16>, vector<384x8xf32> -> vector<384x8xf32>
    %65 = arith.addf %59, %64 : vector<384x8xf32>
    %c0_42 = arith.constant 0 : index
    %c56 = arith.constant 56 : index
    %c0_43 = arith.constant 0 : index
    %66 = vector.load %arg1[%c0_42, %c56, %c0_43] : memref<1x464x8xbf16, #tpu.memory_space<vmem>>, vector<1x384x8xbf16>
    %67 = vector.shape_cast %66 : vector<1x384x8xbf16> to vector<384x8xbf16>
    %c7_44 = arith.constant 7 : index
    %c0_45 = arith.constant 0 : index
    %c0_46 = arith.constant 0 : index
    %68 = vector.load %arg2[%c7_44, %c0_45, %c0_46] : memref<9x8x8xbf16, #tpu.memory_space<vmem>>, vector<1x8x8xbf16>
    %69 = vector.shape_cast %68 : vector<1x8x8xbf16> to vector<8x8xbf16>
    %cst_47 = arith.constant dense<0.000000e+00> : vector<384x8xf32>
    %70 = tpu.matmul %67, %69, %cst_47 {dimension_numbers = #tpu.dot_dimension_numbers<[1], [0], [0], [1], [0, 0, 1, 1], [], []>} : vector<384x8xbf16>, vector<8x8xbf16>, vector<384x8xf32> -> vector<384x8xf32>
    %71 = arith.addf %65, %70 : vector<384x8xf32>
    %c0_48 = arith.constant 0 : index
    %c57 = arith.constant 57 : index
    %c0_49 = arith.constant 0 : index
    %72 = vector.load %arg1[%c0_48, %c57, %c0_49] : memref<1x464x8xbf16, #tpu.memory_space<vmem>>, vector<1x384x8xbf16>
    %73 = vector.shape_cast %72 : vector<1x384x8xbf16> to vector<384x8xbf16>
    %c8_50 = arith.constant 8 : index
    %c0_51 = arith.constant 0 : index
    %c0_52 = arith.constant 0 : index
    %74 = vector.load %arg2[%c8_50, %c0_51, %c0_52] : memref<9x8x8xbf16, #tpu.memory_space<vmem>>, vector<1x8x8xbf16>
    %75 = vector.shape_cast %74 : vector<1x8x8xbf16> to vector<8x8xbf16>
    %cst_53 = arith.constant dense<0.000000e+00> : vector<384x8xf32>
    %76 = tpu.matmul %73, %75, %cst_53 {dimension_numbers = #tpu.dot_dimension_numbers<[1], [0], [0], [1], [0, 0, 1, 1], [], []>} : vector<384x8xbf16>, vector<8x8xbf16>, vector<384x8xf32> -> vector<384x8xf32>
    %77 = arith.addf %71, %76 : vector<384x8xf32>
    %c0_54 = arith.constant 0 : index
    %c0_55 = arith.constant 0 : index
    %78 = vector.load %arg3[%c0_54, %c0_55] : memref<1x8xf32, #tpu.memory_space<vmem>>, vector<1x8xf32>
    %79 = vector.broadcast %78 : vector<1x8xf32> to vector<384x8xf32>
    %80 = arith.addf %77, %79 : vector<384x8xf32>
    %cst_56 = arith.constant 0.000000e+00 : f32
    %81 = vector.broadcast %cst_56 : f32 to vector<384x8xf32>
    %82 = arith.maximumf %80, %81 : vector<384x8xf32>
    %83 = vector.broadcast %20 : vector<384x1xf32> to vector<384x8xf32>
    %84 = arith.mulf %82, %83 : vector<384x8xf32>
    %85 = arith.truncf %84 : vector<384x8xf32> to vector<384x8xbf16>
    %c32_57 = arith.constant 32 : index
    %c0_58 = arith.constant 0 : index
    %86 = vector.load %arg7[%c32_57, %c0_58] : memref<464x8xbf16, #tpu.memory_space<vmem>>, vector<384x8xbf16>
    tpu.vector_store %arg7[%c32_57, %c0_58], %85 {strides = array<i32>} : memref<464x8xbf16, #tpu.memory_space<vmem>>, vector<384x8xbf16>,
    %c7_59 = arith.constant 7 : index
    %c0_60 = arith.constant 0 : index
    %87 = vector.load %arg7[%c7_59, %c0_60] : memref<464x8xbf16, #tpu.memory_space<vmem>>, vector<384x8xbf16>
    %c0_61 = arith.constant 0 : index
    %c0_62 = arith.constant 0 : index
    %c0_63 = arith.constant 0 : index
    %88 = vector.load %arg4[%c0_61, %c0_62, %c0_63] : memref<9x8x8xbf16, #tpu.memory_space<vmem>>, vector<1x8x8xbf16>
    %89 = vector.shape_cast %88 : vector<1x8x8xbf16> to vector<8x8xbf16>
    %cst_64 = arith.constant dense<0.000000e+00> : vector<384x8xf32>
    %90 = tpu.matmul %87, %89, %cst_64 {dimension_numbers = #tpu.dot_dimension_numbers<[1], [0], [0], [1], [0, 0, 1, 1], [], []>} : vector<384x8xbf16>, vector<8x8xbf16>, vector<384x8xf32> -> vector<384x8xf32>
    %c8_65 = arith.constant 8 : index
    %c0_66 = arith.constant 0 : index
    %91 = vector.load %arg7[%c8_65, %c0_66] : memref<464x8xbf16, #tpu.memory_space<vmem>>, vector<384x8xbf16>
    %c1_67 = arith.constant 1 : index
    %c0_68 = arith.constant 0 : index
    %c0_69 = arith.constant 0 : index
    %92 = vector.load %arg4[%c1_67, %c0_68, %c0_69] : memref<9x8x8xbf16, #tpu.memory_space<vmem>>, vector<1x8x8xbf16>
    %93 = vector.shape_cast %92 : vector<1x8x8xbf16> to vector<8x8xbf16>
    %cst_70 = arith.constant dense<0.000000e+00> : vector<384x8xf32>
    %94 = tpu.matmul %91, %93, %cst_70 {dimension_numbers = #tpu.dot_dimension_numbers<[1], [0], [0], [1], [0, 0, 1, 1], [], []>} : vector<384x8xbf16>, vector<8x8xbf16>, vector<384x8xf32> -> vector<384x8xf32>
    %95 = arith.addf %90, %94 : vector<384x8xf32>
    %c9_71 = arith.constant 9 : index
    %c0_72 = arith.constant 0 : index
    %96 = vector.load %arg7[%c9_71, %c0_72] : memref<464x8xbf16, #tpu.memory_space<vmem>>, vector<384x8xbf16>
    %c2_73 = arith.constant 2 : index
    %c0_74 = arith.constant 0 : index
    %c0_75 = arith.constant 0 : index
    %97 = vector.load %arg4[%c2_73, %c0_74, %c0_75] : memref<9x8x8xbf16, #tpu.memory_space<vmem>>, vector<1x8x8xbf16>
    %98 = vector.shape_cast %97 : vector<1x8x8xbf16> to vector<8x8xbf16>
    %cst_76 = arith.constant dense<0.000000e+00> : vector<384x8xf32>
    %99 = tpu.matmul %96, %98, %cst_76 {dimension_numbers = #tpu.dot_dimension_numbers<[1], [0], [0], [1], [0, 0, 1, 1], [], []>} : vector<384x8xbf16>, vector<8x8xbf16>, vector<384x8xf32> -> vector<384x8xf32>
    %100 = arith.addf %95, %99 : vector<384x8xf32>
    %c31_77 = arith.constant 31 : index
    %c0_78 = arith.constant 0 : index
    %101 = vector.load %arg7[%c31_77, %c0_78] : memref<464x8xbf16, #tpu.memory_space<vmem>>, vector<384x8xbf16>
    %c3_79 = arith.constant 3 : index
    %c0_80 = arith.constant 0 : index
    %c0_81 = arith.constant 0 : index
    %102 = vector.load %arg4[%c3_79, %c0_80, %c0_81] : memref<9x8x8xbf16, #tpu.memory_space<vmem>>, vector<1x8x8xbf16>
    %103 = vector.shape_cast %102 : vector<1x8x8xbf16> to vector<8x8xbf16>
    %cst_82 = arith.constant dense<0.000000e+00> : vector<384x8xf32>
    %104 = tpu.matmul %101, %103, %cst_82 {dimension_numbers = #tpu.dot_dimension_numbers<[1], [0], [0], [1], [0, 0, 1, 1], [], []>} : vector<384x8xbf16>, vector<8x8xbf16>, vector<384x8xf32> -> vector<384x8xf32>
    %105 = arith.addf %100, %104 : vector<384x8xf32>
    %c32_83 = arith.constant 32 : index
    %c0_84 = arith.constant 0 : index
    %106 = vector.load %arg7[%c32_83, %c0_84] : memref<464x8xbf16, #tpu.memory_space<vmem>>, vector<384x8xbf16>
    %c4_85 = arith.constant 4 : index
    %c0_86 = arith.constant 0 : index
    %c0_87 = arith.constant 0 : index
    %107 = vector.load %arg4[%c4_85, %c0_86, %c0_87] : memref<9x8x8xbf16, #tpu.memory_space<vmem>>, vector<1x8x8xbf16>
    %108 = vector.shape_cast %107 : vector<1x8x8xbf16> to vector<8x8xbf16>
    %cst_88 = arith.constant dense<0.000000e+00> : vector<384x8xf32>
    %109 = tpu.matmul %106, %108, %cst_88 {dimension_numbers = #tpu.dot_dimension_numbers<[1], [0], [0], [1], [0, 0, 1, 1], [], []>} : vector<384x8xbf16>, vector<8x8xbf16>, vector<384x8xf32> -> vector<384x8xf32>
    %110 = arith.addf %105, %109 : vector<384x8xf32>
    %c33_89 = arith.constant 33 : index
    %c0_90 = arith.constant 0 : index
    %111 = vector.load %arg7[%c33_89, %c0_90] : memref<464x8xbf16, #tpu.memory_space<vmem>>, vector<384x8xbf16>
    %c5_91 = arith.constant 5 : index
    %c0_92 = arith.constant 0 : index
    %c0_93 = arith.constant 0 : index
    %112 = vector.load %arg4[%c5_91, %c0_92, %c0_93] : memref<9x8x8xbf16, #tpu.memory_space<vmem>>, vector<1x8x8xbf16>
    %113 = vector.shape_cast %112 : vector<1x8x8xbf16> to vector<8x8xbf16>
    %cst_94 = arith.constant dense<0.000000e+00> : vector<384x8xf32>
    %114 = tpu.matmul %111, %113, %cst_94 {dimension_numbers = #tpu.dot_dimension_numbers<[1], [0], [0], [1], [0, 0, 1, 1], [], []>} : vector<384x8xbf16>, vector<8x8xbf16>, vector<384x8xf32> -> vector<384x8xf32>
    %115 = arith.addf %110, %114 : vector<384x8xf32>
    %c55_95 = arith.constant 55 : index
    %c0_96 = arith.constant 0 : index
    %116 = vector.load %arg7[%c55_95, %c0_96] : memref<464x8xbf16, #tpu.memory_space<vmem>>, vector<384x8xbf16>
    %c6_97 = arith.constant 6 : index
    %c0_98 = arith.constant 0 : index
    %c0_99 = arith.constant 0 : index
    %117 = vector.load %arg4[%c6_97, %c0_98, %c0_99] : memref<9x8x8xbf16, #tpu.memory_space<vmem>>, vector<1x8x8xbf16>
    %118 = vector.shape_cast %117 : vector<1x8x8xbf16> to vector<8x8xbf16>
    %cst_100 = arith.constant dense<0.000000e+00> : vector<384x8xf32>
    %119 = tpu.matmul %116, %118, %cst_100 {dimension_numbers = #tpu.dot_dimension_numbers<[1], [0], [0], [1], [0, 0, 1, 1], [], []>} : vector<384x8xbf16>, vector<8x8xbf16>, vector<384x8xf32> -> vector<384x8xf32>
    %120 = arith.addf %115, %119 : vector<384x8xf32>
    %c56_101 = arith.constant 56 : index
    %c0_102 = arith.constant 0 : index
    %121 = vector.load %arg7[%c56_101, %c0_102] : memref<464x8xbf16, #tpu.memory_space<vmem>>, vector<384x8xbf16>
    %c7_103 = arith.constant 7 : index
    %c0_104 = arith.constant 0 : index
    %c0_105 = arith.constant 0 : index
    %122 = vector.load %arg4[%c7_103, %c0_104, %c0_105] : memref<9x8x8xbf16, #tpu.memory_space<vmem>>, vector<1x8x8xbf16>
    %123 = vector.shape_cast %122 : vector<1x8x8xbf16> to vector<8x8xbf16>
    %cst_106 = arith.constant dense<0.000000e+00> : vector<384x8xf32>
    %124 = tpu.matmul %121, %123, %cst_106 {dimension_numbers = #tpu.dot_dimension_numbers<[1], [0], [0], [1], [0, 0, 1, 1], [], []>} : vector<384x8xbf16>, vector<8x8xbf16>, vector<384x8xf32> -> vector<384x8xf32>
    %125 = arith.addf %120, %124 : vector<384x8xf32>
    %c57_107 = arith.constant 57 : index
    %c0_108 = arith.constant 0 : index
    %126 = vector.load %arg7[%c57_107, %c0_108] : memref<464x8xbf16, #tpu.memory_space<vmem>>, vector<384x8xbf16>
    %c8_109 = arith.constant 8 : index
    %c0_110 = arith.constant 0 : index
    %c0_111 = arith.constant 0 : index
    %127 = vector.load %arg4[%c8_109, %c0_110, %c0_111] : memref<9x8x8xbf16, #tpu.memory_space<vmem>>, vector<1x8x8xbf16>
    %128 = vector.shape_cast %127 : vector<1x8x8xbf16> to vector<8x8xbf16>
    %cst_112 = arith.constant dense<0.000000e+00> : vector<384x8xf32>
    %129 = tpu.matmul %126, %128, %cst_112 {dimension_numbers = #tpu.dot_dimension_numbers<[1], [0], [0], [1], [0, 0, 1, 1], [], []>} : vector<384x8xbf16>, vector<8x8xbf16>, vector<384x8xf32> -> vector<384x8xf32>
    %130 = arith.addf %125, %129 : vector<384x8xf32>
    %c0_113 = arith.constant 0 : index
    %c32_114 = arith.constant 32 : index
    %c0_115 = arith.constant 0 : index
    %131 = vector.load %arg1[%c0_113, %c32_114, %c0_115] : memref<1x464x8xbf16, #tpu.memory_space<vmem>>, vector<1x384x8xbf16>
    %132 = vector.shape_cast %131 : vector<1x384x8xbf16> to vector<384x8xbf16>
    %133 = arith.extf %132 : vector<384x8xbf16> to vector<384x8xf32>
    %c0_116 = arith.constant 0 : index
    %c0_117 = arith.constant 0 : index
    %134 = vector.load %arg5[%c0_116, %c0_117] : memref<1x8xf32, #tpu.memory_space<vmem>>, vector<1x8xf32>
    %135 = vector.broadcast %134 : vector<1x8xf32> to vector<384x8xf32>
    %136 = arith.addf %130, %135 : vector<384x8xf32>
    %137 = arith.addf %136, %133 : vector<384x8xf32>
    %cst_118 = arith.constant 0.000000e+00 : f32
    %138 = vector.broadcast %cst_118 : f32 to vector<384x8xf32>
    %139 = arith.maximumf %137, %138 : vector<384x8xf32>
    %c0_119 = arith.constant 0 : index
    %c0_120 = arith.constant 0 : index
    %c0_121 = arith.constant 0 : index
    %140 = vector.load %arg6[%c0_119, %c0_120, %c0_121] : memref<1x384x8xf32, #tpu.memory_space<vmem>>, vector<1x384x8xf32>
    %141 = vector.shape_cast %140 : vector<1x384x8xf32> to vector<384x8xf32>
    %142 = vector.shape_cast %139 : vector<384x8xf32> to vector<1x384x8xf32>
    tpu.vector_store %arg6[%c0_119, %c0_120, %c0_121], %142 {strides = array<i32>} : memref<1x384x8xf32, #tpu.memory_space<vmem>>, vector<1x384x8xf32>,
    return
  }
  func.func @transform_0(%arg0: i32) -> (i32, i32, i32) {
    %c0_i32 = arith.constant 0 : i32
    %c0_i32_0 = arith.constant 0 : i32
    %c0_i32_1 = arith.constant 0 : i32
    return %arg0, %c0_i32, %c0_i32_0 : i32, i32, i32
  }
  func.func @transform_1(%arg0: i32) -> (i32, i32, i32) {
    %c0_i32 = arith.constant 0 : i32
    %c0_i32_0 = arith.constant 0 : i32
    %c0_i32_1 = arith.constant 0 : i32
    %c0_i32_2 = arith.constant 0 : i32
    return %c0_i32, %c0_i32_0, %c0_i32_1 : i32, i32, i32
  }
  func.func @transform_2(%arg0: i32) -> (i32, i32) {
    %c0_i32 = arith.constant 0 : i32
    %c0_i32_0 = arith.constant 0 : i32
    %c0_i32_1 = arith.constant 0 : i32
    return %c0_i32, %c0_i32_0 : i32, i32
  }
  func.func @transform_3(%arg0: i32) -> (i32, i32, i32) {
    %c0_i32 = arith.constant 0 : i32
    %c0_i32_0 = arith.constant 0 : i32
    %c0_i32_1 = arith.constant 0 : i32
    %c0_i32_2 = arith.constant 0 : i32
    return %c0_i32, %c0_i32_0, %c0_i32_1 : i32, i32, i32
  }
  func.func @transform_4(%arg0: i32) -> (i32, i32) {
    %c0_i32 = arith.constant 0 : i32
    %c0_i32_0 = arith.constant 0 : i32
    %c0_i32_1 = arith.constant 0 : i32
    return %c0_i32, %c0_i32_0 : i32, i32
  }
  func.func @transform_5(%arg0: i32) -> (i32, i32, i32) {
    %c0_i32 = arith.constant 0 : i32
    %c0_i32_0 = arith.constant 0 : i32
    %c0_i32_1 = arith.constant 0 : i32
    return %arg0, %c0_i32, %c0_i32_0 : i32, i32, i32
  }
}

</mosaic_0001>

<bundles_post_ra>
// kernel: basic_block_forward.1
= control target key start
LH: loop header
LB: loop body
LE: loop exit
PB: predicated region body
PF: predicated region fallthrough
CT: control target
= control target key end

     0   :  { %s14820_s18 = smov 0   ;;  %s18817_s0 = inlined_call_operand.vmem [shape: bf16[2,464,8], index: 0, kind: input, shape index: {}]   ;;  %s18818_s1 = inlined_call_operand.vmem [shape: bf16[9,8,8], index: 1, kind: input, shape index: {}]   ;;  %s18819_s2 = inlined_call_operand.vmem [shape: f32[1,8], index: 2, kind: input, shape index: {}]   ;;  %s18820_s3 = inlined_call_operand.vmem [shape: bf16[9,8,8], index: 3, kind: input, shape index: {}]   ;;  %s18821_s4 = inlined_call_operand.vmem [shape: f32[1,8], index: 4, kind: input, shape index: {}]   ;;  %s18822_s5 = inlined_call_operand.vmem [shape: f32[2,384,8], index: 5, kind: output, shape index: {}]  }
   0x1 LB: > { %s11763_s19 = sadd.s32 4294967295, %s14786_s18   ;;  %p11767_p0 = scmp.ge.s32.totalorder %s14786_s18, 1  ;;  %s14786_s18 = sphi %s14820_s18, %s15_s18  }
   0x2   : > { %p187_p1 = scmp.lt.s32.totalorder %s14786_s18, 3 }
   0x4   : > { %p188_p2 = pnand %p11767_p0, %p187_p1 }
   0x6   : > { %191 = sbr.rel (%p188_p2) target bundleno = 2124 (0x84c), region = 40 }
   0xb   : > { %v11818_v0 = vld [vmem:[%s18818_s1 + $0x4] sm:$0xf]  ;;  %vm2307_vm0 = vcmask 1043456   ;;  %p215_p3 = scmp.lt.s32.totalorder %s11763_s19, 1  ;;  %v2111_v2 = vld [vmem:[%s18818_s1] sm:$0xf] }
   0xc   : > { %v2309_v1 = vsel %vm2307_vm0, %v11818_v0, 0  ;;  %v11867_v3 = vld [vmem:[%s18818_s1 + $0x8] sm:$0xf]  ;;  %v2765_v4 = vsel %vm2307_vm0, %v2111_v2, 0  ;;  %v11988_v6 = vld [vmem:[%s18818_s1 + $0xc] sm:$0xf] }
   0xd   : > { %14574 = vmatpush.bf16.msra.mxu2 %v2309_v1  ;;  %2318 = vmatpush.bf16.msra.mxu0 %v2309_v1  ;;  %s19111_s19 = smov (!%p215_p3, %s11763_s19), 1  ;;  %v3340_v5 = vsel %vm2307_vm0, %v11867_v3, 0  ;;  %v12013_v7 = vld [vmem:[%s18818_s1 + $0x10] sm:$0xf]  ;;  %v3990_v8 = vsel %vm2307_vm0, %v11988_v6, 0  ;;  %vm2234_vm1 = vcmask 64512  }
   0xe   : > { %14575 = vmatpush.bf16.msra.mxu3 %v2765_v4  ;;  %s14758_s30 = smul.u32 232, %s19111_s19  ;;  %2774 = vmatpush.bf16.msra.mxu1 %v2765_v4  ;;  %v4268_v9 = vsel %vm2307_vm0, %v12013_v7, 0  ;;  %vm2467_vm2 = vsmask.f32 4352  ;;  %vm3070_vm3 = vsmask.f32 7424 }
   0xf   : > { %vm2051_vm5 = vcmask 60416   ;;  %s14759_s27 = smul.u32 384, %s19111_s19 }
  0x10   : > { %s14854_s8 = scalar_lea.vmem %s18817_s0, %s14758_s30 }
  0x11   : > { %3349 = vmatpush.bf16.msrb.mxu2 %v3340_v5  ;;  %4277 = vmatpush.bf16.msrb.mxu0 %v4268_v9  ;;  %v14600_v10 = vld [vmem:[%s14854_s8 + $0x64] sm:$0xff]   ;;  %v2062_v11 = vld [vmem:[%s14854_s8] sm:$0x8]  ;;  %v13657_v40 = vld [vmem:[%s14854_s8 + $0x70] sm:$0xff]   ;;  %s18337_s29 = scalar_lea.vmem %s18822_s5, %s14759_s27 }
  0x12   : > { %3999 = vmatpush.bf16.msrb.mxu3 %v3990_v8  ;;  %v2063_v12 = vld [vmem:[%s14854_s8 + $0x4] sm:$0xf]  ;;  %v13644_v13 = vld [vmem:[%s14854_s8 + $0x8] sm:$0xff]   ;;  %v2441_v15 = vunpack.c.l.b16 %v2062_v11  ;;  %11831 = vmatmul.msk.bf16.vlgmr.msra.gmra.mxu2 %vm2234_vm1, %v14600_v10  ;;  %v14871_v43 = vld [vmem:[%s14854_s8 + $0x10] sm:$0xff]   ;;  %v2594_v45 = vshrl.u32 %v13657_v40, 16  ;;  %v2597_v46 = vshll.u32 %v13657_v40, 16 }
  0x13   : > { %v2162_v14 = vunpack.c.l.b16 %v2063_v12  ;;  %v13655_v16 = vld [vmem:[%s14854_s8 + $0x60] sm:$0xff]   ;;  %v13656_v17 = vld [vmem:[%s14854_s8 + $0x68] sm:$0xff]   ;;  %v12990_v18 = vunpack.c.l.b16 %v13644_v13  ;;  %v2477_v24 = vshrl.u32 %v13644_v13, 16  ;;  %v2480_v25 = vshll.u32 %v13644_v13, 16  ;;  %v13658_v58 = vld [vmem:[%s14854_s8 + $0x78] sm:$0xff]  }
  0x14   : > { %v2576_v19 = vshrl.u32 %v13655_v16, 16  ;;  %v2579_v20 = vshll.u32 %v13655_v16, 16  ;;  %v2585_v21 = vshrl.u32 %v13656_v17, 16  ;;  %v2588_v23 = vshll.u32 %v13656_v17, 16  ;;  %v14602_v49 = vld [vmem:[%s14854_s8 + $0x6c] sm:$0xff]   ;;  %v14886_v60 = vld [vmem:[%s14854_s8 + $0x18] sm:$0xff]  }
  0x15   : > { %v2442_v22 = vpack.c.b16 %v2162_v14, %v2441_v15  ;;  %v2210_v26 = vpack.c.b16 %v12990_v18, %v2162_v14  ;;  %v2479_v33 = vrot.slane %v2477_v24, 3  ;;  %v2482_v35 = vrot.slane %v2480_v25, 4  ;;  %v14578_v54 = vld [vmem:[%s14854_s8 + $0xc] sm:$0xff]   ;;  %v14604_v1 = vld [vmem:[%s14854_s8 + $0x74] sm:$0xff]   ;;  %v13659_v10 = vld [vmem:[%s14854_s8 + $0x80] sm:$0xff]  }
  0x16   : > { %v2578_v27 = vrot.slane %v2576_v19, 3  ;;  %v2581_v28 = vrot.slane %v2579_v20, 4  ;;  %v2587_v29 = vrot.slane %v2585_v21, 3  ;;  %v2590_v30 = vrot.slane %v2588_v23, 4  ;;  %v14580_v6 = vld [vmem:[%s14854_s8 + $0x14] sm:$0xff]   ;;  %v14900_v12 = vld [vmem:[%s14854_s8 + $0x20] sm:$0xff]  }
  0x17   : > { %v2469_v31 = vshrl.u32 %v2442_v22, 16  ;;  %v2472_v32 = vshll.u32 %v2442_v22, 16  ;;  %11819 = vmatmul.msk.bf16.vlgmr.msra.gmra.mxu0 %vm2234_vm1, %v2210_v26  ;;  %v2483_v39 = vor.u32 %v2482_v35, %v2479_v33  ;;  %v2486_v47 = vshrl.u32 %v14871_v43, 16  ;;  %v14606_v17 = vld [vmem:[%s14854_s8 + $0x7c] sm:$0xff]   ;;  %v13660_v26 = vld [vmem:[%s14854_s8 + $0x88] sm:$0xff]  }
  0x18   : > { %v14864_v34 = vor.u32 %v2581_v28, %v2578_v27  ;;  %v2591_v36 = vor.u32 %v2590_v30, %v2587_v29  ;;  %v2489_v48 = vshll.u32 %v14871_v43, 16  ;;  %v2596_v50 = vrot.slane %v2594_v45, 3  ;;  %v14582_v22 = vld [vmem:[%s14854_s8 + $0x1c] sm:$0xff]   ;;  %v14914_v28 = vld [vmem:[%s14854_s8 + $0x28] sm:$0xff]  }
  0x19   : > { %v2471_v37 = vrot.slane %v2469_v31, 3  ;;  %v2474_v38 = vrot.slane %v2472_v32, 4  ;;  %v2599_v51 = vrot.slane %v2597_v46, 4  ;;  %v2488_v52 = vrot.slane %v2486_v47, 3  ;;  %v14608_v33 = vld [vmem:[%s14854_s8 + $0x84] sm:$0xff]   ;;  %v14928_v46 = vld [vmem:[%s14854_s8 + $0x30] sm:$0xff]  }
  0x1a   : > { %v2592_v41 = vsel %vm2467_vm2, %v14864_v34, %v2591_v36  ;;  %v2491_v53 = vrot.slane %v2489_v48, 4  ;;  %v2603_v61 = vshrl.u32 %v13658_v58, 16  ;;  %v2606_v62 = vshll.u32 %v13658_v58, 16 }
  0x1b   : > { %v2475_v42 = vor.u32 %v2474_v38, %v2471_v37  ;;  %11855 = vmatmul.msk.bf16.vlgmr.msra.gmra.mxu3 %vm2234_vm1, %v2592_v41  ;;  %v2600_v55 = vor.u32 %v2599_v51, %v2596_v50  ;;  %v2495_v63 = vshrl.u32 %v14886_v60, 16  ;;  %v2498_v0 = vshll.u32 %v14886_v60, 16  ;;  %v14610_v51 = vld [vmem:[%s14854_s8 + $0x8c] sm:$0xff]  }
  0x1c   : > { %v2492_v56 = vor.u32 %v2491_v53, %v2488_v52  ;;  %v2605_v2 = vrot.slane %v2603_v61, 3  ;;  %v2608_v3 = vrot.slane %v2606_v62, 4  ;;  %v2612_v13 = vshrl.u32 %v13659_v10, 16  ;;  %v13662_v61 = vld [vmem:[%s14854_s8 + $0x98] sm:$0xff]  }
  0x1d   : > { %v2484_v44 = vsel %vm2467_vm2, %v2475_v42, %v2483_v39  ;;  %v2601_v57 = vsel %vm2467_vm2, %v2591_v36, %v2600_v55  ;;  %v2497_v4 = vrot.slane %v2495_v63, 3  ;;  %v2500_v5 = vrot.slane %v2498_v0, 4  ;;  %v14942_v63 = vld [vmem:[%s14854_s8 + $0x38] sm:$0xff]  }
  0x1e   : > { %11843 = vmatmul.msk.bf16.vlgmr.msra.gmra.mxu1 %vm2234_vm1, %v2484_v44  ;;  %v2493_v59 = vsel %vm2467_vm2, %v2483_v39, %v2492_v56  ;;  %v2609_v7 = vor.u32 %v2608_v3, %v2605_v2  ;;  %v2615_v14 = vshll.u32 %v13659_v10, 16  ;;  %v2504_v15 = vshrl.u32 %v14900_v12, 16  ;;  %v14584_v39 = vld [vmem:[%s14854_s8 + $0x24] sm:$0xff]   ;;  %v13661_v44 = vld [vmem:[%s14854_s8 + $0x90] sm:$0xff]  }
  0x1f   : > { %v2501_v8 = vor.u32 %v2500_v5, %v2497_v4  ;;  %v2507_v16 = vshll.u32 %v14900_v12, 16  ;;  %v2614_v18 = vrot.slane %v2612_v13, 3  ;;  %v2621_v29 = vshrl.u32 %v13660_v26, 16  ;;  %v14612_v4 = vld [vmem:[%s14854_s8 + $0x94] sm:$0xff]  }
  0x20   : > { %v2610_v9 = vsel %vm2467_vm2, %v2600_v55, %v2609_v7  ;;  %v2617_v19 = vrot.slane %v2615_v14, 4  ;;  %v2506_v20 = vrot.slane %v2504_v15, 3  ;;  %v2624_v30 = vshll.u32 %v13660_v26, 16  ;;  %v13663_v14 = vld [vmem:[%s14854_s8 + $0xa0] sm:$0xff]  }
  0x21   : > { %v2502_v11 = vsel %vm2467_vm2, %v2492_v56, %v2501_v8  ;;  %v2509_v21 = vrot.slane %v2507_v16, 4  ;;  %v2513_v31 = vshrl.u32 %v14914_v28, 16  ;;  %v2516_v32 = vshll.u32 %v14914_v28, 16  ;;  %v14586_v56 = vld [vmem:[%s14854_s8 + $0x2c] sm:$0xff]   ;;  %v14956_v16 = vld [vmem:[%s14854_s8 + $0x40] sm:$0xff]  }
  0x22   : > { %11832 = vmatmul.msk.bf16.gmra.mxu2 %vm2234_vm1, %v14602_v49  ;;  %v2618_v23 = vor.u32 %v2617_v19, %v2614_v18  ;;  %v2623_v35 = vrot.slane %v2621_v29, 3  ;;  %v2626_v36 = vrot.slane %v2624_v30, 4  ;;  %v2630_v47 = vshrl.u32 %v13661_v44, 16  ;;  %v14590_v26 = vld [vmem:[%s14854_s8 + $0x3c] sm:$0xff]   ;;  %v12038_v30 = vld [vmem:[%s18818_s1 + $0x14] sm:$0xf] }
  0x23   : > { %v2510_v24 = vor.u32 %v2509_v21, %v2506_v20  ;;  %v2515_v37 = vrot.slane %v2513_v31, 3  ;;  %v2518_v38 = vrot.slane %v2516_v32, 4  ;;  %v2633_v48 = vshll.u32 %v13661_v44, 16  ;;  %v14614_v21 = vld [vmem:[%s14854_s8 + $0x9c] sm:$0xff]  }
  0x24   : > { %v2619_v25 = vsel %vm2467_vm2, %v2609_v7, %v2618_v23  ;;  %v2627_v40 = vor.u32 %v2626_v36, %v2623_v35  ;;  %v2522_v49 = vshrl.u32 %v14928_v46, 16  ;;  %v2525_v50 = vshll.u32 %v14928_v46, 16  ;;  %v14974_v36 = vld [vmem:[%s14854_s8 + $0x48] sm:$0xff]  }
  0x25   : > { %v2511_v27 = vsel %vm2467_vm2, %v2501_v8, %v2510_v24  ;;  %v2519_v41 = vor.u32 %v2518_v38, %v2515_v37  ;;  %v2632_v52 = vrot.slane %v2630_v47, 3  ;;  %v2635_v53 = vrot.slane %v2633_v48, 4  ;;  %v14592_v48 = vld [vmem:[%s14854_s8 + $0x44] sm:$0xff]  }
  0x26   : > { %v2628_v42 = vsel %vm2467_vm2, %v2618_v23, %v2627_v40  ;;  %v2527_v55 = vrot.slane %v2525_v50, 4  ;;  %v2639_v0 = vshrl.u32 %v13662_v61, 16  ;;  %v2531_v2 = vshrl.u32 %v14942_v63, 16 }
  0x27   : > { %11820 = vmatmul.msk.bf16.gmra.mxu0 %vm2234_vm1, %v14578_v54  ;;  %v2520_v45 = vsel %vm2467_vm2, %v2510_v24, %v2519_v41  ;;  %v2524_v54 = vrot.slane %v2522_v49, 3  ;;  %v2534_v3 = vshll.u32 %v14942_v63, 16  ;;  %v2651_v18 = vshll.u32 %v13663_v14, 16 }
  0x28   : > { %v2641_v5 = vrot.slane %v2639_v0, 3  ;;  %v2533_v7 = vrot.slane %v2531_v2, 3  ;;  %v2540_v19 = vshrl.u32 %v14956_v16, 16  ;;  %v2543_v20 = vshll.u32 %v14956_v16, 16 }
  0x29   : > { %v2528_v58 = vor.u32 %v2527_v55, %v2524_v54  ;;  %v2536_v8 = vrot.slane %v2534_v3, 4  ;;  %v2653_v23 = vrot.slane %v2651_v18, 4  ;;  %v4890_v32 = vsel %vm2307_vm0, %v12038_v30, 0  ;;  %v13665_v54 = vld [vmem:[%s14854_s8 + $0xb0] sm:$0xff]  }
  0x2a   : > { %v2542_v24 = vrot.slane %v2540_v19, 3  ;;  %4899 = vmatpush.bf16.msrb.mxu1 %v4890_v32 }
  0x2b   : > { %11856 = vmatmul.msk.bf16.gmra.mxu3 %vm2234_vm1, %v2601_v57  ;;  %v2636_v57 = vor.u32 %v2635_v53, %v2632_v52  ;;  %v2529_v62 = vsel %vm2467_vm2, %v2519_v41, %v2528_v58  ;;  %v14616_v41 = vld [vmem:[%s14854_s8 + $0xa4] sm:$0xff]  }
  0x2e   : > { %11844 = vmatmul.msk.bf16.gmra.mxu1 %vm2234_vm1, %v2493_v59  ;;  %v2637_v59 = vsel %vm2467_vm2, %v2627_v40, %v2636_v57  ;;  %v2552_v40 = vshll.u32 %v14974_v36, 16 }
  0x30   : > { %v2554_v47 = vrot.slane %v2552_v40, 4 }
  0x32   : > { %11833 = vmatmul.msk.bf16.gmra.mxu2 %vm2234_vm1, %v14604_v1  ;;  %v2642_v1 = vshll.u32 %v13662_v61, 16  ;;  %v2666_v61 = vshrl.u32 %v13665_v54, 16 }
  0x37   : > { %11821 = vmatmul.msk.bf16.gmra.mxu0 %vm2234_vm1, %v14580_v6  ;;  %v2644_v6 = vrot.slane %v2642_v1, 4 }
  0x39   : > { %v2645_v10 = vor.u32 %v2644_v6, %v2641_v5  ;;  %v14618_v5 = vld [vmem:[%s14854_s8 + $0xac] sm:$0xff]   ;;  %v2668_v6 = vrot.slane %v2666_v61, 3 }
  0x3b   : > { %11857 = vmatmul.msk.bf16.gmra.mxu3 %vm2234_vm1, %v2610_v9  ;;  %v14588_v9 = vld [vmem:[%s14854_s8 + $0x34] sm:$0xff]   ;;  %v2646_v13 = vsel %vm2467_vm2, %v2636_v57, %v2645_v10 }
  0x3e   : > { %11845 = vmatmul.msk.bf16.gmra.mxu1 %vm2234_vm1, %v2502_v11  ;;  %v2537_v11 = vor.u32 %v2536_v8, %v2533_v7 }
  0x40   : > { %v2538_v15 = vsel %vm2467_vm2, %v2528_v58, %v2537_v11  ;;  %v14990_v58 = vld [vmem:[%s14854_s8 + $0x50] sm:$0xff]  }
  0x41   : > { %v2558_v2 = vshrl.u32 %v14990_v58, 16  ;;  %v2561_v3 = vshll.u32 %v14990_v58, 16 }
  0x42   : > { %11834 = vmatmul.msk.bf16.gmra.mxu2 %vm2234_vm1, %v14606_v17  ;;  %v2648_v17 = vshrl.u32 %v13663_v14, 16 }
  0x47   : > { %11822 = vmatmul.msk.bf16.gmra.mxu0 %vm2234_vm1, %v14582_v22  ;;  %v2650_v22 = vrot.slane %v2648_v17, 3 }
  0x4b   : > { %11858 = vmatmul.msk.bf16.gmra.mxu3 %vm2234_vm1, %v2619_v25  ;;  %v2545_v25 = vrot.slane %v2543_v20, 4 }
  0x4d   : > { %v2546_v29 = vor.u32 %v2545_v25, %v2542_v24 }
  0x4e   : > { %11846 = vmatmul.msk.bf16.gmra.mxu1 %vm2234_vm1, %v2511_v27  ;;  %v2654_v27 = vor.u32 %v2653_v23, %v2650_v22  ;;  %v13666_v22 = vld [vmem:[%s14854_s8 + $0xb8] sm:$0xff]  }
  0x4f   : > { %v2547_v35 = vsel %vm2467_vm2, %v2537_v11, %v2546_v29  ;;  %v2678_v30 = vshll.u32 %v13666_v22, 16 }
  0x50   : > { %v2655_v31 = vsel %vm2467_vm2, %v2645_v10, %v2654_v27  ;;  %v2563_v10 = vrot.slane %v2561_v3, 4  ;;  %v13079_v3 = vunpack.c.h.b16 %v13666_v22 }
  0x51   : > { %v2680_v40 = vrot.slane %v2678_v30, 4 }
  0x52   : > { %11835 = vmatmul.msk.bf16.gmra.mxu2 %vm2234_vm1, %v14608_v33  ;;  %v13664_v33 = vld [vmem:[%s14854_s8 + $0xa8] sm:$0xff]  }
  0x53   : > { %v2657_v37 = vshrl.u32 %v13664_v33, 16  ;;  %v2660_v38 = vshll.u32 %v13664_v33, 16 }
  0x55   : > { %v2662_v44 = vrot.slane %v2660_v38, 4  ;;  %v14619_v38 = vld [vmem:[%s14854_s8 + $0xb4] sm:$0xff]  }
  0x57   : > { %11823 = vmatmul.msk.bf16.gmra.mxu0 %vm2234_vm1, %v14584_v39  ;;  %v2549_v39 = vshrl.u32 %v14974_v36, 16 }
  0x5b   : > { %11859 = vmatmul.msk.bf16.gmra.mxu3 %vm2234_vm1, %v2628_v42  ;;  %v2659_v42 = vrot.slane %v2657_v37, 3 }
  0x5d   : > { %v2663_v50 = vor.u32 %v2662_v44, %v2659_v42 }
  0x5e   : > { %11847 = vmatmul.msk.bf16.gmra.mxu1 %vm2234_vm1, %v2520_v45  ;;  %v2551_v45 = vrot.slane %v2549_v39, 3 }
  0x5f   : > { %v2664_v53 = vsel %vm2467_vm2, %v2654_v27, %v2663_v50 }
  0x60   : > { %v2555_v52 = vor.u32 %v2554_v47, %v2551_v45 }
  0x62   : > { %11836 = vmatmul.msk.bf16.gmra.mxu2 %vm2234_vm1, %v14610_v51 }
  0x67   : > { %11824 = vmatmul.msk.bf16.gmra.mxu0 %vm2234_vm1, %v14586_v56  ;;  %v2556_v56 = vsel %vm2467_vm2, %v2546_v29, %v2555_v52  ;;  %v2675_v29 = vshrl.u32 %v13666_v22, 16 }
  0x69   : > { %v2677_v39 = vrot.slane %v2675_v29, 3  ;;  %v15054_v29 = vld [vmem:[%s14854_s8 + $0xc] sm:$0xff] }
  0x6b   : > { %11860 = vmatmul.msk.bf16.gmra.mxu3 %vm2234_vm1, %v2637_v59 }
  0x6e   : > { %11848 = vmatmul.msk.bf16.gmra.mxu1 %vm2234_vm1, %v2529_v62  ;;  %v2669_v62 = vshll.u32 %v13665_v54, 16 }
  0x70   : > { %v2671_v7 = vrot.slane %v2669_v62, 4 }
  0x72   : > { %11837 = vmatmul.msk.bf16.gmra.mxu2 %vm2234_vm1, %v14612_v4 }
  0x77   : > { %11825 = vmatmul.msk.bf16.gmra.mxu0 %vm2234_vm1, %v14588_v9  ;;  %v2560_v9 = vrot.slane %v2558_v2, 3 }
  0x79   : > { %v2564_v19 = vor.u32 %v2563_v10, %v2560_v9 }
  0x7b   : > { %11861 = vmatmul.msk.bf16.gmra.mxu3 %vm2234_vm1, %v2646_v13  ;;  %v14594_v13 = vld [vmem:[%s14854_s8 + $0x4c] sm:$0xff]   ;;  %v2565_v24 = vsel %vm2467_vm2, %v2555_v52, %v2564_v19 }
  0x7e   : > { %11849 = vmatmul.msk.bf16.gmra.mxu1 %vm2234_vm1, %v2538_v15  ;;  %v2672_v15 = vor.u32 %v2671_v7, %v2668_v6 }
  0x82   : > { %11838 = vmatmul.msk.bf16.gmra.mxu2 %vm2234_vm1, %v14614_v21  ;;  %v2673_v21 = vsel %vm2467_vm2, %v2663_v50, %v2672_v15  ;;  %v2681_v50 = vor.u32 %v2680_v40, %v2677_v39 }
  0x87   : > { %11826 = vmatmul.msk.bf16.gmra.mxu0 %vm2234_vm1, %v14590_v26  ;;  %v15012_v26 = vld [vmem:[%s14854_s8 + $0x58] sm:$0xff]  }
  0x88   : > { %v2567_v33 = vshrl.u32 %v15012_v26, 16 }
  0x8a   : > { %v2569_v44 = vrot.slane %v2567_v33, 3  ;;  %v14140_v33 = vld [vmem:[%s14854_s8 + $0xc] sm:$0x8] }
  0x8b   : > { %11862 = vmatmul.msk.bf16.gmra.mxu3 %vm2234_vm1, %v2655_v31 }
  0x8e   : > { %11850 = vmatmul.msk.bf16.gmra.mxu1 %vm2234_vm1, %v2547_v35  ;;  %v2570_v35 = vshll.u32 %v15012_v26, 16 }
  0x90   : > { %v2572_v45 = vrot.slane %v2570_v35, 4  ;;  %v14621_v35 = vld [vmem:[%s14854_s8 + $0xc] sm:$0xf0]  }
  0x92   : > { %11839 = vmatmul.msk.bf16.gmra.mxu2 %vm2234_vm1, %v14616_v41  ;;  %v2110_v41 = vld [vmem:[%s14854_s8 + $0xc0] sm:$0xf]  ;;  %v2573_v54 = vor.u32 %v2572_v45, %v2569_v44  ;;  %v3079_v44 = vshll.u32 %v15054_v29, 16 }
  0x94   : > { %v2320_v49 = vpop.f32.mrf.mxu0 }
  0x95   : > { %v2380_v51 = vpop.f32.mrf.mxu2 }
  0x97   : > { %11827 = vmatmul.msk.bf16.gmra.mxu0 %vm2234_vm1, %v14592_v48  ;;  %v14596_v48 = vld [vmem:[%s14854_s8 + $0x54] sm:$0xff]  }
  0x9b   : > { %v2776_v55 = vpop.f32.mrf.mxu1  ;;  %11863 = vmatmul.msk.bf16.gmra.mxu3 %vm2234_vm1, %v2664_v53 }
  0x9c   : > { %v14987_v57 = vadd.f32 %v2776_v55, %v2320_v49  ;;  %v2322_v59 = vpop.f32.mrf.mxu0 }
  0x9d   : > { %v2382_v1 = vpop.f32.mrf.mxu2 }
  0x9e   : > { %11851 = vmatmul.msk.bf16.gmra.mxu1 %vm2234_vm1, %v2556_v56  ;;  %v2836_v0 = vpop.f32.mrf.mxu3  ;;  %v12159_v56 = vld [vmem:[%s18818_s1 + $0x18] sm:$0xf] }
  0x9f   : > { %v14995_v4 = vadd.f32 %v2836_v0, %v2380_v51  ;;  %v2209_v51 = vunpack.c.l.b16 %v2110_v41  ;;  %v5540_v62 = vsel %vm2307_vm0, %v12159_v56, 0 }
  0xa0   : > { %5549 = vmatpush.bf16.msra.mxu2 %v5540_v62 }
  0xa1   : > { %v2466_v61 = vpack.c.b16 %v2209_v51, %v2209_v51 }
  0xa2   : > { %11840 = vmatmul.msk.bf16.gmra.mxu2 %vm2234_vm1, %v14618_v5  ;;  %v12184_v5 = vld [vmem:[%s18818_s1 + $0x1c] sm:$0xf] }
  0xa3   : > { %v2778_v8 = vpop.f32.mrf.mxu1  ;;  %v2684_v7 = vshrl.u32 %v2466_v61, 16  ;;  %v5818_v9 = vsel %vm2307_vm0, %v12184_v5, 0 }
  0xa4   : > { %v14998_v11 = vadd.f32 %v2778_v8, %v2322_v59  ;;  %v2325_v14 = vpop.f32.mrf.mxu0  ;;  %v2682_v59 = vsel %vm2467_vm2, %v2672_v15, %v2681_v50  ;;  %v2687_v8 = vshll.u32 %v2466_v61, 16  ;;  %5827 = vmatpush.bf16.msra.mxu3 %v5818_v9  ;;  %v2233_v15 = vpack.c.b16 %v2209_v51, %v13079_v3 }
  0xa5   : > { %v2385_v18 = vpop.f32.mrf.mxu2  ;;  %v3081_v61 = vrot.slane %v3079_v44, 1 }
  0xa6   : > { %v2838_v17 = vpop.f32.mrf.mxu3 }
  0xa7   : > { %v15002_v20 = vadd.f32 %v2838_v17, %v2382_v1  ;;  %11828 = vmatmul.msk.bf16.gmra.mxu0 %vm2234_vm1, %v14594_v13  ;;  %v2574_v1 = vsel %vm2467_vm2, %v2564_v19, %v2573_v54  ;;  %v12844_v17 = vld [vmem:[%s14854_s8 + $0x4] sm:$0xff]  ;;  %v2686_v19 = vrot.slane %v2684_v7, 3  ;;  %v12869_v7 = vld [vmem:[%s14854_s8 + $0x18] sm:$0xff] }
  0xa8   : > { %v3074_v30 = vshll.u32 %v12844_v17, 16  ;;  %v3072_v41 = vshrl.u32 %v12844_v17, 16 }
  0xab   : > { %v2781_v23 = vpop.f32.mrf.mxu1  ;;  %11864 = vmatmul.msk.bf16.gmra.mxu3 %vm2234_vm1, %v2673_v21  ;;  %v2689_v21 = vrot.slane %v2687_v8, 4 }
  0xac   : > { %v15009_v25 = vadd.f32 %v2781_v23, %v2325_v14  ;;  %v2327_v27 = vpop.f32.mrf.mxu0 }
  0xad   : > { %v2387_v32 = vpop.f32.mrf.mxu2 }
  0xae   : > { %11852 = vmatmul.msk.bf16.gmra.mxu1 %vm2234_vm1, %v2565_v24  ;;  %v2841_v31 = vpop.f32.mrf.mxu3 }
  0xaf   : > { %v15017_v37 = vadd.f32 %v2841_v31, %v2385_v18  ;;  %v12209_v18 = vld [vmem:[%s18818_s1 + $0x20] sm:$0xf] }
  0xb0   : > { %v6440_v22 = vsel %vm2307_vm0, %v12209_v18, 0 }
  0xb1   : > { %6449 = vmatpush.bf16.msra.mxu0 %v6440_v22 }
  0xb2   : > { %11841 = vmatmul.msk.bf16.gmra.mxu2 %vm2234_vm1, %v14619_v38 }
  0xb3   : > { %v2783_v42 = vpop.f32.mrf.mxu1 }
  0xb4   : > { %v15021_v47 = vadd.f32 %v2783_v42, %v2327_v27  ;;  %v2330_v49 = vpop.f32.mrf.mxu0  ;;  %v14598_v27 = vld [vmem:[%s14854_s8 + $0x5c] sm:$0xff]   ;;  %v3076_v42 = vrot.slane %v3074_v30, 1 }
  0xb5   : > { %v2390_v53 = vpop.f32.mrf.mxu2 }
  0xb6   : > { %v2843_v52 = vpop.f32.mrf.mxu3 }
  0xb7   : > { %v15025_v55 = vadd.f32 %v2843_v52, %v2387_v32  ;;  %11829 = vmatmul.msk.bf16.gmra.mxu0 %vm2234_vm1, %v14596_v48  ;;  %v2690_v32 = vor.u32 %v2689_v21, %v2686_v19  ;;  %v14623_v48 = vld [vmem:[%s14854_s8 + $0x14] sm:$0xff]   ;;  %v2583_v52 = vsel %vm2467_vm2, %v2573_v54, %v14864_v34  ;;  %v4629_v21 = vshll.u32 %v12869_v7, 16 }
  0xb8   : > { %v3702_v3 = vshrl.u32 %v14623_v48, 16 }
  0xb9   : > { %v2691_v45 = vsel %vm2467_vm2, %v2681_v50, %v2690_v32  ;;  %v3705_v50 = vshll.u32 %v14623_v48, 16 }
  0xbb   : > { %v2786_v0 = vpop.f32.mrf.mxu1  ;;  %11865 = vmatmul.msk.bf16.gmra.mxu3 %vm2234_vm1, %v2682_v59  ;;  %v3077_v59 = vor.u32 %v3076_v42, %v3072_v41  ;;  %v3083_v42 = vshrl.u32 %v15054_v29, 16  ;;  %v12870_v29 = vld [vmem:[%s14854_s8 + $0x20] sm:$0xff] }
  0xbc   : > { %v15035_v2 = vadd.f32 %v2786_v0, %v2330_v49  ;;  %v2332_v6 = vpop.f32.mrf.mxu0  ;;  %v14141_v49 = vor.u32 %v14621_v35, %v14140_v33 }
  0xbd   : > { %v2392_v13 = vpop.f32.mrf.mxu2  ;;  %v3082_v54 = vsel %vm3070_vm3, %v3077_v59, %v3081_v61 }
  0xbe   : > { %11853 = vmatmul.msk.bf16.gmra.mxu1 %vm2234_vm1, %v2574_v1  ;;  %v2846_v10 = vpop.f32.mrf.mxu3  ;;  %v3694_v0 = vshrl.u32 %v14141_v49, 16  ;;  %v3697_v1 = vshll.u32 %v14141_v49, 16 }
  0xbf   : > { %v15042_v14 = vadd.f32 %v2846_v10, %v2390_v53  ;;  %v12868_v53 = vld [vmem:[%s14854_s8 + $0x10] sm:$0xff] }
  0xc0   : > { %v4624_v8 = vshll.u32 %v12868_v53, 16  ;;  %v3696_v9 = vrot.slane %v3694_v0, 3  ;;  %v3699_v10 = vrot.slane %v3697_v1, 4  ;;  %v4622_v18 = vshrl.u32 %v12868_v53, 16 }
  0xc1   : > { %v3085_v53 = vor.u32 %v3083_v42, %v3081_v61 }
  0xc2   : > { %11842 = vmatmul.msk.bf16.gmra.mxu2 %vm2234_vm1, %v2233_v15  ;;  %v3707_v15 = vrot.slane %v3705_v50, 4  ;;  %v4626_v19 = vrot.slane %v4624_v8, 1 }
  0xc3   : > { %v2788_v23 = vpop.f32.mrf.mxu1 }
  0xc4   : > { %v15049_v24 = vadd.f32 %v2788_v23, %v2332_v6  ;;  %v2335_v31 = vpop.f32.mrf.mxu0  ;;  %v4627_v35 = vor.u32 %v4626_v19, %v4622_v18 }
  0xc5   : > { %v2395_v39 = vpop.f32.mrf.mxu2 }
  0xc6   : > { %v2848_v38 = vpop.f32.mrf.mxu3 }
  0xc7   : > { %v15058_v40 = vadd.f32 %v2848_v38, %v2392_v13  ;;  %11830 = vmatmul.msk.bf16.gmra.mxu0 %vm2234_vm1, %v14598_v27  ;;  %v3704_v13 = vrot.slane %v3702_v3, 3  ;;  %v3700_v27 = vor.u32 %v3699_v10, %v3696_v9  ;;  %v4631_v38 = vrot.slane %v4629_v21, 1 }
  0xc8   : > { %v4637_v9 = vshll.u32 %v12870_v29, 16 }
  0xc9   : > { %v3708_v30 = vor.u32 %v3707_v15, %v3704_v13  ;;  %v4632_v49 = vsel %vm3070_vm3, %v4627_v35, %v4631_v38  ;;  %v12847_v15 = vld [vmem:[%s14854_s8 + $0x1c] sm:$0xff] }
  0xca   : > { %v4639_v21 = vrot.slane %v4637_v9, 1 }
  0xcb   : > { %v2791_v51 = vpop.f32.mrf.mxu1  ;;  %11866 = vmatmul.msk.bf16.gmra.mxu3 %vm2234_vm1, %v2691_v45  ;;  %v3709_v41 = vsel %vm2467_vm2, %v3700_v27, %v3708_v30  ;;  %v14625_v45 = vld [vmem:[%s14854_s8 + $0x1c] sm:$0xff]  }
  0xcc   : > { %v15068_v56 = vadd.f32 %v2791_v51, %v2335_v31  ;;  %v2337_v62 = vpop.f32.mrf.mxu0  ;;  %v12846_v31 = vld [vmem:[%s14854_s8 + $0x14] sm:$0xff]  ;;  %v3714_v0 = vshll.u32 %v14625_v45, 16 }
  0xcd   : > { %v2397_v6 = vpop.f32.mrf.mxu2  ;;  %v3087_v44 = vshll.u32 %v12846_v31, 16  ;;  %v3091_v27 = vshrl.u32 %v12846_v31, 16  ;;  %v12871_v31 = vld [vmem:[%s14854_s8 + $0x28] sm:$0xff] }
  0xce   : > { %11854 = vmatmul.msk.bf16.gmra.mxu1 %vm2234_vm1, %v2583_v52  ;;  %v2851_v5 = vpop.f32.mrf.mxu3 }
  0xcf   : > { %v15072_v34 = vadd.f32 %v2851_v5, %v2395_v39  ;;  %v3089_v59 = vrot.slane %v3087_v44, 1 }
  0xd1   : > { %v3090_v50 = vsel %vm3070_vm3, %v3085_v53, %v3089_v59  ;;  %v3093_v44 = vor.u32 %v3091_v27, %v3089_v59  ;;  %v14629_v27 = vld [vmem:[%s14854_s8 + $0x2c] sm:$0xff]  }
  0xd2   : > { %11964 = vmatmul.msk.bf16.vlgmr.msrb.gmra.mxu2 %vm2234_vm1, %v3082_v54  ;;  %v4633_v54 = vshrl.u32 %v12869_v7, 16 }
  0xd3   : > { %v2793_v17 = vpop.f32.mrf.mxu1 }
  0xd4   : > { %v15075_v22 = vadd.f32 %v2793_v17, %v2337_v62  ;;  %v2340_v23 = vpop.f32.mrf.mxu0  ;;  %v3711_v62 = vshrl.u32 %v14625_v45, 16  ;;  %v4635_v19 = vor.u32 %v4633_v54, %v4631_v38 }
  0xd5   : > { %v2400_v33 = vpop.f32.mrf.mxu2 }
  0xd6   : > { %v2853_v32 = vpop.f32.mrf.mxu3  ;;  %v3713_v5 = vrot.slane %v3711_v62, 3 }
  0xd7   : > { %v15079_v39 = vadd.f32 %v2853_v32, %v2397_v6  ;;  %12014 = vmatmul.msk.bf16.vlgmr.msrb.gmra.mxu0 %vm2234_vm1, %v14871_v43  ;;  %v3716_v6 = vrot.slane %v3714_v0, 4  ;;  %v3095_v32 = vshll.u32 %v12847_v15, 16 }
  0xd9   : > { %v3717_v13 = vor.u32 %v3716_v6, %v3713_v5  ;;  %v3097_v45 = vrot.slane %v3095_v32, 1 }
  0xdb   : > { %v2796_v48 = vpop.f32.mrf.mxu1  ;;  %11989 = vmatmul.msk.bf16.vlgmr.msrb.gmra.mxu3 %vm2234_vm1, %v3709_v41  ;;  %v3718_v7 = vsel %vm2467_vm2, %v3708_v30, %v3717_v13  ;;  %v4640_v41 = vsel %vm3070_vm3, %v4635_v19, %v4639_v21  ;;  %v3098_v53 = vsel %vm3070_vm3, %v3093_v44, %v3097_v45  ;;  %v3099_v19 = vshrl.u32 %v12847_v15, 16  ;;  %v12872_v15 = vld [vmem:[%s14854_s8 + $0x30] sm:$0xff] }
  0xdc   : > { %v15088_v51 = vadd.f32 %v2796_v48, %v2340_v23  ;;  %v2342_v52 = vpop.f32.mrf.mxu0  ;;  %v3729_v44 = vshrl.u32 %v14629_v27, 16 }
  0xdd   : > { %v2402_v1 = vpop.f32.mrf.mxu2 }
  0xde   : > { %12135 = vmatmul.msk.bf16.vlgmr.msrb.gmra.mxu1 %vm2234_vm1, %v4632_v49  ;;  %v2856_v43 = vpop.f32.mrf.mxu3 }
  0xdf   : > { %v15092_v3 = vadd.f32 %v2856_v43, %v2400_v33  ;;  %v14627_v33 = vld [vmem:[%s14854_s8 + $0x24] sm:$0xff]  }
  0xe0   : > { %v3720_v48 = vshrl.u32 %v14627_v33, 16  ;;  %v3723_v49 = vshll.u32 %v14627_v33, 16 }
  0xe2   : > { %11965 = vmatmul.msk.bf16.gmra.mxu2 %vm2234_vm1, %v3090_v50  ;;  %v3722_v62 = vrot.slane %v3720_v48, 3  ;;  %v3725_v0 = vrot.slane %v3723_v49, 4  ;;  %v4645_v50 = vshll.u32 %v12871_v31, 16  ;;  %v3732_v48 = vshll.u32 %v14629_v27, 16 }
  0xe3   : > { %v2798_v8 = vpop.f32.mrf.mxu1 }
  0xe4   : > { %v15095_v61 = vadd.f32 %v2798_v8, %v2342_v52  ;;  %v2345_v10 = vpop.f32.mrf.mxu0  ;;  %v3726_v6 = vor.u32 %v3725_v0, %v3722_v62  ;;  %v12848_v8 = vld [vmem:[%s14854_s8 + $0x24] sm:$0xff]  ;;  %v4649_v0 = vshrl.u32 %v12871_v31, 16 }
  0xe5   : > { %v2405_v18 = vpop.f32.mrf.mxu2 }
  0xe6   : > { %v2858_v17 = vpop.f32.mrf.mxu3 }
  0xe7   : > { %v15099_v23 = vadd.f32 %v2858_v17, %v2402_v1  ;;  %12015 = vmatmul.msk.bf16.gmra.mxu0 %vm2234_vm1, %v14886_v60  ;;  %v4641_v1 = vshrl.u32 %v12870_v29, 16  ;;  %v4647_v17 = vrot.slane %v4645_v50, 1  ;;  %v3727_v29 = vsel %vm2467_vm2, %v3717_v13, %v3726_v6 }
  0xeb   : > { %v2801_v35 = vpop.f32.mrf.mxu1  ;;  %11990 = vmatmul.msk.bf16.gmra.mxu3 %vm2234_vm1, %v3718_v7  ;;  %v3103_v7 = vshll.u32 %v12848_v8, 16 }
  0xec   : > { %v15107_v42 = vadd.f32 %v2801_v35, %v2345_v10  ;;  %v2347_v38 = vpop.f32.mrf.mxu0  ;;  %v4643_v10 = vor.u32 %v4641_v1, %v4639_v21 }
  0xed   : > { %v2407_v30 = vpop.f32.mrf.mxu2 }
  0xee   : > { %12136 = vmatmul.msk.bf16.gmra.mxu1 %vm2234_vm1, %v4640_v41  ;;  %v2861_v60 = vpop.f32.mrf.mxu3  ;;  %v4648_v33 = vsel %vm3070_vm3, %v4643_v10, %v4647_v17  ;;  %v3101_v41 = vor.u32 %v3099_v19, %v3097_v45 }
  0xef   : > { %v15111_v52 = vadd.f32 %v2861_v60, %v2405_v18 }
  0xf2   : > { %11966 = vmatmul.msk.bf16.gmra.mxu2 %vm2234_vm1, %v3098_v53  ;;  %v3734_v53 = vrot.slane %v3732_v48, 4 }
  0xf3   : > { %v2803_v43 = vpop.f32.mrf.mxu1 }
  0xf4   : > { %v15114_v59 = vadd.f32 %v2803_v43, %v2347_v38  ;;  %v2350_v5 = vpop.f32.mrf.mxu0  ;;  %v3105_v38 = vrot.slane %v3103_v7, 1  ;;  %v4653_v43 = vshll.u32 %v12872_v15, 16  ;;  %v3107_v7 = vshrl.u32 %v12848_v8, 16  ;;  %v12873_v8 = vld [vmem:[%s14854_s8 + $0x38] sm:$0xff] }
  0xf5   : > { %v2410_v9 = vpop.f32.mrf.mxu2 }
  0xf6   : > { %v2863_v54 = vpop.f32.mrf.mxu3  ;;  %v3106_v60 = vsel %vm3070_vm3, %v3101_v41, %v3105_v38 }
  0xf7   : > { %v15118_v18 = vadd.f32 %v2863_v54, %v2407_v30  ;;  %12016 = vmatmul.msk.bf16.gmra.mxu0 %vm2234_vm1, %v14900_v12  ;;  %v3731_v30 = vrot.slane %v3729_v44, 3  ;;  %v3109_v44 = vor.u32 %v3107_v7, %v3105_v38 }
  0xf9   : > { %18830 = vst [vmem:[#allocation3_spill] sm:$0xff] %v15118_v18  ;;  %v3735_v50 = vor.u32 %v3734_v53, %v3731_v30 }
  0xfb   : > { %v2806_v32 = vpop.f32.mrf.mxu1  ;;  %11991 = vmatmul.msk.bf16.gmra.mxu3 %vm2234_vm1, %v3727_v29  ;;  %v4651_v29 = vor.u32 %v4649_v0, %v4647_v17  ;;  %v3736_v31 = vsel %vm2467_vm2, %v3726_v6, %v3735_v50 }
  0xfc   : > { %v15126_v35 = vadd.f32 %v2806_v32, %v2350_v5  ;;  %v2352_v21 = vpop.f32.mrf.mxu0  ;;  %v12849_v5 = vld [vmem:[%s14854_s8 + $0x2c] sm:$0xff]  ;;  %v14631_v32 = vld [vmem:[%s14854_s8 + $0x34] sm:$0xff]  }
  0xfd   : > { %v2412_v13 = vpop.f32.mrf.mxu2  ;;  %v3111_v27 = vshll.u32 %v12849_v5, 16 }
  0xfe   : > { %12137 = vmatmul.msk.bf16.gmra.mxu1 %vm2234_vm1, %v4648_v33  ;;  %v2866_v12 = vpop.f32.mrf.mxu3 }
  0xff   : > { %v15130_v49 = vadd.f32 %v2866_v12, %v2410_v9  ;;  %v4655_v9 = vrot.slane %v4653_v43, 1  ;;  %v3113_v48 = vrot.slane %v3111_v27, 1  ;;  %v3738_v12 = vshrl.u32 %v14631_v32, 16 }
 0x100   : > { %v4657_v43 = vshrl.u32 %v12872_v15, 16 }
 0x101   : > { %18831 = vst [vmem:[#allocation4_spill] sm:$0xff] %v15130_v49  ;;  %v3114_v30 = vsel %vm3070_vm3, %v3109_v44, %v3113_v48  ;;  %v3740_v53 = vrot.slane %v3738_v12, 3  ;;  %v14633_v44 = vld [vmem:[%s14854_s8 + $0x3c] sm:$0xff]  }
 0x102   : > { %11967 = vmatmul.msk.bf16.gmra.mxu2 %vm2234_vm1, %v3106_v60 }
 0x103   : > { %v2808_v62 = vpop.f32.mrf.mxu1 }
 0x104   : > { %v15133_v45 = vadd.f32 %v2808_v62, %v2352_v21  ;;  %v2355_v1 = vpop.f32.mrf.mxu0  ;;  %v4656_v21 = vsel %vm3070_vm3, %v4651_v29, %v4655_v9 }
 0x105   : > { %v2415_v10 = vpop.f32.mrf.mxu2 }
 0x106   : > { %v2868_v54 = vpop.f32.mrf.mxu3 }
 0x107   : > { %v15137_v19 = vadd.f32 %v2868_v54, %v2412_v13  ;;  %12017 = vmatmul.msk.bf16.gmra.mxu0 %vm2234_vm1, %v14914_v28  ;;  %v3741_v13 = vshll.u32 %v14631_v32, 16  ;;  %v4659_v32 = vor.u32 %v4657_v43, %v4655_v9 }
 0x109   : > { %18832 = vst [vmem:[#allocation5_spill] sm:$0xff] %v15137_v19  ;;  %v3743_v62 = vrot.slane %v3741_v13, 4 }
 0x10b   : > { %v2811_v33 = vpop.f32.mrf.mxu1  ;;  %11992 = vmatmul.msk.bf16.gmra.mxu3 %vm2234_vm1, %v3736_v31  ;;  %v3744_v29 = vor.u32 %v3743_v62, %v3740_v53  ;;  %v12850_v31 = vld [vmem:[%s14854_s8 + $0x34] sm:$0xff]  ;;  %v3747_v53 = vshrl.u32 %v14633_v44, 16  ;;  %v3750_v62 = vshll.u32 %v14633_v44, 16  ;;  %v12851_v44 = vld [vmem:[%s14854_s8 + $0x3c] sm:$0xff] }
 0x10c   : > { %v15145_v41 = vadd.f32 %v2811_v33, %v2355_v1  ;;  %v2357_v17 = vpop.f32.mrf.mxu0  ;;  %v4661_v1 = vshll.u32 %v12873_v8, 16 }
 0x10d   : > { %v2417_v6 = vpop.f32.mrf.mxu2  ;;  %v3745_v15 = vsel %vm2467_vm2, %v3735_v50, %v3744_v29 }
 0x10e   : > { %12138 = vmatmul.msk.bf16.gmra.mxu1 %vm2234_vm1, %v4656_v21  ;;  %v2871_v28 = vpop.f32.mrf.mxu3  ;;  %v3115_v21 = vshrl.u32 %v12849_v5, 16  ;;  %v12874_v5 = vld [vmem:[%s14854_s8 + $0x40] sm:$0xff] }
 0x10f   : > { %v15149_v60 = vadd.f32 %v2871_v28, %v2415_v10  ;;  %v4663_v10 = vrot.slane %v4661_v1, 1  ;;  %v3749_v1 = vrot.slane %v3747_v53, 3  ;;  %v14635_v53 = vld [vmem:[%s14854_s8 + $0x44] sm:$0xff]  }
 0x111   : > { %18833 = vst [vmem:[#allocation6_spill] sm:$0xff] %v15149_v60  ;;  %v4664_v13 = vsel %vm3070_vm3, %v4659_v32, %v4663_v10 }
 0x112   : > { %11968 = vmatmul.msk.bf16.gmra.mxu2 %vm2234_vm1, %v3114_v30  ;;  %v3117_v30 = vor.u32 %v3115_v21, %v3113_v48 }
 0x113   : > { %v2813_v0 = vpop.f32.mrf.mxu1 }
 0x114   : > { %v15152_v38 = vadd.f32 %v2813_v0, %v2357_v17  ;;  %v2360_v54 = vpop.f32.mrf.mxu0  ;;  %v3119_v17 = vshll.u32 %v12850_v31, 16 }
 0x115   : > { %v2420_v27 = vpop.f32.mrf.mxu2 }
 0x116   : > { %v2873_v7 = vpop.f32.mrf.mxu3 }
 0x117   : > { %v15156_v33 = vadd.f32 %v2873_v7, %v2417_v6  ;;  %12018 = vmatmul.msk.bf16.gmra.mxu0 %vm2234_vm1, %v14928_v46  ;;  %v3121_v6 = vrot.slane %v3119_v17, 1  ;;  %v3752_v7 = vrot.slane %v3750_v62, 4 }
 0x119   : > { %18834 = vst [vmem:[#allocation7_spill] sm:$0xff] %v15156_v33  ;;  %v3122_v43 = vsel %vm3070_vm3, %v3117_v30, %v3121_v6  ;;  %v3753_v17 = vor.u32 %v3752_v7, %v3749_v1  ;;  %v3123_v30 = vshrl.u32 %v12850_v31, 16  ;;  %v12875_v31 = vld [vmem:[%s14854_s8 + $0x48] sm:$0xff] }
 0x11b   : > { %v2816_v12 = vpop.f32.mrf.mxu1  ;;  %11993 = vmatmul.msk.bf16.gmra.mxu3 %vm2234_vm1, %v3745_v15  ;;  %v4669_v15 = vshll.u32 %v12874_v5, 16  ;;  %v3125_v7 = vor.u32 %v3123_v30, %v3121_v6 }
 0x11c   : > { %v15164_v28 = vadd.f32 %v2816_v12, %v2360_v54  ;;  %v2362_v9 = vpop.f32.mrf.mxu0  ;;  %v4665_v54 = vshrl.u32 %v12873_v8, 16  ;;  %v3754_v8 = vsel %vm2467_vm2, %v3744_v29, %v3753_v17 }
 0x11d   : > { %v2422_v50 = vpop.f32.mrf.mxu2 }
 0x11e   : > { %12139 = vmatmul.msk.bf16.gmra.mxu1 %vm2234_vm1, %v4664_v13  ;;  %v2876_v46 = vpop.f32.mrf.mxu3  ;;  %v4667_v33 = vor.u32 %v4665_v54, %v4663_v10  ;;  %v3759_v54 = vshll.u32 %v14635_v53, 16 }
 0x11f   : > { %v15168_v0 = vadd.f32 %v2876_v46, %v2420_v27  ;;  %v4671_v27 = vrot.slane %v4669_v15, 1 }
 0x121   : > { %18835 = vst [vmem:[#allocation8_spill] sm:$0xff] %v15168_v0 }
 0x122   : > { %11969 = vmatmul.msk.bf16.gmra.mxu2 %vm2234_vm1, %v3122_v43  ;;  %v4672_v43 = vsel %vm3070_vm3, %v4667_v33, %v4671_v27 }
 0x123   : > { %v2818_v32 = vpop.f32.mrf.mxu1 }
 0x124   : > { %v15171_v48 = vadd.f32 %v2818_v32, %v2362_v9  ;;  %v2365_v21 = vpop.f32.mrf.mxu0  ;;  %v3127_v9 = vshll.u32 %v12851_v44, 16  ;;  %v3756_v32 = vshrl.u32 %v14635_v53, 16  ;;  %v12852_v53 = vld [vmem:[%s14854_s8 + $0x44] sm:$0xff] }
 0x125   : > { %v2425_v13 = vpop.f32.mrf.mxu2 }
 0x126   : > { %v2878_v12 = vpop.f32.mrf.mxu3  ;;  %v3758_v33 = vrot.slane %v3756_v32, 3  ;;  %v14637_v32 = vld [vmem:[%s14854_s8 + $0x4c] sm:$0xff]  }
 0x127   : > { %v15175_v46 = vadd.f32 %v2878_v12, %v2422_v50  ;;  %12019 = vmatmul.msk.bf16.gmra.mxu0 %vm2234_vm1, %v14942_v63  ;;  %v3129_v50 = vrot.slane %v3127_v9, 1 }
 0x129   : > { %18836 = vst [vmem:[#allocation9_spill] sm:$0xff] %v15175_v46  ;;  %v3130_v12 = vsel %vm3070_vm3, %v3125_v7, %v3129_v50  ;;  %v3761_v46 = vrot.slane %v3759_v54, 4  ;;  %v3131_v7 = vshrl.u32 %v12851_v44, 16  ;;  %v12876_v44 = vld [vmem:[%s14854_s8 + $0x50] sm:$0xff] }
 0x12b   : > { %v2821_v62 = vpop.f32.mrf.mxu1  ;;  %11994 = vmatmul.msk.bf16.gmra.mxu3 %vm2234_vm1, %v3754_v8  ;;  %v3762_v9 = vor.u32 %v3761_v46, %v3758_v33  ;;  %v3133_v33 = vor.u32 %v3131_v7, %v3129_v50 }
 0x12c   : > { %v15183_v1 = vadd.f32 %v2821_v62, %v2365_v21  ;;  %v2367_v10 = vpop.f32.mrf.mxu0  ;;  %v4673_v21 = vshrl.u32 %v12874_v5, 16  ;;  %v4677_v62 = vshll.u32 %v12875_v31, 16 }
 0x12d   : > { %v2427_v29 = vpop.f32.mrf.mxu2  ;;  %v3763_v5 = vsel %vm2467_vm2, %v3753_v17, %v3762_v9 }
 0x12e   : > { %12140 = vmatmul.msk.bf16.gmra.mxu1 %vm2234_vm1, %v4672_v43  ;;  %v2881_v63 = vpop.f32.mrf.mxu3  ;;  %v4675_v60 = vor.u32 %v4673_v21, %v4671_v27  ;;  %v3768_v21 = vshll.u32 %v14637_v32, 16 }
 0x12f   : > { %v15187_v15 = vadd.f32 %v2881_v63, %v2425_v13  ;;  %v4679_v13 = vrot.slane %v4677_v62, 1 }
 0x131   : > { %18837 = vst [vmem:[#allocation10_spill] sm:$0xff] %v15187_v15 }
 0x132   : > { %11970 = vmatmul.msk.bf16.gmra.mxu2 %vm2234_vm1, %v3130_v12  ;;  %v4680_v12 = vsel %vm3070_vm3, %v4675_v60, %v4679_v13 }
 0x133   : > { %v2823_v8 = vpop.f32.mrf.mxu1 }
 0x134   : > { %v15190_v6 = vadd.f32 %v2823_v8, %v2367_v10  ;;  %v2370_v30 = vpop.f32.mrf.mxu0  ;;  %v3135_v10 = vshll.u32 %v12852_v53, 16  ;;  %v3765_v8 = vshrl.u32 %v14637_v32, 16  ;;  %v12853_v32 = vld [vmem:[%s14854_s8 + $0x4c] sm:$0xff] }
 0x135   : > { %v2430_v0 = vpop.f32.mrf.mxu2 }
 0x136   : > { %v2883_v43 = vpop.f32.mrf.mxu3  ;;  %v3767_v60 = vrot.slane %v3765_v8, 3  ;;  %v3143_v8 = vshll.u32 %v12853_v32, 16 }
 0x137   : > { %v15194_v63 = vadd.f32 %v2883_v43, %v2427_v29  ;;  %12020 = vmatmul.msk.bf16.gmra.mxu0 %vm2234_vm1, %v14956_v16  ;;  %v3137_v29 = vrot.slane %v3135_v10, 1 }
 0x139   : > { %18838 = vst [vmem:[#allocation11_spill] sm:$0xff] %v15194_v63  ;;  %v3138_v43 = vsel %vm3070_vm3, %v3133_v33, %v3137_v29  ;;  %v3770_v63 = vrot.slane %v3768_v21, 4  ;;  %v3139_v33 = vshrl.u32 %v12852_v53, 16 }
 0x13b   : > { %v2826_v54 = vpop.f32.mrf.mxu1  ;;  %11995 = vmatmul.msk.bf16.gmra.mxu3 %vm2234_vm1, %v3763_v5  ;;  %v3771_v10 = vor.u32 %v3770_v63, %v3767_v60  ;;  %v14639_v63 = vld [vmem:[%s14854_s8 + $0x54] sm:$0xff]   ;;  %v3141_v60 = vor.u32 %v3139_v33, %v3137_v29 }
 0x13c   : > { %v15202_v46 = vadd.f32 %v2826_v54, %v2370_v30  ;;  %v2372_v27 = vpop.f32.mrf.mxu0  ;;  %v4681_v30 = vshrl.u32 %v12875_v31, 16  ;;  %v4685_v54 = vshll.u32 %v12876_v44, 16  ;;  %v12330_v31 = vld [vmem:[%s18820_s3 + $0x4] sm:$0xf] }
 0x13d   : > { %v2432_v17 = vpop.f32.mrf.mxu2  ;;  %v7108_v21 = vsel %vm2307_vm0, %v12330_v31, 0 }
 0x13e   : > { %12141 = vmatmul.msk.bf16.gmra.mxu1 %vm2234_vm1, %v4680_v12  ;;  %v2886_v16 = vpop.f32.mrf.mxu3  ;;  %v4683_v19 = vor.u32 %v4681_v30, %v4679_v13  ;;  %v3774_v30 = vshrl.u32 %v14639_v63, 16 }
 0x13f   : > { %v15206_v62 = vadd.f32 %v2886_v16, %v2430_v0  ;;  %v4687_v0 = vrot.slane %v4685_v54, 1  ;;  %7117 = vmatpush.bf16.msra.mxu1 %v7108_v21  ;;  %v3777_v54 = vshll.u32 %v14639_v63, 16  ;;  %v12854_v63 = vld [vmem:[%s14854_s8 + $0x54] sm:$0xff] }
 0x141   : > { %18839 = vst [vmem:[#allocation12_spill] sm:$0xff] %v15206_v62 }
 0x142   : > { %11971 = vmatmul.msk.bf16.gmra.mxu2 %vm2234_vm1, %v3138_v43 }
 0x143   : > { %v2828_v5 = vpop.f32.mrf.mxu1 }
 0x144   : > { %v15209_v50 = vadd.f32 %v2828_v5, %v2372_v27  ;;  %v2375_v7 = vpop.f32.mrf.mxu0  ;;  %v3772_v27 = vsel %vm2467_vm2, %v3762_v9, %v3771_v10  ;;  %v3145_v5 = vrot.slane %v3143_v8, 1 }
 0x145   : > { %v2435_v15 = vpop.f32.mrf.mxu2 }
 0x146   : > { %v2888_v12 = vpop.f32.mrf.mxu3  ;;  %v3146_v21 = vsel %vm3070_vm3, %v3141_v60, %v3145_v5  ;;  %v3147_v60 = vshrl.u32 %v12853_v32, 16 }
 0x147   : > { %v15213_v16 = vadd.f32 %v2888_v12, %v2432_v17  ;;  %12021 = vmatmul.msk.bf16.gmra.mxu0 %vm2234_vm1, %v14974_v36  ;;  %v4688_v17 = vsel %vm3070_vm3, %v4683_v19, %v4687_v0  ;;  %v12877_v12 = vld [vmem:[%s14854_s8 + $0x58] sm:$0xff]  ;;  %v3776_v19 = vrot.slane %v3774_v30, 3  ;;  %v3151_v30 = vshll.u32 %v12854_v63, 16 }
 0x149   : > { %18840 = vst [vmem:[#allocation13_spill] sm:$0xff] %v15213_v16  ;;  %v3779_v16 = vrot.slane %v3777_v54, 4  ;;  %v14641_v54 = vld [vmem:[%s14854_s8 + $0x5c] sm:$0xff]  }
 0x14b   : > { %v2831_v13 = vpop.f32.mrf.mxu1  ;;  %11996 = vmatmul.msk.bf16.gmra.mxu3 %vm2234_vm1, %v3772_v27  ;;  %v3780_v8 = vor.u32 %v3779_v16, %v3776_v19  ;;  %v3149_v19 = vor.u32 %v3147_v60, %v3145_v5 }
 0x14c   : > { %v15225_v43 = vadd.f32 %v2831_v13, %v2375_v7  ;;  %v2377_v36 = vpop.f32.mrf.mxu0  ;;  %v4689_v7 = vshrl.u32 %v12876_v44, 16  ;;  %v4693_v13 = vshll.u32 %v12877_v12, 16 }
 0x14d   : > { %v2437_v53 = vpop.f32.mrf.mxu2 }
 0x14e   : > { %12142 = vmatmul.msk.bf16.gmra.mxu1 %vm2234_vm1, %v4688_v17  ;;  %v2891_v9 = vpop.f32.mrf.mxu3  ;;  %v4691_v49 = vor.u32 %v4689_v7, %v4687_v0  ;;  %v3786_v7 = vshll.u32 %v14641_v54, 16 }
 0x14f   : > { %v15229_v31 = vadd.f32 %v2891_v9, %v2435_v15  ;;  %v4695_v15 = vrot.slane %v4693_v13, 1 }
 0x151   : > { %18841 = vst [vmem:[#allocation14_spill] sm:$0xff] %v15229_v31  ;;  %v4696_v16 = vsel %vm3070_vm3, %v4691_v49, %v4695_v15  ;;  %v3788_v49 = vrot.slane %v3786_v7, 4  ;;  %v4697_v31 = vshrl.u32 %v12877_v12, 16 }
 0x152   : > { %11972 = vmatmul.msk.bf16.gmra.mxu2 %vm2234_vm1, %v3146_v21 }
 0x153   : > { %v2833_v27 = vpop.f32.mrf.mxu1 }
 0x154   : > { %v15232_v29 = vadd.f32 %v2833_v27, %v2377_v36  ;;  %v4279_v33 = vpop.f32.mrf.mxu0  ;;  %v3781_v36 = vsel %vm2467_vm2, %v3771_v10, %v3780_v8  ;;  %v3783_v27 = vshrl.u32 %v14641_v54, 16 }
 0x155   : > { %v3351_v62 = vpop.f32.mrf.mxu2 }
 0x156   : > { %v2893_v17 = vpop.f32.mrf.mxu3  ;;  %v3471_v44 = vadd.f32 %v3351_v62, %v14987_v57  ;;  %v12878_v62 = vld [vmem:[%s14854_s8 + $0x60] sm:$0xff] }
 0x157   : > { %v15236_v9 = vadd.f32 %v2893_v17, %v2437_v53  ;;  %12022 = vmatmul.msk.bf16.gmra.mxu0 %vm2234_vm1, %v14990_v58  ;;  %v3153_v53 = vrot.slane %v3151_v30, 1  ;;  %v3785_v17 = vrot.slane %v3783_v27, 3  ;;  %v4701_v5 = vshll.u32 %v12878_v62, 16 }
 0x159   : > { %18842 = vst [vmem:[#allocation15_spill] sm:$0xff] %v15236_v9  ;;  %v3154_v13 = vsel %vm3070_vm3, %v3149_v19, %v3153_v53  ;;  %v3789_v54 = vor.u32 %v3788_v49, %v3785_v17  ;;  %v3155_v19 = vshrl.u32 %v12854_v63, 16  ;;  %v12879_v63 = vld [vmem:[%s14854_s8 + $0x68] sm:$0xff] }
 0x15b   : > { %v4901_v21 = vpop.f32.mrf.mxu1  ;;  %11997 = vmatmul.msk.bf16.gmra.mxu3 %vm2234_vm1, %v3781_v36  ;;  %v3790_v12 = vsel %vm2467_vm2, %v3780_v8, %v3789_v54 }
 0x15c   : > { %v4281_v0 = vpop.f32.mrf.mxu0 }
 0x15d   : > { %v3353_v57 = vpop.f32.mrf.mxu2 }
 0x15e   : > { %12143 = vmatmul.msk.bf16.gmra.mxu1 %vm2234_vm1, %v4696_v16  ;;  %v4001_v58 = vpop.f32.mrf.mxu3  ;;  %v3472_v32 = vadd.f32 %v3353_v57, %v14998_v11  ;;  %v12855_v16 = vld [vmem:[%s14854_s8 + $0x5c] sm:$0xff]  ;;  %v4703_v11 = vrot.slane %v4701_v5, 1 }
 0x15f   : > { %v4121_v10 = vadd.f32 %v4001_v58, %v3471_v44  ;;  %v4699_v58 = vor.u32 %v4697_v31, %v4695_v15  ;;  %v3157_v31 = vor.u32 %v3155_v19, %v3153_v53  ;;  %v4705_v53 = vshrl.u32 %v12878_v62, 16 }
 0x161   : > { %v4399_v9 = vadd.f32 %v4279_v33, %v4121_v10  ;;  %v4704_v10 = vsel %vm3070_vm3, %v4699_v58, %v4703_v11 }
 0x162   : > { %11973 = vmatmul.msk.bf16.gmra.mxu2 %vm2234_vm1, %v3154_v13 }
 0x163   : > { %v4903_v36 = vpop.f32.mrf.mxu1  ;;  %v15249_v60 = vadd.f32 %v4901_v21, %v4399_v9  ;;  %v3159_v9 = vshll.u32 %v12855_v16, 16  ;;  %v14643_v21 = vld [vmem:[%s14854_s8 + $0x64] sm:$0xff]  }
 0x164   : > { %v4284_v30 = vpop.f32.mrf.mxu0 }
 0x165   : > { %v3356_v44 = vpop.f32.mrf.mxu2  ;;  %v3161_v15 = vrot.slane %v3159_v9, 1  ;;  %v13677_v9 = vld [vmem:[%s14854_s8 + $0x60] sm:$0xff]  }
 0x166   : > { %v4003_v18 = vpop.f32.mrf.mxu3  ;;  %v3473_v33 = vadd.f32 %v3356_v44, %v15009_v25 }
 0x167   : > { %v4122_v57 = vadd.f32 %v4003_v18, %v3472_v32  ;;  %12023 = vmatmul.msk.bf16.gmra.mxu0 %vm2234_vm1, %v15012_v26  ;;  %v3792_v26 = vshrl.u32 %v14643_v21, 16  ;;  %v3795_v32 = vshll.u32 %v14643_v21, 16  ;;  %v3162_v49 = vsel %vm3070_vm3, %v3157_v31, %v3161_v15 }
 0x169   : > { %v4400_v27 = vadd.f32 %v4281_v0, %v4122_v57  ;;  %v3797_v5 = vrot.slane %v3795_v32, 4  ;;  %v4709_v57 = vshll.u32 %v12879_v63, 16  ;;  %v14645_v32 = vld [vmem:[%s14854_s8 + $0x6c] sm:$0xff]  }
 0x16b   : > { %v4906_v7 = vpop.f32.mrf.mxu1  ;;  %v15259_v13 = vadd.f32 %v4903_v36, %v4400_v27  ;;  %11998 = vmatmul.msk.bf16.gmra.mxu3 %vm2234_vm1, %v3790_v12  ;;  %v3794_v36 = vrot.slane %v3792_v26, 3  ;;  %v12856_v27 = vld [vmem:[%s14854_s8 + $0x64] sm:$0xff] }
 0x16c   : > { %v4286_v18 = vpop.f32.mrf.mxu0  ;;  %v3167_v26 = vshll.u32 %v12856_v27, 16 }
 0x16d   : > { %v3358_v8 = vpop.f32.mrf.mxu2  ;;  %v3798_v21 = vor.u32 %v3797_v5, %v3794_v36 }
 0x16e   : > { %12144 = vmatmul.msk.bf16.gmra.mxu1 %vm2234_vm1, %v4704_v10  ;;  %v4006_v25 = vpop.f32.mrf.mxu3  ;;  %v3474_v17 = vadd.f32 %v3358_v8, %v15021_v47  ;;  %v4707_v47 = vor.u32 %v4705_v53, %v4703_v11  ;;  %v3169_v5 = vrot.slane %v3167_v26, 1  ;;  %v3804_v53 = vshll.u32 %v14645_v32, 16  ;;  %v13678_v26 = vld [vmem:[%s14854_s8 + $0x68] sm:$0xff]  }
 0x16f   : > { %v4123_v0 = vadd.f32 %v4006_v25, %v3473_v33  ;;  %v4711_v25 = vrot.slane %v4709_v57, 1  ;;  %v3799_v62 = vsel %vm2467_vm2, %v3789_v54, %v3798_v21 }
 0x171   : > { %v4401_v44 = vadd.f32 %v4284_v30, %v4123_v0 }
 0x172   : > { %11974 = vmatmul.msk.bf16.gmra.mxu2 %vm2234_vm1, %v3162_v49  ;;  %v4712_v49 = vsel %vm3070_vm3, %v4707_v47, %v4711_v25 }
 0x173   : > { %v4908_v58 = vpop.f32.mrf.mxu1  ;;  %v15266_v12 = vadd.f32 %v4906_v7, %v4401_v44  ;;  %v3163_v7 = vshrl.u32 %v12855_v16, 16  ;;  %v3801_v44 = vshrl.u32 %v14645_v32, 16  ;;  %v12880_v16 = vld [vmem:[%s14854_s8 + $0x70] sm:$0xff] }
 0x174   : > { %v4289_v19 = vpop.f32.mrf.mxu0 }
 0x175   : > { %v3361_v10 = vpop.f32.mrf.mxu2 }
 0x176   : > { %v4008_v33 = vpop.f32.mrf.mxu3  ;;  %v3475_v30 = vadd.f32 %v3361_v10, %v15035_v2 }
 0x177   : > { %v4124_v31 = vadd.f32 %v4008_v33, %v3474_v17  ;;  %12024 = vmatmul.msk.bf16.gmra.mxu0 %vm2234_vm1, %v13677_v9  ;;  %v3165_v17 = vor.u32 %v3163_v7, %v3161_v15  ;;  %v3803_v9 = vrot.slane %v3801_v44, 3  ;;  %v3806_v33 = vrot.slane %v3804_v53, 4  ;;  %v14647_v53 = vld [vmem:[%s14854_s8 + $0x74] sm:$0xff]  }
 0x178   : > { %v4713_v15 = vshrl.u32 %v12879_v63, 16 }
 0x179   : > { %v4402_v8 = vadd.f32 %v4286_v18, %v4124_v31  ;;  %v4717_v31 = vshll.u32 %v12880_v16, 16  ;;  %v3807_v32 = vor.u32 %v3806_v33, %v3803_v9 }
 0x17b   : > { %v4911_v0 = vpop.f32.mrf.mxu1  ;;  %v15276_v36 = vadd.f32 %v4908_v58, %v4402_v8  ;;  %11999 = vmatmul.msk.bf16.gmra.mxu3 %vm2234_vm1, %v3799_v62  ;;  %v3170_v58 = vsel %vm3070_vm3, %v3165_v17, %v3169_v5  ;;  %v12857_v8 = vld [vmem:[%s14854_s8 + $0x6c] sm:$0xff]  ;;  %v3808_v63 = vsel %vm2467_vm2, %v3798_v21, %v3807_v32 }
 0x17c   : > { %v4291_v11 = vpop.f32.mrf.mxu0  ;;  %v3175_v44 = vshll.u32 %v12857_v8, 16 }
 0x17d   : > { %v3363_v54 = vpop.f32.mrf.mxu2 }
 0x17e   : > { %12145 = vmatmul.msk.bf16.gmra.mxu1 %vm2234_vm1, %v4712_v49  ;;  %v4011_v2 = vpop.f32.mrf.mxu3  ;;  %v3476_v57 = vadd.f32 %v3363_v54, %v15049_v24  ;;  %v4715_v24 = vor.u32 %v4713_v15, %v4711_v25  ;;  %v3177_v33 = vrot.slane %v3175_v44, 1  ;;  %v3813_v15 = vshll.u32 %v14647_v53, 16  ;;  %v13679_v44 = vld [vmem:[%s14854_s8 + $0x70] sm:$0xff]  }
 0x17f   : > { %v4125_v18 = vadd.f32 %v4011_v2, %v3475_v30  ;;  %v4719_v2 = vrot.slane %v4717_v31, 1 }
 0x181   : > { %v4403_v10 = vadd.f32 %v4289_v19, %v4125_v18 }
 0x182   : > { %11975 = vmatmul.msk.bf16.gmra.mxu2 %vm2234_vm1, %v3170_v58  ;;  %v4720_v58 = vsel %vm3070_vm3, %v4715_v24, %v4719_v2 }
 0x183   : > { %v4913_v47 = vpop.f32.mrf.mxu1  ;;  %v15283_v62 = vadd.f32 %v4911_v0, %v4403_v10  ;;  %v3171_v0 = vshrl.u32 %v12856_v27, 16  ;;  %v3810_v10 = vshrl.u32 %v14647_v53, 16  ;;  %v12881_v27 = vld [vmem:[%s14854_s8 + $0x78] sm:$0xff] }
 0x184   : > { %v4294_v7 = vpop.f32.mrf.mxu0 }
 0x185   : > { %v3366_v49 = vpop.f32.mrf.mxu2 }
 0x186   : > { %v4013_v30 = vpop.f32.mrf.mxu3  ;;  %v3477_v19 = vadd.f32 %v3366_v49, %v15068_v56 }
 0x187   : > { %v4126_v17 = vadd.f32 %v4013_v30, %v3476_v57  ;;  %12025 = vmatmul.msk.bf16.gmra.mxu0 %vm2234_vm1, %v13678_v26  ;;  %v3173_v57 = vor.u32 %v3171_v0, %v3169_v5  ;;  %v3812_v26 = vrot.slane %v3810_v10, 3  ;;  %v3815_v30 = vrot.slane %v3813_v15, 4  ;;  %v14649_v15 = vld [vmem:[%s14854_s8 + $0x7c] sm:$0xff]  }
 0x188   : > { %v4721_v5 = vshrl.u32 %v12880_v16, 16 }
 0x189   : > { %v4404_v54 = vadd.f32 %v4291_v11, %v4126_v17  ;;  %v4725_v17 = vshll.u32 %v12881_v27, 16  ;;  %v3816_v53 = vor.u32 %v3815_v30, %v3812_v26 }
 0x18b   : > { %v4916_v18 = vpop.f32.mrf.mxu1  ;;  %v15293_v9 = vadd.f32 %v4913_v47, %v4404_v54  ;;  %12000 = vmatmul.msk.bf16.gmra.mxu3 %vm2234_vm1, %v3808_v63  ;;  %v3178_v47 = vsel %vm3070_vm3, %v3173_v57, %v3177_v33  ;;  %v12858_v54 = vld [vmem:[%s14854_s8 + $0x74] sm:$0xff]  ;;  %v3817_v16 = vsel %vm2467_vm2, %v3807_v32, %v3816_v53 }
 0x18c   : > { %v4296_v25 = vpop.f32.mrf.mxu0  ;;  %v3183_v10 = vshll.u32 %v12858_v54, 16 }
 0x18d   : > { %v3368_v21 = vpop.f32.mrf.mxu2 }
 0x18e   : > { %12146 = vmatmul.msk.bf16.gmra.mxu1 %vm2234_vm1, %v4720_v58  ;;  %v4016_v56 = vpop.f32.mrf.mxu3  ;;  %v3478_v31 = vadd.f32 %v3368_v21, %v15075_v22  ;;  %v4723_v22 = vor.u32 %v4721_v5, %v4719_v2  ;;  %v3185_v30 = vrot.slane %v3183_v10, 1  ;;  %v3822_v5 = vshll.u32 %v14649_v15, 16  ;;  %v13680_v10 = vld [vmem:[%s14854_s8 + $0x78] sm:$0xff]  }
 0x18f   : > { %v4127_v11 = vadd.f32 %v4016_v56, %v3477_v19  ;;  %v4727_v56 = vrot.slane %v4725_v17, 1 }
 0x191   : > { %v4405_v49 = vadd.f32 %v4294_v7, %v4127_v11 }
 0x192   : > { %11976 = vmatmul.msk.bf16.gmra.mxu2 %vm2234_vm1, %v3178_v47  ;;  %v4728_v47 = vsel %vm3070_vm3, %v4723_v22, %v4727_v56 }
 0x193   : > { %v4918_v24 = vpop.f32.mrf.mxu1  ;;  %v15300_v63 = vadd.f32 %v4916_v18, %v4405_v49  ;;  %v3179_v18 = vshrl.u32 %v12857_v8, 16  ;;  %v3819_v49 = vshrl.u32 %v14649_v15, 16  ;;  %v12882_v8 = vld [vmem:[%s14854_s8 + $0x80] sm:$0xff] }
 0x194   : > { %v4299_v0 = vpop.f32.mrf.mxu0 }
 0x195   : > { %v3371_v58 = vpop.f32.mrf.mxu2 }
 0x196   : > { %v4018_v19 = vpop.f32.mrf.mxu3  ;;  %v3479_v7 = vadd.f32 %v3371_v58, %v15088_v51 }
 0x197   : > { %v4128_v57 = vadd.f32 %v4018_v19, %v3478_v31  ;;  %12026 = vmatmul.msk.bf16.gmra.mxu0 %vm2234_vm1, %v13679_v44  ;;  %v3181_v31 = vor.u32 %v3179_v18, %v3177_v33  ;;  %v3821_v44 = vrot.slane %v3819_v49, 3  ;;  %v3824_v19 = vrot.slane %v3822_v5, 4  ;;  %v14651_v5 = vld [vmem:[%s14854_s8 + $0x84] sm:$0xff]  }
 0x198   : > { %v4729_v33 = vshrl.u32 %v12881_v27, 16 }
 0x199   : > { %v4406_v21 = vadd.f32 %v4296_v25, %v4128_v57  ;;  %v4733_v57 = vshll.u32 %v12882_v8, 16  ;;  %v3825_v15 = vor.u32 %v3824_v19, %v3821_v44 }
 0x19b   : > { %v4921_v11 = vpop.f32.mrf.mxu1  ;;  %v15310_v26 = vadd.f32 %v4918_v24, %v4406_v21  ;;  %12001 = vmatmul.msk.bf16.gmra.mxu3 %vm2234_vm1, %v3817_v16  ;;  %v3186_v24 = vsel %vm3070_vm3, %v3181_v31, %v3185_v30  ;;  %v12859_v21 = vld [vmem:[%s14854_s8 + $0x7c] sm:$0xff]  ;;  %v3826_v27 = vsel %vm2467_vm2, %v3816_v53, %v3825_v15 }
 0x19c   : > { %v4301_v2 = vpop.f32.mrf.mxu0  ;;  %v3191_v49 = vshll.u32 %v12859_v21, 16 }
 0x19d   : > { %v3373_v32 = vpop.f32.mrf.mxu2 }
 0x19e   : > { %12147 = vmatmul.msk.bf16.gmra.mxu1 %vm2234_vm1, %v4728_v47  ;;  %v4021_v51 = vpop.f32.mrf.mxu3  ;;  %v3480_v17 = vadd.f32 %v3373_v32, %v15095_v61  ;;  %v4731_v61 = vor.u32 %v4729_v33, %v4727_v56  ;;  %v3193_v19 = vrot.slane %v3191_v49, 1  ;;  %v3831_v33 = vshll.u32 %v14651_v5, 16  ;;  %v13681_v49 = vld [vmem:[%s14854_s8 + $0x80] sm:$0xff]  }
 0x19f   : > { %v4129_v25 = vadd.f32 %v4021_v51, %v3479_v7  ;;  %v4735_v51 = vrot.slane %v4733_v57, 1 }
 0x1a1   : > { %v4407_v58 = vadd.f32 %v4299_v0, %v4129_v25 }
 0x1a2   : > { %11977 = vmatmul.msk.bf16.gmra.mxu2 %vm2234_vm1, %v3186_v24  ;;  %v4736_v24 = vsel %vm3070_vm3, %v4731_v61, %v4735_v51 }
 0x1a3   : > { %v4923_v22 = vpop.f32.mrf.mxu1  ;;  %v15317_v16 = vadd.f32 %v4921_v11, %v4407_v58  ;;  %v3187_v11 = vshrl.u32 %v12858_v54, 16  ;;  %v3828_v58 = vshrl.u32 %v14651_v5, 16  ;;  %v12883_v54 = vld [vmem:[%s14854_s8 + $0x88] sm:$0xff] }
 0x1a4   : > { %v4304_v18 = vpop.f32.mrf.mxu0 }
 0x1a5   : > { %v3376_v47 = vpop.f32.mrf.mxu2 }
 0x1a6   : > { %v4023_v7 = vpop.f32.mrf.mxu3  ;;  %v3481_v0 = vadd.f32 %v3376_v47, %v15107_v42 }
 0x1a7   : > { %v4130_v31 = vadd.f32 %v4023_v7, %v3480_v17  ;;  %12027 = vmatmul.msk.bf16.gmra.mxu0 %vm2234_vm1, %v13680_v10  ;;  %v3189_v17 = vor.u32 %v3187_v11, %v3185_v30  ;;  %v3830_v10 = vrot.slane %v3828_v58, 3  ;;  %v3833_v7 = vrot.slane %v3831_v33, 4  ;;  %v14653_v33 = vld [vmem:[%s14854_s8 + $0x8c] sm:$0xff]  }
 0x1a8   : > { %v4737_v30 = vshrl.u32 %v12882_v8, 16 }
 0x1a9   : > { %v4408_v32 = vadd.f32 %v4301_v2, %v4130_v31  ;;  %v4741_v31 = vshll.u32 %v12883_v54, 16  ;;  %v3834_v5 = vor.u32 %v3833_v7, %v3830_v10 }
 0x1ab   : > { %v4926_v25 = vpop.f32.mrf.mxu1  ;;  %v15327_v44 = vadd.f32 %v4923_v22, %v4408_v32  ;;  %12002 = vmatmul.msk.bf16.gmra.mxu3 %vm2234_vm1, %v3826_v27  ;;  %v3194_v22 = vsel %vm3070_vm3, %v3189_v17, %v3193_v19  ;;  %v12860_v32 = vld [vmem:[%s14854_s8 + $0x84] sm:$0xff]  ;;  %v3835_v8 = vsel %vm2467_vm2, %v3825_v15, %v3834_v5 }
 0x1ac   : > { %v4306_v56 = vpop.f32.mrf.mxu0  ;;  %v3199_v58 = vshll.u32 %v12860_v32, 16 }
 0x1ad   : > { %v3378_v53 = vpop.f32.mrf.mxu2 }
 0x1ae   : > { %12148 = vmatmul.msk.bf16.gmra.mxu1 %vm2234_vm1, %v4736_v24  ;;  %v4026_v42 = vpop.f32.mrf.mxu3  ;;  %v3482_v57 = vadd.f32 %v3378_v53, %v15114_v59  ;;  %v4739_v59 = vor.u32 %v4737_v30, %v4735_v51  ;;  %v3201_v7 = vrot.slane %v3199_v58, 1  ;;  %v3840_v30 = vshll.u32 %v14653_v33, 16  ;;  %v13682_v58 = vld [vmem:[%s14854_s8 + $0x88] sm:$0xff]  }
 0x1af   : > { %v4131_v2 = vadd.f32 %v4026_v42, %v3481_v0  ;;  %v4743_v42 = vrot.slane %v4741_v31, 1 }
 0x1b1   : > { %v4409_v47 = vadd.f32 %v4304_v18, %v4131_v2 }
 0x1b2   : > { %11978 = vmatmul.msk.bf16.gmra.mxu2 %vm2234_vm1, %v3194_v22  ;;  %v4744_v22 = vsel %vm3070_vm3, %v4739_v59, %v4743_v42 }
 0x1b3   : > { %v4928_v61 = vpop.f32.mrf.mxu1  ;;  %v15334_v27 = vadd.f32 %v4926_v25, %v4409_v47  ;;  %v3195_v25 = vshrl.u32 %v12859_v21, 16  ;;  %v3837_v47 = vshrl.u32 %v14653_v33, 16  ;;  %v12884_v21 = vld [vmem:[%s14854_s8 + $0x90] sm:$0xff] }
 0x1b4   : > { %v4309_v11 = vpop.f32.mrf.mxu0 }
 0x1b5   : > { %v3381_v24 = vpop.f32.mrf.mxu2 }
 0x1b6   : > { %v4028_v0 = vpop.f32.mrf.mxu3  ;;  %v3483_v18 = vadd.f32 %v3381_v24, %v15126_v35 }
 0x1b7   : > { %v4132_v17 = vadd.f32 %v4028_v0, %v3482_v57  ;;  %12028 = vmatmul.msk.bf16.gmra.mxu0 %vm2234_vm1, %v13681_v49  ;;  %v3197_v57 = vor.u32 %v3195_v25, %v3193_v19  ;;  %v3839_v49 = vrot.slane %v3837_v47, 3  ;;  %v3842_v0 = vrot.slane %v3840_v30, 4  ;;  %v14655_v30 = vld [vmem:[%s14854_s8 + $0x94] sm:$0xff]  }
 0x1b8   : > { %v4745_v19 = vshrl.u32 %v12883_v54, 16 }
 0x1b9   : > { %v4410_v53 = vadd.f32 %v4306_v56, %v4132_v17  ;;  %v4749_v17 = vshll.u32 %v12884_v21, 16  ;;  %v3843_v33 = vor.u32 %v3842_v0, %v3839_v49 }
 0x1bb   : > { %v4931_v2 = vpop.f32.mrf.mxu1  ;;  %v15344_v10 = vadd.f32 %v4928_v61, %v4410_v53  ;;  %12003 = vmatmul.msk.bf16.gmra.mxu3 %vm2234_vm1, %v3835_v8  ;;  %v3202_v61 = vsel %vm3070_vm3, %v3197_v57, %v3201_v7  ;;  %v12861_v53 = vld [vmem:[%s14854_s8 + $0x8c] sm:$0xff]  ;;  %v3844_v54 = vsel %vm2467_vm2, %v3834_v5, %v3843_v33 }
 0x1bc   : > { %v4311_v51 = vpop.f32.mrf.mxu0  ;;  %v3207_v47 = vshll.u32 %v12861_v53, 16 }
 0x1bd   : > { %v3383_v15 = vpop.f32.mrf.mxu2 }
 0x1be   : > { %12149 = vmatmul.msk.bf16.gmra.mxu1 %vm2234_vm1, %v4744_v22  ;;  %v4031_v35 = vpop.f32.mrf.mxu3  ;;  %v3484_v31 = vadd.f32 %v3383_v15, %v15133_v45  ;;  %v4747_v45 = vor.u32 %v4745_v19, %v4743_v42  ;;  %v3209_v0 = vrot.slane %v3207_v47, 1  ;;  %v3849_v19 = vshll.u32 %v14655_v30, 16  ;;  %v13683_v47 = vld [vmem:[%s14854_s8 + $0x90] sm:$0xff]  }
 0x1bf   : > { %v4133_v56 = vadd.f32 %v4031_v35, %v3483_v18  ;;  %v4751_v35 = vrot.slane %v4749_v17, 1 }
 0x1c1   : > { %v4411_v24 = vadd.f32 %v4309_v11, %v4133_v56 }
 0x1c2   : > { %11979 = vmatmul.msk.bf16.gmra.mxu2 %vm2234_vm1, %v3202_v61  ;;  %v4752_v61 = vsel %vm3070_vm3, %v4747_v45, %v4751_v35 }
 0x1c3   : > { %v4933_v59 = vpop.f32.mrf.mxu1  ;;  %v15351_v8 = vadd.f32 %v4931_v2, %v4411_v24  ;;  %v3203_v2 = vshrl.u32 %v12860_v32, 16  ;;  %v3846_v24 = vshrl.u32 %v14655_v30, 16  ;;  %v12885_v32 = vld [vmem:[%s14854_s8 + $0x98] sm:$0xff] }
 0x1c4   : > { %v4314_v25 = vpop.f32.mrf.mxu0 }
 0x1c5   : > { %v3386_v22 = vpop.f32.mrf.mxu2 }
 0x1c6   : > { %v4033_v18 = vpop.f32.mrf.mxu3  ;;  %v3485_v11 = vadd.f32 %v3386_v22, %v15145_v41 }
 0x1c7   : > { %v4134_v57 = vadd.f32 %v4033_v18, %v3484_v31  ;;  %12029 = vmatmul.msk.bf16.gmra.mxu0 %vm2234_vm1, %v13682_v58  ;;  %v3205_v31 = vor.u32 %v3203_v2, %v3201_v7  ;;  %v3848_v58 = vrot.slane %v3846_v24, 3  ;;  %v3851_v18 = vrot.slane %v3849_v19, 4  ;;  %v14657_v19 = vld [vmem:[%s14854_s8 + $0x9c] sm:$0xff]  }
 0x1c8   : > { %v4753_v7 = vshrl.u32 %v12884_v21, 16 }
 0x1c9   : > { %v4412_v15 = vadd.f32 %v4311_v51, %v4134_v57  ;;  %v4757_v57 = vshll.u32 %v12885_v32, 16  ;;  %v3852_v30 = vor.u32 %v3851_v18, %v3848_v58 }
 0x1cb   : > { %v4936_v56 = vpop.f32.mrf.mxu1  ;;  %v15361_v49 = vadd.f32 %v4933_v59, %v4412_v15  ;;  %12004 = vmatmul.msk.bf16.gmra.mxu3 %vm2234_vm1, %v3844_v54  ;;  %v3210_v59 = vsel %vm3070_vm3, %v3205_v31, %v3209_v0  ;;  %v12862_v15 = vld [vmem:[%s14854_s8 + $0x94] sm:$0xff]  ;;  %v3853_v21 = vsel %vm2467_vm2, %v3843_v33, %v3852_v30 }
 0x1cc   : > { %v4316_v42 = vpop.f32.mrf.mxu0  ;;  %v3215_v24 = vshll.u32 %v12862_v15, 16 }
 0x1cd   : > { %v3388_v5 = vpop.f32.mrf.mxu2 }
 0x1ce   : > { %12150 = vmatmul.msk.bf16.gmra.mxu1 %vm2234_vm1, %v4752_v61  ;;  %v4036_v41 = vpop.f32.mrf.mxu3  ;;  %v3486_v17 = vadd.f32 %v3388_v5, %v15152_v38  ;;  %v4755_v38 = vor.u32 %v4753_v7, %v4751_v35  ;;  %v3217_v18 = vrot.slane %v3215_v24, 1  ;;  %v3858_v7 = vshll.u32 %v14657_v19, 16  ;;  %v13684_v24 = vld [vmem:[%s14854_s8 + $0x98] sm:$0xff]  }
 0x1cf   : > { %v4135_v51 = vadd.f32 %v4036_v41, %v3485_v11  ;;  %v4759_v41 = vrot.slane %v4757_v57, 1 }
 0x1d1   : > { %v4413_v22 = vadd.f32 %v4314_v25, %v4135_v51 }
 0x1d2   : > { %11980 = vmatmul.msk.bf16.gmra.mxu2 %vm2234_vm1, %v3210_v59  ;;  %v4760_v59 = vsel %vm3070_vm3, %v4755_v38, %v4759_v41 }
 0x1d3   : > { %v4938_v45 = vpop.f32.mrf.mxu1  ;;  %v15368_v54 = vadd.f32 %v4936_v56, %v4413_v22  ;;  %v3211_v56 = vshrl.u32 %v12861_v53, 16  ;;  %v3855_v22 = vshrl.u32 %v14657_v19, 16  ;;  %v12886_v53 = vld [vmem:[%s14854_s8 + $0xa0] sm:$0xff] }
 0x1d4   : > { %v4319_v2 = vpop.f32.mrf.mxu0 }
 0x1d5   : > { %v3391_v61 = vpop.f32.mrf.mxu2 }
 0x1d6   : > { %v4038_v11 = vpop.f32.mrf.mxu3  ;;  %v3487_v25 = vadd.f32 %v3391_v61, %v15164_v28 }
 0x1d7   : > { %v4136_v31 = vadd.f32 %v4038_v11, %v3486_v17  ;;  %12030 = vmatmul.msk.bf16.gmra.mxu0 %vm2234_vm1, %v13683_v47  ;;  %v3213_v17 = vor.u32 %v3211_v56, %v3209_v0  ;;  %v3857_v47 = vrot.slane %v3855_v22, 3  ;;  %v3860_v11 = vrot.slane %v3858_v7, 4  ;;  %v14659_v7 = vld [vmem:[%s14854_s8 + $0xa4] sm:$0xff]  }
 0x1d8   : > { %v4761_v0 = vshrl.u32 %v12885_v32, 16 }
 0x1d9   : > { %v4414_v5 = vadd.f32 %v4316_v42, %v4136_v31  ;;  %v4765_v31 = vshll.u32 %v12886_v53, 16  ;;  %v3861_v19 = vor.u32 %v3860_v11, %v3857_v47 }
 0x1db   : > { %v4941_v51 = vpop.f32.mrf.mxu1  ;;  %v15378_v58 = vadd.f32 %v4938_v45, %v4414_v5  ;;  %12005 = vmatmul.msk.bf16.gmra.mxu3 %vm2234_vm1, %v3853_v21  ;;  %v3218_v45 = vsel %vm3070_vm3, %v3213_v17, %v3217_v18  ;;  %v12863_v5 = vld [vmem:[%s14854_s8 + $0x9c] sm:$0xff]  ;;  %v3862_v32 = vsel %vm2467_vm2, %v3852_v30, %v3861_v19 }
 0x1dc   : > { %v4321_v35 = vpop.f32.mrf.mxu0  ;;  %v3223_v22 = vshll.u32 %v12863_v5, 16 }
 0x1dd   : > { %v3393_v33 = vpop.f32.mrf.mxu2 }
 0x1de   : > { %12151 = vmatmul.msk.bf16.gmra.mxu1 %vm2234_vm1, %v4760_v59  ;;  %v4041_v28 = vpop.f32.mrf.mxu3  ;;  %v3488_v57 = vadd.f32 %v3393_v33, %v15171_v48  ;;  %v4763_v48 = vor.u32 %v4761_v0, %v4759_v41  ;;  %v3225_v11 = vrot.slane %v3223_v22, 1  ;;  %v3867_v0 = vshll.u32 %v14659_v7, 16  ;;  %v13685_v22 = vld [vmem:[%s14854_s8 + $0xa0] sm:$0xff]  }
 0x1df   : > { %v4137_v42 = vadd.f32 %v4041_v28, %v3487_v25  ;;  %v4767_v28 = vrot.slane %v4765_v31, 1 }
 0x1e1   : > { %v4415_v61 = vadd.f32 %v4319_v2, %v4137_v42 }
 0x1e2   : > { %11981 = vmatmul.msk.bf16.gmra.mxu2 %vm2234_vm1, %v3218_v45  ;;  %v4768_v45 = vsel %vm3070_vm3, %v4763_v48, %v4767_v28 }
 0x1e3   : > { %v4943_v38 = vpop.f32.mrf.mxu1  ;;  %v15385_v21 = vadd.f32 %v4941_v51, %v4415_v61  ;;  %v3219_v51 = vshrl.u32 %v12862_v15, 16  ;;  %v3864_v61 = vshrl.u32 %v14659_v7, 16  ;;  %v12887_v15 = vld [vmem:[%s14854_s8 + $0xa8] sm:$0xff] }
 0x1e4   : > { %v4324_v56 = vpop.f32.mrf.mxu0 }
 0x1e5   : > { %v3396_v59 = vpop.f32.mrf.mxu2 }
 0x1e6   : > { %v4043_v25 = vpop.f32.mrf.mxu3  ;;  %v3489_v2 = vadd.f32 %v3396_v59, %v15183_v1 }
 0x1e7   : > { %v4138_v17 = vadd.f32 %v4043_v25, %v3488_v57  ;;  %12031 = vmatmul.msk.bf16.gmra.mxu0 %vm2234_vm1, %v13684_v24  ;;  %v3221_v57 = vor.u32 %v3219_v51, %v3217_v18  ;;  %v3866_v24 = vrot.slane %v3864_v61, 3  ;;  %v3869_v25 = vrot.slane %v3867_v0, 4  ;;  %v14661_v0 = vld [vmem:[%s14854_s8 + $0xac] sm:$0xff]  }
 0x1e8   : > { %v4769_v18 = vshrl.u32 %v12886_v53, 16 }
 0x1e9   : > { %v4416_v33 = vadd.f32 %v4321_v35, %v4138_v17  ;;  %v4773_v17 = vshll.u32 %v12887_v15, 16  ;;  %v3870_v7 = vor.u32 %v3869_v25, %v3866_v24 }
 0x1eb   : > { %v4946_v42 = vpop.f32.mrf.mxu1  ;;  %v15395_v47 = vadd.f32 %v4943_v38, %v4416_v33  ;;  %12006 = vmatmul.msk.bf16.gmra.mxu3 %vm2234_vm1, %v3862_v32  ;;  %v3226_v38 = vsel %vm3070_vm3, %v3221_v57, %v3225_v11  ;;  %v12864_v33 = vld [vmem:[%s14854_s8 + $0xa4] sm:$0xff]  ;;  %v3871_v53 = vsel %vm2467_vm2, %v3861_v19, %v3870_v7 }
 0x1ec   : > { %v4326_v41 = vpop.f32.mrf.mxu0  ;;  %v3231_v61 = vshll.u32 %v12864_v33, 16 }
 0x1ed   : > { %v3398_v30 = vpop.f32.mrf.mxu2 }
 0x1ee   : > { %12152 = vmatmul.msk.bf16.gmra.mxu1 %vm2234_vm1, %v4768_v45  ;;  %v4046_v1 = vpop.f32.mrf.mxu3  ;;  %v3490_v31 = vadd.f32 %v3398_v30, %v15190_v6  ;;  %v4771_v6 = vor.u32 %v4769_v18, %v4767_v28  ;;  %v3233_v25 = vrot.slane %v3231_v61, 1  ;;  %v3876_v18 = vshll.u32 %v14661_v0, 16  ;;  %v13686_v61 = vld [vmem:[%s14854_s8 + $0xa8] sm:$0xff]  }
 0x1ef   : > { %v4139_v35 = vadd.f32 %v4046_v1, %v3489_v2  ;;  %v4775_v1 = vrot.slane %v4773_v17, 1 }
 0x1f1   : > { %v4417_v59 = vadd.f32 %v4324_v56, %v4139_v35 }
 0x1f2   : > { %11982 = vmatmul.msk.bf16.gmra.mxu2 %vm2234_vm1, %v3226_v38  ;;  %v4776_v38 = vsel %vm3070_vm3, %v4771_v6, %v4775_v1 }
 0x1f3   : > { %v4948_v48 = vpop.f32.mrf.mxu1  ;;  %v15402_v32 = vadd.f32 %v4946_v42, %v4417_v59  ;;  %v3227_v42 = vshrl.u32 %v12863_v5, 16  ;;  %v3873_v59 = vshrl.u32 %v14661_v0, 16  ;;  %v12888_v5 = vld [vmem:[%s14854_s8 + $0xb0] sm:$0xff] }
 0x1f4   : > { %v4329_v51 = vpop.f32.mrf.mxu0 }
 0x1f5   : > { %v3401_v45 = vpop.f32.mrf.mxu2 }
 0x1f6   : > { %v4048_v2 = vpop.f32.mrf.mxu3  ;;  %v3491_v56 = vadd.f32 %v3401_v45, %v15202_v46 }
 0x1f7   : > { %v4140_v57 = vadd.f32 %v4048_v2, %v3490_v31  ;;  %12032 = vmatmul.msk.bf16.gmra.mxu0 %vm2234_vm1, %v13685_v22  ;;  %v3229_v31 = vor.u32 %v3227_v42, %v3225_v11  ;;  %v3875_v22 = vrot.slane %v3873_v59, 3  ;;  %v3878_v2 = vrot.slane %v3876_v18, 4  ;;  %v14663_v18 = vld [vmem:[%s14854_s8 + $0xb4] sm:$0xff]  }
 0x1f8   : > { %v4777_v11 = vshrl.u32 %v12887_v15, 16 }
 0x1f9   : > { %v4418_v30 = vadd.f32 %v4326_v41, %v4140_v57  ;;  %v4781_v57 = vshll.u32 %v12888_v5, 16  ;;  %v3879_v0 = vor.u32 %v3878_v2, %v3875_v22 }
 0x1fb   : > { %v4951_v35 = vpop.f32.mrf.mxu1  ;;  %v15412_v24 = vadd.f32 %v4948_v48, %v4418_v30  ;;  %12007 = vmatmul.msk.bf16.gmra.mxu3 %vm2234_vm1, %v3871_v53  ;;  %v3234_v48 = vsel %vm3070_vm3, %v3229_v31, %v3233_v25  ;;  %v12865_v30 = vld [vmem:[%s14854_s8 + $0xac] sm:$0xff]  ;;  %v3880_v15 = vsel %vm2467_vm2, %v3870_v7, %v3879_v0 }
 0x1fc   : > { %v4331_v28 = vpop.f32.mrf.mxu0  ;;  %v3239_v59 = vshll.u32 %v12865_v30, 16 }
 0x1fd   : > { %v3403_v19 = vpop.f32.mrf.mxu2 }
 0x1fe   : > { %12153 = vmatmul.msk.bf16.gmra.mxu1 %vm2234_vm1, %v4776_v38  ;;  %v4051_v46 = vpop.f32.mrf.mxu3  ;;  %v3492_v17 = vadd.f32 %v3403_v19, %v15209_v50  ;;  %v4779_v50 = vor.u32 %v4777_v11, %v4775_v1  ;;  %v3241_v2 = vrot.slane %v3239_v59, 1  ;;  %v3885_v11 = vshll.u32 %v14663_v18, 16  ;;  %v13687_v59 = vld [vmem:[%s14854_s8 + $0xb0] sm:$0xff]  }
 0x1ff   : > { %v4141_v41 = vadd.f32 %v4051_v46, %v3491_v56  ;;  %v4783_v46 = vrot.slane %v4781_v57, 1 }
 0x201   : > { %v4419_v45 = vadd.f32 %v4329_v51, %v4141_v41 }
 0x202   : > { %11983 = vmatmul.msk.bf16.gmra.mxu2 %vm2234_vm1, %v3234_v48  ;;  %v4784_v48 = vsel %vm3070_vm3, %v4779_v50, %v4783_v46 }
 0x203   : > { %v4953_v6 = vpop.f32.mrf.mxu1  ;;  %v15419_v53 = vadd.f32 %v4951_v35, %v4419_v45  ;;  %v3235_v35 = vshrl.u32 %v12864_v33, 16  ;;  %v3882_v45 = vshrl.u32 %v14663_v18, 16  ;;  %v12889_v33 = vld [vmem:[%s14854_s8 + $0xb8] sm:$0xff] }
 0x204   : > { %v4334_v42 = vpop.f32.mrf.mxu0 }
 0x205   : > { %v3406_v38 = vpop.f32.mrf.mxu2 }
 0x206   : > { %v4053_v56 = vpop.f32.mrf.mxu3  ;;  %v3493_v51 = vadd.f32 %v3406_v38, %v15225_v43 }
 0x207   : > { %v4142_v31 = vadd.f32 %v4053_v56, %v3492_v17  ;;  %12033 = vmatmul.msk.bf16.gmra.mxu0 %vm2234_vm1, %v13686_v61  ;;  %v3237_v17 = vor.u32 %v3235_v35, %v3233_v25  ;;  %v3884_v61 = vrot.slane %v3882_v45, 3  ;;  %v3887_v56 = vrot.slane %v3885_v11, 4  ;;  %v14665_v11 = vld [vmem:[%s14854_s8 + $0xbc] sm:$0xff]  }
 0x208   : > { %v4785_v25 = vshrl.u32 %v12888_v5, 16 }
 0x209   : > { %v4420_v19 = vadd.f32 %v4331_v28, %v4142_v31  ;;  %v4789_v31 = vshll.u32 %v12889_v33, 16  ;;  %v3888_v18 = vor.u32 %v3887_v56, %v3884_v61 }
 0x20b   : > { %v4956_v41 = vpop.f32.mrf.mxu1  ;;  %v15429_v22 = vadd.f32 %v4953_v6, %v4420_v19  ;;  %12008 = vmatmul.msk.bf16.gmra.mxu3 %vm2234_vm1, %v3880_v15  ;;  %v3242_v6 = vsel %vm3070_vm3, %v3237_v17, %v3241_v2  ;;  %v12866_v19 = vld [vmem:[%s14854_s8 + $0xb4] sm:$0xff]  ;;  %v3889_v5 = vsel %vm2467_vm2, %v3879_v0, %v3888_v18 }
 0x20c   : > { %v4336_v1 = vpop.f32.mrf.mxu0  ;;  %v3247_v45 = vshll.u32 %v12866_v19, 16 }
 0x20d   : > { %18843 = vst [vmem:[#allocation16_spill] sm:$0xff] %v15429_v22  ;;  %v3408_v7 = vpop.f32.mrf.mxu2 }
 0x20e   : > { %12154 = vmatmul.msk.bf16.gmra.mxu1 %vm2234_vm1, %v4784_v48  ;;  %v4056_v43 = vpop.f32.mrf.mxu3  ;;  %v3494_v57 = vadd.f32 %v3408_v7, %v15232_v29  ;;  %v4787_v29 = vor.u32 %v4785_v25, %v4783_v46  ;;  %v3249_v56 = vrot.slane %v3247_v45, 1  ;;  %v3894_v25 = vshll.u32 %v14665_v11, 16  ;;  %v13688_v45 = vld [vmem:[%s14854_s8 + $0xb8] sm:$0xff]  }
 0x20f   : > { %v4143_v28 = vadd.f32 %v4056_v43, %v3493_v51  ;;  %v4791_v43 = vrot.slane %v4789_v31, 1 }
 0x211   : > { %v4421_v38 = vadd.f32 %v4334_v42, %v4143_v28 }
 0x212   : > { %11984 = vmatmul.msk.bf16.gmra.mxu2 %vm2234_vm1, %v3242_v6  ;;  %v4792_v6 = vsel %vm3070_vm3, %v4787_v29, %v4791_v43 }
 0x213   : > { %v4958_v50 = vpop.f32.mrf.mxu1  ;;  %v15436_v15 = vadd.f32 %v4956_v41, %v4421_v38  ;;  %v3243_v41 = vshrl.u32 %v12865_v30, 16  ;;  %v3891_v38 = vshrl.u32 %v14665_v11, 16  ;;  %v12890_v30 = vld [vmem:[%s14854_s8 + $0xc0] sm:$0xff] }
 0x214   : > { %v4339_v35 = vpop.f32.mrf.mxu0 }
 0x215   : > { %18844 = vst [vmem:[#allocation17_spill] sm:$0xff] %v15436_v15  ;;  %v3411_v48 = vpop.f32.mrf.mxu2 }
 0x216   : > { %v4058_v51 = vpop.f32.mrf.mxu3  ;;  %v3495_v42 = vadd.f32 %v3411_v48, %v14995_v4 }
 0x217   : > { %v4144_v17 = vadd.f32 %v4058_v51, %v3494_v57  ;;  %12034 = vmatmul.msk.bf16.gmra.mxu0 %vm2234_vm1, %v13687_v59  ;;  %v3245_v57 = vor.u32 %v3243_v41, %v3241_v2  ;;  %v3893_v59 = vrot.slane %v3891_v38, 3  ;;  %v3896_v51 = vrot.slane %v3894_v25, 4 }
 0x218   : > { %v4793_v2 = vshrl.u32 %v12889_v33, 16 }
 0x219   : > { %v4422_v7 = vadd.f32 %v4336_v1, %v4144_v17  ;;  %v4797_v17 = vshll.u32 %v12890_v30, 16  ;;  %v3897_v11 = vor.u32 %v3896_v51, %v3893_v59 }
 0x21b   : > { %v4961_v28 = vpop.f32.mrf.mxu1  ;;  %v15446_v61 = vadd.f32 %v4958_v50, %v4422_v7  ;;  %12009 = vmatmul.msk.bf16.gmra.mxu3 %vm2234_vm1, %v3889_v5  ;;  %v3250_v50 = vsel %vm3070_vm3, %v3245_v57, %v3249_v56  ;;  %v4799_v57 = vrot.slane %v4797_v17, 1 }
 0x21c   : > { %v4341_v46 = vpop.f32.mrf.mxu0 }
 0x21d   : > { %18845 = vst [vmem:[#allocation18_spill] sm:$0xff] %v15446_v61  ;;  %v3413_v0 = vpop.f32.mrf.mxu2 }
 0x21e   : > { %12155 = vmatmul.msk.bf16.gmra.mxu1 %vm2234_vm1, %v4792_v6  ;;  %v4061_v4 = vpop.f32.mrf.mxu3  ;;  %v3496_v31 = vadd.f32 %v3413_v0, %v15002_v20  ;;  %v4795_v6 = vor.u32 %v4793_v2, %v4791_v43  ;;  %v15474_v2 = vld [vmem:[%s14854_s8 + $0xc8] sm:$0xff] }
 0x21f   : > { %v4145_v1 = vadd.f32 %v4061_v4, %v3495_v42  ;;  %v15460_v42 = vld [vmem:[%s14854_s8 + $0xbc] sm:$0xff]  ;;  %v14666_v4 = vld [vmem:[%s14854_s8 + $0xc4] sm:$0xff]  }
 0x220   : > { %v3255_v25 = vshll.u32 %v15460_v42, 16  ;;  %v3900_v51 = vshrl.u32 %v14666_v4, 16 }
 0x221   : > { %v4423_v48 = vadd.f32 %v4339_v35, %v4145_v1  ;;  %v3898_v35 = vsel %vm2467_vm2, %v3888_v18, %v3897_v11  ;;  %v2944_v18 = vld [vmem:[%s14854_s8 + $0xc4] sm:$0x1] }
 0x222   : > { %11985 = vmatmul.msk.bf16.gmra.mxu2 %vm2234_vm1, %v3250_v50  ;;  %v4800_v50 = vsel %vm3070_vm3, %v4795_v6, %v4799_v57  ;;  %v3257_v59 = vrot.slane %v3255_v25, 1  ;;  %v4805_v25 = vshll.u32 %v15474_v2, 16 }
 0x223   : > { %v15453_v29 = vpop.f32.mrf.mxu1  ;;  %v15455_v5 = vadd.f32 %v4961_v28, %v4423_v48  ;;  %v3251_v28 = vshrl.u32 %v12866_v19, 16 }
 0x224   : > { %v4344_v41 = vpop.f32.mrf.mxu0 }
 0x225   : > { %18846 = vst [vmem:[#allocation19_spill] sm:$0xff] %v15455_v5  ;;  %v3416_v7 = vpop.f32.mrf.mxu2 }
 0x226   : > { %v4063_v20 = vpop.f32.mrf.mxu3  ;;  %v3497_v33 = vadd.f32 %v3416_v7, %v15017_v37  ;;  %v3903_v37 = vshll.u32 %v14666_v4, 16 }
 0x227   : > { %v4146_v38 = vadd.f32 %v4063_v20, %v3496_v31  ;;  %12035 = vmatmul.msk.bf16.gmra.mxu0 %vm2234_vm1, %v13688_v45  ;;  %v3253_v31 = vor.u32 %v3251_v28, %v3249_v56  ;;  %v3902_v20 = vrot.slane %v3900_v51, 3  ;;  %v3044_v56 = vunpack.c.l.b16 %v2944_v18 }
 0x228   : > { %v3905_v7 = vrot.slane %v3903_v37, 4  ;;  %v4801_v28 = vshrl.u32 %v12890_v30, 16  ;;  %v4807_v30 = vrot.slane %v4805_v25, 1 }
 0x229   : > { %v15467_v0 = vadd.f32 %v4341_v46, %v4146_v38  ;;  %v3258_v45 = vsel %vm3070_vm3, %v3253_v31, %v3257_v59  ;;  %v15479_v38 = vld [vmem:[%s14854_s8 + $0xc8] sm:$0xff]   ;;  %v3069_v31 = vpack.c.b16 %v3044_v56, %v3044_v56  ;;  %v5069_v56 = vld [vmem:[%s14854_s8 + $0x18] sm:$0x8] }
 0x22a   : > { %v4803_v18 = vor.u32 %v4801_v28, %v4799_v57 }
 0x22b   : > { %v4966_v1 = vpop.f32.mrf.mxu1  ;;  %12010 = vmatmul.msk.bf16.gmra.mxu3 %vm2234_vm1, %v3898_v35 }
 0x22c   : > { %v4346_v43 = vpop.f32.mrf.mxu0 }
 0x22d   : > { %v3418_v48 = vpop.f32.mrf.mxu2 }
 0x22e   : > { %12156 = vmatmul.msk.bf16.gmra.mxu1 %vm2234_vm1, %v4800_v50  ;;  %v4066_v19 = vpop.f32.mrf.mxu3  ;;  %v3498_v17 = vadd.f32 %v3418_v48, %v15025_v55  ;;  %v13689_v55 = vld [vmem:[%s14854_s8 + $0xc0] sm:$0xff]   ;;  %v15488_v50 = vor.u32 %v3905_v7, %v3902_v20  ;;  %v4495_v48 = vld [vmem:[%s14854_s8 + $0xd0] sm:$0x1]  ;;  %v3263_v20 = vshll.u32 %v3069_v31, 16 }
 0x22f   : > { %v4147_v46 = vadd.f32 %v4066_v19, %v3497_v33  ;;  %v4595_v28 = vunpack.c.l.b16 %v4495_v48 }
 0x231   : > { %v4425_v6 = vadd.f32 %v4344_v41, %v4147_v46  ;;  %v13175_v41 = vunpack.c.h.b16 %v15479_v38  ;;  %v3907_v46 = vsel %vm2467_vm2, %v3897_v11, %v15488_v50 }
 0x232   : > { %11986 = vmatmul.msk.bf16.gmra.mxu2 %vm2234_vm1, %v3258_v45  ;;  %v3259_v45 = vshrl.u32 %v15460_v42, 16  ;;  %v3265_v42 = vrot.slane %v3263_v20, 1 }
 0x233   : > { %v15481_v35 = vpop.f32.mrf.mxu1  ;;  %v15484_v4 = vadd.f32 %v4966_v1, %v4425_v6  ;;  %v3692_v7 = vpack.c.b16 %v13175_v41, %v13175_v41  ;;  %v15499_v6 = vld [vmem:[%s14854_s8 + $0x1c] sm:$0xf] }
 0x234   : > { %v4349_v33 = vpop.f32.mrf.mxu0  ;;  %v18823_v25 = vunpack.c.l.b16 %v15499_v6  ;;  %v3261_v11 = vor.u32 %v3259_v45, %v3257_v59  ;;  %v13691_v45 = vld [vmem:[%s14854_s8 + $0x20] sm:$0xff]  }
 0x235   : > { %18847 = vst [vmem:[#allocation20_spill] sm:$0xff] %v15484_v4  ;;  %v3421_v37 = vpop.f32.mrf.mxu2  ;;  %v3909_v31 = vshrl.u32 %v3692_v7, 16  ;;  %v3912_v41 = vshll.u32 %v3692_v7, 16  ;;  %v4809_v7 = vshrl.u32 %v15474_v2, 16 }
 0x236   : > { %v4068_v51 = vpop.f32.mrf.mxu3  ;;  %v3499_v1 = vadd.f32 %v3421_v37, %v15042_v14  ;;  %v5169_v14 = vunpack.c.l.b16 %v5069_v56  ;;  %v4620_v37 = vpack.c.b16 %v4595_v28, %v4595_v28 }
 0x237   : > { %v4148_v19 = vadd.f32 %v4068_v51, %v3498_v17  ;;  %12036 = vmatmul.msk.bf16.gmra.mxu0 %vm2234_vm1, %v13689_v55  ;;  %v4808_v17 = vsel %vm3070_vm3, %v4803_v18, %v4807_v30  ;;  %v3911_v56 = vrot.slane %v3909_v31, 3  ;;  %v3914_v5 = vrot.slane %v3912_v41, 4  ;;  %v12892_v31 = vld [vmem:[%s14854_s8 + $0x1c] sm:$0xff] }
 0x238   : > { %v5218_v48 = vpack.c.b16 %v18823_v25, %v5169_v14 }
 0x239   : > { %v15501_v4 = vadd.f32 %v4346_v43, %v4148_v19  ;;  %v3915_v14 = vor.u32 %v3914_v5, %v3911_v56  ;;  %v12893_v56 = vld [vmem:[%s14854_s8 + $0x24] sm:$0xff] }
 0x23b   : > { %v4971_v57 = vpop.f32.mrf.mxu1  ;;  %12011 = vmatmul.msk.bf16.gmra.mxu3 %vm2234_vm1, %v3907_v46  ;;  %v3266_v46 = vsel %vm3070_vm3, %v3261_v11, %v3265_v42  ;;  %v5252_v11 = vshrl.u32 %v13691_v45, 16  ;;  %v5255_v42 = vshll.u32 %v13691_v45, 16 }
 0x23c   : > { %v4351_v55 = vpop.f32.mrf.mxu0 }
 0x23d   : > { %v3423_v43 = vpop.f32.mrf.mxu2  ;;  %v5254_v5 = vrot.slane %v5252_v11, 3 }
 0x23e   : > { %12157 = vmatmul.msk.bf16.gmra.mxu1 %vm2234_vm1, %v4808_v17  ;;  %v4071_v51 = vpop.f32.mrf.mxu3  ;;  %v3500_v18 = vadd.f32 %v3423_v43, %v15058_v40  ;;  %v4813_v17 = vshll.u32 %v4620_v37, 16  ;;  %v5244_v40 = vshrl.u32 %v5218_v48, 16 }
 0x23f   : > { %v4149_v19 = vadd.f32 %v4071_v51, %v3499_v1  ;;  %v5247_v1 = vshll.u32 %v5218_v48, 16  ;;  %v4811_v51 = vor.u32 %v4809_v7, %v4807_v30  ;;  %v3916_v48 = vsel %vm2467_vm2, %v15488_v50, %v3915_v14 }
 0x240   : > { %v4815_v43 = vrot.slane %v4813_v17, 1  ;;  %v6172_v7 = vshrl.u32 %v12892_v31, 16 }
 0x241   : > { %v4427_v59 = vadd.f32 %v4349_v33, %v4149_v19  ;;  %v5249_v37 = vrot.slane %v5247_v1, 4 }
 0x242   : > { %11987 = vmatmul.msk.bf16.gmra.mxu2 %vm2234_vm1, %v3266_v46  ;;  %v5257_v46 = vrot.slane %v5255_v42, 4  ;;  %v4816_v30 = vsel %vm3070_vm3, %v4811_v51, %v4815_v43  ;;  %v13692_v51 = vld [vmem:[%s14854_s8 + $0x28] sm:$0xff]  }
 0x243   : > { %v15512_v20 = vpop.f32.mrf.mxu1  ;;  %v15515_v61 = vadd.f32 %v4971_v57, %v4427_v59  ;;  %v5246_v57 = vrot.slane %v5244_v40, 3  ;;  %v6174_v59 = vshll.u32 %v12892_v31, 16  ;;  %v6179_v40 = vshll.u32 %v12893_v56, 16 }
 0x244   : > { %v4354_v28 = vpop.f32.mrf.mxu0  ;;  %v13178_v31 = vunpack.c.l.b16 %v13691_v45 }
 0x245   : > { %18848 = vst [vmem:[#allocation21_spill] sm:$0xff] %v15515_v61  ;;  %v3426_v33 = vpop.f32.mrf.mxu2  ;;  %v6176_v17 = vrot.slane %v6174_v59, 1  ;;  %v18850_v59 = vunpack.c.l.b16 %v15499_v6 }
 0x246   : > { %v4073_v41 = vpop.f32.mrf.mxu3  ;;  %v3501_v2 = vadd.f32 %v3426_v33, %v15072_v34  ;;  %v5258_v34 = vor.u32 %v5257_v46, %v5254_v5 }
 0x247   : > { %v4150_v19 = vadd.f32 %v4073_v41, %v3500_v18  ;;  %12037 = vmatmul.msk.bf16.gmra.mxu0 %vm2234_vm1, %v15479_v38  ;;  %v5250_v38 = vor.u32 %v5249_v37, %v5246_v57  ;;  %v6177_v42 = vor.u32 %v6176_v17, %v6172_v7  ;;  %v6181_v41 = vrot.slane %v6179_v40, 1  ;;  %v12894_v7 = vld [vmem:[%s14854_s8 + $0x2c] sm:$0xff] }
 0x249   : > { %v15525_v25 = vadd.f32 %v4351_v55, %v4150_v19  ;;  %v5259_v11 = vsel %vm2467_vm2, %v5250_v38, %v5258_v34  ;;  %v6182_v37 = vsel %vm3070_vm3, %v6177_v42, %v6181_v41 }
 0x24b   : > { %v4976_v61 = vpop.f32.mrf.mxu1  ;;  %12012 = vmatmul.msk.bf16.gmra.mxu3 %vm2234_vm1, %v3916_v48  ;;  %v5264_v48 = vshll.u32 %v13692_v51, 16 }
 0x24c   : > { %v4356_v18 = vpop.f32.mrf.mxu0 }
 0x24d   : > { %v3428_v1 = vpop.f32.mrf.mxu2  ;;  %v5266_v38 = vrot.slane %v5264_v48, 4 }
 0x24e   : > { %12158 = vmatmul.msk.bf16.gmra.mxu1 %vm2234_vm1, %v4816_v30  ;;  %v4076_v50 = vpop.f32.mrf.mxu3  ;;  %v3502_v55 = vadd.f32 %v3428_v1, %v15079_v39  ;;  %v5721_v30 = vpack.c.b16 %v13178_v31, %v18850_v59  ;;  %v6183_v1 = vshrl.u32 %v12893_v56, 16 }
 0x24f   : > { %v4151_v14 = vadd.f32 %v4076_v50, %v3501_v2  ;;  %v5261_v2 = vshrl.u32 %v13692_v51, 16 }
 0x251   : > { %v4429_v33 = vadd.f32 %v4354_v28, %v4151_v14  ;;  %v6187_v14 = vshll.u32 %v12894_v7, 16 }
 0x252   : > { %12160 = vmatmul.msk.bf16.vlgmr.msra.gmra.mxu2 %vm2234_vm1, %v5259_v11 }
 0x253   : > { %v15533_v43 = vpop.f32.mrf.mxu1  ;;  %v15535_v19 = vadd.f32 %v4976_v61, %v4429_v33  ;;  %v5263_v61 = vrot.slane %v5261_v2, 3  ;;  %v6185_v33 = vor.u32 %v6183_v1, %v6181_v41  ;;  %v6189_v51 = vrot.slane %v6187_v14, 1 }
 0x254   : > { %v4359_v57 = vpop.f32.mrf.mxu0  ;;  %v6191_v14 = vshrl.u32 %v12894_v7, 16 }
 0x255   : > { %18849 = vst [vmem:[#allocation22_spill] sm:$0xff] %v15535_v19  ;;  %v3431_v5 = vpop.f32.mrf.mxu2  ;;  %v5267_v50 = vor.u32 %v5266_v38, %v5263_v61  ;;  %v6190_v48 = vsel %vm3070_vm3, %v6185_v33, %v6189_v51 }
 0x256   : > { %v4078_v39 = vpop.f32.mrf.mxu3  ;;  %v3503_v28 = vadd.f32 %v3431_v5, %v15092_v3 }
 0x257   : > { %v4152_v46 = vadd.f32 %v4078_v39, %v3502_v55  ;;  %12306 = vmatmul.msk.bf16.vlgmr.msra.gmra.mxu0 %vm2234_vm1, %v6182_v37  ;;  %v5268_v6 = vsel %vm2467_vm2, %v5258_v34, %v5267_v50 }
 0x259   : > { %v15544_v45 = vadd.f32 %v4356_v18, %v4152_v46  ;;  %v13693_v18 = vld [vmem:[%s14854_s8 + $0x30] sm:$0xff]  }
 0x25a   : > { %v5270_v39 = vshrl.u32 %v13693_v18, 16  ;;  %v5273_v5 = vshll.u32 %v13693_v18, 16 }
 0x25b   : > { %v4981_v17 = vpop.f32.mrf.mxu1  ;;  %12185 = vmatmul.msk.bf16.vlgmr.msra.gmra.mxu3 %vm2234_vm1, %v5721_v30  ;;  %v12895_v30 = vld [vmem:[%s14854_s8 + $0x34] sm:$0xff] }
 0x25c   : > { %v4361_v40 = vpop.f32.mrf.mxu0  ;;  %v5275_v59 = vrot.slane %v5273_v5, 4 }
 0x25d   : > { %v3433_v11 = vpop.f32.mrf.mxu2 }
 0x25e   : > { %v4081_v55 = vpop.f32.mrf.mxu3  ;;  %v3504_v3 = vadd.f32 %v3433_v11, %v15099_v23 }
 0x25f   : > { %v4153_v42 = vadd.f32 %v4081_v55, %v3503_v28  ;;  %v5272_v28 = vrot.slane %v5270_v39, 3  ;;  %v6195_v55 = vshll.u32 %v12895_v30, 16 }
 0x261   : > { %v4431_v31 = vadd.f32 %v4359_v57, %v4153_v42  ;;  %v14259_v57 = vld [vmem:[%s14854_s8 + $0x24] sm:$0xff]   ;;  %v5276_v1 = vor.u32 %v5275_v59, %v5272_v28  ;;  %v6197_v18 = vrot.slane %v6195_v55, 1  ;;  %v14261_v28 = vld [vmem:[%s14854_s8 + $0x2c] sm:$0xff]   ;;  %v12896_v55 = vld [vmem:[%s14854_s8 + $0x3c] sm:$0xff] }
 0x262   : > { %12161 = vmatmul.msk.bf16.gmra.mxu2 %vm2234_vm1, %v5268_v6  ;;  %v18852_v6 = vld [vmem:[#allocation3_spill] sm:$0xff] }
 0x263   : > { %v15550_v37 = vpop.f32.mrf.mxu1  ;;  %v15552_v2 = vadd.f32 %v4981_v17, %v4431_v31  ;;  %v6193_v31 = vor.u32 %v6191_v14, %v6189_v51  ;;  %v18854_v51 = vld [vmem:[#allocation4_spill] sm:$0xff] }
 0x264   : > { %v4364_v56 = vpop.f32.mrf.mxu0 }
 0x265   : > { %18851 = vst [vmem:[#allocation23_spill] sm:$0xff] %v15552_v2  ;;  %v3436_v46 = vpop.f32.mrf.mxu2 }
 0x266   : > { %v4083_v23 = vpop.f32.mrf.mxu3  ;;  %v3505_v41 = vadd.f32 %v3436_v46, %v15111_v52  ;;  %v5277_v52 = vsel %vm2467_vm2, %v5267_v50, %v5276_v1 }
 0x267   : > { %v4154_v34 = vadd.f32 %v4083_v23, %v3504_v3  ;;  %12307 = vmatmul.msk.bf16.gmra.mxu0 %vm2234_vm1, %v6190_v48  ;;  %v6198_v23 = vsel %vm3070_vm3, %v6193_v31, %v6197_v18 }
 0x269   : > { %v15560_v61 = vadd.f32 %v4361_v40, %v4154_v34  ;;  %v13694_v40 = vld [vmem:[%s14854_s8 + $0x38] sm:$0xff]  }
 0x26a   : > { %v5279_v46 = vshrl.u32 %v13694_v40, 16  ;;  %v5282_v34 = vshll.u32 %v13694_v40, 16  ;;  %v18855_v40 = vld [vmem:[#allocation5_spill] sm:$0xff] }
 0x26b   : > { %v4986_v38 = vpop.f32.mrf.mxu1  ;;  %12186 = vmatmul.msk.bf16.gmra.mxu3 %vm2234_vm1, %v14259_v57 }
 0x26c   : > { %v4366_v17 = vpop.f32.mrf.mxu0  ;;  %v5281_v59 = vrot.slane %v5279_v46, 3  ;;  %v5284_v14 = vrot.slane %v5282_v34, 4 }
 0x26d   : > { %v3438_v42 = vpop.f32.mrf.mxu2 }
 0x26e   : > { %v4086_v11 = vpop.f32.mrf.mxu3  ;;  %v3506_v33 = vadd.f32 %v3438_v42, %v18852_v6  ;;  %v6199_v6 = vshrl.u32 %v12895_v30, 16 }
 0x26f   : > { %v4155_v3 = vadd.f32 %v4086_v11, %v3505_v41 }
 0x270   : > { %v6201_v46 = vor.u32 %v6199_v6, %v6197_v18  ;;  %v18857_v18 = vld [vmem:[#allocation6_spill] sm:$0xff]  ;;  %v14263_v6 = vld [vmem:[%s14854_s8 + $0x34] sm:$0xff]  }
 0x271   : > { %v4433_v48 = vadd.f32 %v4364_v56, %v4155_v3  ;;  %v5285_v3 = vor.u32 %v5284_v14, %v5281_v59 }
 0x272   : > { %12162 = vmatmul.msk.bf16.gmra.mxu2 %vm2234_vm1, %v5277_v52  ;;  %v6203_v52 = vshll.u32 %v12896_v55, 16 }
 0x273   : > { %v15566_v39 = vpop.f32.mrf.mxu1  ;;  %v15568_v5 = vadd.f32 %v4986_v38, %v4433_v48 }
 0x274   : > { %v4369_v7 = vpop.f32.mrf.mxu0  ;;  %v6205_v34 = vrot.slane %v6203_v52, 1 }
 0x275   : > { %18853 = vst [vmem:[#allocation3_spill] sm:$0xff] %v15568_v5  ;;  %v3441_v57 = vpop.f32.mrf.mxu2 }
 0x276   : > { %v4088_v41 = vpop.f32.mrf.mxu3  ;;  %v3507_v56 = vadd.f32 %v3441_v57, %v18854_v51 }
 0x277   : > { %v4156_v50 = vadd.f32 %v4088_v41, %v3506_v33  ;;  %12308 = vmatmul.msk.bf16.gmra.mxu0 %vm2234_vm1, %v6198_v23  ;;  %v5286_v41 = vsel %vm2467_vm2, %v5276_v1, %v5285_v3 }
 0x279   : > { %v15576_v38 = vadd.f32 %v4366_v17, %v4156_v50  ;;  %v13695_v17 = vld [vmem:[%s14854_s8 + $0x40] sm:$0xff]  }
 0x27a   : > { %v5291_v59 = vshll.u32 %v13695_v17, 16 }
 0x27b   : > { %v4991_v11 = vpop.f32.mrf.mxu1  ;;  %12187 = vmatmul.msk.bf16.gmra.mxu3 %vm2234_vm1, %v14261_v28  ;;  %v6206_v28 = vsel %vm3070_vm3, %v6201_v46, %v6205_v34 }
 0x27c   : > { %v4371_v42 = vpop.f32.mrf.mxu0 }
 0x27d   : > { %v3443_v33 = vpop.f32.mrf.mxu2 }
 0x27e   : > { %v4091_v31 = vpop.f32.mrf.mxu3  ;;  %v3508_v23 = vadd.f32 %v3443_v33, %v18855_v40  ;;  %v5293_v33 = vrot.slane %v5291_v59, 4 }
 0x27f   : > { %v4157_v48 = vadd.f32 %v4091_v31, %v3507_v56  ;;  %v5288_v56 = vshrl.u32 %v13695_v17, 16 }
 0x281   : > { %v4435_v57 = vadd.f32 %v4369_v7, %v4157_v48  ;;  %v5290_v52 = vrot.slane %v5288_v56, 3  ;;  %v12897_v48 = vld [vmem:[%s14854_s8 + $0x44] sm:$0xff] }
 0x282   : > { %12163 = vmatmul.msk.bf16.gmra.mxu2 %vm2234_vm1, %v5286_v41  ;;  %v6211_v17 = vshll.u32 %v12897_v48, 16 }
 0x283   : > { %v15582_v50 = vpop.f32.mrf.mxu1  ;;  %v15584_v51 = vadd.f32 %v4991_v11, %v4435_v57  ;;  %v5294_v46 = vor.u32 %v5293_v33, %v5290_v52  ;;  %v6207_v57 = vshrl.u32 %v12896_v55, 16 }
 0x284   : > { %v4374_v30 = vpop.f32.mrf.mxu0  ;;  %v6213_v59 = vrot.slane %v6211_v17, 1 }
 0x285   : > { %18856 = vst [vmem:[#allocation4_spill] sm:$0xff] %v15584_v51  ;;  %v3446_v31 = vpop.f32.mrf.mxu2  ;;  %v6209_v56 = vor.u32 %v6207_v57, %v6205_v34  ;;  %v18860_v34 = vld [vmem:[#allocation8_spill] sm:$0xff]  ;;  %v14265_v57 = vld [vmem:[%s14854_s8 + $0x3c] sm:$0xff]  }
 0x286   : > { %v4093_v14 = vpop.f32.mrf.mxu3  ;;  %v3509_v7 = vadd.f32 %v3446_v31, %v18857_v18  ;;  %v5295_v31 = vsel %vm2467_vm2, %v5285_v3, %v5294_v46 }
 0x287   : > { %v4158_v1 = vadd.f32 %v4093_v14, %v3508_v23  ;;  %12309 = vmatmul.msk.bf16.gmra.mxu0 %vm2234_vm1, %v6206_v28  ;;  %v18858_v28 = vld [vmem:[#allocation7_spill] sm:$0xff]  ;;  %v6214_v52 = vsel %vm3070_vm3, %v6209_v56, %v6213_v59 }
 0x289   : > { %v15592_v11 = vadd.f32 %v4371_v42, %v4158_v1  ;;  %v13696_v42 = vld [vmem:[%s14854_s8 + $0x48] sm:$0xff]  }
 0x28b   : > { %v4996_v40 = vpop.f32.mrf.mxu1  ;;  %12188 = vmatmul.msk.bf16.gmra.mxu3 %vm2234_vm1, %v14263_v6 }
 0x28c   : > { %v4376_v41 = vpop.f32.mrf.mxu0 }
 0x28d   : > { %v3448_v23 = vpop.f32.mrf.mxu2 }
 0x28e   : > { %v4096_v51 = vpop.f32.mrf.mxu3  ;;  %v3510_v5 = vadd.f32 %v3448_v23, %v18858_v28 }
 0x28f   : > { %v4159_v14 = vadd.f32 %v4096_v51, %v3509_v7  ;;  %v5297_v51 = vshrl.u32 %v13696_v42, 16  ;;  %v5300_v7 = vshll.u32 %v13696_v42, 16  ;;  %v6215_v42 = vshrl.u32 %v12897_v48, 16 }
 0x291   : > { %v4437_v18 = vadd.f32 %v4374_v30, %v4159_v14  ;;  %v5299_v17 = vrot.slane %v5297_v51, 3  ;;  %v5302_v14 = vrot.slane %v5300_v7, 4  ;;  %v6217_v7 = vor.u32 %v6215_v42, %v6213_v59 }
 0x292   : > { %12164 = vmatmul.msk.bf16.gmra.mxu2 %vm2234_vm1, %v5295_v31 }
 0x293   : > { %v15598_v1 = vpop.f32.mrf.mxu1  ;;  %v15600_v6 = vadd.f32 %v4996_v40, %v4437_v18  ;;  %v12898_v40 = vld [vmem:[%s14854_s8 + $0x4c] sm:$0xff]  ;;  %v5303_v18 = vor.u32 %v5302_v14, %v5299_v17 }
 0x294   : > { %v4379_v55 = vpop.f32.mrf.mxu0 }
 0x295   : > { %18859 = vst [vmem:[#allocation5_spill] sm:$0xff] %v15600_v6  ;;  %v3451_v23 = vpop.f32.mrf.mxu2  ;;  %v6219_v6 = vshll.u32 %v12898_v40, 16  ;;  %v5304_v51 = vsel %vm2467_vm2, %v5294_v46, %v5303_v18 }
 0x296   : > { %v4098_v33 = vpop.f32.mrf.mxu3  ;;  %v3511_v30 = vadd.f32 %v3451_v23, %v18860_v34 }
 0x297   : > { %v4160_v3 = vadd.f32 %v4098_v33, %v3510_v5  ;;  %12310 = vmatmul.msk.bf16.gmra.mxu0 %vm2234_vm1, %v6214_v52  ;;  %v18861_v33 = vld [vmem:[#allocation9_spill] sm:$0xff]  ;;  %v6221_v34 = vrot.slane %v6219_v6, 1 }
 0x299   : > { %v15608_v28 = vadd.f32 %v4376_v41, %v4160_v3  ;;  %v13697_v41 = vld [vmem:[%s14854_s8 + $0x50] sm:$0xff]  }
 0x29a   : > { %v5306_v48 = vshrl.u32 %v13697_v41, 16  ;;  %v5309_v17 = vshll.u32 %v13697_v41, 16  ;;  %v226_v41 = vlaneseq }
 0x29b   : > { %v5001_v31 = vpop.f32.mrf.mxu1  ;;  %12189 = vmatmul.msk.bf16.gmra.mxu3 %vm2234_vm1, %v14265_v57 }
 0x29c   : > { %v4381_v56 = vpop.f32.mrf.mxu0  ;;  %v15630_v15 = vshrl.u32 %v226_v41, 7 }
 0x29d   : > { %v3453_v5 = vpop.f32.mrf.mxu2 }
 0x29e   : > { %v4101_v2 = vpop.f32.mrf.mxu3  ;;  %v3512_v23 = vadd.f32 %v3453_v5, %v18861_v33  ;;  %v14267_v5 = vld [vmem:[%s14854_s8 + $0x44] sm:$0xff]   ;;  %v6223_v33 = vshrl.u32 %v12898_v40, 16 }
 0x29f   : > { %v4161_v52 = vadd.f32 %v4101_v2, %v3511_v30  ;;  %v6222_v2 = vsel %vm3070_vm3, %v6217_v7, %v6221_v34  ;;  %v15621_v30 = vld [vmem:[%s14854_s8 + $0x54] sm:$0xff] }
 0x2a0   : > { %v13698_v7 = vld [vmem:[%s14854_s8 + $0x58] sm:$0xff]  }
 0x2a1   : > { %v4439_v3 = vadd.f32 %v4379_v55, %v4161_v52  ;;  %v18863_v55 = vld [vmem:[#allocation10_spill] sm:$0xff]  ;;  %v5311_v52 = vrot.slane %v5309_v17, 4  ;;  %v6225_v17 = vor.u32 %v6223_v33, %v6221_v34 }
 0x2a2   : > { %12165 = vmatmul.msk.bf16.gmra.mxu2 %vm2234_vm1, %v5304_v51  ;;  %v6227_v51 = vshll.u32 %v15621_v30, 16 }
 0x2a3   : > { %v15614_v19 = vpop.f32.mrf.mxu1  ;;  %v15616_v57 = vadd.f32 %v5001_v31, %v4439_v3  ;;  %v5308_v31 = vrot.slane %v5306_v48, 3 }
 0x2a4   : > { %v4384_v14 = vpop.f32.mrf.mxu0 }
 0x2a5   : > { %18862 = vst [vmem:[#allocation6_spill] sm:$0xff] %v15616_v57  ;;  %v3456_v59 = vpop.f32.mrf.mxu2  ;;  %v15641_v40 = vor.u32 %v5311_v52, %v5308_v31  ;;  %v12900_v52 = vld [vmem:[%s14854_s8 + $0x5c] sm:$0xff] }
 0x2a6   : > { %v4103_v46 = vpop.f32.mrf.mxu3  ;;  %v3513_v42 = vadd.f32 %v3456_v59, %v18863_v55  ;;  %v5318_v59 = vshll.u32 %v13698_v7, 16 }
 0x2a7   : > { %v4162_v6 = vadd.f32 %v4103_v46, %v3512_v23  ;;  %12311 = vmatmul.msk.bf16.gmra.mxu0 %vm2234_vm1, %v6222_v2  ;;  %v15634_v23 = vadd.f32 %v15453_v29, %v15467_v0  ;;  %v15638_v2 = vadd.f32 %v15481_v35, %v15501_v4  ;;  %v6229_v46 = vrot.slane %v6227_v51, 1 }
 0x2a8   : > { %v278_v29 = vand.u32 65535, %v15630_v15  ;;  %v15652_v0 = vadd.f32 %v15533_v43, %v15544_v45  ;;  %v15656_v35 = vadd.f32 %v15550_v37, %v15560_v61  ;;  %v5315_v4 = vshrl.u32 %v13698_v7, 16  ;;  %v18871_v37 = vld [vmem:[#allocation11_spill] sm:$0xff] }
 0x2a9   : > { %v15627_v3 = vadd.f32 %v4381_v56, %v4162_v6  ;;  %18864 = vst [vmem:[#allocation7_spill] sm:$0xff] %v15634_v23  ;;  %v15645_v56 = vadd.f32 %v15512_v20, %v15525_v25  ;;  %v13699_v6 = vld [vmem:[%s14854_s8 + $0x60] sm:$0xff]   ;;  %v15661_v25 = vadd.f32 %v15566_v39, %v15576_v38  ;;  %v15665_v20 = vadd.f32 %v15582_v50, %v15592_v11 }
 0x2aa   : > { %18865 = vst [vmem:[#allocation8_spill] sm:$0xff] %v15638_v2  ;;  %v279_v43 = vshrl.u32 %v15630_v15, 16  ;;  %v282_v45 = vmul.u32 43690, %v278_v29  ;;  %v5313_v31 = vsel %vm2467_vm2, %v5303_v18, %v15641_v40  ;;  %v5324_v33 = vshrl.u32 %v13699_v6, 16 }
 0x2ab   : > { %v5006_v57 = vpop.f32.mrf.mxu1  ;;  %12190 = vmatmul.msk.bf16.gmra.mxu3 %vm2234_vm1, %v14267_v5  ;;  %18866 = vst [vmem:[#allocation9_spill] sm:$0xff] %v15645_v56  ;;  %v6230_v39 = vsel %vm3070_vm3, %v6225_v17, %v6229_v46  ;;  %v5327_v38 = vshll.u32 %v13699_v6, 16  ;;  %v281_v51 = vmul.u32 43691, %v278_v29  ;;  %v5317_v41 = vrot.slane %v5315_v4, 3 }
 0x2ac   : > { %v15647_v48 = vpop.f32.mrf.mxu0  ;;  %18867 = vst [vmem:[#allocation10_spill] sm:$0xff] %v15652_v0  ;;  %v15673_v50 = vmul.u32 43691, %v279_v43  ;;  %v5320_v7 = vrot.slane %v5318_v59, 4  ;;  %v6235_v17 = vshll.u32 %v12900_v52, 16  ;;  %v5326_v29 = vrot.slane %v5324_v33, 3 }
 0x2ad   : > { %18868 = vst [vmem:[#allocation24_spill] sm:$0xff] %v15656_v35  ;;  %v3458_v55 = vpop.f32.mrf.mxu2  ;;  %v5329_v4 = vrot.slane %v5327_v38, 4  ;;  %v18824_v59 = vmov 0  }
 0x2ae   : > { %18869 = vst [vmem:[#allocation25_spill] sm:$0xff] %v15661_v25  ;;  %v4106_v34 = vpop.f32.mrf.mxu3  ;;  %v3514_v61 = vadd.f32 %v3458_v55, %v18871_v37  ;;  %v285_v25 = vshll.u32 %v282_v45, 16  ;;  %v284_v55 = vmul.u32 43690, %v279_v43  ;;  %v287_v18 = vshll.u32 %v15673_v50, 16 }
 0x2af   : > { %18870 = vst [vmem:[#allocation26_spill] sm:$0xff] %v15665_v20  ;;  %v4163_v5 = vadd.f32 %v4106_v34, %v3513_v42  ;;  %v15676_v20 = vld [vmem:[%s14854_s8 + $0x64] sm:$0xff]  ;;  %v6231_v34 = vshrl.u32 %v15621_v30, 16  ;;  %v6239_v30 = vshrl.u32 %v12900_v52, 16  ;;  %v18873_v52 = vld [vmem:[#allocation12_spill] sm:$0xff] }
 0x2b0   : > { %vm289_vm4 = vc.u32 %v281_v51, %v285_v25  ;;  %v6243_v43 = vshll.u32 %v15676_v20, 16  ;;  %2052 = vst.msk [vmem:[#allocation2] sm:$0xf] %vm2051_vm5, %v18824_v59 }
 0x2b1   : > { %v4441_v11 = vadd.f32 %v4384_v14, %v4163_v5  ;;  %v290_v6 = vsel %vm289_vm4, 1, %v18824_v59  ;;  %v291_v5 = vadd.s32 %v285_v25, %v281_v51  ;;  %v6233_v38 = vor.u32 %v6231_v34, %v6229_v46  ;;  %2053 = vst.msk [vmem:[#allocation2 + $0x4] sm:$0xf] %vm2051_vm5, %v18824_v59 }
 0x2b2   : > { %12166 = vmatmul.msk.bf16.gmra.mxu2 %vm2234_vm1, %v5313_v31  ;;  %v292_v35 = vadd.s32 %v290_v6, %v284_v55  ;;  %v14269_v55 = vld [vmem:[%s14854_s8 + $0x4c] sm:$0xff]   ;;  %v6237_v6 = vrot.slane %v6235_v17, 1  ;;  %2054 = vst.msk [vmem:[#allocation2 + $0x8] sm:$0xf] %vm2051_vm5, %v18824_v59 }
 0x2b3   : > { %v15678_v42 = vpop.f32.mrf.mxu1  ;;  %v15682_v37 = vadd.f32 %v5006_v57, %v4441_v11  ;;  %v15692_v57 = vadd.s32 8, %v15630_v15  ;;  %v5321_v11 = vor.u32 %v5320_v7, %v5317_v41  ;;  %vm293_vm6 = vc.u32 %v291_v5, %v287_v18  ;;  %2055 = vst.msk [vmem:[#allocation2 + $0xc] sm:$0xf] %vm2051_vm5, %v18824_v59 }
 0x2b4   : > { %v15685_v14 = vpop.f32.mrf.mxu0  ;;  %v294_v0 = vsel %vm293_vm6, 1, %v18824_v59  ;;  %v288_v41 = vshrl.u32 %v15673_v50, 16  ;;  %v15708_v7 = vor.u32 %v5329_v4, %v5326_v29  ;;  %v6241_v34 = vor.u32 %v6239_v30, %v6237_v6  ;;  %2056 = vst.msk [vmem:[#allocation2 + $0xd0] sm:$0xf] %vm2051_vm5, %v18824_v59 }
 0x2b5   : > { %18872 = vst [vmem:[#allocation11_spill] sm:$0xff] %v15682_v37  ;;  %v3461_v33 = vpop.f32.mrf.mxu2  ;;  %v286_v37 = vshrl.u32 %v282_v45, 16  ;;  %v296_v46 = vadd.s32 %v294_v0, %v292_v35  ;;  %v307_v45 = vand.u32 65535, %v15692_v57  ;;  %v15710_v18 = vrot.slane %v6243_v43, 1  ;;  %v12379_v43 = vld [vmem:[%s18820_s3 + $0x8] sm:$0xf] }
 0x2b6   : > { %v4108_v31 = vpop.f32.mrf.mxu3  ;;  %v3515_v51 = vadd.f32 %v3461_v33, %v18873_v52  ;;  %v15716_v0 = vadd.f32 %v15598_v1, %v15608_v28  ;;  %2057 = vst.msk [vmem:[#allocation2 + $0xd4] sm:$0xf] %vm2051_vm5, %v18824_v59  ;;  %v5322_v29 = vsel %vm2467_vm2, %v15641_v40, %v5321_v11  ;;  %v15726_v4 = vsel %vm3070_vm3, %v6233_v38, %v6237_v6  ;;  %v6912_v1 = vld [vmem:[%s18820_s3] sm:$0xf] }
 0x2b7   : > { %v4164_v25 = vadd.f32 %v4108_v31, %v3514_v61  ;;  %12312 = vmatmul.msk.bf16.gmra.mxu0 %vm2234_vm1, %v6230_v39  ;;  %v308_v61 = vshrl.u32 %v15692_v57, 16  ;;  %v297_v35 = vadd.s32 %v296_v46, %v286_v37  ;;  %v310_v50 = vmul.u32 43691, %v307_v45  ;;  %2058 = vst.msk [vmem:[#allocation2 + $0xd8] sm:$0xf] %vm2051_vm5, %v18824_v59 }
 0x2b8   : > { %18874 = vst [vmem:[#allocation12_spill] sm:$0xff] %v15716_v0  ;;  %v15720_v17 = vmul.u32 43690, %v307_v45  ;;  %v15737_v5 = vadd.f32 %v15614_v19, %v15627_v3  ;;  %v7563_v40 = vsel %vm2307_vm0, %v6912_v1, 0  ;;  %v15748_v33 = vadd.s32 16, %v15630_v15  ;;  %v15762_v52 = vld [vmem:[#allocation2 + $0x4] sm:$0xf] }
 0x2b9   : > { %v4442_v39 = vadd.f32 %v15647_v48, %v4164_v25  ;;  %v15733_v28 = vmul.u32 43691, %v308_v61  ;;  %v313_v37 = vmul.u32 43690, %v308_v61  ;;  %v298_v31 = vadd.s32 %v297_v35, %v288_v41  ;;  %2059 = vst.msk [vmem:[#allocation2 + $0xdc] sm:$0xf] %vm2051_vm5, %v18824_v59  ;;  %7572 = vmatpush.bf16.msrb.mxu2 %v7563_v40 }
 0x2ba   : > { %18875 = vst [vmem:[#allocation27_spill] sm:$0xff] %v15737_v5  ;;  %v15755_v19 = vsel %vm2467_vm2, %v5321_v11, %v15708_v7  ;;  %v15759_v3 = vsel %vm3070_vm3, %v6241_v34, %v15710_v18  ;;  %v8137_v25 = vsel %vm2307_vm0, %v12379_v43, 0  ;;  %v13824_v34 = vld [vmem:[#allocation2 + $0x8] sm:$0xff]   ;;  %v314_v1 = vshll.u32 %v15720_v17, 16 }
 0x2bb   : > { %12191 = vmatmul.msk.bf16.gmra.mxu3 %vm2234_vm1, %v14269_v55  ;;  %v5011_v48 = vpop.f32.mrf.mxu1  ;;  %v15751_v38 = vadd.f32 %v15678_v42, %v4442_v39  ;;  %18877 = vst [vmem:[#allocation29_spill] sm:$0xff] %v15762_v52  ;;  %v13700_v55 = vld [vmem:[%s14854_s8 + $0x68] sm:$0xff]   ;;  %v299_v46 = vshrl.u32 %v298_v31, 4  ;;  %v18878_v39 = vld [vmem:[#allocation13_spill] sm:$0xff]  ;;  %v13270_v43 = vunpack.c.l.b16 %v13824_v34  ;;  %v316_v31 = vshll.u32 %v15733_v28, 16 }
 0x2bc   : > { %v15739_v30 = vpop.f32.mrf.mxu0  ;;  %8146 = vmatpush.bf16.msrb.mxu3 %v8137_v25  ;;  %v5333_v45 = vshrl.u32 %v13700_v55, 16  ;;  %v5336_v11 = vshll.u32 %v13700_v55, 16  ;;  %v315_v25 = vshrl.u32 %v15720_v17, 16  ;;  %vm318_vm7 = vc.u32 %v310_v50, %v314_v1  ;;  %v15772_v42 = vld [vmem:[%s14854_s8 + $0x6c] sm:$0xff] }
 0x2bd   : > { %18876 = vst [vmem:[#allocation28_spill] sm:$0xff] %v15751_v38  ;;  %v3463_v41 = vpop.f32.mrf.mxu2  ;;  %v300_v40 = vmul.u32 24, %v299_v46  ;;  %v18879_v55 = vunpack.c.l.b16 %v15762_v52  ;;  %v18880_v46 = vmov 0  }
 0x2be   : > { %v4111_v6 = vpop.f32.mrf.mxu3  ;;  %v3516_v35 = vadd.f32 %v3463_v41, %v18878_v39  ;;  %v5335_v59 = vrot.slane %v5333_v45, 3  ;;  %v5338_v38 = vrot.slane %v5336_v11, 4  ;;  %v317_v41 = vshrl.u32 %v15733_v28, 16 }
 0x2bf   : > { %v4165_v61 = vadd.f32 %v4111_v6, %v3515_v51  ;;  %v301_v51 = vsub.s32 %v15630_v15, %v300_v40  ;;  %v7011_v6 = vpack.c.b16 %v13270_v43, %v18879_v55  ;;  %v319_v39 = vsel %vm318_vm7, 1, %v18880_v46  ;;  %v14271_v55 = vld [vmem:[%s14854_s8 + $0x54] sm:$0xff]  }
 0x2c0   : > { %v321_v17 = vadd.s32 %v319_v39, %v313_v37  ;;  %v6247_v11 = vshrl.u32 %v15676_v20, 16  ;;  %v15786_v40 = vor.u32 %v5338_v38, %v5335_v59  ;;  %v337_v43 = vshrl.u32 %v15748_v33, 16 }
 0x2c1   : > { %v4443_v5 = vadd.f32 %v15685_v14, %v4165_v61  ;;  %v320_v14 = vadd.s32 %v314_v1, %v310_v50  ;;  %vm1667_vm8 = vcmp.ne.s32.totalorder %v301_v51, 0  ;;  %vm1715_vm9 = vcmp.lt.s32.totalorder %v301_v51, 0  ;;  %12331 = vmatmul.msk.bf16.vlgmr.msra.gmra.mxu1 %vm2234_vm1, %v7011_v6 }
 0x2c2   : > { %12167 = vmatmul.msk.bf16.gmra.mxu2 %vm2234_vm1, %v5322_v29  ;;  %v1811_v34 = vadd.s32 24, %v301_v51  ;;  %vm1763_vm10 = vmand %vm1715_vm9, %vm1667_vm8  ;;  %v6251_v50 = vshll.u32 %v15772_v42, 16  ;;  %v336_v29 = vand.u32 65535, %v15748_v33  ;;  %v15794_v59 = vadd.s32 24, %v15630_v15 }
 0x2c3   : > { %v15779_v45 = vadd.f32 %v5011_v48, %v4443_v5  ;;  %v5013_v28 = vpop.f32.mrf.mxu1  ;;  %vm322_vm11 = vc.u32 %v320_v14, %v316_v31  ;;  %v6249_v48 = vor.u32 %v6247_v11, %v15710_v18  ;;  %v18882_v31 = vld [vmem:[#allocation14_spill] sm:$0xff] }
 0x2c4   : > { %v15783_v61 = vpop.f32.mrf.mxu0  ;;  %v1859_v5 = vsel %vm1763_vm10, %v1811_v34, %v301_v51  ;;  %v323_v1 = vsel %vm322_vm11, 1, %v18880_v46  ;;  %v15803_v51 = vsel %vm2467_vm2, %v15708_v7, %v15786_v40  ;;  %v15805_v39 = vrot.slane %v6251_v50, 1 }
 0x2c5   : > { %18881 = vst [vmem:[#allocation13_spill] sm:$0xff] %v15779_v45  ;;  %v3466_v37 = vpop.f32.mrf.mxu2  ;;  %vm1907_vm12 = vcmp.lt.s32.totalorder %v1859_v5, 16  ;;  %v325_v6 = vadd.s32 %v323_v1, %v321_v17  ;;  %v339_v14 = vmul.u32 43691, %v336_v29  ;;  %v340_v11 = vmul.u32 43690, %v336_v29 }
 0x2c6   : > { %v4113_v20 = vpop.f32.mrf.mxu3  ;;  %v3517_v18 = vadd.f32 %v3466_v37, %v18882_v31  ;;  %v341_v37 = vmul.u32 43691, %v337_v43  ;;  %v15813_v17 = vsel %vm3070_vm3, %v6249_v48, %v15805_v39  ;;  %v342_v5 = vmul.u32 43690, %v337_v43 }
 0x2c7   : > { %v4166_v38 = vadd.f32 %v4113_v20, %v3516_v35  ;;  %12313 = vmatmul.msk.bf16.gmra.mxu0 %vm2234_vm1, %v15726_v4  ;;  %v18826_v35 = vmov 0.0   ;;  %v326_v4 = vadd.s32 %v325_v6, %v315_v25  ;;  %v343_v1 = vshll.u32 %v340_v11, 16 }
 0x2c8   : > { %v15809_v20 = vsel %vm1907_vm12, 1.0, %v18826_v35  ;;  %v365_v7 = vand.u32 65535, %v15794_v59  ;;  %v344_v25 = vshrl.u32 %v340_v11, 16  ;;  %v366_v6 = vshrl.u32 %v15794_v59, 16  ;;  %v13701_v35 = vld [vmem:[%s14854_s8 + $0x70] sm:$0xff]  }
 0x2c9   : > { %v4444_v34 = vadd.f32 %v15739_v30, %v4166_v38  ;;  %v12500_v30 = vld [vmem:[%s18820_s3 + $0xc] sm:$0xf]  ;;  %v327_v29 = vadd.s32 %v326_v4, %v317_v41  ;;  %v345_v38 = vshll.u32 %v341_v37, 16  ;;  %vm347_vm13 = vc.u32 %v339_v14, %v343_v1 }
 0x2ca   : > { %v8787_v48 = vsel %vm2307_vm0, %v12500_v30, 0  ;;  %v349_v43 = vadd.s32 %v343_v1, %v339_v14  ;;  %v5342_v4 = vshrl.u32 %v13701_v35, 16  ;;  %v5345_v0 = vshll.u32 %v13701_v35, 16  ;;  %v18884_v30 = vld [vmem:[#allocation15_spill] sm:$0xff] }
 0x2cb   : > { %v15816_v50 = vadd.f32 %v5013_v28, %v4444_v34  ;;  %12192 = vmatmul.msk.bf16.gmra.mxu3 %vm2234_vm1, %v14271_v55  ;;  %8796 = vmatpush.bf16.msrb.mxu0 %v8787_v48  ;;  %v328_v28 = vshrl.u32 %v327_v29, 4  ;;  %v346_v34 = vshrl.u32 %v341_v37, 16  ;;  %v348_v55 = vsel %vm347_vm13, 1, %v18880_v46  ;;  %v5016_v29 = vpop.f32.mrf.mxu1 }
 0x2cc   : > { %v15822_v31 = vpop.f32.mrf.mxu0  ;;  %v350_v11 = vadd.s32 %v348_v55, %v342_v5  ;;  %vm351_vm14 = vc.u32 %v349_v43, %v345_v38  ;;  %v5344_v48 = vrot.slane %v5342_v4, 3  ;;  %v5347_v2 = vrot.slane %v5345_v0, 4  ;;  %v15841_v55 = vld [vmem:[%s14854_s8 + $0x74] sm:$0xff] }
 0x2cd   : > { %18883 = vst [vmem:[#allocation14_spill] sm:$0xff] %v15816_v50  ;;  %v15828_v50 = vmul.u32 43690, %v365_v7  ;;  %v3468_v41 = vpop.f32.mrf.mxu2  ;;  %v329_v14 = vmul.u32 24, %v328_v28  ;;  %v352_v1 = vsel %vm351_vm14, 1, %v18880_v46  ;;  %v15832_v23 = vmul.u32 43691, %v366_v6 }
 0x2ce   : > { %v4116_v45 = vpop.f32.mrf.mxu3  ;;  %v3518_v56 = vadd.f32 %v3468_v41, %v18884_v30  ;;  %v354_v37 = vadd.s32 %v352_v1, %v350_v11  ;;  %v368_v38 = vmul.u32 43691, %v365_v7  ;;  %v371_v43 = vmul.u32 43690, %v366_v6 }
 0x2cf   : > { %v4167_v52 = vadd.f32 %v4116_v45, %v3517_v18  ;;  %v330_v5 = vsub.s32 %v15692_v57, %v329_v14  ;;  %v372_v35 = vshll.u32 %v15828_v50, 16  ;;  %v15837_v18 = vor.u32 %v5347_v2, %v5344_v48  ;;  %v12525_v57 = vld [vmem:[%s18820_s3 + $0x10] sm:$0xf] }
 0x2d0   : > { %v355_v45 = vadd.s32 %v354_v37, %v344_v25  ;;  %v373_v28 = vshrl.u32 %v15828_v50, 16  ;;  %v374_v7 = vshll.u32 %v15832_v23, 16  ;;  %v6255_v6 = vshrl.u32 %v15772_v42, 16  ;;  %v14273_v37 = vld [vmem:[%s14854_s8 + $0x5c] sm:$0xff]  }
 0x2d1   : > { %v4445_v22 = vadd.f32 %v15783_v61, %v4167_v52  ;;  %vm1668_vm15 = vcmp.ne.s32.totalorder %v330_v5, 0  ;;  %vm1716_vm4 = vcmp.lt.s32.totalorder %v330_v5, 0  ;;  %v1812_v0 = vadd.s32 24, %v330_v5 }
 0x2d2   : > { %12168 = vmatmul.msk.bf16.gmra.mxu2 %vm2234_vm1, %v15755_v19  ;;  %vm15852_vm6 = vmand %vm1716_vm4, %vm1668_vm15  ;;  %v9065_v61 = vsel %vm2307_vm0, %v12525_v57, 0  ;;  %v15860_v19 = vsel %vm2467_vm2, %v15786_v40, %v15837_v18  ;;  %vm376_vm7 = vc.u32 %v368_v38, %v372_v35  ;;  %v378_v25 = vadd.s32 %v372_v35, %v368_v38 }
 0x2d3   : > { %v15843_v41 = vadd.f32 %v5016_v29, %v4445_v22  ;;  %v356_v22 = vadd.s32 %v355_v45, %v346_v34  ;;  %v1860_v50 = vsel %vm15852_vm6, %v1812_v0, %v330_v5  ;;  %9074 = vmatpush.bf16.msrb.mxu1 %v9065_v61  ;;  %v375_v34 = vshrl.u32 %v15832_v23, 16 }
 0x2d4   : > { %v15850_v52 = vpop.f32.mrf.mxu0  ;;  %v377_v14 = vsel %vm376_vm7, 1, %v18880_v46  ;;  %v6259_v40 = vshll.u32 %v15841_v55, 16  ;;  %vm1908_vm8 = vcmp.lt.s32.totalorder %v1860_v50, 16  ;;  %vm380_vm9 = vc.u32 %v378_v25, %v374_v7 }
 0x2d5   : > { %18885 = vst [vmem:[#allocation15_spill] sm:$0xff] %v15843_v41  ;;  %v5551_v4 = vpop.f32.mrf.mxu2  ;;  %v357_v30 = vshrl.u32 %v356_v22, 4  ;;  %v379_v48 = vadd.s32 %v377_v14, %v371_v43  ;;  %v6257_v42 = vor.u32 %v6255_v6, %v15805_v39  ;;  %v381_v35 = vsel %vm380_vm9, 1, %v18880_v46 }
 0x2d6   : > { %v4118_v11 = vpop.f32.mrf.mxu3  ;;  %v5671_v29 = vadd.f32 %v5551_v4, %v15249_v60  ;;  %v15874_v38 = vrot.slane %v6259_v40, 1  ;;  %v18888_v60 = vmov 0.0   ;;  %v15899_v61 = vadd.s32 48, %v15630_v15  ;;  %v13702_v4 = vld [vmem:[%s14854_s8 + $0x78] sm:$0xff]  }
 0x2d7   : > { %v4168_v1 = vadd.f32 %v4118_v11, %v3518_v56  ;;  %12314 = vmatmul.msk.bf16.gmra.mxu0 %vm2234_vm1, %v15759_v3  ;;  %v358_v5 = vmul.u32 24, %v357_v30  ;;  %v15881_v56 = vadd.s32 32, %v15630_v15  ;;  %v15884_v3 = vadd.s32 40, %v15630_v15 }
 0x2d8   : > { %v15887_v45 = vsel %vm1908_vm8, 1.0, %v18888_v60  ;;  %v383_v0 = vadd.s32 %v381_v35, %v379_v48  ;;  %v15892_v39 = vsel %vm3070_vm3, %v6257_v42, %v15874_v38  ;;  %v5354_v48 = vshll.u32 %v13702_v4, 16  ;;  %v15907_v42 = vld [vmem:[%s18819_s2] ss:$0 sm:$0xff] }
 0x2d9   : > { %v15877_v23 = vadd.f32 %v15822_v31, %v4168_v1  ;;  %v359_v43 = vsub.s32 %v15748_v33, %v358_v5  ;;  %v394_v31 = vand.u32 65535, %v15881_v56  ;;  %v395_v57 = vshrl.u32 %v15881_v56, 16 }
 0x2da   : > { %v423_v2 = vand.u32 65535, %v15884_v3  ;;  %v384_v7 = vadd.s32 %v383_v0, %v373_v28 }
 0x2db   : > { %12193 = vmatmul.msk.bf16.gmra.mxu3 %vm2234_vm1, %v14273_v37  ;;  %vm1669_vm10 = vcmp.ne.s32.totalorder %v359_v43, 0  ;;  %vm1717_vm11 = vcmp.lt.s32.totalorder %v359_v43, 0  ;;  %v1813_v33 = vadd.s32 24, %v359_v43  ;;  %v397_v50 = vmul.u32 43691, %v394_v31 }
 0x2dc   : > { %v15901_v22 = vpop.f32.mrf.mxu0  ;;  %vm1765_vm12 = vmand %vm1717_vm11, %vm1669_vm10  ;;  %v398_v25 = vmul.u32 43690, %v394_v31  ;;  %v399_v6 = vmul.u32 43691, %v395_v57  ;;  %v400_v11 = vmul.u32 43690, %v395_v57  ;;  %v385_v1 = vadd.s32 %v384_v7, %v375_v34 }
 0x2dd   : > { %v5553_v14 = vpop.f32.mrf.mxu2  ;;  %v1861_v40 = vsel %vm1765_vm12, %v1813_v33, %v359_v43  ;;  %v5351_v37 = vshrl.u32 %v13702_v4, 16 }
 0x2de   : > { %v5829_v30 = vpop.f32.mrf.mxu3  ;;  %v5672_v28 = vadd.f32 %v5553_v14, %v15259_v13  ;;  %vm1909_vm13 = vcmp.lt.s32.totalorder %v1861_v40, 16  ;;  %v401_v35 = vshll.u32 %v398_v25, 16  ;;  %v386_v31 = vshrl.u32 %v385_v1, 4 }
 0x2df   : > { %v5949_v5 = vadd.f32 %v5829_v30, %v5671_v29  ;;  %v15911_v0 = vsel %vm1909_vm13, 1.0, %v18888_v60  ;;  %v402_v57 = vshrl.u32 %v398_v25, 16  ;;  %v403_v41 = vshll.u32 %v399_v6, 16 }
 0x2e0   : > { %v404_v43 = vshrl.u32 %v399_v6, 16  ;;  %vm405_vm14 = vc.u32 %v397_v50, %v401_v35  ;;  %v407_v29 = vadd.s32 %v401_v35, %v397_v50  ;;  %v387_v33 = vmul.u32 24, %v386_v31 }
 0x2e1   : > { %v6571_v34 = vadd.f32 %v15850_v52, %v5949_v5  ;;  %v406_v7 = vsel %vm405_vm14, 1, %v18880_v46  ;;  %v5353_v4 = vrot.slane %v5351_v37, 3  ;;  %v5356_v30 = vrot.slane %v5354_v48, 4 }
 0x2e2   : > { %12169 = vmatmul.msk.bf16.gmra.mxu2 %vm2234_vm1, %v15803_v51  ;;  %v408_v14 = vadd.s32 %v406_v7, %v400_v11  ;;  %vm409_vm15 = vc.u32 %v407_v29, %v403_v41  ;;  %v424_v25 = vshrl.u32 %v15884_v3, 16  ;;  %v388_v52 = vsub.s32 %v15794_v59, %v387_v33  ;;  %v14275_v29 = vld [vmem:[%s14854_s8 + $0x64] sm:$0xff]  }
 0x2e3   : > { %v6623_v13 = vadd.f32 %v15907_v42, %v6571_v34  ;;  %v410_v50 = vsel %vm409_vm15, 1, %v18880_v46  ;;  %v15923_v6 = vor.u32 %v5356_v30, %v5353_v4  ;;  %v426_v1 = vmul.u32 43691, %v423_v2 }
 0x2e4   : > { %v15919_v40 = vpop.f32.mrf.mxu0  ;;  %v412_v48 = vadd.s32 %v410_v50, %v408_v14  ;;  %v15925_v5 = vmul.u32 43690, %v423_v2  ;;  %v15927_v35 = vmul.u32 43691, %v424_v25  ;;  %vm1670_vm4 = vcmp.ne.s32.totalorder %v388_v52, 0  ;;  %v15942_v14 = vld [vmem:[%s14854_s8 + $0x7c] sm:$0xff] }
 0x2e5   : > { %v6671_v37 = vmax.f32 %v6623_v13, 0.0  ;;  %v5556_v41 = vpop.f32.mrf.mxu2  ;;  %vm1718_vm6 = vcmp.lt.s32.totalorder %v388_v52, 0  ;;  %v1814_v11 = vadd.s32 24, %v388_v52  ;;  %v15932_v59 = vsel %vm2467_vm2, %v15837_v18, %v15923_v6 }
 0x2e6   : > { %v5831_v51 = vpop.f32.mrf.mxu3  ;;  %v5673_v2 = vadd.f32 %v5556_v41, %v15266_v12  ;;  %vm1766_vm7 = vmand %vm1718_vm6, %vm1670_vm4  ;;  %v413_v33 = vadd.s32 %v412_v48, %v402_v57  ;;  %v429_v4 = vmul.u32 43690, %v424_v25  ;;  %v430_v30 = vshll.u32 %v15925_v5, 16 }
 0x2e7   : > { %v6719_v31 = vmul.f32 %v15809_v20, %v6671_v37  ;;  %v5950_v34 = vadd.f32 %v5831_v51, %v5672_v28  ;;  %12315 = vmatmul.msk.bf16.gmra.mxu0 %vm2234_vm1, %v15813_v17  ;;  %v1862_v7 = vsel %vm1766_vm7, %v1814_v11, %v388_v52  ;;  %v431_v13 = vshrl.u32 %v15925_v5, 16 }
 0x2e8   : > { %vm1910_vm8 = vcmp.lt.s32.totalorder %v1862_v7, 16  ;;  %v414_v28 = vadd.s32 %v413_v33, %v404_v43  ;;  %v432_v12 = vshll.u32 %v15927_v35, 16  ;;  %v433_v57 = vshrl.u32 %v15927_v35, 16 }
 0x2e9   : > { %v6767_v18 = vpack.c.bf16 %v6719_v31, %v6719_v31  ;;  %v6572_v20 = vadd.f32 %v15901_v22, %v5950_v34  ;;  %v15946_v17 = vsel %vm1910_vm8, 1.0, %v18888_v60  ;;  %vm434_vm9 = vc.u32 %v426_v1, %v430_v30 }
 0x2ea   : > { %v415_v52 = vshrl.u32 %v414_v28, 4  ;;  %v435_v50 = vsel %vm434_vm9, 1, %v18880_v46  ;;  %v436_v22 = vadd.s32 %v430_v30, %v426_v1  ;;  %v6263_v48 = vshrl.u32 %v15841_v55, 16 }
 0x2eb   : > { %6815 = vst.msk [vmem:[#allocation2 + $0x10] sm:$0xf] %vm2051_vm5, %v6767_v18  ;;  %v6624_v25 = vadd.f32 %v15907_v42, %v6572_v20  ;;  %12194 = vmatmul.msk.bf16.gmra.mxu3 %vm2234_vm1, %v14275_v29  ;;  %v437_v43 = vadd.s32 %v435_v50, %v429_v4  ;;  %v6267_v5 = vshll.u32 %v15942_v14, 16  ;;  %v452_v35 = vand.u32 65535, %v15899_v61 }
 0x2ec   : > { %v15954_v37 = vpop.f32.mrf.mxu0  ;;  %v416_v41 = vmul.u32 24, %v415_v52  ;;  %vm438_vm10 = vc.u32 %v436_v22, %v432_v12  ;;  %v453_v11 = vshrl.u32 %v15899_v61, 16  ;;  %v6265_v1 = vor.u32 %v6263_v48, %v15874_v38 }
 0x2ed   : > { %v6672_v51 = vmax.f32 %v6624_v25, 0.0  ;;  %v5558_v34 = vpop.f32.mrf.mxu2  ;;  %v439_v29 = vsel %vm438_vm10, 1, %v18880_v46  ;;  %v15962_v33 = vrot.slane %v6267_v5, 1  ;;  %v455_v7 = vmul.u32 43691, %v452_v35 }
 0x2ee   : > { %v5834_v31 = vpop.f32.mrf.mxu3  ;;  %v5674_v30 = vadd.f32 %v5558_v34, %v15276_v36  ;;  %v417_v18 = vsub.s32 %v15881_v56, %v416_v41  ;;  %v441_v20 = vadd.s32 %v439_v29, %v437_v43  ;;  %v456_v12 = vmul.u32 43690, %v452_v35  ;;  %v13703_v43 = vld [vmem:[%s14854_s8 + $0x80] sm:$0xff]  }
 0x2ef   : > { %v6720_v55 = vmul.f32 %v15887_v45, %v6672_v51  ;;  %v5951_v4 = vadd.f32 %v5834_v31, %v5673_v2  ;;  %v15969_v28 = vsel %vm3070_vm3, %v6265_v1, %v15962_v33  ;;  %v15971_v25 = vmul.u32 43691, %v453_v11 }
 0x2f0   : > { %vm1671_vm11 = vcmp.ne.s32.totalorder %v417_v18, 0  ;;  %vm1719_vm12 = vcmp.lt.s32.totalorder %v417_v18, 0  ;;  %v1815_v36 = vadd.s32 24, %v417_v18  ;;  %v442_v56 = vadd.s32 %v441_v20, %v431_v13 }
 0x2f1   : > { %v6768_v38 = vpack.c.bf16 %v6720_v55, %v6720_v55  ;;  %v6573_v52 = vadd.f32 %v15919_v40, %v5951_v4  ;;  %vm15974_vm13 = vmand %vm1719_vm12, %vm1671_vm11  ;;  %v458_v50 = vmul.u32 43690, %v453_v11  ;;  %v459_v22 = vshll.u32 %v456_v12, 16 }
 0x2f2   : > { %v14669_v45 = vld [vmem:[#allocation2 + $0xc] sm:$0xff]   ;;  %12170 = vmatmul.msk.bf16.gmra.mxu2 %vm2234_vm1, %v15860_v19  ;;  %v460_v40 = vshrl.u32 %v456_v12, 16  ;;  %v461_v5 = vshll.u32 %v15971_v25, 16  ;;  %v462_v35 = vshrl.u32 %v15971_v25, 16  ;;  %v1863_v13 = vsel %vm15974_vm13, %v1815_v36, %v417_v18  ;;  %v15995_v12 = vld [vmem:[%s14854_s8 + $0x84] sm:$0xff] }
 0x2f3   : > { %6816 = vst.msk [vmem:[#allocation2 + $0x14] sm:$0xf] %vm2051_vm5, %v6768_v38  ;;  %v6625_v48 = vadd.f32 %v15907_v42, %v6573_v52  ;;  %12332 = vmatmul.msk.bf16.gmra.mxu1 %vm2234_vm1, %v14669_v45  ;;  %v443_v41 = vadd.s32 %v442_v56, %v433_v57  ;;  %vm463_vm14 = vc.u32 %v455_v7, %v459_v22  ;;  %vm1911_vm15 = vcmp.lt.s32.totalorder %v1863_v13, 16  ;;  %v14277_v25 = vld [vmem:[%s14854_s8 + $0x6c] sm:$0xff]  }
 0x2f4   : > { %v15985_v51 = vpop.f32.mrf.mxu0  ;;  %v465_v11 = vadd.s32 %v459_v22, %v455_v7  ;;  %v464_v19 = vsel %vm463_vm14, 1, %v18880_v46  ;;  %v5360_v34 = vshrl.u32 %v13703_v43, 16  ;;  %v15992_v55 = vsel %vm1911_vm15, 1.0, %v18888_v60 }
 0x2f5   : > { %v6673_v31 = vmax.f32 %v6625_v48, 0.0  ;;  %v5561_v1 = vpop.f32.mrf.mxu2  ;;  %v444_v4 = vshrl.u32 %v443_v41, 4  ;;  %v466_v20 = vadd.s32 %v464_v19, %v458_v50  ;;  %v5363_v36 = vshll.u32 %v13703_v43, 16 }
 0x2f6   : > { %v5836_v29 = vpop.f32.mrf.mxu3  ;;  %vm467_vm4 = vc.u32 %v465_v11, %v461_v5  ;;  %v5675_v7 = vadd.f32 %v5561_v1, %v15283_v62  ;;  %v5362_v2 = vrot.slane %v5360_v34, 3  ;;  %v16005_v22 = vadd.s32 56, %v15630_v15 }
 0x2f7   : > { %v6721_v57 = vmul.f32 %v15911_v0, %v6673_v31  ;;  %v5952_v18 = vadd.f32 %v5836_v29, %v5674_v30  ;;  %12316 = vmatmul.msk.bf16.gmra.mxu0 %vm2234_vm1, %v15892_v39  ;;  %v468_v38 = vsel %vm467_vm4, 1, %v18880_v46  ;;  %v445_v52 = vmul.u32 24, %v444_v4 }
 0x2f8   : > { %v470_v45 = vadd.s32 %v468_v38, %v466_v20  ;;  %v6271_v0 = vshrl.u32 %v15942_v14, 16  ;;  %v5365_v48 = vrot.slane %v5363_v36, 4  ;;  %v6275_v62 = vshll.u32 %v15995_v12, 16 }
 0x2f9   : > { %v6769_v56 = vpack.c.bf16 %v6721_v57, %v6721_v57  ;;  %v6574_v50 = vadd.f32 %v15954_v37, %v5952_v18  ;;  %v446_v30 = vsub.s32 %v15884_v3, %v445_v52  ;;  %v481_v43 = vand.u32 65535, %v16005_v22 }
 0x2fa   : > { %v471_v39 = vadd.s32 %v470_v45, %v460_v40  ;;  %v482_v37 = vshrl.u32 %v16005_v22, 16  ;;  %v6273_v13 = vor.u32 %v6271_v0, %v15962_v33  ;;  %v16018_v11 = vor.u32 %v5365_v48, %v5362_v2  ;;  %v13704_v48 = vld [vmem:[%s14854_s8 + $0x88] sm:$0xff]  }
 0x2fb   : > { %6817 = vst.msk [vmem:[#allocation2 + $0x18] sm:$0xf] %vm2051_vm5, %v6769_v56  ;;  %v6626_v5 = vadd.f32 %v15907_v42, %v6574_v50  ;;  %12195 = vmatmul.msk.bf16.gmra.mxu3 %vm2234_vm1, %v14277_v25  ;;  %vm1672_vm6 = vcmp.ne.s32.totalorder %v446_v30, 0  ;;  %vm1720_vm7 = vcmp.lt.s32.totalorder %v446_v30, 0  ;;  %v1816_v3 = vadd.s32 24, %v446_v30 }
 0x2fc   : > { %v16016_v41 = vpop.f32.mrf.mxu0  ;;  %v472_v14 = vadd.s32 %v471_v39, %v462_v35  ;;  %vm1768_vm8 = vmand %vm1720_vm7, %vm1672_vm6  ;;  %v484_v31 = vmul.u32 43691, %v481_v43  ;;  %v16020_v19 = vmul.u32 43690, %v481_v43  ;;  %v16022_v20 = vmul.u32 43691, %v482_v37 }
 0x2fd   : > { %v6674_v40 = vmax.f32 %v6626_v5, 0.0  ;;  %v5563_v29 = vpop.f32.mrf.mxu2  ;;  %v1864_v1 = vsel %vm1768_vm8, %v1816_v3, %v446_v30  ;;  %v487_v33 = vmul.u32 43690, %v482_v37  ;;  %v16032_v52 = vsel %vm2467_vm2, %v15923_v6, %v16018_v11 }
 0x2fe   : > { %v5839_v34 = vpop.f32.mrf.mxu3  ;;  %v473_v4 = vshrl.u32 %v472_v14, 4  ;;  %v5676_v25 = vadd.f32 %v5563_v29, %v15293_v9  ;;  %vm1912_vm9 = vcmp.lt.s32.totalorder %v1864_v1, 16  ;;  %v488_v45 = vshll.u32 %v16020_v19, 16 }
 0x2ff   : > { %v6722_v57 = vmul.f32 %v15946_v17, %v6674_v40  ;;  %v5953_v18 = vadd.f32 %v5839_v34, %v5675_v7  ;;  %v16027_v35 = vsel %vm1912_vm9, 1.0, %v18888_v60  ;;  %v489_v17 = vshrl.u32 %v16020_v19, 16 }
 0x300   : > { %v474_v38 = vmul.u32 24, %v473_v4  ;;  %v490_v9 = vshll.u32 %v16022_v20, 16  ;;  %v491_v50 = vshrl.u32 %v16022_v20, 16  ;;  %vm492_vm10 = vc.u32 %v484_v31, %v488_v45 }
 0x301   : > { %v6770_v2 = vpack.c.bf16 %v6722_v57, %v6722_v57  ;;  %v6575_v36 = vadd.f32 %v15985_v51, %v5953_v18  ;;  %v494_v0 = vadd.s32 %v488_v45, %v484_v31  ;;  %v493_v51 = vsel %vm492_vm10, 1, %v18880_v46 }
 0x302   : > { %v14671_v7 = vld [vmem:[#allocation2 + $0x14] sm:$0xff]   ;;  %v475_v56 = vsub.s32 %v15899_v61, %v474_v38  ;;  %12171 = vmatmul.msk.bf16.gmra.mxu2 %vm2234_vm1, %v15932_v59  ;;  %v16045_v30 = vrot.slane %v6275_v62, 1  ;;  %v16048_v39 = vadd.s32 64, %v15630_v15  ;;  %v495_v43 = vadd.s32 %v493_v51, %v487_v33 }
 0x303   : > { %6818 = vst.msk [vmem:[#allocation2 + $0x1c] sm:$0xf] %vm2051_vm5, %v6770_v2  ;;  %v6627_v6 = vadd.f32 %v15907_v42, %v6575_v36  ;;  %12333 = vmatmul.msk.bf16.gmra.mxu1 %vm2234_vm1, %v14671_v7  ;;  %vm496_vm14 = vc.u32 %v494_v0, %v490_v9  ;;  %v5369_v34 = vshrl.u32 %v13704_v48, 16  ;;  %v5372_v0 = vshll.u32 %v13704_v48, 16 }
 0x304   : > { %v16051_v61 = vpop.f32.mrf.mxu0  ;;  %vm1673_vm11 = vcmp.ne.s32.totalorder %v475_v56, 0  ;;  %vm1721_vm12 = vcmp.lt.s32.totalorder %v475_v56, 0  ;;  %v1817_v5 = vadd.s32 24, %v475_v56  ;;  %v16056_v59 = vsel %vm3070_vm3, %v6273_v13, %v16045_v30  ;;  %v14279_v13 = vld [vmem:[%s14854_s8 + $0x74] sm:$0xff]  }
 0x305   : > { %v6675_v37 = vmax.f32 %v6627_v6, 0.0  ;;  %vm1769_vm13 = vmand %vm1721_vm12, %vm1673_vm11  ;;  %v510_v62 = vand.u32 65535, %v16048_v39  ;;  %v5566_v14 = vpop.f32.mrf.mxu2  ;;  %v497_v31 = vsel %vm496_vm14, 1, %v18880_v46  ;;  %v511_v19 = vshrl.u32 %v16048_v39, 16 }
 0x306   : > { %v5841_v3 = vpop.f32.mrf.mxu3  ;;  %v1865_v40 = vsel %vm1769_vm13, %v1817_v5, %v475_v56  ;;  %v5677_v4 = vadd.f32 %v5566_v14, %v15300_v63  ;;  %v499_v33 = vadd.s32 %v497_v31, %v495_v43  ;;  %v5371_v7 = vrot.slane %v5369_v34, 3 }
 0x307   : > { %v6723_v29 = vmul.f32 %v15992_v55, %v6675_v37  ;;  %v5954_v1 = vadd.f32 %v5841_v3, %v5676_v25  ;;  %12317 = vmatmul.msk.bf16.gmra.mxu0 %vm2234_vm1, %v15969_v28  ;;  %vm1913_vm15 = vcmp.lt.s32.totalorder %v1865_v40, 16  ;;  %v513_v57 = vmul.u32 43691, %v510_v62 }
 0x308   : > { %v16067_v20 = vsel %vm1913_vm15, 1.0, %v18888_v60  ;;  %v514_v18 = vmul.u32 43690, %v510_v62  ;;  %v515_v2 = vmul.u32 43691, %v511_v19  ;;  %v516_v36 = vmul.u32 43690, %v511_v19 }
 0x309   : > { %v6771_v38 = vpack.c.bf16 %v6723_v29, %v6723_v29  ;;  %v6576_v45 = vadd.f32 %v16016_v41, %v5954_v1  ;;  %v500_v55 = vadd.s32 %v499_v33, %v489_v17  ;;  %v16076_v5 = vadd.s32 72, %v15630_v15 }
 0x30a   : > { %v517_v25 = vshll.u32 %v514_v18, 16  ;;  %v518_v9 = vshrl.u32 %v514_v18, 16  ;;  %v519_v28 = vshll.u32 %v515_v2, 16  ;;  %v520_v56 = vshrl.u32 %v515_v2, 16 }
 0x30b   : > { %6819 = vst.msk [vmem:[#allocation2 + $0x20] sm:$0xf] %vm2051_vm5, %v6771_v38  ;;  %v6628_v63 = vadd.f32 %v15907_v42, %v6576_v45  ;;  %12196 = vmatmul.msk.bf16.gmra.mxu3 %vm2234_vm1, %v14279_v13  ;;  %v501_v51 = vadd.s32 %v500_v55, %v491_v50  ;;  %v5374_v37 = vrot.slane %v5372_v0, 4  ;;  %v6279_v62 = vshrl.u32 %v15995_v12, 16 }
 0x30c   : > { %v16073_v6 = vpop.f32.mrf.mxu0  ;;  %vm521_vm4 = vc.u32 %v513_v57, %v517_v25  ;;  %v523_v41 = vadd.s32 %v517_v25, %v513_v57  ;;  %v539_v48 = vand.u32 65535, %v16076_v5  ;;  %v540_v12 = vshrl.u32 %v16076_v5, 16 }
 0x30d   : > { %v6676_v17 = vmax.f32 %v6628_v63, 0.0  ;;  %v522_v43 = vsel %vm521_vm4, 1, %v18880_v46  ;;  %v5568_v14 = vpop.f32.mrf.mxu2  ;;  %v502_v40 = vshrl.u32 %v501_v51, 4  ;;  %v16084_v33 = vor.u32 %v5374_v37, %v5371_v7 }
 0x30e   : > { %v5844_v3 = vpop.f32.mrf.mxu3  ;;  %v524_v31 = vadd.s32 %v522_v43, %v516_v36  ;;  %vm525_vm6 = vc.u32 %v523_v41, %v519_v28  ;;  %v5678_v34 = vadd.f32 %v5568_v14, %v15310_v26  ;;  %v542_v38 = vmul.u32 43691, %v539_v48 }
 0x30f   : > { %v6724_v50 = vmul.f32 %v16027_v35, %v6676_v17  ;;  %v5955_v19 = vadd.f32 %v5844_v3, %v5677_v4  ;;  %v526_v29 = vsel %vm525_vm6, 1, %v18880_v46  ;;  %v503_v1 = vmul.u32 24, %v502_v40  ;;  %v16107_v3 = vld [vmem:[%s14854_s8 + $0x8c] sm:$0xff] }
 0x310   : > { %v528_v13 = vadd.s32 %v526_v29, %v524_v31  ;;  %v543_v45 = vmul.u32 43690, %v539_v48  ;;  %v16092_v26 = vsel %vm2467_vm2, %v16018_v11, %v16084_v33  ;;  %v16094_v4 = vmul.u32 43691, %v540_v12  ;;  %v14281_v31 = vld [vmem:[%s14854_s8 + $0x7c] sm:$0xff]   ;;  %v13705_v29 = vld [vmem:[%s14854_s8 + $0x90] sm:$0xff]  }
 0x311   : > { %v6772_v57 = vpack.c.bf16 %v6724_v50, %v6724_v50  ;;  %v6577_v18 = vadd.f32 %v16051_v61, %v5955_v19  ;;  %v504_v36 = vsub.s32 %v16005_v22, %v503_v1  ;;  %v545_v61 = vmul.u32 43690, %v540_v12 }
 0x312   : > { %v14673_v2 = vld [vmem:[#allocation2 + $0x1c] sm:$0xff]   ;;  %v529_v35 = vadd.s32 %v528_v13, %v518_v9  ;;  %12172 = vmatmul.msk.bf16.gmra.mxu2 %vm2234_vm1, %v16032_v52  ;;  %v546_v25 = vshll.u32 %v543_v45, 16  ;;  %v547_v7 = vshrl.u32 %v543_v45, 16  ;;  %v548_v28 = vshll.u32 %v16094_v4, 16 }
 0x313   : > { %6820 = vst.msk [vmem:[#allocation2 + $0x24] sm:$0xf] %vm2051_vm5, %v6772_v57  ;;  %v6629_v55 = vadd.f32 %v15907_v42, %v6577_v18  ;;  %12334 = vmatmul.msk.bf16.gmra.mxu1 %vm2234_vm1, %v14673_v2  ;;  %vm1674_vm7 = vcmp.ne.s32.totalorder %v504_v36, 0  ;;  %vm1722_vm8 = vcmp.lt.s32.totalorder %v504_v36, 0  ;;  %v1818_v22 = vadd.s32 24, %v504_v36 }
 0x314   : > { %v16100_v63 = vpop.f32.mrf.mxu0  ;;  %v530_v11 = vadd.s32 %v529_v35, %v520_v56  ;;  %vm1770_vm9 = vmand %vm1722_vm8, %vm1674_vm7  ;;  %v549_v0 = vshrl.u32 %v16094_v4, 16  ;;  %vm550_vm10 = vc.u32 %v542_v38, %v546_v25  ;;  %v552_v37 = vadd.s32 %v546_v25, %v542_v38 }
 0x315   : > { %v6677_v9 = vmax.f32 %v6629_v55, 0.0  ;;  %v1866_v52 = vsel %vm1770_vm9, %v1818_v22, %v504_v36  ;;  %v5571_v41 = vpop.f32.mrf.mxu2  ;;  %v551_v43 = vsel %vm550_vm10, 1, %v18880_v46  ;;  %v5378_v38 = vshrl.u32 %v13705_v29, 16 }
 0x316   : > { %v5846_v51 = vpop.f32.mrf.mxu3  ;;  %v531_v17 = vshrl.u32 %v530_v11, 4  ;;  %vm1914_vm11 = vcmp.lt.s32.totalorder %v1866_v52, 16  ;;  %v5679_v40 = vadd.f32 %v5571_v41, %v15317_v16  ;;  %v553_v19 = vadd.s32 %v551_v43, %v545_v61 }
 0x317   : > { %v6725_v56 = vmul.f32 %v16067_v20, %v6677_v9  ;;  %v5956_v14 = vadd.f32 %v5846_v51, %v5678_v34  ;;  %12318 = vmatmul.msk.bf16.gmra.mxu0 %vm2234_vm1, %v16056_v59  ;;  %v11777_v48 = vsel %vm1914_vm11, 1.0, %v18888_v60  ;;  %vm554_vm12 = vc.u32 %v552_v37, %v548_v28 }
 0x318   : > { %v532_v50 = vmul.u32 24, %v531_v17  ;;  %v555_v12 = vsel %vm554_vm12, 1, %v18880_v46  ;;  %v6281_v20 = vor.u32 %v6279_v62, %v16045_v30  ;;  %v6283_v59 = vshll.u32 %v16107_v3, 16 }
 0x319   : > { %v6773_v1 = vpack.c.bf16 %v6725_v56, %v6725_v56  ;;  %v6578_v13 = vadd.f32 %v16073_v6, %v5956_v14  ;;  %v557_v57 = vadd.s32 %v555_v12, %v553_v19  ;;  %v16122_v16 = vadd.s32 80, %v15630_v15 }
 0x31a   : > { %v533_v34 = vsub.s32 %v16048_v39, %v532_v50  ;;  %v5381_v6 = vshll.u32 %v13705_v29, 16  ;;  %v16128_v45 = vadd.s32 88, %v15630_v15  ;;  %v16132_v36 = vrot.slane %v6283_v59, 1 }
 0x31b   : > { %6821 = vst.msk [vmem:[#allocation2 + $0x28] sm:$0xf] %vm2051_vm5, %v6773_v1  ;;  %v6630_v18 = vadd.f32 %v15907_v42, %v6578_v13  ;;  %12197 = vmatmul.msk.bf16.gmra.mxu3 %vm2234_vm1, %v14281_v31  ;;  %v558_v62 = vadd.s32 %v557_v57, %v547_v7  ;;  %v568_v35 = vand.u32 65535, %v16122_v16  ;;  %v569_v4 = vshrl.u32 %v16122_v16, 16 }
 0x31c   : > { %v16130_v30 = vpop.f32.mrf.mxu0  ;;  %vm1675_vm13 = vcmp.ne.s32.totalorder %v533_v34, 0  ;;  %vm1723_vm14 = vcmp.lt.s32.totalorder %v533_v34, 0  ;;  %v1819_v39 = vadd.s32 24, %v533_v34  ;;  %v5380_v11 = vrot.slane %v5378_v38, 3 }
 0x31d   : > { %v6678_v2 = vmax.f32 %v6630_v18, 0.0  ;;  %vm1771_vm15 = vmand %vm1723_vm14, %vm1675_vm13  ;;  %v5573_v25 = vpop.f32.mrf.mxu2  ;;  %v559_v22 = vadd.s32 %v558_v62, %v549_v0  ;;  %v5383_v9 = vrot.slane %v5381_v6, 4  ;;  %v6286_v17 = vsel %vm3070_vm3, %v6281_v20, %v16132_v36 }
 0x31e   : > { %v1867_v55 = vsel %vm1771_vm15, %v1819_v39, %v533_v34  ;;  %v5849_v61 = vpop.f32.mrf.mxu3  ;;  %v5680_v51 = vadd.f32 %v5573_v25, %v15327_v44  ;;  %v571_v43 = vmul.u32 43691, %v568_v35  ;;  %v572_v14 = vmul.u32 43690, %v568_v35  ;;  %v14283_v35 = vld [vmem:[%s14854_s8 + $0x84] sm:$0xff]  }
 0x31f   : > { %v6726_v28 = vmul.f32 %v11777_v48, %v6678_v2  ;;  %vm1915_vm4 = vcmp.lt.s32.totalorder %v1867_v55, 16  ;;  %v5957_v52 = vadd.f32 %v5849_v61, %v5679_v40  ;;  %v560_v41 = vshrl.u32 %v559_v22, 4 }
 0x320   : > { %v11778_v7 = vsel %vm1915_vm4, 1.0, %v18888_v60  ;;  %v16141_v31 = vmul.u32 43691, %v569_v4  ;;  %v574_v48 = vmul.u32 43690, %v569_v4  ;;  %v16143_v19 = vor.u32 %v5383_v9, %v5380_v11 }
 0x321   : > { %v6774_v37 = vpack.c.bf16 %v6726_v28, %v6726_v28  ;;  %v6579_v56 = vadd.f32 %v16100_v63, %v5957_v52  ;;  %v561_v50 = vmul.u32 24, %v560_v41  ;;  %v597_v44 = vand.u32 65535, %v16128_v45  ;;  %v16169_v28 = vld [vmem:[%s14854_s8 + $0x94] sm:$0xff] }
 0x322   : > { %v14675_v0 = vld [vmem:[#allocation2 + $0x24] sm:$0xff]   ;;  %12173 = vmatmul.msk.bf16.gmra.mxu2 %vm2234_vm1, %v16092_v26  ;;  %v575_v29 = vshll.u32 %v572_v14, 16  ;;  %v576_v1 = vshrl.u32 %v572_v14, 16  ;;  %v577_v63 = vshll.u32 %v16141_v31, 16  ;;  %v578_v20 = vshrl.u32 %v16141_v31, 16 }
 0x323   : > { %6822 = vst.msk [vmem:[#allocation2 + $0x2c] sm:$0xf] %vm2051_vm5, %v6774_v37  ;;  %v6631_v40 = vadd.f32 %v15907_v42, %v6579_v56  ;;  %12335 = vmatmul.msk.bf16.gmra.mxu1 %vm2234_vm1, %v14675_v0  ;;  %v562_v12 = vsub.s32 %v16076_v5, %v561_v50  ;;  %v16159_v34 = vsel %vm2467_vm2, %v16084_v33, %v16143_v19  ;;  %v598_v57 = vshrl.u32 %v16128_v45, 16 }
 0x324   : > { %v16151_v13 = vpop.f32.mrf.mxu0  ;;  %vm579_vm6 = vc.u32 %v571_v43, %v575_v29  ;;  %v581_v59 = vadd.s32 %v575_v29, %v571_v43  ;;  %v600_v18 = vmul.u32 43691, %v597_v44  ;;  %v601_v61 = vmul.u32 43690, %v597_v44 }
 0x325   : > { %v6679_v26 = vmax.f32 %v6631_v40, 0.0  ;;  %vm1676_vm7 = vcmp.ne.s32.totalorder %v562_v12, 0  ;;  %vm1724_vm8 = vcmp.lt.s32.totalorder %v562_v12, 0  ;;  %v1820_v38 = vadd.s32 24, %v562_v12  ;;  %v5576_v39 = vpop.f32.mrf.mxu2 }
 0x326   : > { %v5851_v6 = vpop.f32.mrf.mxu3  ;;  %v580_v5 = vsel %vm579_vm6, 1, %v18880_v46  ;;  %vm1772_vm9 = vmand %vm1724_vm8, %vm1676_vm7  ;;  %v5681_v33 = vadd.f32 %v5576_v39, %v15334_v27  ;;  %vm583_vm10 = vc.u32 %v581_v59, %v577_v63  ;;  %v602_v25 = vmul.u32 43691, %v598_v57 }
 0x327   : > { %v6727_v62 = vmul.f32 %v11778_v7, %v6679_v26  ;;  %v5958_v2 = vadd.f32 %v5851_v6, %v5680_v51  ;;  %12319 = vmatmul.msk.bf16.gmra.mxu0 %vm2234_vm1, %v6286_v17  ;;  %v582_v4 = vadd.s32 %v580_v5, %v574_v48  ;;  %v1868_v55 = vsel %vm1772_vm9, %v1820_v38, %v562_v12 }
 0x328   : > { %vm1916_vm11 = vcmp.lt.s32.totalorder %v1868_v55, 16  ;;  %v584_v9 = vsel %vm583_vm10, 1, %v18880_v46  ;;  %v603_v7 = vmul.u32 43690, %v598_v57  ;;  %v604_v41 = vshll.u32 %v601_v61, 16 }
 0x329   : > { %v6775_v22 = vpack.c.bf16 %v6727_v62, %v6727_v62  ;;  %v6580_v11 = vadd.f32 %v16130_v30, %v5958_v2  ;;  %v11779_v52 = vsel %vm1916_vm11, 1.0, %v18888_v60  ;;  %v586_v51 = vadd.s32 %v584_v9, %v582_v4 }
 0x32a   : > { %v605_v17 = vshrl.u32 %v601_v61, 16  ;;  %v606_v43 = vshll.u32 %v602_v25, 16  ;;  %v607_v37 = vshrl.u32 %v602_v25, 16  ;;  %vm608_vm12 = vc.u32 %v600_v18, %v604_v41 }
 0x32b   : > { %6823 = vst.msk [vmem:[#allocation2 + $0x30] sm:$0xf] %vm2051_vm5, %v6775_v22  ;;  %v6632_v27 = vadd.f32 %v15907_v42, %v6580_v11  ;;  %12198 = vmatmul.msk.bf16.gmra.mxu3 %vm2234_vm1, %v14283_v35  ;;  %v587_v56 = vadd.s32 %v586_v51, %v576_v1  ;;  %v610_v14 = vadd.s32 %v604_v41, %v600_v18  ;;  %v6287_v31 = vshrl.u32 %v16107_v3, 16  ;;  %v13706_v1 = vld [vmem:[%s14854_s8 + $0x98] sm:$0xff]  }
 0x32c   : > { %v16175_v30 = vpop.f32.mrf.mxu0  ;;  %v609_v50 = vsel %vm608_vm12, 1, %v18880_v46  ;;  %v6291_v48 = vshll.u32 %v16169_v28, 16  ;;  %v16181_v44 = vadd.s32 96, %v15630_v15  ;;  %v5387_v35 = vshrl.u32 %v13706_v1, 16 }
 0x32d   : > { %v6680_v0 = vmax.f32 %v6632_v27, 0.0  ;;  %v588_v40 = vadd.s32 %v587_v56, %v578_v20  ;;  %v5578_v63 = vpop.f32.mrf.mxu2  ;;  %v611_v12 = vadd.s32 %v609_v50, %v603_v7  ;;  %vm612_vm13 = vc.u32 %v610_v14, %v606_v43 }
 0x32e   : > { %v5854_v29 = vpop.f32.mrf.mxu3  ;;  %v6289_v57 = vor.u32 %v6287_v31, %v16132_v36  ;;  %v5682_v3 = vadd.f32 %v5578_v63, %v15344_v10  ;;  %v613_v18 = vsel %vm612_vm13, 1, %v18880_v46  ;;  %v16187_v39 = vrot.slane %v6291_v48, 1 }
 0x32f   : > { %v6728_v26 = vmul.f32 %v11779_v52, %v6680_v0  ;;  %v5959_v59 = vadd.f32 %v5854_v29, %v5681_v33  ;;  %v589_v38 = vshrl.u32 %v588_v40, 4  ;;  %v615_v6 = vadd.s32 %v613_v18, %v611_v12  ;;  %v14285_v0 = vld [vmem:[%s14854_s8 + $0x8c] sm:$0xff]  }
 0x330   : > { %v626_v5 = vand.u32 65535, %v16181_v44  ;;  %v627_v2 = vshrl.u32 %v16181_v44, 16  ;;  %v6294_v10 = vsel %vm3070_vm3, %v6289_v57, %v16187_v39  ;;  %v5389_v52 = vrot.slane %v5387_v35, 3 }
 0x331   : > { %v6776_v20 = vpack.c.bf16 %v6728_v26, %v6728_v26  ;;  %v6581_v62 = vadd.f32 %v16151_v13, %v5959_v59  ;;  %v590_v36 = vmul.u32 24, %v589_v38  ;;  %v616_v55 = vadd.s32 %v615_v6, %v605_v17 }
 0x332   : > { %v14677_v4 = vld [vmem:[#allocation2 + $0x2c] sm:$0xff]   ;;  %v629_v33 = vmul.u32 43691, %v626_v5  ;;  %12174 = vmatmul.msk.bf16.gmra.mxu2 %vm2234_vm1, %v16159_v34  ;;  %v630_v25 = vmul.u32 43690, %v626_v5  ;;  %v16198_v22 = vmul.u32 43691, %v627_v2  ;;  %v632_v13 = vmul.u32 43690, %v627_v2 }
 0x333   : > { %6824 = vst.msk [vmem:[#allocation2 + $0x34] sm:$0xf] %vm2051_vm5, %v6776_v20  ;;  %v6633_v61 = vadd.f32 %v15907_v42, %v6581_v62  ;;  %v591_v11 = vsub.s32 %v16122_v16, %v590_v36  ;;  %12336 = vmatmul.msk.bf16.gmra.mxu1 %vm2234_vm1, %v14677_v4  ;;  %v617_v9 = vadd.s32 %v616_v55, %v607_v37  ;;  %v5390_v51 = vshll.u32 %v13706_v1, 16 }
 0x334   : > { %v6481_v41 = vpop.f32.mrf.mxu0  ;;  %v633_v27 = vshll.u32 %v630_v25, 16  ;;  %v634_v17 = vshrl.u32 %v630_v25, 16  ;;  %v635_v43 = vshll.u32 %v16198_v22, 16  ;;  %v636_v50 = vshrl.u32 %v16198_v22, 16 }
 0x335   : > { %v6681_v7 = vmax.f32 %v6633_v61, 0.0  ;;  %vm1677_vm14 = vcmp.ne.s32.totalorder %v591_v11, 0  ;;  %vm1725_vm15 = vcmp.lt.s32.totalorder %v591_v11, 0  ;;  %v1821_v34 = vadd.s32 24, %v591_v11  ;;  %v5581_v31 = vpop.f32.mrf.mxu2 }
 0x336   : > { %v618_v56 = vshrl.u32 %v617_v9, 4  ;;  %v5856_v14 = vpop.f32.mrf.mxu3  ;;  %vm1773_vm4 = vmand %vm1725_vm15, %vm1677_vm14  ;;  %v5683_v37 = vadd.f32 %v5581_v31, %v15351_v8  ;;  %vm637_vm6 = vc.u32 %v629_v33, %v633_v27  ;;  %v639_v63 = vadd.s32 %v633_v27, %v629_v33  ;;  %v13707_v31 = vld [vmem:[%s14854_s8 + $0xa0] sm:$0xff]  }
 0x337   : > { %v5960_v16 = vadd.f32 %v5856_v14, %v5682_v3  ;;  %12320 = vmatmul.msk.bf16.gmra.mxu0 %vm2234_vm1, %v6294_v10  ;;  %v1869_v48 = vsel %vm1773_vm4, %v1821_v34, %v591_v11  ;;  %v638_v29 = vsel %vm637_vm6, 1, %v18880_v46  ;;  %v5392_v1 = vrot.slane %v5390_v51, 4 }
 0x338   : > { %v619_v40 = vmul.u32 24, %v618_v56  ;;  %vm1917_vm7 = vcmp.lt.s32.totalorder %v1869_v48, 16  ;;  %v640_v57 = vadd.s32 %v638_v29, %v632_v13  ;;  %vm641_vm8 = vc.u32 %v639_v63, %v635_v43 }
 0x339   : > { %v6582_v12 = vadd.f32 %v16175_v30, %v5960_v16  ;;  %v11780_v26 = vsel %vm1917_vm7, 1.0, %v18888_v60  ;;  %v16212_v8 = vadd.s32 104, %v15630_v15  ;;  %v642_v38 = vsel %vm641_vm8, 1, %v18880_v46 }
 0x33a   : > { %v620_v59 = vsub.s32 %v16128_v45, %v619_v40  ;;  %v6729_v3 = vmul.f32 %v11780_v26, %v6681_v7  ;;  %v16217_v6 = vor.u32 %v5392_v1, %v5389_v52  ;;  %v644_v5 = vadd.s32 %v642_v38, %v640_v57 }
 0x33b   : > { %v6634_v18 = vadd.f32 %v15907_v42, %v6582_v12  ;;  %12199 = vmatmul.msk.bf16.gmra.mxu3 %vm2234_vm1, %v14285_v0  ;;  %v655_v2 = vand.u32 65535, %v16212_v8  ;;  %v656_v10 = vshrl.u32 %v16212_v8, 16  ;;  %v6295_v33 = vshrl.u32 %v16169_v28, 16 }
 0x33c   : > { %vm1678_vm9 = vcmp.ne.s32.totalorder %v620_v59, 0  ;;  %vm1726_vm10 = vcmp.lt.s32.totalorder %v620_v59, 0  ;;  %v1822_v30 = vadd.s32 24, %v620_v59  ;;  %v6777_v20 = vpack.c.bf16 %v6729_v3, %v6729_v3  ;;  %v6483_v61 = vpop.f32.mrf.mxu0 }
 0x33d   : > { %vm1774_vm11 = vmand %vm1726_vm10, %vm1678_vm9  ;;  %v6682_v45 = vmax.f32 %v6634_v18, 0.0  ;;  %v5394_v62 = vsel %vm2467_vm2, %v16143_v19, %v16217_v6  ;;  %v645_v36 = vadd.s32 %v644_v5, %v634_v17  ;;  %v5583_v55 = vpop.f32.mrf.mxu2  ;;  %v658_v13 = vmul.u32 43691, %v655_v2  ;;  %v16228_v19 = vld [vmem:[%s14854_s8 + $0x9c] sm:$0xff]  ;;  %v14287_v5 = vld [vmem:[%s14854_s8 + $0x94] sm:$0xff]  }
 0x33e   : > { %v1870_v35 = vsel %vm1774_vm11, %v1822_v30, %v620_v59  ;;  %v5859_v4 = vpop.f32.mrf.mxu3  ;;  %6825 = vst.msk [vmem:[#allocation2 + $0x38] sm:$0xf] %vm2051_vm5, %v6777_v20  ;;  %v5684_v22 = vadd.f32 %v5583_v55, %v15361_v49  ;;  %v659_v52 = vmul.u32 43690, %v655_v2  ;;  %v660_v51 = vmul.u32 43691, %v656_v10 }
 0x33f   : > { %vm1918_vm12 = vcmp.lt.s32.totalorder %v1870_v35, 16  ;;  %v5961_v25 = vadd.f32 %v5859_v4, %v5683_v37  ;;  %v646_v9 = vadd.s32 %v645_v36, %v636_v50  ;;  %v661_v17 = vmul.u32 43690, %v656_v10 }
 0x340   : > { %v11781_v11 = vsel %vm1918_vm12, 1.0, %v18888_v60  ;;  %v6297_v28 = vor.u32 %v6295_v33, %v16187_v39  ;;  %v662_v34 = vshll.u32 %v659_v52, 16  ;;  %v663_v56 = vshrl.u32 %v659_v52, 16  ;;  %v16256_v33 = vld [vmem:[%s18819_s2] ss:$0 sm:$0xff] }
 0x341   : > { %v6730_v7 = vmul.f32 %v11781_v11, %v6682_v45  ;;  %v6583_v27 = vadd.f32 %v6481_v41, %v5961_v25  ;;  %v647_v43 = vshrl.u32 %v646_v9, 4  ;;  %v664_v14 = vshll.u32 %v660_v51, 16 }
 0x342   : > { %12175 = vmatmul.msk.bf16.gmra.mxu2 %vm2234_vm1, %v5394_v62  ;;  %v665_v37 = vshrl.u32 %v660_v51, 16  ;;  %v6299_v0 = vshll.u32 %v16228_v19, 16  ;;  %vm666_vm13 = vc.u32 %v658_v13, %v662_v34  ;;  %v668_v48 = vadd.s32 %v662_v34, %v658_v13 }
 0x343   : > { %v6778_v16 = vpack.c.bf16 %v6730_v7, %v6730_v7  ;;  %v6635_v49 = vadd.f32 %v15907_v42, %v6583_v27  ;;  %v648_v50 = vmul.u32 24, %v647_v43  ;;  %v16237_v41 = vadd.s32 112, %v15630_v15 }
 0x344   : > { %v667_v40 = vsel %vm666_vm13, 1, %v18880_v46  ;;  %v16241_v29 = vrot.slane %v6299_v0, 1  ;;  %v5396_v42 = vshrl.u32 %v13707_v31, 16  ;;  %vm670_vm14 = vc.u32 %v668_v48, %v664_v14  ;;  %v6486_v45 = vpop.f32.mrf.mxu0 }
 0x345   : > { %6826 = vst.msk [vmem:[#allocation2 + $0x3c] sm:$0xf] %vm2051_vm5, %v6778_v16  ;;  %v6683_v39 = vmax.f32 %v6635_v49, 0.0  ;;  %v649_v63 = vsub.s32 %v16181_v44, %v648_v50  ;;  %v14679_v12 = vld [vmem:[#allocation2 + $0x34] sm:$0xff]   ;;  %v669_v57 = vadd.s32 %v667_v40, %v661_v17  ;;  %v5586_v26 = vpop.f32.mrf.mxu2  ;;  %v684_v59 = vand.u32 65535, %v16237_v41 }
 0x346   : > { %v5861_v1 = vpop.f32.mrf.mxu3  ;;  %v671_v3 = vsel %vm670_vm14, 1, %v18880_v46  ;;  %v6302_v38 = vsel %vm3070_vm3, %v6297_v28, %v16241_v29  ;;  %v5685_v30 = vadd.f32 %v5586_v26, %v15368_v54  ;;  %12337 = vmatmul.msk.bf16.gmra.mxu1 %vm2234_vm1, %v14679_v12  ;;  %v685_v2 = vshrl.u32 %v16237_v41, 16 }
 0x347   : > { %v5962_v18 = vadd.f32 %v5861_v1, %v5684_v22  ;;  %vm1679_vm15 = vcmp.ne.s32.totalorder %v649_v63, 0  ;;  %vm1727_vm4 = vcmp.lt.s32.totalorder %v649_v63, 0  ;;  %v1823_v20 = vadd.s32 24, %v649_v63  ;;  %12321 = vmatmul.msk.bf16.gmra.mxu0 %vm2234_vm1, %v6302_v38 }
 0x348   : > { %v673_v44 = vadd.s32 %v671_v3, %v669_v57  ;;  %vm1775_vm6 = vmand %vm1727_vm4, %vm1679_vm15  ;;  %v687_v35 = vmul.u32 43691, %v684_v59  ;;  %v688_v36 = vmul.u32 43690, %v684_v59  ;;  %v5398_v10 = vrot.slane %v5396_v42, 3 }
 0x349   : > { %v6584_v62 = vadd.f32 %v6483_v61, %v5962_v18  ;;  %v1871_v4 = vsel %vm1775_vm6, %v1823_v20, %v649_v63  ;;  %v5399_v54 = vshll.u32 %v13707_v31, 16  ;;  %v689_v61 = vmul.u32 43691, %v685_v2  ;;  %v16265_v31 = vld [vmem:[%s14854_s8 + $0xa4] sm:$0xff] }
 0x34a   : > { %v674_v55 = vadd.s32 %v673_v44, %v663_v56  ;;  %vm1919_vm7 = vcmp.lt.s32.totalorder %v1871_v4, 16  ;;  %v690_v22 = vmul.u32 43690, %v685_v2  ;;  %v691_v9 = vshll.u32 %v688_v36, 16 }
 0x34b   : > { %v16259_v25 = vadd.f32 %v16256_v33, %v6584_v62  ;;  %12200 = vmatmul.msk.bf16.gmra.mxu3 %vm2234_vm1, %v14287_v5  ;;  %v11782_v13 = vsel %vm1919_vm7, 1.0, %v18888_v60  ;;  %v692_v52 = vshrl.u32 %v688_v36, 16  ;;  %v693_v27 = vshll.u32 %v689_v61, 16 }
 0x34c   : > { %v675_v11 = vadd.s32 %v674_v55, %v665_v37  ;;  %v6731_v51 = vmul.f32 %v11782_v13, %v6683_v39  ;;  %v694_v17 = vshrl.u32 %v689_v61, 16  ;;  %vm695_vm8 = vc.u32 %v687_v35, %v691_v9  ;;  %v6488_v59 = vpop.f32.mrf.mxu0 }
 0x34d   : > { %v6684_v7 = vmax.f32 %v16259_v25, 0.0  ;;  %v697_v43 = vadd.s32 %v691_v9, %v687_v35  ;;  %v5588_v56 = vpop.f32.mrf.mxu2  ;;  %v5401_v14 = vrot.slane %v5399_v54, 4  ;;  %v696_v49 = vsel %vm695_vm8, 1, %v18880_v46  ;;  %v14289_v54 = vld [vmem:[%s14854_s8 + $0x9c] sm:$0xff]  }
 0x34e   : > { %v676_v28 = vshrl.u32 %v675_v11, 4  ;;  %v5864_v34 = vpop.f32.mrf.mxu3  ;;  %v6779_v16 = vpack.c.bf16 %v6731_v51, %v6731_v51  ;;  %v5686_v37 = vadd.f32 %v5588_v56, %v15378_v58  ;;  %v698_v48 = vadd.s32 %v696_v49, %v690_v22 }
 0x34f   : > { %v5963_v0 = vadd.f32 %v5864_v34, %v5685_v30  ;;  %vm699_vm9 = vc.u32 %v697_v43, %v693_v27  ;;  %v16269_v39 = vor.u32 %v5401_v14, %v5398_v10  ;;  %v16274_v63 = vadd.s32 120, %v15630_v15  ;;  %v13708_v27 = vld [vmem:[%s14854_s8 + $0xa8] sm:$0xff]  }
 0x350   : > { %v677_v50 = vmul.u32 24, %v676_v28  ;;  %6827 = vst.msk [vmem:[#allocation2 + $0x40] sm:$0xf] %vm2051_vm5, %v6779_v16  ;;  %v700_v40 = vsel %vm699_vm9, 1, %v18880_v46  ;;  %v6303_v12 = vshrl.u32 %v16228_v19, 16  ;;  %v6307_v26 = vshll.u32 %v16265_v31, 16 }
 0x351   : > { %v6585_v42 = vadd.f32 %v6486_v45, %v5963_v0  ;;  %v702_v1 = vadd.s32 %v700_v40, %v698_v48  ;;  %v5403_v58 = vsel %vm2467_vm2, %v16217_v6, %v16269_v39  ;;  %v713_v18 = vand.u32 65535, %v16274_v63 }
 0x352   : > { %v678_v57 = vsub.s32 %v16212_v8, %v677_v50  ;;  %12176 = vmatmul.msk.bf16.gmra.mxu2 %vm2234_vm1, %v5403_v58  ;;  %v714_v38 = vshrl.u32 %v16274_v63, 16  ;;  %v6305_v19 = vor.u32 %v6303_v12, %v16241_v29  ;;  %v16290_v36 = vrot.slane %v6307_v26, 1 }
 0x353   : > { %v16283_v3 = vadd.f32 %v16256_v33, %v6585_v42  ;;  %v703_v30 = vadd.s32 %v702_v1, %v692_v52  ;;  %v716_v5 = vmul.u32 43691, %v713_v18  ;;  %v717_v20 = vmul.u32 43690, %v713_v18 }
 0x354   : > { %vm1680_vm10 = vcmp.ne.s32.totalorder %v678_v57, 0  ;;  %vm1728_vm11 = vcmp.lt.s32.totalorder %v678_v57, 0  ;;  %v1824_v8 = vadd.s32 24, %v678_v57  ;;  %v718_v44 = vmul.u32 43691, %v714_v38  ;;  %v6491_v50 = vpop.f32.mrf.mxu0 }
 0x355   : > { %vm1776_vm12 = vmand %vm1728_vm11, %vm1680_vm10  ;;  %v6685_v6 = vmax.f32 %v16283_v3, 0.0  ;;  %v704_v62 = vadd.s32 %v703_v30, %v694_v17  ;;  %v719_v2 = vmul.u32 43690, %v714_v38  ;;  %v5591_v4 = vpop.f32.mrf.mxu2  ;;  %v720_v29 = vshll.u32 %v717_v20, 16 }
 0x356   : > { %v1872_v45 = vsel %vm1776_vm12, %v1824_v8, %v678_v57  ;;  %v5866_v35 = vpop.f32.mrf.mxu3  ;;  %v721_v55 = vshrl.u32 %v717_v20, 16  ;;  %v722_v10 = vshll.u32 %v718_v44, 16  ;;  %v723_v13 = vshrl.u32 %v718_v44, 16 }
 0x357   : > { %vm1920_vm13 = vcmp.lt.s32.totalorder %v1872_v45, 16  ;;  %v705_v61 = vshrl.u32 %v704_v62, 4  ;;  %v14681_v22 = vld [vmem:[#allocation2 + $0x3c] sm:$0xff]   ;;  %v5964_v11 = vadd.f32 %v5866_v35, %v5686_v37  ;;  %vm724_vm14 = vc.u32 %v716_v5, %v720_v29 }
 0x358   : > { %v11783_v25 = vsel %vm1920_vm13, 1.0, %v18888_v60  ;;  %v726_v52 = vadd.s32 %v720_v29, %v716_v5  ;;  %v6310_v51 = vsel %vm3070_vm3, %v6305_v19, %v16290_v36  ;;  %12338 = vmatmul.msk.bf16.gmra.mxu1 %vm2234_vm1, %v14681_v22  ;;  %v725_v28 = vsel %vm724_vm14, 1, %v18880_v46 }
 0x359   : > { %v6732_v9 = vmul.f32 %v11783_v25, %v6684_v7  ;;  %v706_v17 = vmul.u32 24, %v705_v61  ;;  %v6586_v43 = vadd.f32 %v6488_v59, %v5964_v11  ;;  %12322 = vmatmul.msk.bf16.gmra.mxu0 %vm2234_vm1, %v6310_v51  ;;  %v5687_v34 = vadd.f32 %v5591_v4, %v15385_v21  ;;  %v16323_v61 = vld [vmem:[%s14854_s8 + $0xac] sm:$0xff] }
 0x35a   : > { %v727_v14 = vadd.s32 %v725_v28, %v719_v2  ;;  %vm728_vm15 = vc.u32 %v726_v52, %v722_v10  ;;  %v16303_v7 = vadd.s32 128, %v15630_v15  ;;  %v5405_v37 = vshrl.u32 %v13708_v27, 16 }
 0x35b   : > { %v6780_v56 = vpack.c.bf16 %v6732_v9, %v6732_v9  ;;  %12201 = vmatmul.msk.bf16.gmra.mxu3 %vm2234_vm1, %v14289_v54  ;;  %v707_v16 = vsub.s32 %v16237_v41, %v706_v17  ;;  %v729_v49 = vsel %vm728_vm15, 1, %v18880_v46  ;;  %v16308_v0 = vadd.f32 %v16256_v33, %v6586_v43 }
 0x35c   : > { %v731_v21 = vadd.s32 %v729_v49, %v727_v14  ;;  %v742_v48 = vand.u32 65535, %v16303_v7  ;;  %v743_v40 = vshrl.u32 %v16303_v7, 16  ;;  %v5408_v42 = vshll.u32 %v13708_v27, 16  ;;  %v6493_v14 = vpop.f32.mrf.mxu0 }
 0x35d   : > { %6828 = vst.msk [vmem:[#allocation2 + $0x44] sm:$0xf] %vm2051_vm5, %v6780_v56  ;;  %vm1681_vm4 = vcmp.ne.s32.totalorder %v707_v16, 0  ;;  %vm1729_vm6 = vcmp.lt.s32.totalorder %v707_v16, 0  ;;  %v1825_v12 = vadd.s32 24, %v707_v16  ;;  %v6686_v41 = vmax.f32 %v16308_v0, 0.0  ;;  %v5593_v1 = vpop.f32.mrf.mxu2 }
 0x35e   : > { %v5869_v57 = vpop.f32.mrf.mxu3  ;;  %vm1777_vm7 = vmand %vm1729_vm6, %vm1681_vm4  ;;  %v732_v58 = vadd.s32 %v731_v21, %v721_v55  ;;  %v745_v26 = vmul.u32 43691, %v742_v48  ;;  %v746_v59 = vmul.u32 43690, %v742_v48  ;;  %v747_v18 = vmul.u32 43691, %v743_v40  ;;  %v14291_v56 = vld [vmem:[%s14854_s8 + $0xa4] sm:$0xff]  }
 0x35f   : > { %v1873_v38 = vsel %vm1777_vm7, %v1825_v12, %v707_v16  ;;  %v748_v19 = vmul.u32 43690, %v743_v40  ;;  %v5965_v8 = vadd.f32 %v5869_v57, %v5687_v34  ;;  %v5688_v30 = vadd.f32 %v5593_v1, %v15395_v47 }
 0x360   : > { %vm1921_vm8 = vcmp.lt.s32.totalorder %v1873_v38, 16  ;;  %v733_v5 = vadd.s32 %v732_v58, %v723_v13  ;;  %v749_v20 = vshll.u32 %v746_v59, 16  ;;  %v750_v44 = vshrl.u32 %v746_v59, 16 }
 0x361   : > { %v11784_v45 = vsel %vm1921_vm8, 1.0, %v18888_v60  ;;  %v751_v62 = vshll.u32 %v747_v18, 16  ;;  %v752_v2 = vshrl.u32 %v747_v18, 16  ;;  %v6587_v35 = vadd.f32 %v6491_v50, %v5965_v8 }
 0x362   : > { %v6733_v4 = vmul.f32 %v11784_v45, %v6685_v6  ;;  %v734_v29 = vshrl.u32 %v733_v5, 4  ;;  %vm753_vm9 = vc.u32 %v745_v26, %v749_v20  ;;  %v755_v55 = vadd.s32 %v749_v20, %v745_v26 }
 0x363   : > { %v754_v10 = vsel %vm753_vm9, 1, %v18880_v46  ;;  %v16320_v47 = vadd.f32 %v16256_v33, %v6587_v35  ;;  %v5407_v54 = vrot.slane %v5405_v37, 3  ;;  %v5410_v25 = vrot.slane %v5408_v42, 4 }
 0x364   : > { %v6781_v22 = vpack.c.bf16 %v6733_v4, %v6733_v4  ;;  %v735_v13 = vmul.u32 24, %v734_v29  ;;  %v756_v11 = vadd.s32 %v754_v10, %v748_v19  ;;  %vm757_vm10 = vc.u32 %v755_v55, %v751_v62  ;;  %v13709_v29 = vld [vmem:[%s14854_s8 + $0xb0] sm:$0xff]  }
 0x365   : > { %v758_v3 = vsel %vm757_vm10, 1, %v18880_v46  ;;  %v6687_v6 = vmax.f32 %v16320_v47, 0.0  ;;  %v16327_v9 = vor.u32 %v5410_v25, %v5407_v54  ;;  %v16330_v52 = vadd.s32 136, %v15630_v15  ;;  %v5596_v27 = vpop.f32.mrf.mxu2 }
 0x366   : > { %v5871_v51 = vpop.f32.mrf.mxu3  ;;  %6829 = vst.msk [vmem:[#allocation2 + $0x48] sm:$0xf] %vm2051_vm5, %v6781_v22  ;;  %v736_v17 = vsub.s32 %v16274_v63, %v735_v13  ;;  %v760_v28 = vadd.s32 %v758_v3, %v756_v11  ;;  %v6311_v34 = vshrl.u32 %v16265_v31, 16  ;;  %v6315_v50 = vshll.u32 %v16323_v61, 16  ;;  %v16366_v22 = vpop.f32.mrf.mxu1 }
 0x367   : > { %v5966_v43 = vadd.f32 %v5871_v51, %v5688_v30  ;;  %v5412_v16 = vsel %vm2467_vm2, %v16269_v39, %v16327_v9  ;;  %v771_v49 = vand.u32 65535, %v16330_v52  ;;  %v772_v37 = vshrl.u32 %v16330_v52, 16  ;;  %v6496_v13 = vpop.f32.mrf.mxu0 }
 0x368   : > { %vm1682_vm11 = vcmp.ne.s32.totalorder %v736_v17, 0  ;;  %vm1730_vm12 = vcmp.lt.s32.totalorder %v736_v17, 0  ;;  %v1826_v21 = vadd.s32 24, %v736_v17  ;;  %v761_v63 = vadd.s32 %v760_v28, %v750_v44  ;;  %12177 = vmatmul.msk.bf16.gmra.mxu2 %vm2234_vm1, %v5412_v16 }
 0x369   : > { %vm1778_vm13 = vmand %vm1730_vm12, %vm1682_vm11  ;;  %v774_v31 = vmul.u32 43691, %v771_v49  ;;  %v775_v48 = vmul.u32 43690, %v771_v49  ;;  %v776_v40 = vmul.u32 43691, %v772_v37  ;;  %v777_v42 = vmul.u32 43690, %v772_v37 }
 0x36a   : > { %v1874_v12 = vsel %vm1778_vm13, %v1826_v21, %v736_v17  ;;  %v762_v57 = vadd.s32 %v761_v63, %v752_v2  ;;  %v6588_v39 = vadd.f32 %v6493_v14, %v5966_v43  ;;  %v6313_v1 = vor.u32 %v6311_v34, %v16290_v36 }
 0x36b   : > { %12202 = vmatmul.msk.bf16.gmra.mxu3 %vm2234_vm1, %v14291_v56  ;;  %vm1922_vm14 = vcmp.lt.s32.totalorder %v1874_v12, 16  ;;  %v778_v58 = vshll.u32 %v775_v48, 16  ;;  %v779_v26 = vshrl.u32 %v775_v48, 16  ;;  %v780_v59 = vshll.u32 %v776_v40, 16 }
 0x36c   : > { %v11785_v18 = vsel %vm1922_vm14, 1.0, %v18888_v60  ;;  %v763_v38 = vshrl.u32 %v762_v57, 4  ;;  %v781_v19 = vshrl.u32 %v776_v40, 16  ;;  %v16347_v8 = vadd.f32 %v16256_v33, %v6588_v39 }
 0x36d   : > { %v6734_v30 = vmul.f32 %v11785_v18, %v6686_v41  ;;  %v14683_v5 = vld [vmem:[#allocation2 + $0x44] sm:$0xff]   ;;  %vm782_vm15 = vc.u32 %v774_v31, %v778_v58  ;;  %v784_v36 = vadd.s32 %v778_v58, %v774_v31  ;;  %v16351_v20 = vrot.slane %v6315_v50, 1  ;;  %v5598_v4 = vpop.f32.mrf.mxu2 }
 0x36e   : > { %v5874_v44 = vpop.f32.mrf.mxu3  ;;  %v764_v45 = vmul.u32 24, %v763_v38  ;;  %v783_v62 = vsel %vm782_vm15, 1, %v18880_v46  ;;  %v6688_v2 = vmax.f32 %v16347_v8, 0.0  ;;  %v5689_v35 = vadd.f32 %v5596_v27, %v15402_v32  ;;  %12339 = vmatmul.msk.bf16.gmra.mxu1 %vm2234_vm1, %v14683_v5  ;;  %v16383_v38 = vld [vmem:[%s14854_s8 + $0xb4] sm:$0xff] }
 0x36f   : > { %v6782_v55 = vpack.c.bf16 %v6734_v30, %v6734_v30  ;;  %v785_v0 = vadd.s32 %v783_v62, %v777_v42  ;;  %vm786_vm4 = vc.u32 %v784_v36, %v780_v59  ;;  %v6318_v41 = vsel %vm3070_vm3, %v6313_v1, %v16351_v20  ;;  %v14293_v42 = vld [vmem:[%s14854_s8 + $0xac] sm:$0xff]   ;;  %v16385_v30 = vpop.f32.mrf.mxu1  ;;  %v13710_v8 = vld [vmem:[%s14854_s8 + $0xb8] sm:$0xff]  }
 0x370   : > { %v765_v10 = vsub.s32 %v16303_v7, %v764_v45  ;;  %v787_v54 = vsel %vm786_vm4, 1, %v18880_v46  ;;  %12323 = vmatmul.msk.bf16.gmra.mxu0 %vm2234_vm1, %v6318_v41  ;;  %v16364_v25 = vadd.s32 144, %v15630_v15  ;;  %v5967_v32 = vadd.f32 %v5874_v44, %v5689_v35 }
 0x371   : > { %6830 = vst.msk [vmem:[#allocation2 + $0x4c] sm:$0xf] %vm2051_vm5, %v6782_v55  ;;  %v789_v11 = vadd.s32 %v787_v54, %v785_v0  ;;  %v5690_v3 = vadd.f32 %v5598_v4, %v15412_v24  ;;  %v5414_v51 = vshrl.u32 %v13709_v29, 16  ;;  %v5417_v27 = vshll.u32 %v13709_v29, 16  ;;  %v6498_v4 = vpop.f32.mrf.mxu0 }
 0x372   : > { %vm1683_vm6 = vcmp.ne.s32.totalorder %v765_v10, 0  ;;  %vm1731_vm7 = vcmp.lt.s32.totalorder %v765_v10, 0  ;;  %v1827_v7 = vadd.s32 24, %v765_v10  ;;  %v800_v17 = vand.u32 65535, %v16364_v25 }
 0x373   : > { %vm1779_vm8 = vmand %vm1731_vm7, %vm1683_vm6  ;;  %v790_v28 = vadd.s32 %v789_v11, %v779_v26  ;;  %v801_v43 = vshrl.u32 %v16364_v25, 16  ;;  %v6589_v34 = vadd.f32 %v6496_v13, %v5967_v32  ;;  %v5416_v56 = vrot.slane %v5414_v51, 3 }
 0x374   : > { %v1875_v14 = vsel %vm1779_vm8, %v1827_v7, %v765_v10  ;;  %v803_v16 = vmul.u32 43691, %v800_v17  ;;  %v804_v49 = vmul.u32 43690, %v800_v17  ;;  %v5419_v37 = vrot.slane %v5417_v27, 4 }
 0x375   : > { %vm1923_vm9 = vcmp.lt.s32.totalorder %v1875_v14, 16  ;;  %v791_v24 = vadd.s32 %v790_v28, %v781_v19  ;;  %v805_v50 = vmul.u32 43691, %v801_v43  ;;  %v806_v21 = vmul.u32 43690, %v801_v43  ;;  %v5601_v19 = vpop.f32.mrf.mxu2 }
 0x376   : > { %v11786_v63 = vsel %vm1923_vm9, 1.0, %v18888_v60  ;;  %v807_v31 = vshll.u32 %v804_v49, 16  ;;  %v808_v48 = vshrl.u32 %v804_v49, 16  ;;  %v16374_v40 = vadd.f32 %v16256_v33, %v6589_v34  ;;  %v5876_v58 = vpop.f32.mrf.mxu3 }
 0x377   : > { %v6735_v12 = vmul.f32 %v11786_v63, %v6687_v6  ;;  %v792_v57 = vshrl.u32 %v791_v24, 4  ;;  %v809_v39 = vshll.u32 %v805_v50, 16  ;;  %v810_v1 = vshrl.u32 %v805_v50, 16 }
 0x378   : > { %vm811_vm10 = vc.u32 %v803_v16, %v807_v31  ;;  %v813_v26 = vadd.s32 %v807_v31, %v803_v16  ;;  %v6689_v59 = vmax.f32 %v16374_v40, 0.0  ;;  %v16380_v18 = vor.u32 %v5419_v37, %v5416_v56  ;;  %v16413_v31 = vpop.f32.mrf.mxu1 }
 0x379   : > { %v6783_v5 = vpack.c.bf16 %v6735_v12, %v6735_v12  ;;  %v793_v36 = vmul.u32 24, %v792_v57  ;;  %v812_v47 = vsel %vm811_vm10, 1, %v18880_v46  ;;  %v16389_v6 = vadd.s32 152, %v15630_v15 }
 0x37a   : > { %v814_v44 = vadd.s32 %v812_v47, %v806_v21  ;;  %vm815_vm11 = vc.u32 %v813_v26, %v809_v39  ;;  %v5421_v45 = vsel %vm2467_vm2, %v16327_v9, %v16380_v18  ;;  %v5968_v62 = vadd.f32 %v5876_v58, %v5690_v3 }
 0x37b   : > { %12203 = vmatmul.msk.bf16.gmra.mxu3 %vm2234_vm1, %v14293_v42  ;;  %6831 = vst.msk [vmem:[#allocation2 + $0x50] sm:$0xf] %vm2051_vm5, %v6783_v5  ;;  %v794_v35 = vsub.s32 %v16330_v52, %v793_v36  ;;  %v816_v29 = vsel %vm815_vm11, 1, %v18880_v46  ;;  %12178 = vmatmul.msk.bf16.gmra.mxu2 %vm2234_vm1, %v5421_v45  ;;  %v829_v55 = vand.u32 65535, %v16389_v6  ;;  %v830_v0 = vshrl.u32 %v16389_v6, 16  ;;  %v6501_v36 = vpop.f32.mrf.mxu0 }
 0x37c   : > { %v818_v41 = vadd.s32 %v816_v29, %v814_v44  ;;  %v6590_v10 = vadd.f32 %v6498_v4, %v5968_v62  ;;  %v6319_v9 = vshrl.u32 %v16323_v61, 16  ;;  %v6323_v54 = vshll.u32 %v16383_v38, 16  ;;  %v18891_v44 = vld [vmem:[#allocation16_spill] sm:$0xff] }
 0x37d   : > { %vm1684_vm12 = vcmp.ne.s32.totalorder %v794_v35, 0  ;;  %vm1732_vm13 = vcmp.lt.s32.totalorder %v794_v35, 0  ;;  %v1828_v32 = vadd.s32 24, %v794_v35  ;;  %v832_v13 = vmul.u32 43691, %v829_v55  ;;  %v5603_v63 = vpop.f32.mrf.mxu2 }
 0x37e   : > { %vm1780_vm14 = vmand %vm1732_vm13, %vm1684_vm12  ;;  %v819_v52 = vadd.s32 %v818_v41, %v808_v48  ;;  %v833_v11 = vmul.u32 43690, %v829_v55  ;;  %v834_v3 = vmul.u32 43691, %v830_v0  ;;  %v835_v51 = vmul.u32 43690, %v830_v0  ;;  %v5879_v21 = vpop.f32.mrf.mxu3 }
 0x37f   : > { %v1876_v27 = vsel %vm1780_vm14, %v1828_v32, %v794_v35  ;;  %v16404_v7 = vadd.f32 %v16256_v33, %v6590_v10  ;;  %v6321_v17 = vor.u32 %v6319_v9, %v16351_v20  ;;  %v16407_v28 = vrot.slane %v6323_v54, 1  ;;  %v14295_v35 = vld [vmem:[%s14854_s8 + $0xb4] sm:$0xff]  }
 0x380   : > { %vm1924_vm15 = vcmp.lt.s32.totalorder %v1876_v27, 16  ;;  %v820_v61 = vadd.s32 %v819_v52, %v810_v1  ;;  %v836_v43 = vshll.u32 %v833_v11, 16  ;;  %v837_v34 = vshrl.u32 %v833_v11, 16 }
 0x381   : > { %v11787_v56 = vsel %vm1924_vm15, 1.0, %v18888_v60  ;;  %v838_v14 = vshll.u32 %v834_v3, 16  ;;  %v839_v16 = vshrl.u32 %v834_v3, 16  ;;  %v6690_v49 = vmax.f32 %v16404_v7, 0.0 }
 0x382   : > { %v6736_v37 = vmul.f32 %v11787_v56, %v6688_v2  ;;  %v821_v24 = vshrl.u32 %v820_v61, 4  ;;  %v14685_v50 = vld [vmem:[#allocation2 + $0x4c] sm:$0xff]   ;;  %vm840_vm4 = vc.u32 %v832_v13, %v836_v43  ;;  %v842_v20 = vadd.s32 %v836_v43, %v832_v13 }
 0x383   : > { %v841_v48 = vsel %vm840_vm4, 1, %v18880_v46  ;;  %v6326_v42 = vsel %vm3070_vm3, %v6321_v17, %v16407_v28  ;;  %v5691_v12 = vadd.f32 %v5601_v19, %v15419_v53  ;;  %v16420_v57 = vadd.s32 160, %v15630_v15  ;;  %12340 = vmatmul.msk.bf16.gmra.mxu1 %vm2234_vm1, %v14685_v50 }
 0x384   : > { %v6784_v2 = vpack.c.bf16 %v6736_v37, %v6736_v37  ;;  %v822_v39 = vmul.u32 24, %v821_v24  ;;  %v843_v1 = vadd.s32 %v841_v48, %v835_v51  ;;  %vm844_vm6 = vc.u32 %v842_v20, %v838_v14  ;;  %12324 = vmatmul.msk.bf16.gmra.mxu0 %vm2234_vm1, %v6326_v42  ;;  %v16433_v51 = vpop.f32.mrf.mxu1  ;;  %v16443_v20 = vld [vmem:[%s14854_s8 + $0xbc] sm:$0xff] }
 0x385   : > { %v845_v58 = vsel %vm844_vm6, 1, %v18880_v46  ;;  %v858_v26 = vand.u32 65535, %v16420_v57  ;;  %v859_v5 = vshrl.u32 %v16420_v57, 16  ;;  %v5969_v53 = vadd.f32 %v5879_v21, %v5691_v12 }
 0x386   : > { %6832 = vst.msk [vmem:[#allocation2 + $0x54] sm:$0xf] %vm2051_vm5, %v6784_v2  ;;  %v823_v19 = vsub.s32 %v16364_v25, %v822_v39  ;;  %v847_v47 = vadd.s32 %v845_v58, %v843_v1  ;;  %v5692_v45 = vadd.f32 %v5603_v63, %v18891_v44  ;;  %v5423_v62 = vshrl.u32 %v13710_v8, 16  ;;  %v5881_v14 = vpop.f32.mrf.mxu3 }
 0x387   : > { %v861_v4 = vmul.u32 43691, %v858_v26  ;;  %v862_v29 = vmul.u32 43690, %v858_v26  ;;  %v863_v55 = vmul.u32 43691, %v859_v5  ;;  %v864_v0 = vmul.u32 43690, %v859_v5 }
 0x388   : > { %vm1685_vm7 = vcmp.ne.s32.totalorder %v823_v19, 0  ;;  %vm1733_vm8 = vcmp.lt.s32.totalorder %v823_v19, 0  ;;  %v1829_v41 = vadd.s32 24, %v823_v19  ;;  %v848_v10 = vadd.s32 %v847_v47, %v837_v34 }
 0x389   : > { %vm1781_vm9 = vmand %vm1733_vm8, %vm1685_vm7  ;;  %v865_v9 = vshll.u32 %v862_v29, 16  ;;  %v866_v54 = vshrl.u32 %v862_v29, 16  ;;  %v867_v32 = vshll.u32 %v863_v55, 16  ;;  %v868_v13 = vshrl.u32 %v863_v55, 16 }
 0x38a   : > { %v1877_v25 = vsel %vm1781_vm9, %v1829_v41, %v823_v19  ;;  %v849_v52 = vadd.s32 %v848_v10, %v839_v16  ;;  %v6591_v11 = vadd.f32 %v6501_v36, %v5969_v53  ;;  %v5425_v3 = vrot.slane %v5423_v62, 3  ;;  %v5606_v16 = vpop.f32.mrf.mxu2 }
 0x38b   : > { %12204 = vmatmul.msk.bf16.gmra.mxu3 %vm2234_vm1, %v14295_v35  ;;  %vm1925_vm10 = vcmp.lt.s32.totalorder %v1877_v25, 16  ;;  %vm869_vm11 = vc.u32 %v861_v4, %v865_v9  ;;  %v871_v27 = vadd.s32 %v865_v9, %v861_v4  ;;  %v5426_v17 = vshll.u32 %v13710_v8, 16 }
 0x38c   : > { %v11788_v61 = vsel %vm1925_vm10, 1.0, %v18888_v60  ;;  %v850_v43 = vshrl.u32 %v849_v52, 4  ;;  %v870_v34 = vsel %vm869_vm11, 1, %v18880_v46  ;;  %v16438_v56 = vadd.f32 %v16256_v33, %v6591_v11  ;;  %v16469_v9 = vpop.f32.mrf.mxu1 }
 0x38d   : > { %v6737_v37 = vmul.f32 %v11788_v61, %v6689_v59  ;;  %v872_v24 = vadd.s32 %v870_v34, %v864_v0  ;;  %vm873_vm12 = vc.u32 %v871_v27, %v867_v32  ;;  %v5428_v50 = vrot.slane %v5426_v17, 4  ;;  %v6503_v59 = vpop.f32.mrf.mxu0  ;;  %18892 = vst [vmem:[#allocation16_spill] sm:$0xff] %v16469_v9 }
 0x38e   : > { %v851_v21 = vmul.u32 24, %v850_v43  ;;  %v874_v63 = vsel %vm873_vm12, 1, %v18880_v46  ;;  %v6691_v48 = vmax.f32 %v16438_v56, 0.0  ;;  %v16448_v42 = vadd.s32 168, %v15630_v15  ;;  %v18893_v43 = vld [vmem:[#allocation17_spill] sm:$0xff] }
 0x38f   : > { %v6785_v12 = vpack.c.bf16 %v6737_v37, %v6737_v37  ;;  %v876_v8 = vadd.s32 %v874_v63, %v872_v24  ;;  %v16450_v2 = vor.u32 %v5428_v50, %v5425_v3  ;;  %v5970_v39 = vadd.f32 %v5881_v14, %v5692_v45  ;;  %v5884_v3 = vpop.f32.mrf.mxu3 }
 0x390   : > { %v852_v40 = vsub.s32 %v16389_v6, %v851_v21  ;;  %v887_v1 = vand.u32 65535, %v16448_v42  ;;  %v888_v58 = vshrl.u32 %v16448_v42, 16  ;;  %v6327_v26 = vshrl.u32 %v16383_v38, 16 }
 0x391   : > { %6833 = vst.msk [vmem:[#allocation2 + $0x58] sm:$0xf] %vm2051_vm5, %v6785_v12  ;;  %v877_v5 = vadd.s32 %v876_v8, %v866_v54  ;;  %v5430_v53 = vsel %vm2467_vm2, %v16380_v18, %v16450_v2  ;;  %v6592_v19 = vadd.f32 %v6503_v59, %v5970_v39  ;;  %v6331_v36 = vshll.u32 %v16443_v20, 16  ;;  %v14297_v8 = vld [vmem:[%s14854_s8 + $0xbc] sm:$0xff]  }
 0x392   : > { %vm1686_vm13 = vcmp.ne.s32.totalorder %v852_v40, 0  ;;  %vm1734_vm14 = vcmp.lt.s32.totalorder %v852_v40, 0  ;;  %v1830_v6 = vadd.s32 24, %v852_v40  ;;  %12179 = vmatmul.msk.bf16.gmra.mxu2 %vm2234_vm1, %v5430_v53  ;;  %v890_v47 = vmul.u32 43691, %v887_v1  ;;  %v5608_v25 = vpop.f32.mrf.mxu2  ;;  %v18894_v53 = vld [vmem:[#allocation18_spill] sm:$0xff] }
 0x393   : > { %vm1782_vm15 = vmand %vm1734_vm14, %vm1686_vm13  ;;  %v878_v44 = vadd.s32 %v877_v5, %v868_v13  ;;  %v891_v45 = vmul.u32 43690, %v887_v1  ;;  %v892_v38 = vmul.u32 43691, %v888_v58  ;;  %v893_v62 = vmul.u32 43690, %v888_v58 }
 0x394   : > { %v1878_v35 = vsel %vm1782_vm15, %v1830_v6, %v852_v40  ;;  %v16463_v4 = vadd.f32 %v16256_v33, %v6592_v19  ;;  %v6329_v18 = vor.u32 %v6327_v26, %v16407_v28  ;;  %v16466_v29 = vrot.slane %v6331_v36, 1  ;;  %v13711_v36 = vld [vmem:[%s14854_s8 + $0xc0] sm:$0xff]  }
 0x395   : > { %vm1926_vm4 = vcmp.lt.s32.totalorder %v1878_v35, 16  ;;  %v879_v55 = vshrl.u32 %v878_v44, 4  ;;  %v894_v0 = vshll.u32 %v891_v45, 16  ;;  %v895_v41 = vshrl.u32 %v891_v45, 16 }
 0x396   : > { %v11789_v10 = vsel %vm1926_vm4, 1.0, %v18888_v60  ;;  %v896_v54 = vshll.u32 %v892_v38, 16  ;;  %v897_v32 = vshrl.u32 %v892_v38, 16  ;;  %v6692_v13 = vmax.f32 %v16463_v4, 0.0 }
 0x397   : > { %v6738_v52 = vmul.f32 %v11789_v10, %v6690_v49  ;;  %v880_v11 = vmul.u32 24, %v879_v55  ;;  %vm898_vm6 = vc.u32 %v890_v47, %v894_v0  ;;  %v900_v28 = vadd.s32 %v894_v0, %v890_v47  ;;  %v16498_v55 = vpop.f32.mrf.mxu1  ;;  %v16501_v10 = vld [vmem:[%s14854_s8 + $0xc4] sm:$0xff] }
 0x398   : > { %v14687_v27 = vld [vmem:[#allocation2 + $0x54] sm:$0xff]   ;;  %v899_v17 = vsel %vm898_vm6, 1, %v18880_v46  ;;  %v6334_v61 = vsel %vm3070_vm3, %v6329_v18, %v16466_v29  ;;  %v5693_v34 = vadd.f32 %v5606_v16, %v18893_v43  ;;  %v16479_v14 = vadd.s32 176, %v15630_v15 }
 0x399   : > { %v6786_v37 = vpack.c.bf16 %v6738_v52, %v6738_v52  ;;  %v881_v7 = vsub.s32 %v16420_v57, %v880_v11  ;;  %v901_v49 = vadd.s32 %v899_v17, %v893_v62  ;;  %vm902_vm7 = vc.u32 %v900_v28, %v896_v54  ;;  %12325 = vmatmul.msk.bf16.gmra.mxu0 %vm2234_vm1, %v6334_v61  ;;  %v6506_v57 = vpop.f32.mrf.mxu0  ;;  %v5886_v28 = vpop.f32.mrf.mxu3 }
 0x39a   : > { %12341 = vmatmul.msk.bf16.gmra.mxu1 %vm2234_vm1, %v14687_v27  ;;  %v903_v24 = vsel %vm902_vm7, 1, %v18880_v46  ;;  %v916_v50 = vand.u32 65535, %v16479_v14  ;;  %v917_v21 = vshrl.u32 %v16479_v14, 16  ;;  %v5971_v16 = vadd.f32 %v5884_v3, %v5693_v34  ;;  %v5611_v54 = vpop.f32.mrf.mxu2 }
 0x39b   : > { %6834 = vst.msk [vmem:[#allocation2 + $0x5c] sm:$0xf] %vm2051_vm5, %v6786_v37  ;;  %vm1687_vm8 = vcmp.ne.s32.totalorder %v881_v7, 0  ;;  %vm1735_vm9 = vcmp.lt.s32.totalorder %v881_v7, 0  ;;  %v1831_v63 = vadd.s32 24, %v881_v7  ;;  %v905_v12 = vadd.s32 %v903_v24, %v901_v49  ;;  %12205 = vmatmul.msk.bf16.gmra.mxu3 %vm2234_vm1, %v14297_v8 }
 0x39c   : > { %vm1783_vm10 = vmand %vm1735_vm9, %vm1687_vm8  ;;  %v919_v39 = vmul.u32 43691, %v916_v50  ;;  %v920_v40 = vmul.u32 43690, %v916_v50  ;;  %v921_v59 = vmul.u32 43691, %v917_v21  ;;  %v922_v1 = vmul.u32 43690, %v917_v21 }
 0x39d   : > { %v1879_v58 = vsel %vm1783_vm10, %v1831_v63, %v881_v7  ;;  %v906_v26 = vadd.s32 %v905_v12, %v895_v41  ;;  %v6593_v5 = vadd.f32 %v6506_v57, %v5971_v16  ;;  %v5694_v19 = vadd.f32 %v5608_v25, %v18894_v53 }
 0x39e   : > { %vm1927_vm11 = vcmp.lt.s32.totalorder %v1879_v58, 16  ;;  %v923_v6 = vshll.u32 %v920_v40, 16  ;;  %v924_v47 = vshrl.u32 %v920_v40, 16  ;;  %v925_v44 = vshll.u32 %v921_v59, 16 }
 0x39f   : > { %v11790_v45 = vsel %vm1927_vm11, 1.0, %v18888_v60  ;;  %v907_v38 = vadd.s32 %v906_v26, %v897_v32  ;;  %v926_v62 = vshrl.u32 %v921_v59, 16  ;;  %v16494_v35 = vadd.f32 %v16256_v33, %v6593_v5 }
 0x3a0   : > { %v6739_v18 = vmul.f32 %v11790_v45, %v6691_v48  ;;  %vm927_vm12 = vc.u32 %v919_v39, %v923_v6  ;;  %v929_v0 = vadd.s32 %v923_v6, %v919_v39  ;;  %v5432_v41 = vshrl.u32 %v13711_v36, 16 }
 0x3a1   : > { %v908_v25 = vshrl.u32 %v907_v38, 4  ;;  %v928_v52 = vsel %vm927_vm12, 1, %v18880_v46  ;;  %v6693_v32 = vmax.f32 %v16494_v35, 0.0  ;;  %v5435_v11 = vshll.u32 %v13711_v36, 16  ;;  %v6508_v50 = vpop.f32.mrf.mxu0 }
 0x3a2   : > { %v6787_v3 = vpack.c.bf16 %v6739_v18, %v6739_v18  ;;  %v930_v27 = vadd.s32 %v928_v52, %v922_v1  ;;  %vm931_vm13 = vc.u32 %v929_v0, %v925_v44  ;;  %v5434_v56 = vrot.slane %v5432_v41, 3  ;;  %v5889_v18 = vpop.f32.mrf.mxu3 }
 0x3a3   : > { %v909_v48 = vmul.u32 24, %v908_v25  ;;  %v932_v17 = vsel %vm931_vm13, 1, %v18880_v46  ;;  %v5437_v61 = vrot.slane %v5435_v11, 4  ;;  %v16507_v43 = vadd.s32 184, %v15630_v15  ;;  %v18896_v11 = vld [vmem:[#allocation19_spill] sm:$0xff] }
 0x3a4   : > { %6835 = vst.msk [vmem:[#allocation2 + $0x60] sm:$0xf] %vm2051_vm5, %v6787_v3  ;;  %v934_v34 = vadd.s32 %v932_v17, %v930_v27  ;;  %v5972_v37 = vadd.f32 %v5886_v28, %v5694_v19  ;;  %v6335_v7 = vshrl.u32 %v16443_v20, 16  ;;  %v6339_v49 = vshll.u32 %v16501_v10, 16  ;;  %v16529_v19 = vpop.f32.mrf.mxu1  ;;  %v18897_v27 = vld [vmem:[#allocation7_spill] sm:$0xff] }
 0x3a5   : > { %v910_v24 = vsub.s32 %v16448_v42, %v909_v48  ;;  %v16513_v21 = vor.u32 %v5437_v61, %v5434_v56  ;;  %v945_v16 = vand.u32 65535, %v16507_v43  ;;  %v946_v63 = vshrl.u32 %v16507_v43, 16  ;;  %18895 = vst [vmem:[#allocation17_spill] sm:$0xff] %v16529_v19 }
 0x3a6   : > { %v935_v57 = vadd.s32 %v934_v34, %v924_v47  ;;  %v6594_v12 = vadd.f32 %v6508_v50, %v5972_v37  ;;  %v6337_v8 = vor.u32 %v6335_v7, %v16466_v29  ;;  %v16518_v39 = vrot.slane %v6339_v49, 1  ;;  %v5613_v47 = vpop.f32.mrf.mxu2 }
 0x3a7   : > { %vm1688_vm14 = vcmp.ne.s32.totalorder %v910_v24, 0  ;;  %vm1736_vm15 = vcmp.lt.s32.totalorder %v910_v24, 0  ;;  %v1832_v20 = vadd.s32 24, %v910_v24  ;;  %v5439_v42 = vsel %vm2467_vm2, %v16450_v2, %v16513_v21 }
 0x3a8   : > { %vm1784_vm4 = vmand %vm1736_vm15, %vm1688_vm14  ;;  %v936_v40 = vadd.s32 %v935_v57, %v926_v62  ;;  %12180 = vmatmul.msk.bf16.gmra.mxu2 %vm2234_vm1, %v5439_v42  ;;  %v948_v59 = vmul.u32 43691, %v945_v16  ;;  %v949_v1 = vmul.u32 43690, %v945_v16  ;;  %v950_v58 = vmul.u32 43691, %v946_v63 }
 0x3a9   : > { %v1880_v26 = vsel %vm1784_vm4, %v1832_v20, %v910_v24  ;;  %v951_v5 = vmul.u32 43690, %v946_v63  ;;  %v16525_v29 = vadd.f32 %v16256_v33, %v6594_v12  ;;  %v6342_v53 = vsel %vm3070_vm3, %v6337_v8, %v16518_v39  ;;  %v6511_v61 = vpop.f32.mrf.mxu0 }
 0x3aa   : > { %vm1928_vm6 = vcmp.lt.s32.totalorder %v1880_v26, 16  ;;  %v937_v36 = vshrl.u32 %v936_v40, 4  ;;  %v952_v2 = vshll.u32 %v949_v1, 16  ;;  %v953_v6 = vshrl.u32 %v949_v1, 16  ;;  %12326 = vmatmul.msk.bf16.gmra.mxu0 %vm2234_vm1, %v6342_v53 }
 0x3ab   : > { %v11791_v44 = vsel %vm1928_vm6, 1.0, %v18888_v60  ;;  %v14689_v45 = vld [vmem:[#allocation2 + $0x5c] sm:$0xff]   ;;  %v954_v38 = vshll.u32 %v950_v58, 16  ;;  %v955_v62 = vshrl.u32 %v950_v58, 16  ;;  %v6694_v33 = vmax.f32 %v16525_v29, 0.0 }
 0x3ac   : > { %v6740_v0 = vmul.f32 %v11791_v44, %v6692_v13  ;;  %v938_v41 = vmul.u32 24, %v937_v36  ;;  %vm956_vm7 = vc.u32 %v948_v59, %v952_v2  ;;  %v958_v25 = vadd.s32 %v952_v2, %v948_v59  ;;  %12342 = vmatmul.msk.bf16.gmra.mxu1 %vm2234_vm1, %v14689_v45  ;;  %v14299_v13 = vld [vmem:[%s14854_s8 + $0xc4] sm:$0xff]   ;;  %v16552_v26 = vpop.f32.mrf.mxu1  ;;  %v16557_v36 = vld [vmem:[%s18819_s2] ss:$0 sm:$0xff]  ;;  %v5891_v45 = vpop.f32.mrf.mxu3 }
 0x3ad   : > { %v957_v52 = vsel %vm956_vm7, 1, %v18880_v46  ;;  %v5695_v28 = vadd.f32 %v5611_v54, %v18896_v11  ;;  %v16540_v3 = vadd.s32 192, %v15630_v15  ;;  %v5696_v56 = vadd.f32 %v5613_v47, %v18897_v27  ;;  %v13712_v54 = vld [vmem:[%s14854_s8 + $0xc8] sm:$0xff]   ;;  %12206 = vmatmul.msk.bf16.gmra.mxu3 %vm2234_vm1, %v14299_v13 }
 0x3ae   : > { %v6788_v48 = vpack.c.bf16 %v6740_v0, %v6740_v0  ;;  %v939_v17 = vsub.s32 %v16479_v14, %v938_v41  ;;  %v959_v4 = vadd.s32 %v957_v52, %v951_v5  ;;  %vm960_vm8 = vc.u32 %v958_v25, %v954_v38  ;;  %v16567_v41 = vld [vmem:[%s14854_s8 + $0xcc] sm:$0xff]  ;;  %v5616_v25 = vpop.f32.mrf.mxu2 }
 0x3af   : > { %v961_v34 = vsel %vm960_vm8, 1, %v18880_v46  ;;  %v974_v37 = vand.u32 65535, %v16540_v3  ;;  %v975_v7 = vshrl.u32 %v16540_v3, 16  ;;  %v5973_v49 = vadd.f32 %v5889_v18, %v5695_v28 }
 0x3b0   : > { %6836 = vst.msk [vmem:[#allocation2 + $0x64] sm:$0xf] %vm2051_vm5, %v6788_v48  ;;  %vm1689_vm9 = vcmp.ne.s32.totalorder %v939_v17, 0  ;;  %vm1737_vm10 = vcmp.lt.s32.totalorder %v939_v17, 0  ;;  %v1833_v24 = vadd.s32 24, %v939_v17  ;;  %v963_v50 = vadd.s32 %v961_v34, %v959_v4 }
 0x3b1   : > { %vm1785_vm11 = vmand %vm1737_vm10, %vm1689_vm9  ;;  %v977_v14 = vmul.u32 43691, %v974_v37  ;;  %v978_v16 = vmul.u32 43690, %v974_v37  ;;  %v979_v63 = vmul.u32 43691, %v975_v7  ;;  %v980_v57 = vmul.u32 43690, %v975_v7 }
 0x3b2   : > { %v1881_v12 = vsel %vm1785_vm11, %v1833_v24, %v939_v17  ;;  %v964_v8 = vadd.s32 %v963_v50, %v953_v6  ;;  %v6595_v20 = vadd.f32 %v6511_v61, %v5973_v49  ;;  %v5441_v42 = vshrl.u32 %v13712_v54, 16  ;;  %v6513_v17 = vpop.f32.mrf.mxu0 }
 0x3b3   : > { %vm1929_vm12 = vcmp.lt.s32.totalorder %v1881_v12, 16  ;;  %v981_v40 = vshll.u32 %v978_v16, 16  ;;  %v982_v59 = vshrl.u32 %v978_v16, 16  ;;  %v983_v1 = vshll.u32 %v979_v63, 16 }
 0x3b4   : > { %v11792_v58 = vsel %vm1929_vm12, 1.0, %v18888_v60  ;;  %v965_v5 = vadd.s32 %v964_v8, %v955_v62  ;;  %v984_v53 = vshrl.u32 %v979_v63, 16  ;;  %v16560_v2 = vadd.f32 %v16557_v36, %v6595_v20  ;;  %v16585_v20 = vpop.f32.mrf.mxu1 }
 0x3b5   : > { %v6741_v6 = vmul.f32 %v11792_v58, %v6693_v32  ;;  %vm985_vm13 = vc.u32 %v977_v14, %v981_v40  ;;  %v987_v47 = vadd.s32 %v981_v40, %v977_v14  ;;  %v5443_v44 = vrot.slane %v5441_v42, 3  ;;  %18898 = vst [vmem:[#allocation18_spill] sm:$0xff] %v16585_v20 }
 0x3b6   : > { %v966_v38 = vshrl.u32 %v965_v5, 4  ;;  %v986_v18 = vsel %vm985_vm13, 1, %v18880_v46  ;;  %v6695_v62 = vmax.f32 %v16560_v2, 0.0  ;;  %v5444_v0 = vshll.u32 %v13712_v54, 16 }
 0x3b7   : > { %v6789_v52 = vpack.c.bf16 %v6741_v6, %v6741_v6  ;;  %v988_v11 = vadd.s32 %v986_v18, %v980_v57  ;;  %vm989_vm14 = vc.u32 %v987_v47, %v983_v1  ;;  %v16570_v28 = vadd.s32 200, %v15630_v15 }
 0x3b8   : > { %v967_v35 = vmul.u32 24, %v966_v38  ;;  %v990_v32 = vsel %vm989_vm14, 1, %v18880_v46  ;;  %v5446_v27 = vrot.slane %v5444_v0, 4  ;;  %v5974_v48 = vadd.f32 %v5891_v45, %v5696_v56  ;;  %v5618_v45 = vpop.f32.mrf.mxu2 }
 0x3b9   : > { %6837 = vst.msk [vmem:[#allocation2 + $0x68] sm:$0xf] %vm2051_vm5, %v6789_v52  ;;  %v992_v4 = vadd.s32 %v990_v32, %v988_v11  ;;  %v1003_v13 = vand.u32 65535, %v16570_v28  ;;  %v1004_v61 = vshrl.u32 %v16570_v28, 16  ;;  %v6343_v34 = vshrl.u32 %v16501_v10, 16 }
 0x3ba   : > { %v968_v37 = vsub.s32 %v16507_v43, %v967_v35  ;;  %v16578_v7 = vor.u32 %v5446_v27, %v5443_v44  ;;  %v6596_v49 = vadd.f32 %v6513_v17, %v5974_v48  ;;  %v6347_v54 = vshll.u32 %v16567_v41, 16  ;;  %v5894_v44 = vpop.f32.mrf.mxu3  ;;  %v18899_v35 = vld [vmem:[#allocation20_spill] sm:$0xff] }
 0x3bb   : > { %v993_v24 = vadd.s32 %v992_v4, %v982_v59  ;;  %v1006_v50 = vmul.u32 43691, %v1003_v13  ;;  %v1007_v56 = vmul.u32 43690, %v1003_v13  ;;  %v1008_v14 = vmul.u32 43691, %v1004_v61  ;;  %v14300_v4 = vld [vmem:[%s14854_s8 + $0xcc] sm:$0xff]  }
 0x3bc   : > { %vm1690_vm15 = vcmp.ne.s32.totalorder %v968_v37, 0  ;;  %vm1738_vm4 = vcmp.lt.s32.totalorder %v968_v37, 0  ;;  %v1834_v16 = vadd.s32 24, %v968_v37  ;;  %v5448_v63 = vsel %vm2467_vm2, %v16513_v21, %v16578_v7 }
 0x3bd   : > { %vm1786_vm6 = vmand %vm1738_vm4, %vm1690_vm15  ;;  %v994_v10 = vadd.s32 %v993_v24, %v984_v53  ;;  %12181 = vmatmul.msk.bf16.gmra.mxu2 %vm2234_vm1, %v5448_v63  ;;  %v1009_v43 = vmul.u32 43690, %v1004_v61  ;;  %v1010_v57 = vshll.u32 %v1007_v56, 16  ;;  %v1011_v12 = vshrl.u32 %v1007_v56, 16  ;;  %12207 = vmatmul.msk.bf16.gmra.mxu3 %vm2234_vm1, %v14300_v4 }
 0x3be   : > { %v1882_v8 = vsel %vm1786_vm6, %v1834_v16, %v968_v37  ;;  %v1012_v42 = vshll.u32 %v1008_v14, 16  ;;  %v1013_v40 = vshrl.u32 %v1008_v14, 16  ;;  %v16588_v59 = vadd.f32 %v16557_v36, %v6596_v49  ;;  %v16612_v49 = vld [vmem:[%s14854_s8 + $0xd0] sm:$0xff]  }
 0x3bf   : > { %vm1930_vm7 = vcmp.lt.s32.totalorder %v1882_v8, 16  ;;  %v995_v1 = vshrl.u32 %v994_v10, 4  ;;  %vm1014_vm8 = vc.u32 %v1006_v50, %v1010_v57  ;;  %v1016_v58 = vadd.s32 %v1010_v57, %v1006_v50  ;;  %v16618_v57 = vpop.f32.mrf.mxu1 }
 0x3c0   : > { %v11793_v21 = vsel %vm1930_vm7, 1.0, %v18888_v60  ;;  %v14691_v5 = vld [vmem:[#allocation2 + $0x64] sm:$0xff]   ;;  %v1015_v53 = vsel %vm1014_vm8, 1, %v18880_v46  ;;  %v6696_v6 = vmax.f32 %v16588_v59, 0.0  ;;  %v6345_v47 = vor.u32 %v6343_v34, %v16518_v39 }
 0x3c1   : > { %v6742_v38 = vmul.f32 %v11793_v21, %v6694_v33  ;;  %v996_v18 = vmul.u32 24, %v995_v1  ;;  %v1017_v0 = vadd.s32 %v1015_v53, %v1009_v43  ;;  %vm1018_vm9 = vc.u32 %v1016_v58, %v1012_v42  ;;  %12343 = vmatmul.msk.bf16.gmra.mxu1 %vm2234_vm1, %v14691_v5  ;;  %v18900_v33 = vld [vmem:[#allocation8_spill] sm:$0xff] }
 0x3c2   : > { %v1019_v52 = vsel %vm1018_vm9, 1, %v18880_v46  ;;  %v16598_v11 = vrot.slane %v6347_v54, 1  ;;  %v5697_v32 = vadd.f32 %v5616_v25, %v18899_v35  ;;  %v16602_v39 = vadd.s32 208, %v15630_v15  ;;  %v6516_v54 = vpop.f32.mrf.mxu0 }
 0x3c3   : > { %v6790_v27 = vpack.c.bf16 %v6742_v38, %v6742_v38  ;;  %v997_v48 = vsub.s32 %v16540_v3, %v996_v18  ;;  %v1021_v29 = vadd.s32 %v1019_v52, %v1017_v0  ;;  %v5698_v17 = vadd.f32 %v5618_v45, %v18900_v33  ;;  %v5621_v52 = vpop.f32.mrf.mxu2 }
 0x3c4   : > { %v6350_v13 = vsel %vm3070_vm3, %v6345_v47, %v16598_v11  ;;  %v1032_v61 = vand.u32 65535, %v16602_v39  ;;  %v1033_v34 = vshrl.u32 %v16602_v39, 16  ;;  %v5975_v37 = vadd.f32 %v5894_v44, %v5697_v32  ;;  %v5896_v44 = vpop.f32.mrf.mxu3 }
 0x3c5   : > { %6838 = vst.msk [vmem:[#allocation2 + $0x6c] sm:$0xf] %vm2051_vm5, %v6790_v27  ;;  %vm1691_vm10 = vcmp.ne.s32.totalorder %v997_v48, 0  ;;  %vm1739_vm11 = vcmp.lt.s32.totalorder %v997_v48, 0  ;;  %v1835_v25 = vadd.s32 24, %v997_v48  ;;  %v1022_v3 = vadd.s32 %v1021_v29, %v1011_v12  ;;  %12327 = vmatmul.msk.bf16.gmra.mxu0 %vm2234_vm1, %v6350_v13 }
 0x3c6   : > { %vm1787_vm12 = vmand %vm1739_vm11, %vm1691_vm10  ;;  %v1035_v24 = vmul.u32 43691, %v1032_v61  ;;  %v1036_v50 = vmul.u32 43690, %v1032_v61  ;;  %v1037_v56 = vmul.u32 43691, %v1033_v34  ;;  %v1038_v14 = vmul.u32 43690, %v1033_v34 }
 0x3c7   : > { %v1883_v16 = vsel %vm1787_vm12, %v1835_v25, %v997_v48  ;;  %v1023_v63 = vadd.s32 %v1022_v3, %v1013_v40  ;;  %v6597_v10 = vadd.f32 %v6516_v54, %v5975_v37  ;;  %v5450_v43 = vshrl.u32 %v16612_v49, 16 }
 0x3c8   : > { %vm1931_vm13 = vcmp.lt.s32.totalorder %v1883_v16, 16  ;;  %v1039_v8 = vshll.u32 %v1036_v50, 16  ;;  %v1040_v12 = vshrl.u32 %v1036_v50, 16  ;;  %v1041_v42 = vshll.u32 %v1037_v56, 16  ;;  %v16644_v16 = vld [vmem:[%s14854_s8 + $0xd4] sm:$0xff] }
 0x3c9   : > { %v11794_v1 = vsel %vm1931_vm13, 1.0, %v18888_v60  ;;  %v1024_v58 = vshrl.u32 %v1023_v63, 4  ;;  %v1042_v21 = vshrl.u32 %v1037_v56, 16  ;;  %v16622_v5 = vadd.f32 %v16557_v36, %v6597_v10 }
 0x3ca   : > { %v6743_v53 = vmul.f32 %v11794_v1, %v6695_v62  ;;  %vm1043_vm14 = vc.u32 %v1035_v24, %v1039_v8  ;;  %v1045_v40 = vadd.s32 %v1039_v8, %v1035_v24  ;;  %v5452_v47 = vrot.slane %v5450_v43, 3 }
 0x3cb   : > { %v1025_v45 = vmul.u32 24, %v1024_v58  ;;  %v1044_v38 = vsel %vm1043_vm14, 1, %v18880_v46  ;;  %v6697_v18 = vmax.f32 %v16622_v5, 0.0  ;;  %v5453_v0 = vshll.u32 %v16612_v49, 16 }
 0x3cc   : > { %v6791_v35 = vpack.c.bf16 %v6743_v53, %v6743_v53  ;;  %v1046_v32 = vadd.s32 %v1044_v38, %v1038_v14  ;;  %vm1047_vm15 = vc.u32 %v1045_v40, %v1041_v42  ;;  %v16630_v27 = vadd.s32 216, %v15630_v15  ;;  %v5623_v38 = vpop.f32.mrf.mxu2  ;;  %v5899_v59 = vpop.f32.mrf.mxu3 }
 0x3cd   : > { %v1026_v2 = vsub.s32 %v16570_v28, %v1025_v45  ;;  %v1048_v62 = vsel %vm1047_vm15, 1, %v18880_v46  ;;  %v5455_v48 = vrot.slane %v5453_v0, 4  ;;  %v5976_v29 = vadd.f32 %v5896_v44, %v5698_v17  ;;  %v6518_v28 = vpop.f32.mrf.mxu0  ;;  %v5117_v0 = vld [vmem:[%s14854_s8 + $0xd8] sm:$0xf] }
 0x3ce   : > { %6839 = vst.msk [vmem:[#allocation2 + $0x70] sm:$0xf] %vm2051_vm5, %v6791_v35  ;;  %v1050_v33 = vadd.s32 %v1048_v62, %v1046_v32  ;;  %v1061_v4 = vand.u32 65535, %v16630_v27  ;;  %v1062_v13 = vshrl.u32 %v16630_v27, 16  ;;  %v6351_v61 = vshrl.u32 %v16567_v41, 16  ;;  %v16646_v41 = vpop.f32.mrf.mxu1 }
 0x3cf   : > { %vm1692_vm4 = vcmp.ne.s32.totalorder %v1026_v2, 0  ;;  %vm1740_vm6 = vcmp.lt.s32.totalorder %v1026_v2, 0  ;;  %v1836_v34 = vadd.s32 24, %v1026_v2  ;;  %v16638_v37 = vor.u32 %v5455_v48, %v5452_v47  ;;  %18901 = vst [vmem:[#allocation19_spill] sm:$0xff] %v16646_v41  ;;  %v18902_v48 = vld [vmem:[#allocation21_spill] sm:$0xff] }
 0x3d0   : > { %vm1788_vm7 = vmand %vm1740_vm6, %vm1692_vm4  ;;  %v1051_v25 = vadd.s32 %v1050_v33, %v1040_v12  ;;  %v1064_v3 = vmul.u32 43691, %v1061_v4  ;;  %v1065_v17 = vmul.u32 43690, %v1061_v4  ;;  %v1066_v54 = vmul.u32 43691, %v1062_v13 }
 0x3d1   : > { %v1884_v24 = vsel %vm1788_vm7, %v1836_v34, %v1026_v2  ;;  %v5457_v50 = vsel %vm2467_vm2, %v16578_v7, %v16638_v37  ;;  %v1067_v56 = vmul.u32 43690, %v1062_v13  ;;  %v6598_v14 = vadd.f32 %v6518_v28, %v5976_v29  ;;  %v18903_v13 = vld [vmem:[#allocation9_spill] sm:$0xff] }
 0x3d2   : > { %vm1932_vm8 = vcmp.lt.s32.totalorder %v1884_v24, 16  ;;  %v1052_v63 = vadd.s32 %v1051_v25, %v1042_v21  ;;  %12182 = vmatmul.msk.bf16.gmra.mxu2 %vm2234_vm1, %v5457_v50  ;;  %v1068_v10 = vshll.u32 %v1065_v17, 16  ;;  %v1069_v43 = vshrl.u32 %v1065_v17, 16 }
 0x3d3   : > { %v11795_v8 = vsel %vm1932_vm8, 1.0, %v18888_v60  ;;  %v1070_v12 = vshll.u32 %v1066_v54, 16  ;;  %v1071_v42 = vshrl.u32 %v1066_v54, 16  ;;  %v16651_v1 = vadd.f32 %v16557_v36, %v6598_v14 }
 0x3d4   : > { %v6744_v7 = vmul.f32 %v11795_v8, %v6696_v6  ;;  %v1053_v58 = vshrl.u32 %v1052_v63, 4  ;;  %vm1072_vm9 = vc.u32 %v1064_v3, %v1068_v10  ;;  %v1074_v53 = vadd.s32 %v1068_v10, %v1064_v3 }
 0x3d5   : > { %v14693_v40 = vld [vmem:[#allocation2 + $0x6c] sm:$0xff]   ;;  %v1073_v21 = vsel %vm1072_vm9, 1, %v18880_v46  ;;  %v6698_v47 = vmax.f32 %v16651_v1, 0.0  ;;  %v6353_v44 = vor.u32 %v6351_v61, %v16598_v11  ;;  %v6355_v45 = vshll.u32 %v16644_v16, 16  ;;  %v6521_v54 = vpop.f32.mrf.mxu0 }
 0x3d6   : > { %v6792_v35 = vpack.c.bf16 %v6744_v7, %v6744_v7  ;;  %v1054_v32 = vmul.u32 24, %v1053_v58  ;;  %v1075_v2 = vadd.s32 %v1073_v21, %v1067_v56  ;;  %vm1076_vm10 = vc.u32 %v1074_v53, %v1070_v12  ;;  %12344 = vmatmul.msk.bf16.gmra.mxu1 %vm2234_vm1, %v14693_v40  ;;  %v16678_v10 = vpop.f32.mrf.mxu1 }
 0x3d7   : > { %v1077_v6 = vsel %vm1076_vm10, 1, %v18880_v46  ;;  %v16662_v62 = vrot.slane %v6355_v45, 1  ;;  %v5699_v29 = vadd.f32 %v5621_v52, %v18902_v48  ;;  %v16666_v33 = vadd.s32 224, %v15630_v15  ;;  %v6045_v48 = vld [vmem:[%s14854_s8 + $0xdc] sm:$0x1] }
 0x3d8   : > { %6840 = vst.msk [vmem:[#allocation2 + $0x74] sm:$0xf] %vm2051_vm5, %v6792_v35  ;;  %v1055_v11 = vsub.s32 %v16602_v39, %v1054_v32  ;;  %v1079_v4 = vadd.s32 %v1077_v6, %v1075_v2  ;;  %v5700_v61 = vadd.f32 %v5623_v38, %v18903_v13  ;;  %v16671_v34 = vunpack.c.l.b16 %v5117_v0  ;;  %v5901_v6 = vpop.f32.mrf.mxu3 }
 0x3d9   : > { %v6358_v28 = vsel %vm3070_vm3, %v6353_v44, %v16662_v62  ;;  %v1090_v25 = vand.u32 65535, %v16666_v33  ;;  %v1091_v3 = vshrl.u32 %v16666_v33, 16  ;;  %v5977_v52 = vadd.f32 %v5899_v59, %v5699_v29 }
 0x3da   : > { %vm1693_vm11 = vcmp.ne.s32.totalorder %v1055_v11, 0  ;;  %vm1741_vm12 = vcmp.lt.s32.totalorder %v1055_v11, 0  ;;  %v1837_v17 = vadd.s32 24, %v1055_v11  ;;  %v1080_v24 = vadd.s32 %v1079_v4, %v1069_v43  ;;  %12328 = vmatmul.msk.bf16.gmra.mxu0 %vm2234_vm1, %v6358_v28 }
 0x3db   : > { %vm1789_vm13 = vmand %vm1741_vm12, %vm1693_vm11  ;;  %v1093_v39 = vmul.u32 43691, %v1090_v25  ;;  %v1094_v50 = vmul.u32 43690, %v1090_v25  ;;  %v1095_v56 = vmul.u32 43691, %v1091_v3  ;;  %v1096_v14 = vmul.u32 43690, %v1091_v3 }
 0x3dc   : > { %v1885_v63 = vsel %vm1789_vm13, %v1837_v17, %v1055_v11  ;;  %v1081_v8 = vadd.s32 %v1080_v24, %v1071_v42  ;;  %v6599_v12 = vadd.f32 %v6521_v54, %v5977_v52  ;;  %v5242_v7 = vpack.c.b16 %v16671_v34, %v16671_v34  ;;  %v5626_v54 = vpop.f32.mrf.mxu2 }
 0x3dd   : > { %vm1933_vm14 = vcmp.lt.s32.totalorder %v1885_v63, 16  ;;  %v1097_v58 = vshll.u32 %v1094_v50, 16  ;;  %v1098_v53 = vshrl.u32 %v1094_v50, 16  ;;  %v1099_v43 = vshll.u32 %v1095_v56, 16 }
 0x3de   : > { %v11796_v40 = vsel %vm1933_vm14, 1.0, %v18888_v60  ;;  %v1082_v21 = vshrl.u32 %v1081_v8, 4  ;;  %v1100_v44 = vshrl.u32 %v1095_v56, 16  ;;  %v16684_v45 = vadd.f32 %v16557_v36, %v6599_v12  ;;  %v16700_v12 = vpop.f32.mrf.mxu1 }
 0x3df   : > { %v6745_v38 = vmul.f32 %v11796_v40, %v6697_v18  ;;  %vm1101_vm15 = vc.u32 %v1093_v39, %v1097_v58  ;;  %v1103_v42 = vadd.s32 %v1097_v58, %v1093_v39  ;;  %v5459_v0 = vshrl.u32 %v5242_v7, 16  ;;  %v6523_v39 = vpop.f32.mrf.mxu0  ;;  %18904 = vst [vmem:[#allocation7_spill] sm:$0xff] %v16700_v12 }
 0x3e0   : > { %v1083_v35 = vmul.u32 24, %v1082_v21  ;;  %v1102_v32 = vsel %vm1101_vm15, 1, %v18880_v46  ;;  %v6699_v2 = vmax.f32 %v16684_v45, 0.0  ;;  %v5462_v59 = vshll.u32 %v5242_v7, 16 }
 0x3e1   : > { %v6793_v29 = vpack.c.bf16 %v6745_v38, %v6745_v38  ;;  %v1104_v11 = vadd.s32 %v1102_v32, %v1096_v14  ;;  %vm1105_vm4 = vc.u32 %v1103_v42, %v1099_v43  ;;  %v5461_v4 = vrot.slane %v5459_v0, 3 }
 0x3e2   : > { %v1084_v13 = vsub.s32 %v16630_v27, %v1083_v35  ;;  %v1106_v5 = vsel %vm1105_vm4, 1, %v18880_v46  ;;  %v5464_v18 = vrot.slane %v5462_v59, 4  ;;  %v16694_v28 = vadd.s32 232, %v15630_v15 }
 0x3e3   : > { %6841 = vst.msk [vmem:[#allocation2 + $0x78] sm:$0xf] %vm2051_vm5, %v6793_v29  ;;  %v1108_v25 = vadd.s32 %v1106_v5, %v1104_v11  ;;  %v5978_v3 = vadd.f32 %v5901_v6, %v5700_v61  ;;  %v6145_v52 = vunpack.c.l.b16 %v6045_v48  ;;  %v6359_v17 = vshrl.u32 %v16644_v16, 16 }
 0x3e4   : > { %vm1694_vm6 = vcmp.ne.s32.totalorder %v1084_v13, 0  ;;  %vm1742_vm7 = vcmp.lt.s32.totalorder %v1084_v13, 0  ;;  %v1838_v24 = vadd.s32 24, %v1084_v13  ;;  %v5465_v50 = vor.u32 %v5464_v18, %v5461_v4 }
 0x3e5   : > { %vm1790_vm8 = vmand %vm1742_vm7, %vm1694_vm6  ;;  %v1109_v27 = vadd.s32 %v1108_v25, %v1098_v53  ;;  %v1119_v56 = vand.u32 65535, %v16694_v28  ;;  %v1120_v14 = vshrl.u32 %v16694_v28, 16  ;;  %v6600_v63 = vadd.f32 %v6523_v39, %v5978_v3 }
 0x3e6   : > { %v1886_v8 = vsel %vm1790_vm8, %v1838_v24, %v1084_v13  ;;  %v5466_v61 = vsel %vm2467_vm2, %v16638_v37, %v5465_v50  ;;  %v6170_v16 = vpack.c.b16 %v6145_v52, %v6145_v52  ;;  %v6361_v7 = vor.u32 %v6359_v17, %v16662_v62  ;;  %v5904_v13 = vpop.f32.mrf.mxu3  ;;  %v5628_v24 = vpop.f32.mrf.mxu2 }
 0x3e7   : > { %vm1934_vm9 = vcmp.lt.s32.totalorder %v1886_v8, 16  ;;  %v1110_v58 = vadd.s32 %v1109_v27, %v1100_v44  ;;  %12183 = vmatmul.msk.bf16.gmra.mxu2 %vm2234_vm1, %v5466_v61  ;;  %v1122_v43 = vmul.u32 43691, %v1119_v56  ;;  %v1123_v53 = vmul.u32 43690, %v1119_v56 }
 0x3e8   : > { %v11797_v40 = vsel %vm1934_vm9, 1.0, %v18888_v60  ;;  %v1124_v21 = vmul.u32 43691, %v1120_v14  ;;  %v1125_v38 = vmul.u32 43690, %v1120_v14  ;;  %v16708_v42 = vadd.f32 %v16557_v36, %v6600_v63  ;;  %v6526_v14 = vpop.f32.mrf.mxu0  ;;  %v16728_v63 = vpop.f32.mrf.mxu1 }
 0x3e9   : > { %v6746_v0 = vmul.f32 %v11797_v40, %v6698_v47  ;;  %v1111_v37 = vshrl.u32 %v1110_v58, 4  ;;  %v1126_v35 = vshll.u32 %v1123_v53, 16  ;;  %v1127_v32 = vshrl.u32 %v1123_v53, 16  ;;  %v18905_v47 = vld [vmem:[#allocation22_spill] sm:$0xff] }
 0x3ea   : > { %v14695_v62 = vld [vmem:[#allocation2 + $0x74] sm:$0xff]   ;;  %v1128_v59 = vshll.u32 %v1124_v21, 16  ;;  %v1129_v44 = vshrl.u32 %v1124_v21, 16  ;;  %v6700_v6 = vmax.f32 %v16708_v42, 0.0  ;;  %v6363_v48 = vshll.u32 %v6170_v16, 16  ;;  %v18906_v16 = vld [vmem:[#allocation10_spill] sm:$0xff] }
 0x3eb   : > { %v6794_v29 = vpack.c.bf16 %v6746_v0, %v6746_v0  ;;  %v1112_v11 = vmul.u32 24, %v1111_v37  ;;  %vm1130_vm10 = vc.u32 %v1122_v43, %v1126_v35  ;;  %v1132_v4 = vadd.s32 %v1126_v35, %v1122_v43  ;;  %12345 = vmatmul.msk.bf16.gmra.mxu1 %vm2234_vm1, %v14695_v62 }
 0x3ec   : > { %v1131_v5 = vsel %vm1130_vm10, 1, %v18880_v46  ;;  %v6365_v1 = vrot.slane %v6363_v48, 1  ;;  %v5701_v18 = vadd.f32 %v5626_v54, %v18905_v47  ;;  %v13267_v25 = vunpack.c.h.b16 %v16612_v49  ;;  %v16725_v54 = vld [vmem:[#allocation2] sm:$0x8] }
 0x3ed   : > { %6842 = vst.msk [vmem:[#allocation2 + $0x7c] sm:$0xf] %vm2051_vm5, %v6794_v29  ;;  %v1113_v3 = vsub.s32 %v16666_v33, %v1112_v11  ;;  %v1133_v52 = vadd.s32 %v1131_v5, %v1125_v38  ;;  %vm1134_vm11 = vc.u32 %v1132_v4, %v1128_v59  ;;  %v16720_v17 = vadd.s32 240, %v15630_v15 }
 0x3ee   : > { %v1135_v39 = vsel %vm1134_vm11, 1, %v18880_v46  ;;  %v6366_v50 = vsel %vm3070_vm3, %v6361_v7, %v6365_v1  ;;  %v5744_v27 = vpack.c.b16 %v16671_v34, %v13267_v25  ;;  %v5979_v56 = vadd.f32 %v5904_v13, %v5701_v18 }
 0x3ef   : > { %vm1695_vm12 = vcmp.ne.s32.totalorder %v1113_v3, 0  ;;  %vm1743_vm13 = vcmp.lt.s32.totalorder %v1113_v3, 0  ;;  %v1839_v49 = vadd.s32 24, %v1113_v3  ;;  %v1137_v33 = vadd.s32 %v1135_v39, %v1133_v52  ;;  %12329 = vmatmul.msk.bf16.gmra.mxu0 %vm2234_vm1, %v6366_v50 }
 0x3f0   : > { %vm1791_vm14 = vmand %vm1743_vm13, %vm1695_vm12  ;;  %12208 = vmatmul.msk.bf16.gmra.mxu3 %vm2234_vm1, %v5744_v27  ;;  %v1148_v8 = vand.u32 65535, %v16720_v17  ;;  %v1149_v61 = vshrl.u32 %v16720_v17, 16  ;;  %v6601_v34 = vadd.f32 %v6526_v14, %v5979_v56  ;;  %v5702_v7 = vadd.f32 %v5628_v24, %v18906_v16  ;;  %v16751_v14 = vpop.f32.mrf.mxu1 }
 0x3f1   : > { %v1887_v58 = vsel %vm1791_vm14, %v1839_v49, %v1113_v3  ;;  %v1138_v43 = vadd.s32 %v1137_v33, %v1127_v32  ;;  %v16735_v53 = vadd.s32 248, %v15630_v15  ;;  %v7240_v40 = vunpack.c.l.b16 %v16725_v54  ;;  %18907 = vst [vmem:[#allocation20_spill] sm:$0xff] %v16751_v14 }
 0x3f2   : > { %vm1935_vm15 = vcmp.lt.s32.totalorder %v1887_v58, 16  ;;  %v1151_v21 = vmul.u32 43691, %v1148_v8  ;;  %v1152_v38 = vmul.u32 43690, %v1148_v8  ;;  %v1153_v0 = vmul.u32 43691, %v1149_v61  ;;  %v6528_v58 = vpop.f32.mrf.mxu0 }
 0x3f3   : > { %v11798_v37 = vsel %vm1935_vm15, 1.0, %v18888_v60  ;;  %v1139_v35 = vadd.s32 %v1138_v43, %v1129_v44  ;;  %v1154_v62 = vmul.u32 43690, %v1149_v61  ;;  %v16740_v59 = vadd.f32 %v16557_v36, %v6601_v34 }
 0x3f4   : > { %v6747_v48 = vmul.f32 %v11798_v37, %v6699_v2  ;;  %v1155_v32 = vshll.u32 %v1152_v38, 16  ;;  %v1156_v29 = vshrl.u32 %v1152_v38, 16  ;;  %v1157_v11 = vshll.u32 %v1153_v0, 16  ;;  %v5906_v2 = vpop.f32.mrf.mxu3 }
 0x3f5   : > { %v1140_v4 = vshrl.u32 %v1139_v35, 4  ;;  %v1158_v13 = vshrl.u32 %v1153_v0, 16  ;;  %v6701_v5 = vmax.f32 %v16740_v59, 0.0  ;;  %v1177_v1 = vand.u32 65535, %v16735_v53  ;;  %v18908_v35 = vld [vmem:[#allocation29_spill] sm:$0xff] }
 0x3f6   : > { %v6795_v47 = vpack.c.bf16 %v6747_v48, %v6747_v48  ;;  %vm1159_vm4 = vc.u32 %v1151_v21, %v1155_v32  ;;  %v1161_v18 = vadd.s32 %v1155_v32, %v1151_v21  ;;  %v1178_v44 = vshrl.u32 %v16735_v53, 16  ;;  %v14774_v32 = vld [vmem:[#allocation2 + $0x8] sm:$0xff]  }
 0x3f7   : > { %v1141_v25 = vmul.u32 24, %v1140_v4  ;;  %v1160_v3 = vsel %vm1159_vm4, 1, %v18880_v46  ;;  %v1180_v52 = vmul.u32 43691, %v1177_v1  ;;  %v1181_v45 = vmul.u32 43690, %v1177_v1  ;;  %v14413_v1 = vld [vmem:[#allocation2 + $0xc] sm:$0x8] }
 0x3f8   : > { %6843 = vst.msk [vmem:[#allocation2 + $0x80] sm:$0xf] %vm2051_vm5, %v6795_v47  ;;  %v1162_v24 = vadd.s32 %v1160_v3, %v1154_v62  ;;  %vm1163_vm6 = vc.u32 %v1161_v18, %v1157_v11  ;;  %v1182_v39 = vmul.u32 43691, %v1178_v44  ;;  %v1183_v50 = vmul.u32 43690, %v1178_v44  ;;  %v14712_v47 = vld [vmem:[#allocation2 + $0xc] sm:$0xf0]  }
 0x3f9   : > { %v1142_v27 = vsub.s32 %v16694_v28, %v1141_v25  ;;  %v1164_v56 = vsel %vm1163_vm6, 1, %v18880_v46  ;;  %v1184_v54 = vshll.u32 %v1181_v45, 16  ;;  %v1185_v49 = vshrl.u32 %v1181_v45, 16 }
 0x3fa   : > { %v1166_v33 = vadd.s32 %v1164_v56, %v1162_v24  ;;  %v1186_v8 = vshll.u32 %v1182_v39, 16  ;;  %v1187_v61 = vshrl.u32 %v1182_v39, 16  ;;  %v5980_v34 = vadd.f32 %v5906_v2, %v5702_v7  ;;  %v5631_v56 = vpop.f32.mrf.mxu2 }
 0x3fb   : > { %vm1696_vm7 = vcmp.ne.s32.totalorder %v1142_v27, 0  ;;  %vm1744_vm8 = vcmp.lt.s32.totalorder %v1142_v27, 0  ;;  %v1840_v16 = vadd.s32 24, %v1142_v27  ;;  %vm1188_vm9 = vc.u32 %v1180_v52, %v1184_v54 }
 0x3fc   : > { %vm1792_vm10 = vmand %vm1744_vm8, %vm1696_vm7  ;;  %v1167_v43 = vadd.s32 %v1166_v33, %v1156_v29  ;;  %v1189_v21 = vsel %vm1188_vm9, 1, %v18880_v46  ;;  %v1190_v28 = vadd.s32 %v1184_v54, %v1180_v52  ;;  %v6602_v38 = vadd.f32 %v6528_v58, %v5980_v34  ;;  %v14714_v52 = vld [vmem:[#allocation2 + $0x14] sm:$0xff]  }
 0x3fd   : > { %v1888_v0 = vsel %vm1792_vm10, %v1840_v16, %v1142_v27  ;;  %v1191_v37 = vadd.s32 %v1189_v21, %v1183_v50  ;;  %v18909_v62 = vunpack.c.l.b16 %v18908_v35  ;;  %v7275_v11 = vshrl.u32 %v14774_v32, 16  ;;  %v16767_v21 = vpop.f32.mrf.mxu1  ;;  %v6531_v35 = vpop.f32.mrf.mxu0 }
 0x3fe   : > { %vm1936_vm11 = vcmp.lt.s32.totalorder %v1888_v0, 16  ;;  %v1168_v7 = vadd.s32 %v1167_v43, %v1158_v13  ;;  %vm1192_vm12 = vc.u32 %v1190_v28, %v1186_v8  ;;  %v16757_v4 = vadd.f32 %v16557_v36, %v6602_v38 }
 0x3ff   : > { %v7241_v48 = vpack.c.b16 %v18909_v62, %v7240_v40  ;;  %v11799_v29 = vsel %vm1936_vm11, 1.0, %v18888_v60  ;;  %v14697_v18 = vld [vmem:[#allocation2 + $0x7c] sm:$0xff]   ;;  %v1193_v44 = vsel %vm1192_vm12, 1, %v18880_v46  ;;  %v7277_v50 = vrot.slane %v7275_v11, 3 }
 0x400   : > { %v6748_v40 = vmul.f32 %v11799_v29, %v6700_v6  ;;  %v1169_v45 = vshrl.u32 %v1168_v7, 4  ;;  %v1195_v2 = vadd.s32 %v1193_v44, %v1191_v37  ;;  %v6702_v13 = vmax.f32 %v16757_v4, 0.0  ;;  %12346 = vmatmul.msk.bf16.gmra.mxu1 %vm2234_vm1, %v14697_v18  ;;  %v12916_v37 = vld [vmem:[#allocation2 + $0x4] sm:$0xff]  ;;  %v16772_v7 = vld [vmem:[#allocation2 + $0xc] sm:$0xff] }
 0x401   : > { %v7267_v25 = vshrl.u32 %v7241_v48, 16  ;;  %v7270_v3 = vshll.u32 %v7241_v48, 16  ;;  %v7278_v27 = vshll.u32 %v14774_v32, 16  ;;  %v14414_v34 = vor.u32 %v14712_v47, %v14413_v1  ;;  %v18910_v32 = vld [vmem:[#allocation23_spill] sm:$0xff] }
 0x402   : > { %v6796_v54 = vpack.c.bf16 %v6748_v40, %v6748_v40  ;;  %v1170_v33 = vmul.u32 24, %v1169_v45  ;;  %v1196_v8 = vadd.s32 %v1195_v2, %v1185_v49  ;;  %v8499_v43 = vshrl.u32 %v14714_v52, 16 }
 0x403   : > { %v7269_v24 = vrot.slane %v7267_v25, 3  ;;  %v7272_v39 = vrot.slane %v7270_v3, 4  ;;  %v7280_v58 = vrot.slane %v7278_v27, 4  ;;  %v8502_v42 = vshll.u32 %v14714_v52, 16 }
 0x404   : > { %6844 = vst.msk [vmem:[#allocation2 + $0x84] sm:$0xf] %vm2051_vm5, %v6796_v54  ;;  %v1171_v6 = vsub.s32 %v16720_v17, %v1170_v33  ;;  %v1197_v28 = vadd.s32 %v1196_v8, %v1187_v61  ;;  %v8491_v38 = vshrl.u32 %v14414_v34, 16  ;;  %v8494_v0 = vshll.u32 %v14414_v34, 16  ;;  %v5909_v17 = vpop.f32.mrf.mxu3 }
 0x405   : > { %v7273_v16 = vor.u32 %v7272_v39, %v7269_v24  ;;  %v16769_v62 = vor.u32 %v7280_v58, %v7277_v50  ;;  %v8501_v48 = vrot.slane %v8499_v43, 3  ;;  %v8504_v49 = vrot.slane %v8502_v42, 4 }
 0x406   : > { %v5703_v11 = vadd.f32 %v5631_v56, %v18910_v32  ;;  %vm1697_vm13 = vcmp.ne.s32.totalorder %v1171_v6, 0  ;;  %vm1745_vm14 = vcmp.lt.s32.totalorder %v1171_v6, 0  ;;  %v1841_v1 = vadd.s32 24, %v1171_v6 }
 0x407   : > { %v1198_v47 = vshrl.u32 %v1197_v28, 4  ;;  %vm1793_vm15 = vmand %vm1745_vm14, %vm1697_vm13  ;;  %v7282_v61 = vsel %vm2467_vm2, %v7273_v16, %v16769_v62  ;;  %v8493_v29 = vrot.slane %v8491_v38, 3  ;;  %v8496_v18 = vrot.slane %v8494_v0, 4  ;;  %v5633_v16 = vpop.f32.mrf.mxu2  ;;  %v16798_v38 = vpop.f32.mrf.mxu1 }
 0x408   : > { %v16776_v44 = vor.u32 %v8504_v49, %v8501_v48  ;;  %v1889_v25 = vsel %vm1793_vm15, %v1841_v1, %v1171_v6  ;;  %12355 = vmatmul.msk.bf16.vlgmr.msrb.gmra.mxu2 %vm2234_vm1, %v7282_v61  ;;  %v7869_v52 = vshrl.u32 %v12916_v37, 16  ;;  %v7871_v40 = vshll.u32 %v12916_v37, 16  ;;  %v6533_v48 = vpop.f32.mrf.mxu0 }
 0x409   : > { %v1199_v3 = vmul.u32 24, %v1198_v47  ;;  %vm1937_vm4 = vcmp.lt.s32.totalorder %v1889_v25, 16  ;;  %v8497_v45 = vor.u32 %v8496_v18, %v8493_v29  ;;  %v7876_v2 = vshll.u32 %v16772_v7, 16  ;;  %v18911_v47 = vld [vmem:[#allocation24_spill] sm:$0xff] }
 0x40a   : > { %v16781_v24 = vadd.s32 256, %v15630_v15  ;;  %v11800_v39 = vsel %vm1937_vm4, 1.0, %v18888_v60  ;;  %v7873_v27 = vrot.slane %v7871_v40, 1  ;;  %v5981_v56 = vadd.f32 %v5909_v17, %v5703_v11  ;;  %v13825_v25 = vld [vmem:[#allocation2 + $0x10] sm:$0xff]  }
 0x40b   : > { %v1200_v50 = vsub.s32 %v16735_v53, %v1199_v3  ;;  %v6749_v54 = vmul.f32 %v11800_v39, %v6701_v5  ;;  %v8506_v33 = vsel %vm2467_vm2, %v8497_v45, %v16776_v44  ;;  %v16789_v8 = vrot.slane %v7876_v2, 1 }
 0x40c   : > { %v1206_v34 = vand.u32 65535, %v16781_v24  ;;  %12501 = vmatmul.msk.bf16.vlgmr.msrb.gmra.mxu0 %vm2234_vm1, %v8506_v33  ;;  %v7874_v43 = vor.u32 %v7873_v27, %v7869_v52  ;;  %v1207_v42 = vshrl.u32 %v16781_v24, 16  ;;  %v16796_v6 = vadd.f32 %v16366_v22, %v15877_v23  ;;  %v5911_v1 = vpop.f32.mrf.mxu3 }
 0x40d   : > { %vm1698_vm6 = vcmp.ne.s32.totalorder %v1200_v50, 0  ;;  %vm1746_vm7 = vcmp.lt.s32.totalorder %v1200_v50, 0  ;;  %v1842_v58 = vadd.s32 24, %v1200_v50  ;;  %v6797_v53 = vpack.c.bf16 %v6749_v54, %v6749_v54  ;;  %v14716_v54 = vld [vmem:[#allocation2 + $0x1c] sm:$0xff]  }
 0x40e   : > { %vm1794_vm8 = vmand %vm1746_vm7, %vm1698_vm6  ;;  %v1209_v59 = vmul.u32 43691, %v1206_v34  ;;  %v1210_v5 = vmul.u32 43690, %v1206_v34  ;;  %v7879_v0 = vsel %vm3070_vm3, %v7874_v43, %v16789_v8  ;;  %v6603_v37 = vadd.f32 %v6531_v35, %v5981_v56 }
 0x40f   : > { %v1890_v28 = vsel %vm1794_vm8, %v1842_v58, %v1200_v50  ;;  %6845 = vst.msk [vmem:[#allocation2 + $0x88] sm:$0xf] %vm2051_vm5, %v6797_v53  ;;  %12476 = vmatmul.msk.bf16.vlgmr.msrb.gmra.mxu3 %vm2234_vm1, %v7879_v0  ;;  %v1211_v49 = vmul.u32 43691, %v1207_v42  ;;  %v1212_v32 = vmul.u32 43690, %v1207_v42  ;;  %v5704_v17 = vadd.f32 %v5633_v16, %v18911_v47  ;;  %v5636_v33 = vpop.f32.mrf.mxu2 }
 0x410   : > { %vm1938_vm9 = vcmp.lt.s32.totalorder %v1890_v28, 16  ;;  %v1213_v11 = vshll.u32 %v1210_v5, 16  ;;  %v1214_v22 = vshrl.u32 %v1210_v5, 16  ;;  %v16807_v61 = vadd.s32 264, %v15630_v15 }
 0x411   : > { %v11801_v23 = vsel %vm1938_vm9, 1.0, %v18888_v60  ;;  %v1215_v29 = vshll.u32 %v1211_v49, 16  ;;  %v16812_v18 = vadd.f32 %v16557_v36, %v6603_v37  ;;  %v1216_v3 = vshrl.u32 %v1211_v49, 16 }
 0x412   : > { %v6750_v35 = vmul.f32 %v11801_v23, %v6702_v13  ;;  %vm1217_vm10 = vc.u32 %v1209_v59, %v1213_v11  ;;  %v1219_v40 = vadd.s32 %v1213_v11, %v1209_v59  ;;  %v1235_v45 = vand.u32 65535, %v16807_v61 }
 0x413   : > { %v1218_v52 = vsel %vm1217_vm10, 1, %v18880_v46  ;;  %v1236_v50 = vshrl.u32 %v16807_v61, 16  ;;  %v5982_v27 = vadd.f32 %v5911_v1, %v5704_v17  ;;  %v7284_v56 = vshrl.u32 %v13825_v25, 16  ;;  %v16820_v1 = vpop.f32.mrf.mxu1  ;;  %v16823_v17 = vld [vmem:[#allocation2 + $0x14] sm:$0xff] }
 0x414   : > { %v6798_v2 = vpack.c.bf16 %v6750_v35, %v6750_v35  ;;  %v1220_v39 = vadd.s32 %v1218_v52, %v1212_v32  ;;  %vm1221_vm11 = vc.u32 %v1219_v40, %v1215_v29  ;;  %v1238_v4 = vmul.u32 43691, %v1235_v45 }
 0x415   : > { %v1239_v13 = vmul.u32 43690, %v1235_v45  ;;  %v1222_v34 = vsel %vm1221_vm11, 1, %v18880_v46  ;;  %v6703_v16 = vmax.f32 %v16812_v18, 0.0  ;;  %v1240_v58 = vmul.u32 43691, %v1236_v50  ;;  %v5914_v45 = vpop.f32.mrf.mxu3 }
 0x416   : > { %6846 = vst.msk [vmem:[#allocation2 + $0x8c] sm:$0xf] %vm2051_vm5, %v6798_v2  ;;  %v6604_v43 = vadd.f32 %v6533_v48, %v5982_v27  ;;  %v1224_v53 = vadd.s32 %v1222_v34, %v1220_v39  ;;  %v14699_v42 = vld [vmem:[#allocation2 + $0x84] sm:$0xff]   ;;  %v1241_v59 = vmul.u32 43690, %v1236_v50  ;;  %v7286_v49 = vrot.slane %v7284_v56, 3  ;;  %v6536_v48 = vpop.f32.mrf.mxu0 }
 0x417   : > { %v1242_v5 = vshll.u32 %v1239_v13, 16  ;;  %v1243_v28 = vshrl.u32 %v1239_v13, 16  ;;  %v1244_v0 = vshll.u32 %v1240_v58, 16  ;;  %v1245_v37 = vshrl.u32 %v1240_v58, 16  ;;  %12347 = vmatmul.msk.bf16.gmra.mxu1 %vm2234_vm1, %v14699_v42 }
 0x418   : > { %v7287_v32 = vshll.u32 %v13825_v25, 16  ;;  %v1225_v11 = vadd.s32 %v1224_v53, %v1214_v22  ;;  %v8508_v47 = vshrl.u32 %v14716_v54, 16  ;;  %v16827_v29 = vadd.f32 %v16557_v36, %v6604_v43 }
 0x419   : > { %vm1246_vm12 = vc.u32 %v1238_v4, %v1242_v5  ;;  %v1248_v23 = vadd.s32 %v1242_v5, %v1238_v4  ;;  %v8511_v40 = vshll.u32 %v14716_v54, 16  ;;  %v18912_v4 = vld [vmem:[#allocation3_spill] sm:$0xff]  ;;  %v7880_v58 = vshrl.u32 %v16772_v7, 16  ;;  %v5638_v7 = vpop.f32.mrf.mxu2 }
 0x41a   : > { %v1247_v35 = vsel %vm1246_vm12, 1, %v18880_v46  ;;  %v7289_v52 = vrot.slane %v7287_v32, 4  ;;  %v1226_v25 = vadd.s32 %v1225_v11, %v1216_v3  ;;  %v8510_v2 = vrot.slane %v8508_v47, 3 }
 0x41b   : > { %v1249_v22 = vadd.s32 %v1247_v35, %v1241_v59  ;;  %vm1250_vm13 = vc.u32 %v1248_v23, %v1244_v0  ;;  %v8513_v27 = vrot.slane %v8511_v40, 4  ;;  %v5705_v13 = vadd.f32 %v5636_v33, %v18912_v4  ;;  %v18913_v40 = vld [vmem:[#allocation25_spill] sm:$0xff] }
 0x41c   : > { %v1251_v39 = vsel %vm1250_vm13, 1, %v18880_v46  ;;  %v16830_v50 = vor.u32 %v7289_v52, %v7286_v49  ;;  %v1227_v56 = vshrl.u32 %v1226_v25, 4  ;;  %v7884_v36 = vshll.u32 %v16823_v17, 16 }
 0x41d   : > { %v1253_v34 = vadd.s32 %v1251_v39, %v1249_v22  ;;  %v16838_v54 = vor.u32 %v8513_v27, %v8510_v2  ;;  %v16841_v43 = vadd.s32 272, %v15630_v15  ;;  %v5983_v53 = vadd.f32 %v5914_v45, %v5705_v13  ;;  %v16859_v22 = vpop.f32.mrf.mxu1 }
 0x41e   : > { %v7291_v3 = vsel %vm2467_vm2, %v16769_v62, %v16830_v50  ;;  %v1228_v42 = vmul.u32 24, %v1227_v56  ;;  %v7882_v33 = vor.u32 %v7880_v58, %v16789_v8  ;;  %v16845_v5 = vrot.slane %v7884_v36, 1  ;;  %v16867_v36 = vld [vmem:[%s18819_s2] ss:$0 sm:$0xff] }
 0x41f   : > { %v1254_v59 = vadd.s32 %v1253_v34, %v1243_v28  ;;  %12356 = vmatmul.msk.bf16.gmra.mxu2 %vm2234_vm1, %v7291_v3  ;;  %v6704_v0 = vmax.f32 %v16827_v29, 0.0  ;;  %v8515_v62 = vsel %vm2467_vm2, %v16776_v44, %v16838_v54  ;;  %v1264_v49 = vand.u32 65535, %v16841_v43 }
 0x420   : > { %v1265_v32 = vshrl.u32 %v16841_v43, 16  ;;  %v1229_v11 = vsub.s32 %v16781_v24, %v1228_v42  ;;  %12502 = vmatmul.msk.bf16.gmra.mxu0 %vm2234_vm1, %v8515_v62  ;;  %v7887_v8 = vsel %vm3070_vm3, %v7882_v33, %v16845_v5  ;;  %v6605_v23 = vadd.f32 %v6536_v48, %v5983_v53  ;;  %v6538_v24 = vpop.f32.mrf.mxu0  ;;  %v5916_v48 = vpop.f32.mrf.mxu3 }
 0x421   : > { %v1255_v28 = vadd.s32 %v1254_v59, %v1245_v37  ;;  %12477 = vmatmul.msk.bf16.gmra.mxu3 %vm2234_vm1, %v7887_v8  ;;  %v1267_v47 = vmul.u32 43691, %v1264_v49  ;;  %v1268_v35 = vmul.u32 43690, %v1264_v49  ;;  %v5706_v44 = vadd.f32 %v5638_v7, %v18913_v40 }
 0x422   : > { %v1269_v52 = vmul.u32 43691, %v1265_v32  ;;  %vm1699_vm14 = vcmp.ne.s32.totalorder %v1229_v11, 0  ;;  %vm1747_vm15 = vcmp.lt.s32.totalorder %v1229_v11, 0  ;;  %v1843_v45 = vadd.s32 24, %v1229_v11 }
 0x423   : > { %v1256_v25 = vshrl.u32 %v1255_v28, 4  ;;  %vm1795_vm4 = vmand %vm1747_vm15, %vm1699_vm14  ;;  %v1270_v37 = vmul.u32 43690, %v1265_v32  ;;  %v1271_v2 = vshll.u32 %v1268_v35, 16  ;;  %v1272_v39 = vshrl.u32 %v1268_v35, 16  ;;  %v13826_v32 = vld [vmem:[#allocation2 + $0x18] sm:$0xff]  }
 0x424   : > { %v1273_v27 = vshll.u32 %v1269_v52, 16  ;;  %v1891_v4 = vsel %vm1795_vm4, %v1843_v45, %v1229_v11  ;;  %v1274_v56 = vshrl.u32 %v1269_v52, 16  ;;  %v16862_v34 = vadd.s32 280, %v15630_v15 }
 0x425   : > { %v1257_v13 = vmul.u32 24, %v1256_v25  ;;  %vm1939_vm6 = vcmp.lt.s32.totalorder %v1891_v4, 16  ;;  %vm1275_vm7 = vc.u32 %v1267_v47, %v1271_v2  ;;  %v1277_v58 = vadd.s32 %v1271_v2, %v1267_v47  ;;  %v14718_v4 = vld [vmem:[#allocation2 + $0x24] sm:$0xff]  }
 0x426   : > { %v16870_v3 = vadd.f32 %v16867_v36, %v6605_v23  ;;  %v11802_v53 = vsel %vm1939_vm6, 1.0, %v18888_v60  ;;  %v1276_v59 = vsel %vm1275_vm7, 1, %v18880_v46  ;;  %v5984_v33 = vadd.f32 %v5916_v48, %v5706_v44 }
 0x427   : > { %v1258_v42 = vsub.s32 %v16807_v61, %v1257_v13  ;;  %v6751_v7 = vmul.f32 %v11802_v53, %v6703_v16  ;;  %v1278_v62 = vadd.s32 %v1276_v59, %v1270_v37  ;;  %vm1279_vm8 = vc.u32 %v1277_v58, %v1273_v27  ;;  %v16883_v37 = vpop.f32.mrf.mxu1  ;;  %v5641_v13 = vpop.f32.mrf.mxu2 }
 0x428   : > { %v1293_v49 = vand.u32 65535, %v16862_v34  ;;  %v1280_v28 = vsel %vm1279_vm8, 1, %v18880_v46  ;;  %v1294_v61 = vshrl.u32 %v16862_v34, 16  ;;  %v6606_v18 = vadd.f32 %v6538_v24, %v5984_v33  ;;  %v6541_v53 = vpop.f32.mrf.mxu0 }
 0x429   : > { %vm1700_vm9 = vcmp.ne.s32.totalorder %v1258_v42, 0  ;;  %vm1748_vm10 = vcmp.lt.s32.totalorder %v1258_v42, 0  ;;  %v1844_v11 = vadd.s32 24, %v1258_v42  ;;  %v6799_v8 = vpack.c.bf16 %v6751_v7, %v6751_v7 }
 0x42a   : > { %vm1796_vm11 = vmand %vm1748_vm10, %vm1700_vm9  ;;  %v1282_v23 = vadd.s32 %v1280_v28, %v1278_v62  ;;  %v1296_v47 = vmul.u32 43691, %v1293_v49  ;;  %v1297_v52 = vmul.u32 43690, %v1293_v49  ;;  %v7293_v16 = vshrl.u32 %v13826_v32, 16 }
 0x42b   : > { %v1892_v35 = vsel %vm1796_vm11, %v1844_v11, %v1258_v42  ;;  %6847 = vst.msk [vmem:[#allocation2 + $0x90] sm:$0xf] %vm2051_vm5, %v6799_v8  ;;  %v6705_v44 = vmax.f32 %v16870_v3, 0.0  ;;  %v1298_v45 = vmul.u32 43691, %v1294_v61  ;;  %v1299_v2 = vmul.u32 43690, %v1294_v61  ;;  %v16891_v8 = vld [vmem:[#allocation2 + $0x1c] sm:$0xff] }
 0x42c   : > { %vm1940_vm12 = vcmp.lt.s32.totalorder %v1892_v35, 16  ;;  %v1283_v40 = vadd.s32 %v1282_v23, %v1272_v39  ;;  %v1300_v27 = vshll.u32 %v1297_v52, 16  ;;  %v1301_v48 = vshrl.u32 %v1297_v52, 16  ;;  %v18914_v52 = vld [vmem:[#allocation4_spill] sm:$0xff] }
 0x42d   : > { %v11803_v25 = vsel %vm1940_vm12, 1.0, %v18888_v60  ;;  %v1302_v42 = vshll.u32 %v1298_v45, 16  ;;  %v16888_v39 = vadd.f32 %v16867_v36, %v6606_v18  ;;  %v1303_v59 = vshrl.u32 %v1298_v45, 16  ;;  %v5919_v18 = vpop.f32.mrf.mxu3 }
 0x42e   : > { %v6752_v24 = vmul.f32 %v11803_v25, %v6704_v0  ;;  %v1284_v58 = vadd.s32 %v1283_v40, %v1274_v56  ;;  %vm1304_vm13 = vc.u32 %v1296_v47, %v1300_v27  ;;  %v1306_v33 = vadd.s32 %v1300_v27, %v1296_v47 }
 0x42f   : > { %v7295_v7 = vrot.slane %v7293_v16, 3  ;;  %v1305_v11 = vsel %vm1304_vm13, 1, %v18880_v46  ;;  %v7296_v28 = vshll.u32 %v13826_v32, 16  ;;  %v8517_v29 = vshrl.u32 %v14718_v4, 16 }
 0x430   : > { %v6800_v62 = vpack.c.bf16 %v6752_v24, %v6752_v24  ;;  %v1285_v49 = vshrl.u32 %v1284_v58, 4  ;;  %v1307_v23 = vadd.s32 %v1305_v11, %v1299_v2  ;;  %vm1308_vm14 = vc.u32 %v1306_v33, %v1302_v42  ;;  %v5643_v11 = vpop.f32.mrf.mxu2 }
 0x431   : > { %v8520_v0 = vshll.u32 %v14718_v4, 16  ;;  %v1309_v61 = vsel %vm1308_vm14, 1, %v18880_v46  ;;  %v7298_v35 = vrot.slane %v7296_v28, 4  ;;  %v5707_v47 = vadd.f32 %v5641_v13, %v18914_v52 }
 0x432   : > { %6848 = vst.msk [vmem:[#allocation2 + $0x94] sm:$0xf] %vm2051_vm5, %v6800_v62  ;;  %v1286_v56 = vmul.u32 24, %v1285_v49  ;;  %v14701_v16 = vld [vmem:[#allocation2 + $0x8c] sm:$0xff]   ;;  %v1311_v40 = vadd.s32 %v1309_v61, %v1307_v23  ;;  %v8519_v45 = vrot.slane %v8517_v29, 3  ;;  %v7888_v32 = vshrl.u32 %v16823_v17, 16  ;;  %v16915_v62 = vpop.f32.mrf.mxu1 }
 0x433   : > { %v8522_v25 = vrot.slane %v8520_v0, 4  ;;  %v16898_v27 = vor.u32 %v7298_v35, %v7295_v7  ;;  %v7892_v4 = vshll.u32 %v16891_v8, 16  ;;  %v16902_v24 = vadd.s32 288, %v15630_v15  ;;  %12348 = vmatmul.msk.bf16.gmra.mxu1 %vm2234_vm1, %v14701_v16 }
 0x434   : > { %v1287_v2 = vsub.s32 %v16841_v43, %v1286_v56  ;;  %v1312_v58 = vadd.s32 %v1311_v40, %v1301_v48  ;;  %v7890_v42 = vor.u32 %v7888_v32, %v16845_v5  ;;  %v5985_v33 = vadd.f32 %v5919_v18, %v5707_v47  ;;  %v18915_v56 = vld [vmem:[#allocation26_spill] sm:$0xff] }
 0x435   : > { %v16905_v13 = vor.u32 %v8522_v25, %v8519_v45  ;;  %v7300_v43 = vsel %vm2467_vm2, %v16830_v50, %v16898_v27  ;;  %v16917_v49 = vrot.slane %v7892_v4, 1  ;;  %v1322_v5 = vand.u32 65535, %v16902_v24  ;;  %v6543_v50 = vpop.f32.mrf.mxu0  ;;  %v5921_v45 = vpop.f32.mrf.mxu3 }
 0x436   : > { %vm1701_vm15 = vcmp.ne.s32.totalorder %v1287_v2, 0  ;;  %vm1749_vm4 = vcmp.lt.s32.totalorder %v1287_v2, 0  ;;  %v1845_v17 = vadd.s32 24, %v1287_v2  ;;  %v1313_v7 = vadd.s32 %v1312_v58, %v1303_v59  ;;  %12357 = vmatmul.msk.bf16.gmra.mxu2 %vm2234_vm1, %v7300_v43 }
 0x437   : > { %vm1797_vm6 = vmand %vm1749_vm4, %vm1701_vm15  ;;  %v8524_v48 = vsel %vm2467_vm2, %v16838_v54, %v16905_v13  ;;  %v6706_v23 = vmax.f32 %v16888_v39, 0.0  ;;  %v1323_v59 = vshrl.u32 %v16902_v24, 16  ;;  %v6607_v29 = vadd.f32 %v6541_v53, %v5985_v33 }
 0x438   : > { %v1893_v28 = vsel %vm1797_vm6, %v1845_v17, %v1287_v2  ;;  %12503 = vmatmul.msk.bf16.gmra.mxu0 %vm2234_vm1, %v8524_v48  ;;  %v1314_v0 = vshrl.u32 %v1313_v7, 4  ;;  %v7895_v54 = vsel %vm3070_vm3, %v7890_v42, %v16917_v49  ;;  %v5708_v61 = vadd.f32 %v5643_v11, %v18915_v56 }
 0x439   : > { %vm1941_vm7 = vcmp.lt.s32.totalorder %v1893_v28, 16  ;;  %12478 = vmatmul.msk.bf16.gmra.mxu3 %vm2234_vm1, %v7895_v54  ;;  %v1325_v52 = vmul.u32 43691, %v1322_v5  ;;  %v1326_v47 = vmul.u32 43690, %v1322_v5  ;;  %v1327_v39 = vmul.u32 43691, %v1323_v59 }
 0x43a   : > { %v11804_v35 = vsel %vm1941_vm7, 1.0, %v18888_v60  ;;  %v1315_v16 = vmul.u32 24, %v1314_v0  ;;  %v1328_v40 = vmul.u32 43690, %v1323_v59  ;;  %v16931_v53 = vadd.s32 296, %v15630_v15  ;;  %v16943_v0 = vpop.f32.mrf.mxu1 }
 0x43b   : > { %v6753_v18 = vmul.f32 %v11804_v35, %v6705_v44  ;;  %v1329_v25 = vshll.u32 %v1326_v47, 16  ;;  %v1330_v32 = vshrl.u32 %v1326_v47, 16  ;;  %v1331_v2 = vshll.u32 %v1327_v39, 16  ;;  %v13827_v47 = vld [vmem:[#allocation2 + $0x20] sm:$0xff]  }
 0x43c   : > { %v16934_v4 = vadd.f32 %v16867_v36, %v6607_v29  ;;  %v1316_v42 = vsub.s32 %v16862_v34, %v1315_v16  ;;  %v1332_v33 = vshrl.u32 %v1327_v39, 16  ;;  %v1351_v17 = vand.u32 65535, %v16931_v53 }
 0x43d   : > { %v6801_v58 = vpack.c.bf16 %v6753_v18, %v6753_v18  ;;  %vm1333_vm8 = vc.u32 %v1325_v52, %v1329_v25  ;;  %v1335_v3 = vadd.s32 %v1329_v25, %v1325_v52  ;;  %v1352_v44 = vshrl.u32 %v16931_v53, 16 }
 0x43e   : > { %v5986_v43 = vadd.f32 %v5921_v45, %v5708_v61  ;;  %vm1702_vm9 = vcmp.ne.s32.totalorder %v1316_v42, 0  ;;  %vm1750_vm10 = vcmp.lt.s32.totalorder %v1316_v42, 0  ;;  %v1846_v7 = vadd.s32 24, %v1316_v42  ;;  %v16945_v61 = vpop.f32.mrf.mxu0  ;;  %v5646_v45 = vpop.f32.mrf.mxu2 }
 0x43f   : > { %6849 = vst.msk [vmem:[#allocation2 + $0x98] sm:$0xf] %vm2051_vm5, %v6801_v58  ;;  %v1334_v48 = vsel %vm1333_vm8, 1, %v18880_v46  ;;  %vm1798_vm11 = vmand %vm1750_vm10, %vm1702_vm9  ;;  %vm1337_vm12 = vc.u32 %v1335_v3, %v1331_v2  ;;  %v1354_v11 = vmul.u32 43691, %v1351_v17  ;;  %v1355_v34 = vmul.u32 43690, %v1351_v17 }
 0x440   : > { %v1336_v5 = vadd.s32 %v1334_v48, %v1328_v40  ;;  %v1894_v28 = vsel %vm1798_vm11, %v1846_v7, %v1316_v42  ;;  %v1338_v59 = vsel %vm1337_vm12, 1, %v18880_v46  ;;  %v1356_v54 = vmul.u32 43691, %v1352_v44  ;;  %v14720_v42 = vld [vmem:[#allocation2 + $0x2c] sm:$0xff]  }
 0x441   : > { %vm1942_vm13 = vcmp.lt.s32.totalorder %v1894_v28, 16  ;;  %v1357_v35 = vmul.u32 43690, %v1352_v44  ;;  %v1358_v52 = vshll.u32 %v1355_v34, 16  ;;  %v1359_v18 = vshrl.u32 %v1355_v34, 16 }
 0x442   : > { %v1340_v56 = vadd.s32 %v1338_v59, %v1336_v5  ;;  %v11805_v39 = vsel %vm1942_vm13, 1.0, %v18888_v60  ;;  %v1360_v16 = vshll.u32 %v1356_v54, 16  ;;  %v6608_v40 = vadd.f32 %v6543_v50, %v5986_v43  ;;  %v16949_v5 = vld [vmem:[#allocation2 + $0x24] sm:$0xff] }
 0x443   : > { %v6754_v25 = vmul.f32 %v11805_v39, %v6706_v23  ;;  %vm1362_vm14 = vc.u32 %v1354_v11, %v1358_v52  ;;  %v1364_v58 = vadd.s32 %v1358_v52, %v1354_v11  ;;  %v1361_v17 = vshrl.u32 %v1356_v54, 16 }
 0x444   : > { %v1341_v2 = vadd.s32 %v1340_v56, %v1330_v32  ;;  %v1363_v3 = vsel %vm1362_vm14, 1, %v18880_v46  ;;  %v7302_v7 = vshrl.u32 %v13827_v47, 16  ;;  %v7305_v48 = vshll.u32 %v13827_v47, 16 }
 0x445   : > { %v6802_v44 = vpack.c.bf16 %v6754_v25, %v6754_v25  ;;  %v1365_v29 = vadd.s32 %v1363_v3, %v1357_v35  ;;  %vm1366_vm15 = vc.u32 %v1364_v58, %v1360_v16  ;;  %v16953_v23 = vadd.f32 %v16867_v36, %v6608_v40  ;;  %v5924_v58 = vpop.f32.mrf.mxu3 }
 0x446   : > { %v1342_v28 = vadd.s32 %v1341_v2, %v1332_v33  ;;  %v14703_v59 = vld [vmem:[#allocation2 + $0x94] sm:$0xff]   ;;  %v1367_v50 = vsel %vm1366_vm15, 1, %v18880_v46  ;;  %v7304_v32 = vrot.slane %v7302_v7, 3  ;;  %v7307_v43 = vrot.slane %v7305_v48, 4 }
 0x447   : > { %6850 = vst.msk [vmem:[#allocation2 + $0x9c] sm:$0xf] %vm2051_vm5, %v6802_v44  ;;  %12349 = vmatmul.msk.bf16.gmra.mxu1 %vm2234_vm1, %v14703_v59  ;;  %v1369_v34 = vadd.s32 %v1367_v50, %v1365_v29  ;;  %v8526_v54 = vshrl.u32 %v14720_v42, 16  ;;  %v8529_v56 = vshll.u32 %v14720_v42, 16  ;;  %v18916_v33 = vld [vmem:[#allocation5_spill] sm:$0xff]  ;;  %v7896_v47 = vshrl.u32 %v16891_v8, 16  ;;  %v16965_v29 = vpop.f32.mrf.mxu1 }
 0x448   : > { %v1343_v11 = vshrl.u32 %v1342_v28, 4  ;;  %v16957_v52 = vor.u32 %v7307_v43, %v7304_v32  ;;  %v5709_v35 = vadd.f32 %v5646_v45, %v18916_v33  ;;  %v7900_v39 = vshll.u32 %v16949_v5, 16  ;;  %v16978_v28 = vpop.f32.mrf.mxu0  ;;  %v5648_v32 = vpop.f32.mrf.mxu2 }
 0x449   : > { %v1370_v40 = vadd.s32 %v1369_v34, %v1359_v18  ;;  %v8528_v25 = vrot.slane %v8526_v54, 3  ;;  %v8531_v2 = vrot.slane %v8529_v56, 4  ;;  %v7898_v42 = vor.u32 %v7896_v47, %v16917_v49  ;;  %v18917_v47 = vld [vmem:[#allocation12_spill] sm:$0xff] }
 0x44a   : > { %v1344_v16 = vmul.u32 24, %v1343_v11  ;;  %v7309_v3 = vsel %vm2467_vm2, %v16898_v27, %v16957_v52  ;;  %v16968_v7 = vrot.slane %v7900_v39, 1  ;;  %v16971_v45 = vadd.s32 304, %v15630_v15 }
 0x44b   : > { %v1371_v48 = vadd.s32 %v1370_v40, %v1361_v17  ;;  %v6708_v18 = vmax.f32 %v16953_v23, 0.0  ;;  %12358 = vmatmul.msk.bf16.gmra.mxu2 %vm2234_vm1, %v7309_v3  ;;  %v16976_v44 = vor.u32 %v8531_v2, %v8528_v25  ;;  %v5987_v50 = vadd.f32 %v5924_v58, %v5709_v35  ;;  %v17015_v23 = vld [vmem:[#allocation2 + $0x2c] sm:$0xff] }
 0x44c   : > { %v1345_v8 = vsub.s32 %v16902_v24, %v1344_v16  ;;  %v7903_v27 = vsel %vm3070_vm3, %v7898_v42, %v16968_v7  ;;  %v1380_v49 = vand.u32 65535, %v16971_v45  ;;  %v1381_v59 = vshrl.u32 %v16971_v45, 16 }
 0x44d   : > { %v1372_v17 = vshrl.u32 %v1371_v48, 4  ;;  %12479 = vmatmul.msk.bf16.gmra.mxu3 %vm2234_vm1, %v7903_v27  ;;  %v8533_v43 = vsel %vm2467_vm2, %v16905_v13, %v16976_v44  ;;  %v5710_v39 = vadd.f32 %v5648_v32, %v18917_v47  ;;  %v6609_v25 = vadd.f32 %v16945_v61, %v5987_v50  ;;  %v5926_v61 = vpop.f32.mrf.mxu3  ;;  %v13828_v50 = vld [vmem:[#allocation2 + $0x28] sm:$0xff]  }
 0x44e   : > { %vm1703_vm4 = vcmp.ne.s32.totalorder %v1345_v8, 0  ;;  %vm1751_vm6 = vcmp.lt.s32.totalorder %v1345_v8, 0  ;;  %v1847_v24 = vadd.s32 24, %v1345_v8  ;;  %v1383_v11 = vmul.u32 43691, %v1380_v49  ;;  %12504 = vmatmul.msk.bf16.gmra.mxu0 %vm2234_vm1, %v8533_v43 }
 0x44f   : > { %vm1799_vm7 = vmand %vm1751_vm6, %vm1703_vm4  ;;  %v1384_v34 = vmul.u32 43690, %v1380_v49  ;;  %v1385_v54 = vmul.u32 43691, %v1381_v59  ;;  %v1373_v33 = vmul.u32 24, %v1372_v17  ;;  %v1386_v35 = vmul.u32 43690, %v1381_v59 }
 0x450   : > { %v1895_v56 = vsel %vm1799_vm7, %v1847_v24, %v1345_v8  ;;  %v18918_v42 = vmax.f32 %v16934_v4, 0.0  ;;  %v16996_v27 = vadd.s32 312, %v15630_v15  ;;  %v17000_v24 = vadd.f32 %v16867_v36, %v6609_v25  ;;  %v17002_v4 = vpop.f32.mrf.mxu1 }
 0x451   : > { %vm1943_vm8 = vcmp.lt.s32.totalorder %v1895_v56, 16  ;;  %v1387_v16 = vshll.u32 %v1384_v34, 16  ;;  %v1389_v40 = vshll.u32 %v1385_v54, 16  ;;  %v1374_v58 = vsub.s32 %v16931_v53, %v1373_v33 }
 0x452   : > { %v11806_v2 = vsel %vm1943_vm8, 1.0, %v18888_v60  ;;  %v1388_v13 = vshrl.u32 %v1384_v34, 16  ;;  %v1390_v3 = vshrl.u32 %v1385_v54, 16  ;;  %v1409_v34 = vand.u32 65535, %v16996_v27 }
 0x453   : > { %v6755_v8 = vmul.f32 %v11806_v2, %v18918_v42  ;;  %vm1391_vm9 = vc.u32 %v1383_v11, %v1387_v16  ;;  %v1393_v48 = vadd.s32 %v1387_v16, %v1383_v11  ;;  %vm1704_vm10 = vcmp.ne.s32.totalorder %v1374_v58, 0  ;;  %v17005_v11 = vpop.f32.mrf.mxu0  ;;  %v14722_v2 = vld [vmem:[#allocation2 + $0x34] sm:$0xff]  }
 0x454   : > { %vm1752_vm11 = vcmp.lt.s32.totalorder %v1374_v58, 0  ;;  %v1848_v49 = vadd.s32 24, %v1374_v58  ;;  %v1392_v59 = vsel %vm1391_vm9, 1, %v18880_v46  ;;  %v1410_v54 = vshrl.u32 %v16996_v27, 16 }
 0x455   : > { %v6803_v32 = vpack.c.bf16 %v6755_v8, %v6755_v8  ;;  %vm1800_vm12 = vmand %vm1752_vm11, %vm1704_vm10  ;;  %v1394_v53 = vadd.s32 %v1392_v59, %v1386_v35  ;;  %vm1395_vm13 = vc.u32 %v1393_v48, %v1389_v40  ;;  %v5988_v33 = vadd.f32 %v5926_v61, %v5710_v39  ;;  %v5651_v39 = vpop.f32.mrf.mxu2 }
 0x456   : > { %v1896_v17 = vsel %vm1800_vm12, %v1848_v49, %v1374_v58  ;;  %v1396_v43 = vsel %vm1395_vm13, 1, %v18880_v46  ;;  %v7311_v35 = vshrl.u32 %v13828_v50, 16  ;;  %v1412_v16 = vmul.u32 43691, %v1409_v34 }
 0x457   : > { %6851 = vst.msk [vmem:[#allocation2 + $0xa0] sm:$0xf] %vm2051_vm5, %v6803_v32  ;;  %vm1944_vm14 = vcmp.lt.s32.totalorder %v1896_v17, 16  ;;  %v1398_v56 = vadd.s32 %v1396_v43, %v1394_v53  ;;  %v1413_v40 = vmul.u32 43690, %v1409_v34  ;;  %v1414_v25 = vmul.u32 43691, %v1410_v54 }
 0x458   : > { %v11807_v47 = vsel %vm1944_vm14, 1.0, %v18888_v60  ;;  %v6709_v8 = vmax.f32 %v17000_v24, 0.0  ;;  %v6610_v48 = vadd.f32 %v16978_v28, %v5988_v33  ;;  %v1415_v49 = vmul.u32 43690, %v1410_v54 }
 0x459   : > { %v6756_v58 = vmul.f32 %v11807_v47, %v6708_v18  ;;  %v1399_v42 = vadd.s32 %v1398_v56, %v1388_v13  ;;  %v1416_v59 = vshll.u32 %v1413_v40, 16  ;;  %v1417_v32 = vshrl.u32 %v1413_v40, 16  ;;  %v18919_v40 = vld [vmem:[#allocation6_spill] sm:$0xff] }
 0x45a   : > { %v1418_v53 = vshll.u32 %v1414_v25, 16  ;;  %v1419_v43 = vshrl.u32 %v1414_v25, 16  ;;  %v7313_v14 = vrot.slane %v7311_v35, 3  ;;  %v7314_v12 = vshll.u32 %v13828_v50, 16 }
 0x45b   : > { %v6804_v61 = vpack.c.bf16 %v6756_v58, %v6756_v58  ;;  %v1400_v17 = vadd.s32 %v1399_v42, %v1390_v3  ;;  %vm1420_vm15 = vc.u32 %v1412_v16, %v1416_v59  ;;  %v1422_v34 = vadd.s32 %v1416_v59, %v1412_v16  ;;  %v17024_v58 = vpop.f32.mrf.mxu1  ;;  %v5929_v42 = vpop.f32.mrf.mxu3 }
 0x45c   : > { %v8535_v41 = vshrl.u32 %v14722_v2, 16  ;;  %v1421_v28 = vsel %vm1420_vm15, 1, %v18880_v46  ;;  %v17020_v13 = vadd.f32 %v16867_v36, %v6610_v48  ;;  %v8538_v54 = vshll.u32 %v14722_v2, 16 }
 0x45d   : > { %6852 = vst.msk [vmem:[#allocation2 + $0xa4] sm:$0xf] %vm2051_vm5, %v6804_v61  ;;  %v1401_v18 = vshrl.u32 %v1400_v17, 4  ;;  %v1423_v33 = vadd.s32 %v1421_v28, %v1415_v49  ;;  %vm1424_vm4 = vc.u32 %v1422_v34, %v1418_v53  ;;  %v7316_v3 = vrot.slane %v7314_v12, 4  ;;  %v17031_v12 = vpop.f32.mrf.mxu0 }
 0x45e   : > { %v14705_v56 = vld [vmem:[#allocation2 + $0x9c] sm:$0xff]   ;;  %v8537_v35 = vrot.slane %v8535_v41, 3  ;;  %v1425_v50 = vsel %vm1424_vm4, 1, %v18880_v46  ;;  %v8540_v16 = vrot.slane %v8538_v54, 4  ;;  %v5711_v25 = vadd.f32 %v5651_v39, %v18919_v40  ;;  %v5653_v54 = vpop.f32.mrf.mxu2 }
 0x45f   : > { %v1402_v47 = vmul.u32 24, %v1401_v18  ;;  %12350 = vmatmul.msk.bf16.gmra.mxu1 %vm2234_vm1, %v14705_v56  ;;  %v1427_v59 = vadd.s32 %v1425_v50, %v1423_v33  ;;  %v17027_v48 = vor.u32 %v7316_v3, %v7313_v14  ;;  %v7904_v2 = vshrl.u32 %v16949_v5, 16 }
 0x460   : > { %v7908_v49 = vshll.u32 %v17015_v23, 16  ;;  %v17034_v53 = vor.u32 %v8540_v16, %v8537_v35  ;;  %v17037_v39 = vadd.s32 320, %v15630_v15  ;;  %v5989_v61 = vadd.f32 %v5929_v42, %v5711_v25  ;;  %v18920_v25 = vld [vmem:[#allocation27_spill] sm:$0xff] }
 0x461   : > { %v1403_v41 = vsub.s32 %v16971_v45, %v1402_v47  ;;  %v1428_v17 = vadd.s32 %v1427_v59, %v1417_v32  ;;  %v7318_v14 = vsel %vm2467_vm2, %v16957_v52, %v17027_v48  ;;  %v7906_v34 = vor.u32 %v7904_v2, %v16968_v7 }
 0x462   : > { %v17043_v5 = vrot.slane %v7908_v49, 1  ;;  %12359 = vmatmul.msk.bf16.gmra.mxu2 %vm2234_vm1, %v7318_v14  ;;  %v8542_v45 = vsel %vm2467_vm2, %v16976_v44, %v17034_v53  ;;  %v1438_v7 = vand.u32 65535, %v17037_v39  ;;  %v1439_v32 = vshrl.u32 %v17037_v39, 16 }
 0x463   : > { %vm1705_vm6 = vcmp.ne.s32.totalorder %v1403_v41, 0  ;;  %vm1753_vm7 = vcmp.lt.s32.totalorder %v1403_v41, 0  ;;  %v1849_v18 = vadd.s32 24, %v1403_v41  ;;  %v1429_v28 = vadd.s32 %v1428_v17, %v1419_v43  ;;  %12505 = vmatmul.msk.bf16.gmra.mxu0 %vm2234_vm1, %v8542_v45  ;;  %v17067_v17 = vpop.f32.mrf.mxu1 }
 0x464   : > { %vm1801_vm8 = vmand %vm1753_vm7, %vm1705_vm6  ;;  %v7911_v52 = vsel %vm3070_vm3, %v7906_v34, %v17043_v5  ;;  %v6710_v33 = vmax.f32 %v17020_v13, 0.0  ;;  %v6611_v3 = vadd.f32 %v17005_v11, %v5989_v61  ;;  %v17058_v44 = vadd.s32 328, %v15630_v15 }
 0x465   : > { %v1897_v56 = vsel %vm1801_vm8, %v1849_v18, %v1403_v41  ;;  %12480 = vmatmul.msk.bf16.gmra.mxu3 %vm2234_vm1, %v7911_v52  ;;  %v1430_v43 = vshrl.u32 %v1429_v28, 4  ;;  %v1441_v35 = vmul.u32 43691, %v1438_v7  ;;  %v1442_v47 = vmul.u32 43690, %v1438_v7  ;;  %v17071_v28 = vpop.f32.mrf.mxu0 }
 0x466   : > { %vm1945_vm9 = vcmp.lt.s32.totalorder %v1897_v56, 16  ;;  %v1443_v16 = vmul.u32 43691, %v1439_v32  ;;  %v1444_v40 = vmul.u32 43690, %v1439_v32  ;;  %v5712_v42 = vadd.f32 %v5653_v54, %v18920_v25  ;;  %v5931_v32 = vpop.f32.mrf.mxu3  ;;  %v13829_v25 = vld [vmem:[#allocation2 + $0x30] sm:$0xff]  }
 0x467   : > { %v11808_v50 = vsel %vm1945_vm9, 1.0, %v18888_v60  ;;  %v1431_v59 = vmul.u32 24, %v1430_v43  ;;  %v1445_v2 = vshll.u32 %v1442_v47, 16  ;;  %v17065_v11 = vadd.f32 %v16867_v36, %v6611_v3 }
 0x468   : > { %v6757_v13 = vmul.f32 %v11808_v50, %v6709_v8  ;;  %v1446_v49 = vshrl.u32 %v1442_v47, 16  ;;  %v1447_v41 = vshll.u32 %v1443_v16, 16  ;;  %v1448_v61 = vshrl.u32 %v1443_v16, 16 }
 0x469   : > { %v1467_v14 = vand.u32 65535, %v17058_v44  ;;  %v1432_v18 = vsub.s32 %v16996_v27, %v1431_v59  ;;  %vm1449_vm10 = vc.u32 %v1441_v35, %v1445_v2  ;;  %v1451_v45 = vadd.s32 %v1445_v2, %v1441_v35  ;;  %v5656_v27 = vpop.f32.mrf.mxu2 }
 0x46a   : > { %v6805_v34 = vpack.c.bf16 %v6757_v13, %v6757_v13  ;;  %v1450_v24 = vsel %vm1449_vm10, 1, %v18880_v46  ;;  %v1468_v8 = vshrl.u32 %v17058_v44, 16  ;;  %v5990_v16 = vadd.f32 %v5931_v32, %v5712_v42 }
 0x46b   : > { %v1470_v52 = vmul.u32 43691, %v1467_v14  ;;  %v1471_v7 = vmul.u32 43690, %v1467_v14  ;;  %vm1706_vm11 = vcmp.ne.s32.totalorder %v1432_v18, 0  ;;  %vm1754_vm12 = vcmp.lt.s32.totalorder %v1432_v18, 0 }
 0x46c   : > { %6853 = vst.msk [vmem:[#allocation2 + $0xa8] sm:$0xf] %vm2051_vm5, %v6805_v34  ;;  %v1850_v54 = vadd.s32 24, %v1432_v18  ;;  %v1452_v56 = vadd.s32 %v1450_v24, %v1444_v40  ;;  %vm1802_vm13 = vmand %vm1754_vm12, %vm1706_vm11  ;;  %vm1453_vm14 = vc.u32 %v1451_v45, %v1447_v41  ;;  %v1472_v3 = vmul.u32 43691, %v1468_v8  ;;  %v14724_v34 = vld [vmem:[#allocation2 + $0x3c] sm:$0xff]  }
 0x46d   : > { %v1474_v43 = vshll.u32 %v1471_v7, 16  ;;  %v1454_v47 = vsel %vm1453_vm14, 1, %v18880_v46  ;;  %v1473_v50 = vmul.u32 43690, %v1468_v8  ;;  %v1475_v59 = vshrl.u32 %v1471_v7, 16 }
 0x46e   : > { %v1898_v35 = vsel %vm1802_vm13, %v1850_v54, %v1432_v18  ;;  %v1456_v13 = vadd.s32 %v1454_v47, %v1452_v56  ;;  %v1476_v2 = vshll.u32 %v1472_v3, 16  ;;  %v6612_v41 = vadd.f32 %v17031_v12, %v5990_v16  ;;  %v17081_v56 = vld [vmem:[#allocation2 + $0x34] sm:$0xff]  ;;  %v17084_v12 = vpop.f32.mrf.mxu1 }
 0x46f   : > { %vm1946_vm15 = vcmp.lt.s32.totalorder %v1898_v35, 16  ;;  %vm1478_vm4 = vc.u32 %v1470_v52, %v1474_v43  ;;  %v1480_v40 = vadd.s32 %v1474_v43, %v1470_v52  ;;  %v7320_v54 = vshrl.u32 %v13829_v25, 16 }
 0x470   : > { %v11809_v14 = vsel %vm1946_vm15, 1.0, %v18888_v60  ;;  %v1457_v24 = vadd.s32 %v1456_v13, %v1446_v49  ;;  %v1479_v18 = vsel %vm1478_vm4, 1, %v18880_v46  ;;  %v1477_v8 = vshrl.u32 %v1472_v3, 16  ;;  %v17089_v3 = vpop.f32.mrf.mxu0 }
 0x471   : > { %v6758_v45 = vmul.f32 %v11809_v14, %v6710_v33  ;;  %v1481_v42 = vadd.s32 %v1479_v18, %v1473_v50  ;;  %vm1482_vm6 = vc.u32 %v1480_v40, %v1476_v2  ;;  %v7323_v32 = vshll.u32 %v13829_v25, 16  ;;  %v18921_v25 = vld [vmem:[#allocation11_spill] sm:$0xff]  ;;  %v5934_v40 = vpop.f32.mrf.mxu3 }
 0x472   : > { %v1458_v35 = vadd.s32 %v1457_v24, %v1448_v61  ;;  %v1483_v52 = vsel %vm1482_vm6, 1, %v18880_v46  ;;  %v7322_v43 = vrot.slane %v7320_v54, 3  ;;  %v17087_v49 = vadd.f32 %v16867_v36, %v6612_v41 }
 0x473   : > { %v6806_v7 = vpack.c.bf16 %v6758_v45, %v6758_v45  ;;  %v14707_v47 = vld [vmem:[#allocation2 + $0xa4] sm:$0xff]   ;;  %v1485_v33 = vadd.s32 %v1483_v52, %v1481_v42  ;;  %v7325_v16 = vrot.slane %v7323_v32, 4  ;;  %v8544_v13 = vshrl.u32 %v14724_v34, 16 }
 0x474   : > { %v1459_v50 = vshrl.u32 %v1458_v35, 4  ;;  %12351 = vmatmul.msk.bf16.gmra.mxu1 %vm2234_vm1, %v14707_v47  ;;  %v8547_v61 = vshll.u32 %v14724_v34, 16  ;;  %v5713_v2 = vadd.f32 %v5656_v27, %v18921_v25  ;;  %v7912_v14 = vshrl.u32 %v17015_v23, 16 }
 0x475   : > { %6854 = vst.msk [vmem:[#allocation2 + $0xac] sm:$0xf] %vm2051_vm5, %v6806_v7  ;;  %v1486_v45 = vadd.s32 %v1485_v33, %v1475_v59  ;;  %v17095_v24 = vor.u32 %v7325_v16, %v7322_v43  ;;  %v8546_v41 = vrot.slane %v8544_v13, 3  ;;  %v7916_v18 = vshll.u32 %v17081_v56, 16  ;;  %v5658_v13 = vpop.f32.mrf.mxu2 }
 0x476   : > { %v1460_v54 = vmul.u32 24, %v1459_v50  ;;  %v8549_v42 = vrot.slane %v8547_v61, 4  ;;  %v7914_v32 = vor.u32 %v7912_v14, %v17043_v5  ;;  %v17100_v7 = vadd.s32 336, %v15630_v15 }
 0x477   : > { %v1487_v35 = vadd.s32 %v1486_v45, %v1477_v8  ;;  %v7327_v27 = vsel %vm2467_vm2, %v17027_v48, %v17095_v24  ;;  %v17105_v23 = vrot.slane %v7916_v18, 1  ;;  %v5991_v59 = vadd.f32 %v5934_v40, %v5713_v2  ;;  %v18923_v18 = vld [vmem:[#allocation28_spill] sm:$0xff] }
 0x478   : > { %v1461_v34 = vsub.s32 %v17037_v39, %v1460_v54  ;;  %12360 = vmatmul.msk.bf16.gmra.mxu2 %vm2234_vm1, %v7327_v27  ;;  %v17109_v47 = vor.u32 %v8549_v42, %v8546_v41  ;;  %v1496_v52 = vand.u32 65535, %v17100_v7  ;;  %v1497_v5 = vshrl.u32 %v17100_v7, 16  ;;  %v17134_v42 = vpop.f32.mrf.mxu0 }
 0x479   : > { %v1488_v43 = vshrl.u32 %v1487_v35, 4  ;;  %v6712_v8 = vmax.f32 %v17087_v49, 0.0  ;;  %v7919_v33 = vsel %vm3070_vm3, %v7914_v32, %v17105_v23  ;;  %v6613_v48 = vadd.f32 %v17071_v28, %v5991_v59 }
 0x47a   : > { %vm1707_vm7 = vcmp.ne.s32.totalorder %v1461_v34, 0  ;;  %vm1755_vm8 = vcmp.lt.s32.totalorder %v1461_v34, 0  ;;  %v1851_v16 = vadd.s32 24, %v1461_v34  ;;  %v8551_v39 = vsel %vm2467_vm2, %v17034_v53, %v17109_v47  ;;  %12481 = vmatmul.msk.bf16.gmra.mxu3 %vm2234_vm1, %v7919_v33  ;;  %v17130_v53 = vpop.f32.mrf.mxu1 }
 0x47b   : > { %vm1803_vm9 = vmand %vm1755_vm8, %vm1707_vm7  ;;  %v1489_v50 = vmul.u32 24, %v1488_v43  ;;  %12506 = vmatmul.msk.bf16.gmra.mxu0 %vm2234_vm1, %v8551_v39  ;;  %v1500_v49 = vmul.u32 43690, %v1496_v52  ;;  %v17122_v61 = vmul.u32 43691, %v1497_v5  ;;  %v17125_v25 = vadd.s32 344, %v15630_v15  ;;  %18922 = vst [vmem:[#allocation8_spill] sm:$0xff] %v17130_v53 }
 0x47c   : > { %v1899_v28 = vsel %vm1803_vm9, %v1851_v16, %v1461_v34  ;;  %v1499_v2 = vmul.u32 43691, %v1496_v52  ;;  %v1502_v14 = vmul.u32 43690, %v1497_v5  ;;  %v17128_v40 = vadd.f32 %v16867_v36, %v6613_v48  ;;  %v5936_v34 = vpop.f32.mrf.mxu3 }
 0x47d   : > { %vm1947_vm10 = vcmp.lt.s32.totalorder %v1899_v28, 16  ;;  %v1490_v45 = vsub.s32 %v17058_v44, %v1489_v50  ;;  %v1503_v41 = vshll.u32 %v1500_v49, 16  ;;  %v5714_v54 = vadd.f32 %v5658_v13, %v18923_v18  ;;  %v14726_v28 = vld [vmem:[#allocation2 + $0x44] sm:$0xff]   ;;  %v5661_v20 = vpop.f32.mrf.mxu2 }
 0x47e   : > { %v11810_v32 = vsel %vm1947_vm10, 1.0, %v18888_v60  ;;  %v1504_v35 = vshrl.u32 %v1500_v49, 16  ;;  %v1505_v27 = vshll.u32 %v17122_v61, 16  ;;  %v1506_v59 = vshrl.u32 %v17122_v61, 16  ;;  %v13830_v61 = vld [vmem:[#allocation2 + $0x38] sm:$0xff]  }
 0x47f   : > { %v18924_v52 = vmax.f32 %v17065_v11, 0.0  ;;  %vm1708_vm11 = vcmp.ne.s32.totalorder %v1490_v45, 0  ;;  %vm1756_vm12 = vcmp.lt.s32.totalorder %v1490_v45, 0  ;;  %v1852_v43 = vadd.s32 24, %v1490_v45 }
 0x480   : > { %vm1804_vm13 = vmand %vm1756_vm12, %vm1708_vm11  ;;  %vm1507_vm14 = vc.u32 %v1499_v2, %v1503_v41  ;;  %v1509_v44 = vadd.s32 %v1503_v41, %v1499_v2  ;;  %v1525_v33 = vand.u32 65535, %v17125_v25  ;;  %v1526_v48 = vshrl.u32 %v17125_v25, 16 }
 0x481   : > { %v6759_v5 = vmul.f32 %v11810_v32, %v18924_v52  ;;  %v1900_v39 = vsel %vm1804_vm13, %v1852_v43, %v1490_v45  ;;  %v1508_v13 = vsel %vm1507_vm14, 1, %v18880_v46  ;;  %v5992_v50 = vadd.f32 %v5936_v34, %v5714_v54 }
 0x482   : > { %vm1948_vm15 = vcmp.lt.s32.totalorder %v1900_v39, 16  ;;  %v1510_v49 = vadd.s32 %v1508_v13, %v1502_v14  ;;  %vm1511_vm4 = vc.u32 %v1509_v44, %v1505_v27  ;;  %v1528_v11 = vmul.u32 43691, %v1525_v33  ;;  %v17149_v19 = vpop.f32.mrf.mxu1 }
 0x483   : > { %v6807_v16 = vpack.c.bf16 %v6759_v5, %v6759_v5  ;;  %v11811_v18 = vsel %vm1948_vm15, 1.0, %v18888_v60  ;;  %v1512_v2 = vsel %vm1511_vm4, 1, %v18880_v46  ;;  %v1529_v41 = vmul.u32 43690, %v1525_v33  ;;  %18925 = vst [vmem:[#allocation21_spill] sm:$0xff] %v17149_v19 }
 0x484   : > { %v1530_v32 = vmul.u32 43691, %v1526_v48  ;;  %v6760_v52 = vmul.f32 %v11811_v18, %v6712_v8  ;;  %v1514_v5 = vadd.s32 %v1512_v2, %v1510_v49  ;;  %v6614_v54 = vadd.f32 %v17089_v3, %v5992_v50  ;;  %v17151_v49 = vld [vmem:[#allocation2 + $0x3c] sm:$0xff]  ;;  %v17153_v18 = vpop.f32.mrf.mxu0  ;;  %v5939_v19 = vpop.f32.mrf.mxu3 }
 0x485   : > { %6855 = vst.msk [vmem:[#allocation2 + $0xb0] sm:$0xf] %vm2051_vm5, %v6807_v16  ;;  %v1531_v34 = vmul.u32 43690, %v1526_v48  ;;  %v1532_v14 = vshll.u32 %v1529_v41, 16  ;;  %v1533_v27 = vshrl.u32 %v1529_v41, 16  ;;  %v7329_v16 = vshrl.u32 %v13830_v61, 16 }
 0x486   : > { %v1534_v43 = vshll.u32 %v1530_v32, 16  ;;  %v6808_v44 = vpack.c.bf16 %v6760_v52, %v6760_v52  ;;  %v1515_v39 = vadd.s32 %v1514_v5, %v1504_v35  ;;  %v1535_v13 = vshrl.u32 %v1530_v32, 16 }
 0x487   : > { %vm1536_vm6 = vc.u32 %v1528_v11, %v1532_v14  ;;  %v1538_v33 = vadd.s32 %v1532_v14, %v1528_v11  ;;  %v7332_v9 = vshll.u32 %v13830_v61, 16  ;;  %v8553_v8 = vshrl.u32 %v14726_v28, 16  ;;  %v18926_v14 = vld [vmem:[#allocation13_spill] sm:$0xff] }
 0x488   : > { %6856 = vst.msk [vmem:[#allocation2 + $0xb4] sm:$0xf] %vm2051_vm5, %v6808_v44  ;;  %v1516_v3 = vadd.s32 %v1515_v39, %v1506_v59  ;;  %v1537_v48 = vsel %vm1536_vm6, 1, %v18880_v46  ;;  %v17158_v35 = vadd.f32 %v16867_v36, %v6614_v54  ;;  %v7331_v50 = vrot.slane %v7329_v16, 3 }
 0x489   : > { %v1539_v2 = vadd.s32 %v1537_v48, %v1531_v34  ;;  %vm1540_vm7 = vc.u32 %v1538_v33, %v1534_v43  ;;  %v7334_v41 = vrot.slane %v7332_v9, 4  ;;  %v8555_v32 = vrot.slane %v8553_v8, 3 }
 0x48a   : > { %v1517_v11 = vshrl.u32 %v1516_v3, 4  ;;  %v1541_v52 = vsel %vm1540_vm7, 1, %v18880_v46  ;;  %v8556_v5 = vshll.u32 %v14726_v28, 16  ;;  %v5715_v45 = vadd.f32 %v5661_v20, %v18926_v14 }
 0x48b   : > { %v1543_v44 = vadd.s32 %v1541_v52, %v1539_v2  ;;  %v17162_v59 = vor.u32 %v7334_v41, %v7331_v50  ;;  %v7920_v39 = vshrl.u32 %v17081_v56, 16  ;;  %v7924_v36 = vshll.u32 %v17151_v49, 16  ;;  %v5663_v50 = vpop.f32.mrf.mxu2  ;;  %v17190_v2 = vpop.f32.mrf.mxu1 }
 0x48c   : > { %v14709_v61 = vld [vmem:[#allocation2 + $0xac] sm:$0xff]   ;;  %v1518_v54 = vmul.u32 24, %v1517_v11  ;;  %v8558_v9 = vrot.slane %v8556_v5, 4  ;;  %v17168_v34 = vadd.s32 352, %v15630_v15  ;;  %v5993_v43 = vadd.f32 %v5939_v19, %v5715_v45  ;;  %18927 = vst [vmem:[#allocation9_spill] sm:$0xff] %v17190_v2 }
 0x48d   : > { %12352 = vmatmul.msk.bf16.gmra.mxu1 %vm2234_vm1, %v14709_v61  ;;  %v1544_v16 = vadd.s32 %v1543_v44, %v1533_v27  ;;  %v7336_v20 = vsel %vm2467_vm2, %v17095_v24, %v17162_v59  ;;  %v7922_v28 = vor.u32 %v7920_v39, %v17105_v23  ;;  %v17174_v33 = vrot.slane %v7924_v36, 1  ;;  %v18928_v36 = vld [vmem:[#allocation14_spill] sm:$0xff] }
 0x48e   : > { %v1519_v56 = vsub.s32 %v17100_v7, %v1518_v54  ;;  %12361 = vmatmul.msk.bf16.gmra.mxu2 %vm2234_vm1, %v7336_v20  ;;  %v17178_v8 = vor.u32 %v8558_v9, %v8555_v32  ;;  %v1554_v3 = vand.u32 65535, %v17168_v34  ;;  %v1555_v48 = vshrl.u32 %v17168_v34, 16  ;;  %v5941_v9 = vpop.f32.mrf.mxu3 }
 0x48f   : > { %v1545_v19 = vadd.s32 %v1544_v16, %v1535_v13  ;;  %v6714_v45 = vmax.f32 %v17158_v35, 0.0  ;;  %v7927_v24 = vsel %vm3070_vm3, %v7922_v28, %v17174_v33  ;;  %v6615_v23 = vadd.f32 %v17134_v42, %v5993_v43  ;;  %v17193_v42 = vpop.f32.mrf.mxu0 }
 0x490   : > { %vm1709_vm8 = vcmp.ne.s32.totalorder %v1519_v56, 0  ;;  %vm1757_vm9 = vcmp.lt.s32.totalorder %v1519_v56, 0  ;;  %v1853_v27 = vadd.s32 24, %v1519_v56  ;;  %v8560_v7 = vsel %vm2467_vm2, %v17109_v47, %v17178_v8  ;;  %12482 = vmatmul.msk.bf16.gmra.mxu3 %vm2234_vm1, %v7927_v24  ;;  %v17198_v47 = vld [vmem:[%s18819_s2] ss:$0 sm:$0xff] }
 0x491   : > { %vm1805_vm10 = vmand %vm1757_vm9, %vm1709_vm8  ;;  %v1546_v13 = vshrl.u32 %v1545_v19, 4  ;;  %12507 = vmatmul.msk.bf16.gmra.mxu0 %vm2234_vm1, %v8560_v7  ;;  %v1557_v41 = vmul.u32 43691, %v1554_v3  ;;  %v1558_v32 = vmul.u32 43690, %v1554_v3  ;;  %v1559_v11 = vmul.u32 43691, %v1555_v48 }
 0x492   : > { %v1901_v61 = vsel %vm1805_vm10, %v1853_v27, %v1519_v56  ;;  %v1560_v52 = vmul.u32 43690, %v1555_v48  ;;  %v17201_v5 = vadd.f32 %v17198_v47, %v6615_v23  ;;  %v17204_v14 = vadd.s32 360, %v15630_v15 }
 0x493   : > { %vm1949_vm11 = vcmp.lt.s32.totalorder %v1901_v61, 16  ;;  %v1547_v44 = vmul.u32 24, %v1546_v13  ;;  %v1561_v39 = vshll.u32 %v1558_v32, 16  ;;  %v5716_v54 = vadd.f32 %v5663_v50, %v18928_v36 }
 0x494   : > { %v11812_v43 = vsel %vm1949_vm11, 1.0, %v18888_v60  ;;  %v1562_v16 = vshrl.u32 %v1558_v32, 16  ;;  %v1563_v20 = vshll.u32 %v1559_v11, 16  ;;  %v1564_v28 = vshrl.u32 %v1559_v11, 16 }
 0x495   : > { %v18929_v56 = vmax.f32 %v17128_v40, 0.0  ;;  %v1548_v48 = vsub.s32 %v17125_v25, %v1547_v44  ;;  %vm1565_vm12 = vc.u32 %v1557_v41, %v1561_v39  ;;  %v1567_v19 = vadd.s32 %v1561_v39, %v1557_v41 }
 0x496   : > { %v1566_v24 = vsel %vm1565_vm12, 1, %v18880_v46  ;;  %v1583_v23 = vand.u32 65535, %v17204_v14  ;;  %v1584_v27 = vshrl.u32 %v17204_v14, 16  ;;  %v5994_v7 = vadd.f32 %v5941_v9, %v5716_v54  ;;  %v17217_v9 = vld [vmem:[#allocation2 + $0x40] sm:$0xff]  }
 0x497   : > { %v6761_v3 = vmul.f32 %v11812_v43, %v18929_v56  ;;  %vm1710_vm13 = vcmp.ne.s32.totalorder %v1548_v48, 0  ;;  %vm1758_vm14 = vcmp.lt.s32.totalorder %v1548_v48, 0  ;;  %v1854_v13 = vadd.s32 24, %v1548_v48  ;;  %v5666_v43 = vpop.f32.mrf.mxu2  ;;  %v17219_v56 = vpop.f32.mrf.mxu1 }
 0x498   : > { %vm1806_vm15 = vmand %vm1758_vm14, %vm1710_vm13  ;;  %v1568_v32 = vadd.s32 %v1566_v24, %v1560_v52  ;;  %vm1569_vm4 = vc.u32 %v1567_v19, %v1563_v20  ;;  %v1586_v40 = vmul.u32 43691, %v1583_v23  ;;  %v1587_v11 = vmul.u32 43690, %v1583_v23  ;;  %18930 = vst [vmem:[#allocation22_spill] sm:$0xff] %v17219_v56  ;;  %v17223_v19 = vpop.f32.mrf.mxu0 }
 0x499   : > { %v6809_v50 = vpack.c.bf16 %v6761_v3, %v6761_v3  ;;  %v1902_v25 = vsel %vm1806_vm15, %v1854_v13, %v1548_v48  ;;  %v1570_v41 = vsel %vm1569_vm4, 1, %v18880_v46  ;;  %v1588_v44 = vmul.u32 43691, %v1584_v27 }
 0x49a   : > { %vm1950_vm6 = vcmp.lt.s32.totalorder %v1902_v25, 16  ;;  %v1572_v39 = vadd.s32 %v1570_v41, %v1568_v32  ;;  %v1589_v36 = vmul.u32 43690, %v1584_v27  ;;  %v1590_v54 = vshll.u32 %v1587_v11, 16 }
 0x49b   : > { %6857 = vst.msk [vmem:[#allocation2 + $0xb8] sm:$0xf] %vm2051_vm5, %v6809_v50  ;;  %v11813_v52 = vsel %vm1950_vm6, 1.0, %v18888_v60  ;;  %v1591_v20 = vshrl.u32 %v1587_v11, 16  ;;  %v1592_v3 = vshll.u32 %v1588_v44, 16  ;;  %v6616_v48 = vadd.f32 %v17153_v18, %v5994_v7  ;;  %v14728_v50 = vld [vmem:[#allocation2 + $0x4c] sm:$0xff]  }
 0x49c   : > { %v6762_v24 = vmul.f32 %v11813_v52, %v6714_v45  ;;  %v1573_v23 = vadd.s32 %v1572_v39, %v1562_v16  ;;  %vm1594_vm7 = vc.u32 %v1586_v40, %v1590_v54  ;;  %v1596_v27 = vadd.s32 %v1590_v54, %v1586_v40  ;;  %v17230_v11 = vld [vmem:[#allocation2 + $0x44] sm:$0xff] }
 0x49d   : > { %v1593_v13 = vshrl.u32 %v1588_v44, 16  ;;  %v1595_v32 = vsel %vm1594_vm7, 1, %v18880_v46  ;;  %v7338_v25 = vshrl.u32 %v17217_v9, 16  ;;  %v7341_v41 = vshll.u32 %v17217_v9, 16  ;;  %v5944_v44 = vpop.f32.mrf.mxu3 }
 0x49e   : > { %v6810_v61 = vpack.c.bf16 %v6762_v24, %v6762_v24  ;;  %v1574_v18 = vadd.s32 %v1573_v23, %v1564_v28  ;;  %v1597_v7 = vadd.s32 %v1595_v32, %v1589_v36  ;;  %vm1598_vm8 = vc.u32 %v1596_v27, %v1592_v3  ;;  %v18931_v28 = vld [vmem:[#allocation15_spill] sm:$0xff] }
 0x49f   : > { %v1599_v35 = vsel %vm1598_vm8, 1, %v18880_v46  ;;  %v17234_v45 = vadd.f32 %v17198_v47, %v6616_v48  ;;  %v7340_v16 = vrot.slane %v7338_v25, 3  ;;  %v7343_v40 = vrot.slane %v7341_v41, 4 }
 0x4a0   : > { %6858 = vst.msk [vmem:[#allocation2 + $0xbc] sm:$0xf] %vm2051_vm5, %v6810_v61  ;;  %v1575_v39 = vshrl.u32 %v1574_v18, 4  ;;  %v1601_v52 = vadd.s32 %v1599_v35, %v1597_v7  ;;  %v8562_v56 = vshrl.u32 %v14728_v50, 16  ;;  %v8565_v2 = vshll.u32 %v14728_v50, 16 }
 0x4a1   : > { %v17237_v53 = vor.u32 %v7343_v40, %v7340_v16  ;;  %v5717_v36 = vadd.f32 %v5666_v43, %v18931_v28  ;;  %v7928_v3 = vshrl.u32 %v17151_v49, 16  ;;  %v7932_v24 = vshll.u32 %v17230_v11, 16  ;;  %v17263_v16 = vpop.f32.mrf.mxu0 }
 0x4a2   : > { %v14710_v54 = vld [vmem:[#allocation2 + $0xb4] sm:$0xff]   ;;  %v1576_v48 = vmul.u32 24, %v1575_v39  ;;  %v1602_v23 = vadd.s32 %v1601_v52, %v1591_v20  ;;  %v8564_v27 = vrot.slane %v8562_v56, 3  ;;  %v8567_v32 = vrot.slane %v8565_v2, 4  ;;  %v5668_v2 = vpop.f32.mrf.mxu2  ;;  %v17257_v20 = vpop.f32.mrf.mxu1 }
 0x4a3   : > { %12353 = vmatmul.msk.bf16.gmra.mxu1 %vm2234_vm1, %v14710_v54  ;;  %v7345_v61 = vsel %vm2467_vm2, %v17162_v59, %v17237_v53  ;;  %v7930_v50 = vor.u32 %v7928_v3, %v17174_v33  ;;  %v17247_v25 = vrot.slane %v7932_v24, 1  ;;  %v17250_v43 = vadd.s32 368, %v15630_v15  ;;  %18932 = vst [vmem:[#allocation10_spill] sm:$0xff] %v17257_v20 }
 0x4a4   : > { %v1577_v49 = vsub.s32 %v17168_v34, %v1576_v48  ;;  %v1603_v41 = vadd.s32 %v1602_v23, %v1593_v13  ;;  %v6716_v18 = vmax.f32 %v17234_v45, 0.0  ;;  %12362 = vmatmul.msk.bf16.gmra.mxu2 %vm2234_vm1, %v7345_v61  ;;  %v17255_v56 = vor.u32 %v8567_v32, %v8564_v27 }
 0x4a5   : > { %v7935_v59 = vsel %vm3070_vm3, %v7930_v50, %v17247_v25  ;;  %v1612_v33 = vand.u32 65535, %v17250_v43  ;;  %v1613_v7 = vshrl.u32 %v17250_v43, 16  ;;  %v5995_v35 = vadd.f32 %v5944_v44, %v5717_v36  ;;  %v5946_v24 = vpop.f32.mrf.mxu3 }
 0x4a6   : > { %vm1711_vm9 = vcmp.ne.s32.totalorder %v1577_v49, 0  ;;  %vm1759_vm10 = vcmp.lt.s32.totalorder %v1577_v49, 0  ;;  %v1855_v34 = vadd.s32 24, %v1577_v49  ;;  %v1604_v13 = vshrl.u32 %v1603_v41, 4  ;;  %12483 = vmatmul.msk.bf16.gmra.mxu3 %vm2234_vm1, %v7935_v59 }
 0x4a7   : > { %vm1807_vm11 = vmand %vm1759_vm10, %vm1711_vm9  ;;  %v8569_v40 = vsel %vm2467_vm2, %v17178_v8, %v17255_v56  ;;  %v1615_v39 = vmul.u32 43691, %v1612_v33  ;;  %v1616_v54 = vmul.u32 43690, %v1612_v33  ;;  %v1617_v52 = vmul.u32 43691, %v1613_v7 }
 0x4a8   : > { %v1903_v28 = vsel %vm1807_vm11, %v1855_v34, %v1577_v49  ;;  %v1605_v3 = vmul.u32 24, %v1604_v13  ;;  %12508 = vmatmul.msk.bf16.gmra.mxu0 %vm2234_vm1, %v8569_v40  ;;  %v1618_v44 = vmul.u32 43690, %v1613_v7  ;;  %v5718_v36 = vadd.f32 %v5668_v2, %v16796_v6 }
 0x4a9   : > { %vm1951_vm12 = vcmp.lt.s32.totalorder %v1903_v28, 16  ;;  %v1619_v48 = vshll.u32 %v1616_v54, 16  ;;  %v1621_v23 = vshll.u32 %v1617_v52, 16  ;;  %v6617_v27 = vadd.f32 %v17193_v42, %v5995_v35  ;;  %v17280_v42 = vld [vmem:[#allocation2 + $0x48] sm:$0xff]  }
 0x4aa   : > { %v11814_v32 = vsel %vm1951_vm12, 1.0, %v18888_v60  ;;  %v1606_v8 = vsub.s32 %v17204_v14, %v1605_v3  ;;  %v1620_v61 = vshrl.u32 %v1616_v54, 16  ;;  %v1622_v50 = vshrl.u32 %v1617_v52, 16  ;;  %v17285_v34 = vpop.f32.mrf.mxu1  ;;  %v17290_v54 = vpop.f32.mrf.mxu0 }
 0x4ab   : > { %v18933_v49 = vmax.f32 %v17201_v5, 0.0  ;;  %vm1623_vm13 = vc.u32 %v1615_v39, %v1619_v48  ;;  %v1625_v59 = vadd.s32 %v1619_v48, %v1615_v39  ;;  %v17277_v33 = vadd.s32 376, %v15630_v15  ;;  %v7574_v5 = vpop.f32.mrf.mxu2  ;;  %18934 = vst [vmem:[#allocation29_spill] sm:$0xff] %v17285_v34 }
 0x4ac   : > { %vm1712_vm14 = vcmp.ne.s32.totalorder %v1606_v8, 0  ;;  %vm1760_vm15 = vcmp.lt.s32.totalorder %v1606_v8, 0  ;;  %v1856_v6 = vadd.s32 24, %v1606_v8  ;;  %v1624_v2 = vsel %vm1623_vm13, 1, %v18880_v46 }
 0x4ad   : > { %v6763_v41 = vmul.f32 %v11814_v32, %v18933_v49  ;;  %vm1808_vm4 = vmand %vm1760_vm15, %vm1712_vm14  ;;  %v1626_v14 = vadd.s32 %v1624_v2, %v1618_v44  ;;  %vm1627_vm6 = vc.u32 %v1625_v59, %v1621_v23  ;;  %v17283_v35 = vadd.f32 %v17198_v47, %v6617_v27  ;;  %v17295_v32 = vpop.f32.mrf.mxu3 }
 0x4ae   : > { %v1904_v13 = vsel %vm1808_vm4, %v1856_v6, %v1606_v8  ;;  %v1628_v15 = vsel %vm1627_vm6, 1, %v18880_v46  ;;  %v1641_v40 = vand.u32 65535, %v17277_v33  ;;  %v1642_v39 = vshrl.u32 %v17277_v33, 16 }
 0x4af   : > { %v6811_v7 = vpack.c.bf16 %v6763_v41, %v6763_v41  ;;  %vm1952_vm7 = vcmp.lt.s32.totalorder %v1904_v13, 16  ;;  %v1630_v52 = vadd.s32 %v1628_v15, %v1626_v14  ;;  %v5996_v28 = vadd.f32 %v5946_v24, %v5718_v36  ;;  %v14730_v41 = vld [vmem:[#allocation2 + $0x54] sm:$0xff]  }
 0x4b0   : > { %v7347_v3 = vshrl.u32 %v17280_v42, 16  ;;  %v11815_v44 = vsel %vm1952_vm7, 1.0, %v18888_v60  ;;  %v1644_v48 = vmul.u32 43691, %v1641_v40  ;;  %v1645_v23 = vmul.u32 43690, %v1641_v40  ;;  %v13846_v36 = vld [vmem:[#allocation2 + $0xb8] sm:$0xff]  }
 0x4b1   : > { %6859 = vst.msk [vmem:[#allocation2 + $0xc0] sm:$0xf] %vm2051_vm5, %v6811_v7  ;;  %v1646_v27 = vmul.u32 43691, %v1642_v39  ;;  %v6764_v8 = vmul.f32 %v11815_v44, %v6716_v18  ;;  %v1631_v49 = vadd.s32 %v1630_v52, %v1620_v61  ;;  %v1647_v6 = vmul.u32 43690, %v1642_v39 }
 0x4b2   : > { %v1648_v2 = vshll.u32 %v1645_v23, 16  ;;  %v1649_v13 = vshrl.u32 %v1645_v23, 16  ;;  %v17301_v15 = vadd.f32 %v17223_v19, %v5996_v28  ;;  %v7349_v34 = vrot.slane %v7347_v3, 3  ;;  %v17306_v59 = vpop.f32.mrf.mxu1  ;;  %v17310_v3 = vpop.f32.mrf.mxu0 }
 0x4b3   : > { %v1650_v7 = vshll.u32 %v1646_v27, 16  ;;  %v6812_v24 = vpack.c.bf16 %v6764_v8, %v6764_v8  ;;  %v1632_v14 = vadd.s32 %v1631_v49, %v1622_v50  ;;  %v7350_v45 = vshll.u32 %v17280_v42, 16  ;;  %v7576_v44 = vpop.f32.mrf.mxu2  ;;  %18935 = vst [vmem:[#allocation23_spill] sm:$0xff] %v17306_v59  ;;  %v17308_v8 = vld [vmem:[#allocation2 + $0x4c] sm:$0xff] }
 0x4b4   : > { %vm1652_vm8 = vc.u32 %v1644_v48, %v1648_v2  ;;  %v1654_v40 = vadd.s32 %v1648_v2, %v1644_v48  ;;  %v13359_v39 = vunpack.c.h.b16 %v13846_v36  ;;  %v8571_v52 = vshrl.u32 %v14730_v41, 16 }
 0x4b5   : > { %6860 = vst.msk [vmem:[#allocation2 + $0xc4] sm:$0xf] %vm2051_vm5, %v6812_v24  ;;  %v1633_v18 = vshrl.u32 %v1632_v14, 4  ;;  %v1653_v61 = vsel %vm1652_vm8, 1, %v18880_v46  ;;  %v7352_v23 = vrot.slane %v7350_v45, 4  ;;  %v8574_v28 = vshll.u32 %v14730_v41, 16 }
 0x4b6   : > { %v1655_v50 = vadd.s32 %v1653_v61, %v1647_v6  ;;  %vm1656_vm9 = vc.u32 %v1654_v40, %v1650_v7  ;;  %v8573_v24 = vrot.slane %v8571_v52, 3  ;;  %v1651_v36 = vshrl.u32 %v1646_v27, 16  ;;  %v8150_v6 = vpop.f32.mrf.mxu3 }
 0x4b7   : > { %v1634_v48 = vmul.u32 24, %v1633_v18  ;;  %v1657_v49 = vsel %vm1656_vm9, 1, %v18880_v46  ;;  %v17315_v20 = vor.u32 %v7352_v23, %v7349_v34  ;;  %v8576_v59 = vrot.slane %v8574_v28, 4  ;;  %v12550_v46 = vld [vmem:[%s18820_s3 + $0x14] sm:$0xf] }
 0x4b8   : > { %v6911_v19 = vld [vmem:[#allocation2 + $0xc0] sm:$0xf]  ;;  %v1659_v14 = vadd.s32 %v1657_v49, %v1655_v50  ;;  %v7575_v40 = vadd.f32 %v7574_v5, %v16385_v30  ;;  %v7936_v45 = vshrl.u32 %v17230_v11, 16  ;;  %v7940_v61 = vshll.u32 %v17308_v8, 16  ;;  %v17349_v50 = vld [vmem:[#allocation2 + $0x50] sm:$0xff]  }
 0x4b9   : > { %v17313_v2 = vunpack.c.l.b16 %v6911_v19  ;;  %v1635_v7 = vsub.s32 %v17250_v43, %v1634_v48  ;;  %v7354_v34 = vsel %vm2467_vm2, %v17237_v53, %v17315_v20  ;;  %v17327_v27 = vor.u32 %v8576_v59, %v8573_v24  ;;  %v12671_v43 = vld [vmem:[%s18820_s3 + $0x18] sm:$0xf]  ;;  %v12696_v53 = vld [vmem:[%s18820_s3 + $0x1c] sm:$0xf]  ;;  %v12721_v48 = vld [vmem:[%s18820_s3 + $0x20] sm:$0xf] }
 0x4ba   : > { %v1660_v18 = vadd.s32 %v1659_v14, %v1649_v13  ;;  %12363 = vmatmul.msk.bf16.gmra.mxu2 %vm2234_vm1, %v7354_v34  ;;  %v7938_v11 = vor.u32 %v7936_v45, %v17247_v25  ;;  %v9687_v52 = vsel %vm2307_vm0, %v12550_v46, 0  ;;  %v14732_v25 = vld [vmem:[#allocation2 + $0x5c] sm:$0xff]   ;;  %v10337_v19 = vsel %vm2307_vm0, %v12671_v43, 0  ;;  %v17362_v24 = vpop.f32.mrf.mxu1 }
 0x4bb   : > { %v7034_v41 = vpack.c.b16 %v17313_v2, %v13359_v39  ;;  %vm1713_vm10 = vcmp.ne.s32.totalorder %v1635_v7, 0  ;;  %vm1761_vm11 = vcmp.lt.s32.totalorder %v1635_v7, 0  ;;  %v1857_v30 = vadd.s32 24, %v1635_v7  ;;  %9696 = vmatpush.bf16.msra.mxu2 %v9687_v52  ;;  %v7579_v49 = vpop.f32.mrf.mxu2  ;;  %18938 = vst [vmem:[#allocation24_spill] sm:$0xff] %v17362_v24  ;;  %10346 = vmatpush.bf16.msra.mxu3 %v10337_v19  ;;  %v17382_v52 = vld [vmem:[#allocation2 + $0x54] sm:$0xff] }
 0x4bc   : > { %vm17339_vm12 = vmand %vm1761_vm11, %vm1713_vm10  ;;  %v1661_v59 = vadd.s32 %v1660_v18, %v1651_v36  ;;  %v8578_v13 = vsel %vm2467_vm2, %v17255_v56, %v17327_v27  ;;  %v17346_v39 = vrot.slane %v7940_v61, 1  ;;  %v17356_v28 = vadd.f32 %v17295_v32, %v7575_v40 }
 0x4bd   : > { %12354 = vmatmul.msk.bf16.gmra.mxu1 %vm2234_vm1, %v7034_v41  ;;  %v1905_v23 = vsel %vm17339_vm12, %v1857_v30, %v1635_v7  ;;  %12509 = vmatmul.msk.bf16.gmra.mxu0 %vm2234_vm1, %v8578_v13  ;;  %v7577_v56 = vadd.f32 %v7576_v44, %v16413_v31  ;;  %v10615_v7 = vsel %vm2307_vm0, %v12696_v53, 0  ;;  %v17367_v41 = vpop.f32.mrf.mxu0  ;;  %v7356_v31 = vshrl.u32 %v17349_v50, 16 }
 0x4be   : > { %vm1953_vm13 = vcmp.lt.s32.totalorder %v1905_v23, 16  ;;  %v1662_v36 = vshrl.u32 %v1661_v59, 4  ;;  %v7943_v14 = vsel %vm3070_vm3, %v7938_v11, %v17346_v39  ;;  %18939 = vst [vmem:[#allocation3_spill] sm:$0xff] %v17367_v41  ;;  %10624 = vmatpush.bf16.msra.mxu0 %v10615_v7  ;;  %v7359_v44 = vshll.u32 %v17349_v50, 16  ;;  %v8153_v43 = vpop.f32.mrf.mxu3 }
 0x4bf   : > { %v11816_v32 = vsel %vm1953_vm13, 1.0, %v18888_v60  ;;  %12484 = vmatmul.msk.bf16.gmra.mxu3 %vm2234_vm1, %v7943_v14  ;;  %v17373_v40 = vadd.f32 %v8150_v6, %v7577_v56  ;;  %v18940_v45 = vmax.f32 %v17283_v35, 0.0  ;;  %v11237_v34 = vsel %vm2307_vm0, %v12721_v48, 0 }
 0x4c0   : > { %v1663_v18 = vmul.u32 24, %v1662_v36  ;;  %v8580_v61 = vshrl.u32 %v14732_v25, 16  ;;  %v6670_v30 = vadd.f32 %v17198_v47, %v17301_v15  ;;  %11246 = vmatpush.bf16.msra.mxu1 %v11237_v34  ;;  %v8583_v11 = vshll.u32 %v14732_v25, 16  ;;  %v17402_v34 = vld [vmem:[#allocation2 + $0x58] sm:$0xff]  }
 0x4c1   : > { %v6765_v46 = vmul.f32 %v11816_v32, %v18940_v45  ;;  %v7580_v53 = vadd.f32 %v7579_v49, %v16433_v51  ;;  %v7358_v6 = vrot.slane %v7356_v31, 3  ;;  %v7361_v13 = vrot.slane %v7359_v44, 4  ;;  %v13847_v44 = vld [vmem:[#allocation2 + $0x10] sm:$0xff]  }
 0x4c2   : > { %v1664_v59 = vsub.s32 %v17277_v33, %v1663_v18  ;;  %v8582_v35 = vrot.slane %v8580_v61, 3  ;;  %v8585_v47 = vrot.slane %v8583_v11, 4  ;;  %v6718_v15 = vmax.f32 %v6670_v30, 0.0  ;;  %v17389_v51 = vpop.f32.mrf.mxu1 }
 0x4c3   : > { %v6813_v5 = vpack.c.bf16 %v6765_v46, %v6765_v46  ;;  %v17384_v23 = vadd.f32 %v8153_v43, %v7580_v53  ;;  %v17387_v25 = vpop.f32.mrf.mxu2  ;;  %18942 = vst [vmem:[#allocation4_spill] sm:$0xff] %v17389_v51  ;;  %v7362_v56 = vor.u32 %v7361_v13, %v7358_v6  ;;  %v7948_v48 = vshll.u32 %v17382_v52, 16  ;;  %v14734_v43 = vld [vmem:[#allocation2 + $0x64] sm:$0xff]  }
 0x4c4   : > { %vm1714_vm0 = vcmp.ne.s32.totalorder %v1664_v59, 0  ;;  %vm1762_vm14 = vcmp.lt.s32.totalorder %v1664_v59, 0  ;;  %v1858_v19 = vadd.s32 24, %v1664_v59  ;;  %18941 = vst [vmem:[#allocation25_spill] sm:$0xff] %v17387_v25  ;;  %v8586_v14 = vor.u32 %v8585_v47, %v8582_v35  ;;  %v12927_v47 = vld [vmem:[#allocation2 + $0x5c] sm:$0xff] }
 0x4c5   : > { %6861 = vst.msk [vmem:[#allocation2 + $0xc8] sm:$0xf] %vm2051_vm5, %v6813_v5  ;;  %vm1810_vm15 = vmand %vm1762_vm14, %vm1714_vm0  ;;  %v17392_v49 = vpop.f32.mrf.mxu0  ;;  %v7363_v31 = vsel %vm2467_vm2, %v17315_v20, %v7362_v56  ;;  %v7944_v45 = vshrl.u32 %v17308_v8, 16  ;;  %v7950_v46 = vrot.slane %v7948_v48, 1  ;;  %v7365_v11 = vshrl.u32 %v17402_v34, 16 }
 0x4c6   : > { %v1906_v33 = vsel %vm1810_vm15, %v1858_v19, %v1664_v59  ;;  %v17395_v7 = vpop.f32.mrf.mxu3  ;;  %v7368_v53 = vshll.u32 %v17402_v34, 16  ;;  %v8592_v59 = vshll.u32 %v14734_v43, 16 }
 0x4c7   : > { %vm1954_vm4 = vcmp.lt.s32.totalorder %v1906_v33, 16  ;;  %18943 = vst [vmem:[#allocation26_spill] sm:$0xff] %v17395_v7  ;;  %v7946_v61 = vor.u32 %v7944_v45, %v17346_v39  ;;  %v8589_v39 = vshrl.u32 %v14734_v43, 16  ;;  %v7367_v35 = vrot.slane %v7365_v11, 3 }
 0x4c8   : > { %v11817_v36 = vsel %vm1954_vm4, 1.0, %v18888_v60  ;;  %v8587_v60 = vsel %vm2467_vm2, %v17327_v27, %v8586_v14  ;;  %v7370_v19 = vrot.slane %v7368_v53, 4  ;;  %v8594_v33 = vrot.slane %v8592_v59, 4  ;;  %v14736_v53 = vld [vmem:[#allocation2 + $0x6c] sm:$0xff]  }
 0x4c9   : > { %v6766_v32 = vmul.f32 %v11817_v36, %v6718_v15  ;;  %v7951_v30 = vsel %vm3070_vm3, %v7946_v61, %v7950_v46  ;;  %v8591_v15 = vrot.slane %v8589_v39, 3  ;;  %v7952_v61 = vshrl.u32 %v17382_v52, 16 }
 0x4ca   : > { %12364 = vmatmul.msk.bf16.gmra.mxu2 %vm2234_vm1, %v7363_v31  ;;  %v17409_v8 = vpop.f32.mrf.mxu1  ;;  %v7956_v31 = vshll.u32 %v12927_v47, 16 }
 0x4cb   : > { %v6814_v18 = vpack.c.bf16 %v6766_v32, %v6766_v32  ;;  %v7584_v20 = vpop.f32.mrf.mxu2  ;;  %18944 = vst [vmem:[#allocation5_spill] sm:$0xff] %v17409_v8  ;;  %v7371_v32 = vor.u32 %v7370_v19, %v7367_v35  ;;  %v8595_v45 = vor.u32 %v8594_v33, %v8591_v15  ;;  %v7954_v11 = vor.u32 %v7952_v61, %v7950_v46 }
 0x4cc   : > { %v7585_v27 = vadd.f32 %v7584_v20, %v16498_v55  ;;  %v7958_v43 = vrot.slane %v7956_v31, 1  ;;  %v17432_v20 = vld [vmem:[#allocation2 + $0x60] sm:$0xff]   ;;  %v8598_v35 = vshrl.u32 %v14736_v53, 16  ;;  %v8601_v19 = vshll.u32 %v14736_v53, 16 }
 0x4cd   : > { %12526 = vmatmul.msk.bf16.vlgmr.msrb.gmra.mxu1 %vm2234_vm1, %v13847_v44  ;;  %6862 = vst.msk [vmem:[#allocation2 + $0xcc] sm:$0xf] %vm2051_vm5, %v6814_v18  ;;  %12510 = vmatmul.msk.bf16.gmra.mxu0 %vm2234_vm1, %v8587_v60  ;;  %v17414_v5 = vpop.f32.mrf.mxu0  ;;  %v7372_v18 = vsel %vm2467_vm2, %v7362_v56, %v7371_v32  ;;  %v13848_v60 = vld [vmem:[#allocation2 + $0x18] sm:$0xff]   ;;  %v7374_v56 = vshrl.u32 %v17432_v20, 16  ;;  %v7377_v52 = vshll.u32 %v17432_v20, 16  ;;  %v13849_v53 = vld [vmem:[#allocation2 + $0x20] sm:$0xff]  }
 0x4ce   : > { %18945 = vst [vmem:[#allocation12_spill] sm:$0xff] %v17414_v5  ;;  %v8158_v6 = vpop.f32.mrf.mxu3  ;;  %v7959_v39 = vsel %vm3070_vm3, %v7954_v11, %v7958_v43  ;;  %v8603_v61 = vrot.slane %v8601_v19, 4  ;;  %v14738_v19 = vld [vmem:[#allocation2 + $0x74] sm:$0xff]  }
 0x4cf   : > { %12485 = vmatmul.msk.bf16.gmra.mxu3 %vm2234_vm1, %v7951_v30  ;;  %v17418_v13 = vadd.f32 %v8158_v6, %v7585_v27  ;;  %v8596_v30 = vsel %vm2467_vm2, %v8586_v14, %v8595_v45  ;;  %v7376_v33 = vrot.slane %v7374_v56, 3  ;;  %v7379_v31 = vrot.slane %v7377_v52, 4  ;;  %v17458_v56 = vld [vmem:[#allocation2 + $0x68] sm:$0xff]  }
 0x4d1   : > { %v7380_v11 = vor.u32 %v7379_v31, %v7376_v33  ;;  %v7386_v33 = vshll.u32 %v17458_v56, 16 }
 0x4d2   : > { %v17422_v36 = vpop.f32.mrf.mxu1 }
 0x4d3   : > { %v17420_v48 = vpop.f32.mrf.mxu2  ;;  %18947 = vst [vmem:[#allocation27_spill] sm:$0xff] %v17422_v36 }
 0x4d4   : > { %18946 = vst [vmem:[#allocation6_spill] sm:$0xff] %v17420_v48 }
 0x4d5   : > { %v17424_v44 = vpop.f32.mrf.mxu0 }
 0x4d6   : > { %v17426_v55 = vpop.f32.mrf.mxu3 }
 0x4d7   : > { %18948 = vst [vmem:[#allocation11_spill] sm:$0xff] %v17426_v55  ;;  %v7960_v55 = vshrl.u32 %v12927_v47, 16 }
 0x4da   : > { %12365 = vmatmul.msk.bf16.gmra.mxu2 %vm2234_vm1, %v7372_v18  ;;  %v17441_v6 = vpop.f32.mrf.mxu1  ;;  %v12928_v18 = vld [vmem:[#allocation2 + $0x64] sm:$0xff] }
 0x4db   : > { %v7589_v27 = vpop.f32.mrf.mxu2  ;;  %18949 = vst [vmem:[#allocation28_spill] sm:$0xff] %v17441_v6 }
 0x4dc   : > { %v7590_v59 = vadd.f32 %v7589_v27, %v16552_v26  ;;  %v7381_v27 = vsel %vm2467_vm2, %v7371_v32, %v7380_v11 }
 0x4dd   : > { %12527 = vmatmul.msk.bf16.gmra.mxu1 %vm2234_vm1, %v13848_v60  ;;  %12511 = vmatmul.msk.bf16.gmra.mxu0 %vm2234_vm1, %v8596_v30  ;;  %v17443_v14 = vpop.f32.mrf.mxu0  ;;  %v8600_v60 = vrot.slane %v8598_v35, 3  ;;  %v7962_v35 = vor.u32 %v7960_v55, %v7958_v43  ;;  %v7388_v55 = vrot.slane %v7386_v33, 4  ;;  %v12929_v43 = vld [vmem:[#allocation2 + $0x6c] sm:$0xff] }
 0x4de   : > { %18950 = vst [vmem:[#allocation13_spill] sm:$0xff] %v17443_v14  ;;  %v8163_v46 = vpop.f32.mrf.mxu3  ;;  %v17480_v33 = vld [vmem:[#allocation2 + $0x70] sm:$0xff]  }
 0x4df   : > { %12486 = vmatmul.msk.bf16.gmra.mxu3 %vm2234_vm1, %v7959_v39  ;;  %v17445_v15 = vadd.f32 %v8163_v46, %v7590_v59  ;;  %v7964_v39 = vshll.u32 %v12928_v18, 16  ;;  %v8604_v5 = vor.u32 %v8603_v61, %v8600_v60  ;;  %v7383_v46 = vshrl.u32 %v17458_v56, 16 }
 0x4e0   : > { %v8607_v60 = vshrl.u32 %v14738_v19, 16  ;;  %v8610_v61 = vshll.u32 %v14738_v19, 16 }
 0x4e1   : > { %v7966_v14 = vrot.slane %v7964_v39, 1  ;;  %v8605_v52 = vsel %vm2467_vm2, %v8595_v45, %v8604_v5  ;;  %v7385_v45 = vrot.slane %v7383_v46, 3 }
 0x4e2   : > { %v17452_v48 = vpop.f32.mrf.mxu1 }
 0x4e3   : > { %v17447_v30 = vpop.f32.mrf.mxu2  ;;  %18953 = vst [vmem:[#allocation30_spill] sm:$0xff] %v17452_v48  ;;  %v7967_v47 = vsel %vm3070_vm3, %v7962_v35, %v7966_v14  ;;  %v7389_v41 = vor.u32 %v7388_v55, %v7385_v45 }
 0x4e4   : > { %18951 = vst [vmem:[#allocation14_spill] sm:$0xff] %v17447_v30 }
 0x4e5   : > { %v17454_v59 = vpop.f32.mrf.mxu0  ;;  %v7390_v19 = vsel %vm2467_vm2, %v7380_v11, %v7389_v41 }
 0x4e6   : > { %v17449_v26 = vpop.f32.mrf.mxu3 }
 0x4e7   : > { %18952 = vst [vmem:[#allocation15_spill] sm:$0xff] %v17449_v26 }
 0x4ea   : > { %12366 = vmatmul.msk.bf16.gmra.mxu2 %vm2234_vm1, %v7381_v27  ;;  %v17469_v26 = vpop.f32.mrf.mxu1 }
 0x4eb   : > { %v7594_v32 = vpop.f32.mrf.mxu2  ;;  %18954 = vst [vmem:[#allocation31_spill] sm:$0xff] %v17469_v26 }
 0x4ec   : > { %v7595_v31 = vadd.f32 %v7594_v32, %v16618_v57  ;;  %v13850_v32 = vld [vmem:[#allocation2 + $0x28] sm:$0xff]  }
 0x4ed   : > { %12528 = vmatmul.msk.bf16.gmra.mxu1 %vm2234_vm1, %v13849_v53  ;;  %12512 = vmatmul.msk.bf16.gmra.mxu0 %vm2234_vm1, %v8605_v52  ;;  %v8609_v53 = vrot.slane %v8607_v60, 3  ;;  %v8612_v52 = vrot.slane %v8610_v61, 4  ;;  %v17471_v35 = vpop.f32.mrf.mxu0 }
 0x4ee   : > { %v8168_v39 = vpop.f32.mrf.mxu3  ;;  %18955 = vst [vmem:[#allocation32_spill] sm:$0xff] %v17471_v35 }
 0x4ef   : > { %12487 = vmatmul.msk.bf16.gmra.mxu3 %vm2234_vm1, %v7967_v47  ;;  %v17467_v27 = vadd.f32 %v8168_v39, %v7595_v31  ;;  %v7972_v47 = vshll.u32 %v12929_v43, 16  ;;  %v8613_v7 = vor.u32 %v8612_v52, %v8609_v53  ;;  %v7968_v31 = vshrl.u32 %v12928_v18, 16  ;;  %v14740_v39 = vld [vmem:[#allocation2 + $0x7c] sm:$0xff]  }
 0x4f0   : > { %v7392_v18 = vshrl.u32 %v17480_v33, 16  ;;  %v7395_v52 = vshll.u32 %v17480_v33, 16 }
 0x4f1   : > { %v7974_v46 = vrot.slane %v7972_v47, 1  ;;  %v8614_v60 = vsel %vm2467_vm2, %v8604_v5, %v8613_v7  ;;  %v7970_v61 = vor.u32 %v7968_v31, %v7966_v14  ;;  %v8616_v5 = vshrl.u32 %v14740_v39, 16 }
 0x4f2   : > { %v17485_v53 = vpop.f32.mrf.mxu1  ;;  %v8619_v14 = vshll.u32 %v14740_v39, 16  ;;  %v7394_v31 = vrot.slane %v7392_v18, 3 }
 0x4f3   : > { %v17473_v30 = vpop.f32.mrf.mxu2  ;;  %v7975_v55 = vsel %vm3070_vm3, %v7970_v61, %v7974_v46  ;;  %18958 = vst [vmem:[#allocation35_spill] sm:$0xff] %v17485_v53  ;;  %v12930_v61 = vld [vmem:[#allocation2 + $0x74] sm:$0xff]  ;;  %v8618_v35 = vrot.slane %v8616_v5, 3 }
 0x4f4   : > { %18956 = vst [vmem:[#allocation33_spill] sm:$0xff] %v17473_v30  ;;  %v7980_v25 = vshll.u32 %v12930_v61, 16  ;;  %v7984_v6 = vshrl.u32 %v12930_v61, 16 }
 0x4f6   : > { %v17475_v57 = vpop.f32.mrf.mxu3  ;;  %v7982_v18 = vrot.slane %v7980_v25, 1 }
 0x4f7   : > { %18957 = vst [vmem:[#allocation34_spill] sm:$0xff] %v17475_v57  ;;  %v8621_v57 = vrot.slane %v8619_v14, 4 }
 0x4f8   : > { %v17487_v11 = vpop.f32.mrf.mxu0 }
 0x4f9   : > { %v8622_v26 = vor.u32 %v8621_v57, %v8618_v35  ;;  %v14742_v57 = vld [vmem:[#allocation2 + $0x84] sm:$0xff]  }
 0x4fa   : > { %12367 = vmatmul.msk.bf16.gmra.mxu2 %vm2234_vm1, %v7390_v19  ;;  %v17497_v48 = vpop.f32.mrf.mxu1  ;;  %v8625_v25 = vshrl.u32 %v14742_v57, 16 }
 0x4fb   : > { %v7599_v45 = vpop.f32.mrf.mxu2  ;;  %18960 = vst [vmem:[#allocation37_spill] sm:$0xff] %v17497_v48  ;;  %v8623_v5 = vsel %vm2467_vm2, %v8613_v7, %v8622_v26 }
 0x4fc   : > { %v7600_v47 = vadd.f32 %v7599_v45, %v16678_v10  ;;  %v13851_v45 = vld [vmem:[#allocation2 + $0x30] sm:$0xff]  }
 0x4fd   : > { %12529 = vmatmul.msk.bf16.gmra.mxu1 %vm2234_vm1, %v13850_v32  ;;  %12513 = vmatmul.msk.bf16.gmra.mxu0 %vm2234_vm1, %v8614_v60  ;;  %v7397_v60 = vrot.slane %v7395_v52, 4  ;;  %v17506_v52 = vld [vmem:[#allocation2 + $0x78] sm:$0xff]  }
 0x4fe   : > { %v8173_v19 = vpop.f32.mrf.mxu3 }
 0x4ff   : > { %12488 = vmatmul.msk.bf16.gmra.mxu3 %vm2234_vm1, %v7975_v55  ;;  %v17493_v32 = vadd.f32 %v8173_v19, %v7600_v47  ;;  %v7398_v30 = vor.u32 %v7397_v60, %v7394_v31  ;;  %v7976_v47 = vshrl.u32 %v12929_v43, 16  ;;  %v7401_v19 = vshrl.u32 %v17506_v52, 16 }
 0x500   : > { %v17499_v55 = vpop.f32.mrf.mxu0  ;;  %v8628_v43 = vshll.u32 %v14742_v57, 16 }
 0x501   : > { %18961 = vst [vmem:[#allocation38_spill] sm:$0xff] %v17499_v55  ;;  %v7399_v39 = vsel %vm2467_vm2, %v7389_v41, %v7398_v30  ;;  %v7978_v35 = vor.u32 %v7976_v47, %v7974_v46  ;;  %v7404_v41 = vshll.u32 %v17506_v52, 16  ;;  %v7403_v7 = vrot.slane %v7401_v19, 3  ;;  %v12931_v47 = vld [vmem:[#allocation2 + $0x7c] sm:$0xff] }
 0x502   : > { %v8630_v55 = vrot.slane %v8628_v43, 4  ;;  %v7988_v48 = vshll.u32 %v12931_v47, 16  ;;  %v17524_v19 = vld [vmem:[#allocation2 + $0x80] sm:$0xff]   ;;  %v7992_v8 = vshrl.u32 %v12931_v47, 16 }
 0x503   : > { %v17495_v53 = vpop.f32.mrf.mxu2  ;;  %v7983_v14 = vsel %vm3070_vm3, %v7978_v35, %v7982_v18  ;;  %v7406_v46 = vrot.slane %v7404_v41, 4  ;;  %v8627_v35 = vrot.slane %v8625_v25, 3  ;;  %v7986_v25 = vor.u32 %v7984_v6, %v7982_v18 }
 0x504   : > { %18959 = vst [vmem:[#allocation36_spill] sm:$0xff] %v17495_v53  ;;  %v7990_v36 = vrot.slane %v7988_v48, 1  ;;  %v7410_v61 = vshrl.u32 %v17524_v19, 16 }
 0x505   : > { %v7407_v53 = vor.u32 %v7406_v46, %v7403_v7  ;;  %v12932_v46 = vld [vmem:[#allocation2 + $0x84] sm:$0xff] }
 0x506   : > { %v17501_v10 = vpop.f32.mrf.mxu3  ;;  %v7991_v48 = vsel %vm3070_vm3, %v7986_v25, %v7990_v36  ;;  %v7412_v6 = vrot.slane %v7410_v61, 3  ;;  %v7996_v25 = vshll.u32 %v12932_v46, 16 }
 0x507   : > { %18962 = vst [vmem:[#allocation39_spill] sm:$0xff] %v17501_v10  ;;  %v7408_v57 = vsel %vm2467_vm2, %v7398_v30, %v7407_v53 }
 0x50a   : > { %12368 = vmatmul.msk.bf16.gmra.mxu2 %vm2234_vm1, %v7399_v39  ;;  %v17514_v60 = vpop.f32.mrf.mxu1 }
 0x50b   : > { %18963 = vst [vmem:[#allocation40_spill] sm:$0xff] %v17514_v60  ;;  %v14777_v60 = vld [vmem:[#allocation2 + $0x38] sm:$0xff]  }
 0x50d   : > { %12530 = vmatmul.msk.bf16.gmra.mxu1 %vm2234_vm1, %v13851_v45  ;;  %12514 = vmatmul.msk.bf16.gmra.mxu0 %vm2234_vm1, %v8623_v5 }
 0x50e   : > { %v17516_v39 = vpop.f32.mrf.mxu0 }
 0x50f   : > { %12489 = vmatmul.msk.bf16.gmra.mxu3 %vm2234_vm1, %v7983_v14  ;;  %v8631_v14 = vor.u32 %v8630_v55, %v8627_v35  ;;  %v7413_v55 = vshll.u32 %v17524_v19, 16 }
 0x511   : > { %v7604_v31 = vpop.f32.mrf.mxu2  ;;  %v7415_v18 = vrot.slane %v7413_v55, 4  ;;  %v17551_v55 = vld [vmem:[#allocation2 + $0x88] sm:$0xff]  }
 0x512   : > { %v7605_v45 = vadd.f32 %v7604_v31, %v16728_v63  ;;  %v8632_v63 = vsel %vm2467_vm2, %v8622_v26, %v8631_v14  ;;  %v17527_v41 = vpop.f32.mrf.mxu1  ;;  %v14744_v31 = vld [vmem:[#allocation2 + $0x8c] sm:$0xff]   ;;  %v7422_v47 = vshll.u32 %v17551_v55, 16 }
 0x513   : > { %v8178_v5 = vpop.f32.mrf.mxu3  ;;  %18964 = vst [vmem:[#allocation41_spill] sm:$0xff] %v17527_v41  ;;  %v8634_v26 = vshrl.u32 %v14744_v31, 16  ;;  %v8637_v7 = vshll.u32 %v14744_v31, 16  ;;  %v7998_v31 = vrot.slane %v7996_v25, 1  ;;  %v12933_v25 = vld [vmem:[#allocation2 + $0x8c] sm:$0xff] }
 0x514   : > { %v17519_v10 = vadd.f32 %v8178_v5, %v7605_v45 }
 0x515   : > { %v8636_v45 = vrot.slane %v8634_v26, 3  ;;  %v8639_v5 = vrot.slane %v8637_v7, 4  ;;  %v7994_v7 = vor.u32 %v7992_v8, %v7990_v36 }
 0x516   : > { %v17529_v43 = vpop.f32.mrf.mxu0 }
 0x517   : > { %18965 = vst [vmem:[#allocation42_spill] sm:$0xff] %v17529_v43 }
 0x519   : > { %v17532_v30 = vpop.f32.mrf.mxu2 }
 0x51a   : > { %12369 = vmatmul.msk.bf16.gmra.mxu2 %vm2234_vm1, %v7408_v57  ;;  %18966 = vst [vmem:[#allocation43_spill] sm:$0xff] %v17532_v30  ;;  %v8640_v30 = vor.u32 %v8639_v5, %v8636_v45  ;;  %v7424_v45 = vrot.slane %v7422_v47, 4 }
 0x51c   : > { %v8641_v26 = vsel %vm2467_vm2, %v8631_v14, %v8640_v30 }
 0x51d   : > { %12531 = vmatmul.msk.bf16.gmra.mxu1 %vm2234_vm1, %v14777_v60  ;;  %12515 = vmatmul.msk.bf16.gmra.mxu0 %vm2234_vm1, %v8632_v63  ;;  %v17538_v60 = vpop.f32.mrf.mxu3  ;;  %v7416_v63 = vor.u32 %v7415_v18, %v7412_v6  ;;  %v14746_v6 = vld [vmem:[#allocation2 + $0x94] sm:$0xff]  }
 0x51e   : > { %18967 = vst [vmem:[#allocation44_spill] sm:$0xff] %v17538_v60  ;;  %v8643_v14 = vshrl.u32 %v14746_v6, 16  ;;  %v8646_v8 = vshll.u32 %v14746_v6, 16  ;;  %v17574_v6 = vld [vmem:[#allocation2 + $0x90] sm:$0xff]  }
 0x51f   : > { %12490 = vmatmul.msk.bf16.gmra.mxu3 %vm2234_vm1, %v7991_v48  ;;  %v7417_v60 = vsel %vm2467_vm2, %v7407_v53, %v7416_v63  ;;  %v7419_v53 = vshrl.u32 %v17551_v55, 16 }
 0x520   : > { %v17540_v35 = vpop.f32.mrf.mxu1 }
 0x521   : > { %18968 = vst [vmem:[#allocation45_spill] sm:$0xff] %v17540_v35  ;;  %v7421_v18 = vrot.slane %v7419_v53, 3  ;;  %v8004_v35 = vshll.u32 %v12933_v25, 16 }
 0x525   : > { %v17542_v57 = vpop.f32.mrf.mxu0 }
 0x527   : > { %v7609_v43 = vpop.f32.mrf.mxu2 }
 0x528   : > { %v7610_v41 = vadd.f32 %v7609_v43, %v16767_v21  ;;  %v7999_v21 = vsel %vm3070_vm3, %v7994_v7, %v7998_v31  ;;  %v17559_v43 = vpop.f32.mrf.mxu1  ;;  %v7425_v7 = vor.u32 %v7424_v45, %v7421_v18 }
 0x529   : > { %v8183_v48 = vpop.f32.mrf.mxu3  ;;  %18969 = vst [vmem:[#allocation46_spill] sm:$0xff] %v17559_v43 }
 0x52a   : > { %v17546_v61 = vadd.f32 %v8183_v48, %v7610_v41  ;;  %12370 = vmatmul.msk.bf16.gmra.mxu2 %vm2234_vm1, %v7417_v60  ;;  %v8645_v48 = vrot.slane %v8643_v14, 3  ;;  %v7426_v24 = vsel %vm2467_vm2, %v7416_v63, %v7425_v7  ;;  %v7428_v63 = vshrl.u32 %v17574_v6, 16 }
 0x52c   : > { %v7430_v18 = vrot.slane %v7428_v63, 3 }
 0x52d   : > { %12532 = vmatmul.msk.bf16.gmra.mxu1 %vm2234_vm1, %v17217_v9  ;;  %12516 = vmatmul.msk.bf16.gmra.mxu0 %vm2234_vm1, %v8641_v26  ;;  %v17561_v9 = vpop.f32.mrf.mxu0  ;;  %v8648_v26 = vrot.slane %v8646_v8, 4 }
 0x52f   : > { %12491 = vmatmul.msk.bf16.gmra.mxu3 %vm2234_vm1, %v7999_v21  ;;  %v7611_v41 = vpop.f32.mrf.mxu2  ;;  %v8649_v51 = vor.u32 %v8648_v26, %v8645_v48  ;;  %v17587_v48 = vld [vmem:[#allocation2 + $0x94] sm:$0xff] }
 0x530   : > { %v7612_v60 = vadd.f32 %v7611_v41, %v16798_v38  ;;  %v8000_v38 = vshrl.u32 %v12932_v46, 16  ;;  %v8006_v41 = vrot.slane %v8004_v35, 1  ;;  %v7431_v46 = vshll.u32 %v17574_v6, 16 }
 0x531   : > { %v8185_v36 = vpop.f32.mrf.mxu3  ;;  %v8650_v53 = vsel %vm2467_vm2, %v8640_v30, %v8649_v51 }
 0x532   : > { %v17564_v5 = vadd.f32 %v8185_v36, %v7612_v60  ;;  %v8002_v47 = vor.u32 %v8000_v38, %v7998_v31  ;;  %v14748_v60 = vld [vmem:[#allocation2 + $0x9c] sm:$0xff]   ;;  %v7433_v45 = vrot.slane %v7431_v46, 4 }
 0x533   : > { %v8655_v35 = vshll.u32 %v14748_v60, 16 }
 0x534   : > { %v8007_v8 = vsel %vm3070_vm3, %v8002_v47, %v8006_v41 }
 0x53a   : > { %v17566_v21 = vpop.f32.mrf.mxu1  ;;  %v17568_v43 = vpop.f32.mrf.mxu0  ;;  %12371 = vmatmul.msk.bf16.gmra.mxu2 %vm2234_vm1, %v7426_v24 }
 0x53b   : > { %18970 = vst [vmem:[#allocation47_spill] sm:$0xff] %v17566_v21  ;;  %v7434_v21 = vor.u32 %v7433_v45, %v7430_v18 }
 0x53d   : > { %12533 = vmatmul.msk.bf16.gmra.mxu1 %vm2234_vm1, %v17280_v42  ;;  %12517 = vmatmul.msk.bf16.gmra.mxu0 %vm2234_vm1, %v8650_v53  ;;  %v7614_v14 = vpop.f32.mrf.mxu2  ;;  %v8652_v42 = vshrl.u32 %v14748_v60, 16  ;;  %v8657_v53 = vrot.slane %v8655_v35, 4  ;;  %v8918_v60 = vadd.f32 %v17263_v16, %v17356_v28  ;;  %v7435_v46 = vsel %vm2467_vm2, %v7425_v7, %v7434_v21  ;;  %v17605_v16 = vld [vmem:[#allocation2 + $0x98] sm:$0xff]  }
 0x53e   : > { %v7615_v36 = vadd.f32 %v7614_v14, %v16820_v1  ;;  %v7440_v45 = vshll.u32 %v17605_v16, 16 }
 0x53f   : > { %12492 = vmatmul.msk.bf16.gmra.mxu3 %vm2234_vm1, %v8007_v8  ;;  %v8654_v38 = vrot.slane %v8652_v42, 3  ;;  %v8012_v8 = vshll.u32 %v17587_v48, 16  ;;  %v8008_v42 = vshrl.u32 %v12933_v25, 16  ;;  %v7437_v25 = vshrl.u32 %v17605_v16, 16 }
 0x541   : > { %v8658_v1 = vor.u32 %v8657_v53, %v8654_v38  ;;  %v8014_v35 = vrot.slane %v8012_v8, 1  ;;  %v8010_v28 = vor.u32 %v8008_v42, %v8006_v41 }
 0x542   : > { %v17582_v24 = vpop.f32.mrf.mxu1  ;;  %v17585_v30 = vpop.f32.mrf.mxu0 }
 0x543   : > { %18971 = vst [vmem:[#allocation48_spill] sm:$0xff] %v17582_v24  ;;  %v8188_v31 = vpop.f32.mrf.mxu3  ;;  %v8015_v7 = vsel %vm3070_vm3, %v8010_v28, %v8014_v35 }
 0x544   : > { %18972 = vst [vmem:[#allocation49_spill] sm:$0xff] %v17585_v30  ;;  %v17589_v26 = vadd.f32 %v8188_v31, %v7615_v36 }
 0x545   : > { %v7616_v47 = vpop.f32.mrf.mxu2 }
 0x546   : > { %v7617_v14 = vadd.f32 %v7616_v47, %v16859_v22  ;;  %v8659_v22 = vsel %vm2467_vm2, %v8649_v51, %v8658_v1 }
 0x54a   : > { %v9076_v24 = vpop.f32.mrf.mxu1  ;;  %v17597_v63 = vpop.f32.mrf.mxu0  ;;  %12372 = vmatmul.msk.bf16.gmra.mxu2 %vm2234_vm1, %v7435_v46  ;;  %v7442_v46 = vrot.slane %v7440_v45, 4 }
 0x54b   : > { %v17595_v30 = vadd.f32 %v9076_v24, %v8918_v60  ;;  %v8190_v36 = vpop.f32.mrf.mxu3  ;;  %v14750_v24 = vld [vmem:[#allocation2 + $0xa4] sm:$0xff]  }
 0x54c   : > { %v17601_v31 = vadd.f32 %v8190_v36, %v7617_v14  ;;  %v8661_v53 = vshrl.u32 %v14750_v24, 16  ;;  %v8664_v47 = vshll.u32 %v14750_v24, 16  ;;  %v7439_v14 = vrot.slane %v7437_v25, 3  ;;  %v12935_v36 = vld [vmem:[#allocation2 + $0x9c] sm:$0xff] }
 0x54d   : > { %18973 = vst [vmem:[#allocation50_spill] sm:$0xff] %v17595_v30  ;;  %12534 = vmatmul.msk.bf16.gmra.mxu1 %vm2234_vm1, %v17349_v50  ;;  %12518 = vmatmul.msk.bf16.gmra.mxu0 %vm2234_vm1, %v8659_v22  ;;  %v7619_v18 = vpop.f32.mrf.mxu2  ;;  %v8919_v50 = vadd.f32 %v17290_v54, %v17373_v40  ;;  %v8020_v54 = vshll.u32 %v12935_v36, 16  ;;  %v8920_v40 = vadd.f32 %v17310_v3, %v17384_v23  ;;  %v17636_v3 = vld [vmem:[#allocation2 + $0xa0] sm:$0xff]  }
 0x54e   : > { %v7620_v51 = vadd.f32 %v7619_v18, %v16883_v37  ;;  %v8663_v22 = vrot.slane %v8661_v53, 3  ;;  %v8666_v28 = vrot.slane %v8664_v47, 4  ;;  %v7443_v30 = vor.u32 %v7442_v46, %v7439_v14 }
 0x54f   : > { %12493 = vmatmul.msk.bf16.gmra.mxu3 %vm2234_vm1, %v8015_v7  ;;  %v8016_v53 = vshrl.u32 %v17587_v48, 16  ;;  %v8022_v47 = vrot.slane %v8020_v54, 1  ;;  %v7446_v48 = vshrl.u32 %v17636_v3, 16  ;;  %v7449_v46 = vshll.u32 %v17636_v3, 16 }
 0x550   : > { %v8667_v37 = vor.u32 %v8666_v28, %v8663_v22  ;;  %v7444_v25 = vsel %vm2467_vm2, %v7434_v21, %v7443_v30 }
 0x551   : > { %v8018_v23 = vor.u32 %v8016_v53, %v8014_v35  ;;  %v7448_v54 = vrot.slane %v7446_v48, 3 }
 0x552   : > { %v9078_v38 = vpop.f32.mrf.mxu1  ;;  %v17618_v8 = vpop.f32.mrf.mxu0 }
 0x553   : > { %v17616_v41 = vadd.f32 %v9078_v38, %v8919_v50  ;;  %v8193_v60 = vpop.f32.mrf.mxu3  ;;  %v8023_v14 = vsel %vm3070_vm3, %v8018_v23, %v8022_v47 }
 0x554   : > { %v17620_v42 = vadd.f32 %v8193_v60, %v7620_v51  ;;  %v14752_v60 = vld [vmem:[#allocation2 + $0xac] sm:$0xff]  }
 0x555   : > { %18974 = vst [vmem:[#allocation51_spill] sm:$0xff] %v17616_v41  ;;  %v7621_v7 = vpop.f32.mrf.mxu2  ;;  %v8673_v28 = vshll.u32 %v14752_v60, 16 }
 0x556   : > { %v7622_v18 = vadd.f32 %v7621_v7, %v16915_v62  ;;  %v8668_v62 = vsel %vm2467_vm2, %v8658_v1, %v8667_v37 }
 0x55a   : > { %v9081_v24 = vpop.f32.mrf.mxu1  ;;  %v17627_v38 = vpop.f32.mrf.mxu0  ;;  %12373 = vmatmul.msk.bf16.gmra.mxu2 %vm2234_vm1, %v7444_v25 }
 0x55b   : > { %v17625_v50 = vadd.f32 %v9081_v24, %v8920_v40  ;;  %v8195_v45 = vpop.f32.mrf.mxu3  ;;  %v7451_v40 = vrot.slane %v7449_v46, 4  ;;  %v12936_v24 = vld [vmem:[#allocation2 + $0xa4] sm:$0xff] }
 0x55c   : > { %v17632_v51 = vadd.f32 %v8195_v45, %v7622_v18  ;;  %v8675_v45 = vrot.slane %v8673_v28, 4  ;;  %v8028_v23 = vshll.u32 %v12936_v24, 16 }
 0x55d   : > { %18975 = vst [vmem:[#allocation52_spill] sm:$0xff] %v17625_v50  ;;  %12535 = vmatmul.msk.bf16.gmra.mxu1 %vm2234_vm1, %v17402_v34  ;;  %12519 = vmatmul.msk.bf16.gmra.mxu0 %vm2234_vm1, %v8668_v62  ;;  %v7624_v21 = vpop.f32.mrf.mxu2  ;;  %v8670_v34 = vshrl.u32 %v14752_v60, 16  ;;  %v7452_v62 = vor.u32 %v7451_v40, %v7448_v54 }
 0x55e   : > { %v7625_v7 = vadd.f32 %v7624_v21, %v16943_v0 }
 0x55f   : > { %12494 = vmatmul.msk.bf16.gmra.mxu3 %vm2234_vm1, %v8023_v14  ;;  %v8672_v25 = vrot.slane %v8670_v34, 3  ;;  %v8922_v14 = vadd.f32 %v17392_v49, %v17418_v13  ;;  %v7453_v48 = vsel %vm2467_vm2, %v7443_v30, %v7452_v62  ;;  %v8030_v34 = vrot.slane %v8028_v23, 1  ;;  %v17664_v49 = vld [vmem:[#allocation2 + $0xa8] sm:$0xff]  }
 0x560   : > { %v7458_v54 = vshll.u32 %v17664_v49, 16 }
 0x561   : > { %v8676_v60 = vor.u32 %v8675_v45, %v8672_v25 }
 0x562   : > { %v17644_v22 = vpop.f32.mrf.mxu1  ;;  %v17647_v1 = vpop.f32.mrf.mxu0  ;;  %v7460_v23 = vrot.slane %v7458_v54, 4 }
 0x563   : > { %18976 = vst [vmem:[#allocation53_spill] sm:$0xff] %v17644_v22  ;;  %v8198_v35 = vpop.f32.mrf.mxu3 }
 0x564   : > { %v17649_v18 = vadd.f32 %v8198_v35, %v7625_v7  ;;  %v8024_v7 = vshrl.u32 %v12935_v36, 16  ;;  %v7455_v36 = vshrl.u32 %v17664_v49, 16 }
 0x565   : > { %v7626_v53 = vpop.f32.mrf.mxu2 }
 0x566   : > { %v7627_v0 = vadd.f32 %v7626_v53, %v16965_v29  ;;  %v8677_v29 = vsel %vm2467_vm2, %v8667_v37, %v8676_v60  ;;  %v8026_v13 = vor.u32 %v8024_v7, %v8022_v47  ;;  %v7457_v53 = vrot.slane %v7455_v36, 3 }
 0x568   : > { %v8031_v30 = vsel %vm3070_vm3, %v8026_v13, %v8030_v34 }
 0x56a   : > { %v9086_v22 = vpop.f32.mrf.mxu1  ;;  %v17656_v50 = vpop.f32.mrf.mxu0  ;;  %12374 = vmatmul.msk.bf16.gmra.mxu2 %vm2234_vm1, %v7453_v48 }
 0x56b   : > { %v17654_v21 = vadd.f32 %v9086_v22, %v8922_v14  ;;  %v8200_v46 = vpop.f32.mrf.mxu3  ;;  %v14754_v22 = vld [vmem:[#allocation2 + $0xb4] sm:$0xff]   ;;  %v12937_v14 = vld [vmem:[#allocation2 + $0xac] sm:$0xff] }
 0x56c   : > { %v17660_v28 = vadd.f32 %v8200_v46, %v7627_v0  ;;  %v8682_v25 = vshll.u32 %v14754_v22, 16  ;;  %v8036_v13 = vshll.u32 %v12937_v14, 16 }
 0x56d   : > { %18977 = vst [vmem:[#allocation54_spill] sm:$0xff] %v17654_v21  ;;  %12536 = vmatmul.msk.bf16.gmra.mxu1 %vm2234_vm1, %v17432_v20  ;;  %12520 = vmatmul.msk.bf16.gmra.mxu0 %vm2234_vm1, %v8677_v29  ;;  %v7629_v35 = vpop.f32.mrf.mxu2  ;;  %v8679_v20 = vshrl.u32 %v14754_v22, 16  ;;  %v7461_v29 = vor.u32 %v7460_v23, %v7457_v53 }
 0x56e   : > { %v7630_v45 = vadd.f32 %v7629_v35, %v17002_v4  ;;  %v8684_v46 = vrot.slane %v8682_v25, 4 }
 0x56f   : > { %12495 = vmatmul.msk.bf16.gmra.mxu3 %vm2234_vm1, %v8031_v30  ;;  %v8681_v48 = vrot.slane %v8679_v20, 3  ;;  %v8924_v30 = vadd.f32 %v17424_v44, %v17445_v15  ;;  %v7462_v36 = vsel %vm2467_vm2, %v7452_v62, %v7461_v29  ;;  %v8038_v20 = vrot.slane %v8036_v13, 1  ;;  %v17692_v44 = vld [vmem:[#allocation2 + $0xb0] sm:$0xff]  }
 0x570   : > { %v7467_v53 = vshll.u32 %v17692_v44, 16 }
 0x571   : > { %v8685_v22 = vor.u32 %v8684_v46, %v8681_v48 }
 0x572   : > { %v17672_v40 = vpop.f32.mrf.mxu1  ;;  %v17675_v37 = vpop.f32.mrf.mxu0  ;;  %v7469_v13 = vrot.slane %v7467_v53, 4 }
 0x573   : > { %18978 = vst [vmem:[#allocation55_spill] sm:$0xff] %v17672_v40  ;;  %v8203_v47 = vpop.f32.mrf.mxu3 }
 0x574   : > { %v17677_v0 = vadd.f32 %v8203_v47, %v7630_v45  ;;  %v8032_v45 = vshrl.u32 %v12936_v24, 16  ;;  %v7464_v24 = vshrl.u32 %v17692_v44, 16 }
 0x575   : > { %v7631_v7 = vpop.f32.mrf.mxu2 }
 0x576   : > { %v7632_v4 = vadd.f32 %v7631_v7, %v17024_v58  ;;  %v8686_v58 = vsel %vm2467_vm2, %v8676_v60, %v8685_v22  ;;  %v8034_v15 = vor.u32 %v8032_v45, %v8030_v34  ;;  %v7466_v7 = vrot.slane %v7464_v24, 3 }
 0x578   : > { %v8039_v62 = vsel %vm3070_vm3, %v8034_v15, %v8038_v20 }
 0x57a   : > { %v9091_v40 = vpop.f32.mrf.mxu1  ;;  %v17684_v21 = vpop.f32.mrf.mxu0  ;;  %12375 = vmatmul.msk.bf16.gmra.mxu2 %vm2234_vm1, %v7462_v36 }
 0x57b   : > { %v17682_v35 = vadd.f32 %v9091_v40, %v8924_v30  ;;  %v8205_v54 = vpop.f32.mrf.mxu3  ;;  %v14756_v40 = vld [vmem:[#allocation2 + $0xbc] sm:$0xff]   ;;  %v17705_v30 = vld [vmem:[#allocation2 + $0xb4] sm:$0xff] }
 0x57c   : > { %v17688_v25 = vadd.f32 %v8205_v54, %v7632_v4  ;;  %v8691_v48 = vshll.u32 %v14756_v40, 16  ;;  %v8044_v15 = vshll.u32 %v17705_v30, 16 }
 0x57d   : > { %18979 = vst [vmem:[#allocation56_spill] sm:$0xff] %v17682_v35  ;;  %12537 = vmatmul.msk.bf16.gmra.mxu1 %vm2234_vm1, %v17458_v56  ;;  %12521 = vmatmul.msk.bf16.gmra.mxu0 %vm2234_vm1, %v8686_v58  ;;  %v7634_v47 = vpop.f32.mrf.mxu2  ;;  %v8688_v56 = vshrl.u32 %v14756_v40, 16  ;;  %v7470_v58 = vor.u32 %v7469_v13, %v7466_v7  ;;  %v8926_v40 = vadd.f32 %v17454_v59, %v17467_v27 }
 0x57e   : > { %v7635_v46 = vadd.f32 %v7634_v47, %v17067_v17  ;;  %v8693_v54 = vrot.slane %v8691_v48, 4  ;;  %v8046_v48 = vrot.slane %v8044_v15, 1 }
 0x57f   : > { %12496 = vmatmul.msk.bf16.gmra.mxu3 %vm2234_vm1, %v8039_v62  ;;  %v8690_v36 = vrot.slane %v8688_v56, 3  ;;  %v7471_v53 = vsel %vm2467_vm2, %v7461_v29, %v7470_v58  ;;  %v8040_v56 = vshrl.u32 %v12937_v14, 16  ;;  %v14778_v29 = vld [vmem:[#allocation2 + $0xb8] sm:$0xff]  }
 0x580   : > { %v7476_v14 = vshll.u32 %v14778_v29, 16 }
 0x581   : > { %v8694_v17 = vor.u32 %v8693_v54, %v8690_v36  ;;  %v8042_v27 = vor.u32 %v8040_v56, %v8038_v20  ;;  %v7473_v36 = vshrl.u32 %v14778_v29, 16 }
 0x582   : > { %v17700_v23 = vpop.f32.mrf.mxu1  ;;  %v17703_v60 = vpop.f32.mrf.mxu0 }
 0x583   : > { %18980 = vst [vmem:[#allocation57_spill] sm:$0xff] %v17700_v23  ;;  %v8208_v34 = vpop.f32.mrf.mxu3  ;;  %v8695_v59 = vsel %vm2467_vm2, %v8685_v22, %v8694_v17  ;;  %v8047_v13 = vsel %vm3070_vm3, %v8042_v27, %v8046_v48  ;;  %v7475_v20 = vrot.slane %v7473_v36, 3  ;;  %v17736_v27 = vld [vmem:[#allocation2 + $0xc8] sm:$0xff]  }
 0x584   : > { %v17707_v4 = vadd.f32 %v8208_v34, %v7635_v46  ;;  %v13455_v36 = vunpack.c.h.b16 %v17736_v27 }
 0x585   : > { %v7636_v45 = vpop.f32.mrf.mxu2 }
 0x586   : > { %v7637_v47 = vadd.f32 %v7636_v45, %v17084_v12  ;;  %v14757_v12 = vld [vmem:[#allocation2 + $0xc4] sm:$0xff]  }
 0x587   : > { %v8697_v45 = vshrl.u32 %v14757_v12, 16  ;;  %v8700_v15 = vshll.u32 %v14757_v12, 16  ;;  %v8928_v12 = vadd.f32 %v17487_v11, %v17493_v32  ;;  %v7742_v32 = vld [vmem:[#allocation2 + $0xc4] sm:$0x1] }
 0x589   : > { %v8699_v56 = vrot.slane %v8697_v45, 3  ;;  %v7265_v45 = vpack.c.b16 %v17313_v2, %v17313_v2  ;;  %v8489_v2 = vpack.c.b16 %v13455_v36, %v13455_v36 }
 0x58a   : > { %v9096_v62 = vpop.f32.mrf.mxu1  ;;  %v17715_v24 = vpop.f32.mrf.mxu0  ;;  %12376 = vmatmul.msk.bf16.gmra.mxu2 %vm2234_vm1, %v7471_v53  ;;  %v17732_v53 = vld [vmem:[#allocation2 + $0xbc] sm:$0xff] }
 0x58b   : > { %v17713_v23 = vadd.f32 %v9096_v62, %v8926_v40  ;;  %v8210_v46 = vpop.f32.mrf.mxu3  ;;  %v18983_v40 = vld [vmem:[#allocation8_spill] sm:$0xff] }
 0x58c   : > { %v17719_v34 = vadd.f32 %v8210_v46, %v7637_v47  ;;  %v7478_v47 = vrot.slane %v7476_v14, 4  ;;  %18984 = vst [vmem:[#allocation8_spill] sm:$0xff] %v17736_v27  ;;  %v18985_v14 = vld [vmem:[#allocation21_spill] sm:$0xff]  ;;  %v18990_v27 = vld [vmem:[#allocation22_spill] sm:$0xff] }
 0x58d   : > { %18981 = vst [vmem:[#allocation58_spill] sm:$0xff] %v17713_v23  ;;  %12538 = vmatmul.msk.bf16.gmra.mxu1 %vm2234_vm1, %v17480_v33  ;;  %12522 = vmatmul.msk.bf16.gmra.mxu0 %vm2234_vm1, %v8695_v59  ;;  %v7639_v7 = vpop.f32.mrf.mxu2  ;;  %v8702_v59 = vrot.slane %v8700_v15, 4 }
 0x58e   : > { %v7640_v33 = vadd.f32 %v7639_v7, %v18983_v40  ;;  %v7479_v29 = vor.u32 %v7478_v47, %v7475_v20  ;;  %v8048_v20 = vshrl.u32 %v17705_v30, 16  ;;  %v7485_v30 = vshll.u32 %v7265_v45, 16 }
 0x58f   : > { %12497 = vmatmul.msk.bf16.gmra.mxu3 %vm2234_vm1, %v8047_v13  ;;  %v8703_v40 = vor.u32 %v8702_v59, %v8699_v56 }
 0x590   : > { %v8050_v59 = vor.u32 %v8048_v20, %v8046_v48  ;;  %v7487_v36 = vrot.slane %v7485_v30, 4 }
 0x591   : > { %v8704_v56 = vsel %vm2467_vm2, %v8694_v17, %v8703_v40 }
 0x592   : > { %v17727_v54 = vpop.f32.mrf.mxu1  ;;  %v17730_v62 = vpop.f32.mrf.mxu0 }
 0x593   : > { %18982 = vst [vmem:[#allocation59_spill] sm:$0xff] %v17727_v54  ;;  %v8213_v22 = vpop.f32.mrf.mxu3  ;;  %v8052_v54 = vshll.u32 %v17732_v53, 16 }
 0x594   : > { %v17734_v46 = vadd.f32 %v8213_v22, %v7640_v33  ;;  %v7480_v33 = vsel %vm2467_vm2, %v7470_v58, %v7479_v29 }
 0x595   : > { %v7641_v13 = vpop.f32.mrf.mxu2  ;;  %v8054_v47 = vrot.slane %v8052_v54, 1  ;;  %v7842_v54 = vunpack.c.l.b16 %v7742_v32 }
 0x596   : > { %v7642_v23 = vadd.f32 %v7641_v13, %v18985_v14  ;;  %v8709_v14 = vshll.u32 %v8489_v2, 16 }
 0x597   : > { %v8055_v58 = vsel %vm3070_vm3, %v8050_v59, %v8054_v47  ;;  %v7867_v20 = vpack.c.b16 %v7842_v54, %v7842_v54 }
 0x599   : > { %v8060_v41 = vshll.u32 %v7867_v20, 16 }
 0x59a   : > { %v9101_v7 = vpop.f32.mrf.mxu1  ;;  %v17747_v15 = vpop.f32.mrf.mxu0  ;;  %12377 = vmatmul.msk.bf16.gmra.mxu2 %vm2234_vm1, %v7480_v33 }
 0x59b   : > { %v17743_v35 = vadd.f32 %v9101_v7, %v8928_v12  ;;  %v8215_v22 = vpop.f32.mrf.mxu3  ;;  %v7482_v12 = vshrl.u32 %v7265_v45, 16  ;;  %v8706_v7 = vshrl.u32 %v8489_v2, 16 }
 0x59c   : > { %v17752_v11 = vadd.f32 %v8215_v22, %v7642_v23 }
 0x59d   : > { %18986 = vst [vmem:[#allocation21_spill] sm:$0xff] %v17743_v35  ;;  %12539 = vmatmul.msk.bf16.gmra.mxu1 %vm2234_vm1, %v17506_v52  ;;  %12523 = vmatmul.msk.bf16.gmra.mxu0 %vm2234_vm1, %v8704_v56  ;;  %v7644_v13 = vpop.f32.mrf.mxu2  ;;  %v18988_v52 = vld [vmem:[#allocation9_spill] sm:$0xff]  ;;  %v7484_v48 = vrot.slane %v7482_v12, 3  ;;  %v8708_v59 = vrot.slane %v8706_v7, 3  ;;  %v8711_v35 = vrot.slane %v8709_v14, 4  ;;  %v8056_v7 = vshrl.u32 %v17732_v53, 16 }
 0x59e   : > { %v7645_v33 = vadd.f32 %v7644_v13, %v18988_v52  ;;  %v8062_v14 = vrot.slane %v8060_v41, 1  ;;  %v17784_v53 = vld [vmem:[#allocation2 + $0x18] sm:$0xff] }
 0x59f   : > { %12498 = vmatmul.msk.bf16.gmra.mxu3 %vm2234_vm1, %v8055_v58  ;;  %v7488_v32 = vor.u32 %v7487_v36, %v7484_v48  ;;  %v8930_v58 = vadd.f32 %v17516_v39, %v17519_v10  ;;  %v8712_v2 = vor.u32 %v8711_v35, %v8708_v59  ;;  %v9866_v10 = vld [vmem:[#allocation2 + $0x18] sm:$0x8]  ;;  %v8058_v35 = vor.u32 %v8056_v7, %v8054_v47  ;;  %v13871_v48 = vld [vmem:[#allocation2 + $0x20] sm:$0xff]  }
 0x5a0   : > { %v9966_v41 = vunpack.c.l.b16 %v9866_v10  ;;  %v18994_v59 = vld [vmem:[#allocation10_spill] sm:$0xff] }
 0x5a1   : > { %v7489_v30 = vsel %vm2467_vm2, %v7479_v29, %v7488_v32  ;;  %v8713_v39 = vsel %vm2467_vm2, %v8703_v40, %v8712_v2  ;;  %v10049_v32 = vshrl.u32 %v13871_v48, 16 }
 0x5a2   : > { %v17760_v23 = vpop.f32.mrf.mxu1  ;;  %v17763_v22 = vpop.f32.mrf.mxu0 }
 0x5a3   : > { %18987 = vst [vmem:[#allocation60_spill] sm:$0xff] %v17760_v23  ;;  %v8218_v17 = vpop.f32.mrf.mxu3 }
 0x5a4   : > { %18989 = vst [vmem:[#allocation9_spill] sm:$0xff] %v17763_v22  ;;  %v17765_v56 = vadd.f32 %v8218_v17, %v7645_v33  ;;  %v9867_v22 = vld [vmem:[#allocation2 + $0x1c] sm:$0xf]  ;;  %v8063_v17 = vsel %vm3070_vm3, %v8058_v35, %v8062_v14 }
 0x5a5   : > { %v7646_v45 = vpop.f32.mrf.mxu2 }
 0x5a6   : > { %v7647_v13 = vadd.f32 %v7646_v45, %v18990_v27  ;;  %v12940_v27 = vld [vmem:[#allocation2 + $0x10] sm:$0xff]  ;;  %v9426_v45 = vshll.u32 %v17784_v53, 16 }
 0x5a7   : > { %v9419_v14 = vshrl.u32 %v12940_v27, 16 }
 0x5a8   : > { %v9428_v10 = vrot.slane %v9426_v45, 1 }
 0x5aa   : > { %v9106_v23 = vpop.f32.mrf.mxu1  ;;  %v17772_v12 = vpop.f32.mrf.mxu0  ;;  %12378 = vmatmul.msk.bf16.gmra.mxu2 %vm2234_vm1, %v7489_v30 }
 0x5ab   : > { %v17770_v52 = vadd.f32 %v9106_v23, %v8930_v58  ;;  %18992 = vst [vmem:[#allocation61_spill] sm:$0xff] %v17772_v12  ;;  %v8220_v54 = vpop.f32.mrf.mxu3  ;;  %v9967_v23 = vunpack.c.l.b16 %v9867_v22  ;;  %v10052_v58 = vshll.u32 %v13871_v48, 16 }
 0x5ac   : > { %v17777_v33 = vadd.f32 %v8220_v54, %v7647_v13 }
 0x5ad   : > { %18991 = vst [vmem:[#allocation22_spill] sm:$0xff] %v17770_v52  ;;  %12540 = vmatmul.msk.bf16.gmra.mxu1 %vm2234_vm1, %v17524_v19  ;;  %12524 = vmatmul.msk.bf16.gmra.mxu0 %vm2234_vm1, %v8713_v39  ;;  %v7649_v29 = vpop.f32.mrf.mxu2  ;;  %v9421_v19 = vshll.u32 %v12940_v27, 16  ;;  %v10015_v20 = vpack.c.b16 %v9967_v23, %v9966_v41  ;;  %v10051_v39 = vrot.slane %v10049_v32, 3  ;;  %v10054_v35 = vrot.slane %v10052_v58, 4  ;;  %v12942_v32 = vld [vmem:[#allocation2 + $0x20] sm:$0xff] }
 0x5ae   : > { %v7650_v40 = vadd.f32 %v7649_v29, %v18994_v59  ;;  %v8932_v29 = vadd.f32 %v17542_v57, %v17546_v61  ;;  %v8933_v58 = vadd.f32 %v17561_v9, %v17564_v5  ;;  %v8934_v5 = vadd.f32 %v17568_v43, %v17589_v26  ;;  %v14532_v43 = vld [vmem:[#allocation2 + $0x24] sm:$0xff]  }
 0x5af   : > { %12499 = vmatmul.msk.bf16.gmra.mxu3 %vm2234_vm1, %v8063_v17  ;;  %v9423_v13 = vrot.slane %v9421_v19, 1  ;;  %v10041_v30 = vshrl.u32 %v10015_v20, 16  ;;  %v10044_v54 = vshll.u32 %v10015_v20, 16  ;;  %v13458_v17 = vunpack.c.l.b16 %v13871_v48 }
 0x5b1   : > { %v9424_v59 = vor.u32 %v9423_v13, %v9419_v14  ;;  %v10046_v52 = vrot.slane %v10044_v54, 4  ;;  %v10518_v57 = vpack.c.b16 %v13458_v17, %v9967_v23  ;;  %v9434_v23 = vshll.u32 %v12942_v32, 16 }
 0x5b2   : > { %v17787_v36 = vpop.f32.mrf.mxu1  ;;  %v17790_v47 = vpop.f32.mrf.mxu0 }
 0x5b3   : > { %18993 = vst [vmem:[#allocation62_spill] sm:$0xff] %v17787_v36  ;;  %v8223_v22 = vpop.f32.mrf.mxu3  ;;  %v10043_v36 = vrot.slane %v10041_v30, 3  ;;  %v9429_v27 = vsel %vm3070_vm3, %v9424_v59, %v9428_v10  ;;  %v18997_v30 = vld [vmem:[#allocation23_spill] sm:$0xff]  ;;  %v9436_v17 = vrot.slane %v9434_v23, 1 }
 0x5b4   : > { %18995 = vst [vmem:[#allocation10_spill] sm:$0xff] %v17790_v47  ;;  %v17793_v2 = vadd.f32 %v8223_v22, %v7650_v40  ;;  %v18996_v47 = vld [vmem:[#allocation29_spill] sm:$0xff]  ;;  %v10055_v22 = vor.u32 %v10054_v35, %v10051_v39 }
 0x5b5   : > { %v7651_v7 = vpop.f32.mrf.mxu2  ;;  %v10047_v61 = vor.u32 %v10046_v52, %v10043_v36 }
 0x5b6   : > { %v7652_v12 = vadd.f32 %v7651_v7, %v18996_v47 }
 0x5b7   : > { %v10056_v47 = vsel %vm2467_vm2, %v10047_v61, %v10055_v22 }
 0x5ba   : > { %v9111_v41 = vpop.f32.mrf.mxu1  ;;  %v17800_v19 = vpop.f32.mrf.mxu0  ;;  %12647 = vmatmul.msk.bf16.vlgmr.msra.gmra.mxu2 %vm2234_vm1, %v9429_v27  ;;  %v18998_v27 = vld [vmem:[#allocation24_spill] sm:$0xff] }
 0x5bb   : > { %v17798_v40 = vadd.f32 %v9111_v41, %v8932_v29  ;;  %v8225_v20 = vpop.f32.mrf.mxu3  ;;  %v9430_v29 = vshrl.u32 %v17784_v53, 16 }
 0x5bc   : > { %v17803_v45 = vadd.f32 %v8225_v20, %v7652_v12  ;;  %v13872_v12 = vld [vmem:[#allocation2 + $0x28] sm:$0xff]  }
 0x5bd   : > { %12541 = vmatmul.msk.bf16.gmra.mxu1 %vm2234_vm1, %v17551_v55  ;;  %12697 = vmatmul.msk.bf16.vlgmr.msra.gmra.mxu0 %vm2234_vm1, %v10518_v57  ;;  %v7654_v48 = vpop.f32.mrf.mxu2  ;;  %v10058_v36 = vshrl.u32 %v13872_v12, 16  ;;  %v10061_v14 = vshll.u32 %v13872_v12, 16  ;;  %v9432_v20 = vor.u32 %v9430_v29, %v9428_v10  ;;  %v12943_v10 = vld [vmem:[#allocation2 + $0x28] sm:$0xff] }
 0x5be   : > { %v7655_v54 = vadd.f32 %v7654_v48, %v18997_v30  ;;  %v18999_v30 = vld [vmem:[#allocation49_spill] sm:$0xff] }
 0x5bf   : > { %12672 = vmatmul.msk.bf16.vlgmr.msra.gmra.mxu3 %vm2234_vm1, %v10056_v47  ;;  %v10060_v41 = vrot.slane %v10058_v36, 3  ;;  %v10063_v9 = vrot.slane %v10061_v14, 4  ;;  %v19000_v36 = vld [vmem:[#allocation4_spill] sm:$0xff] }
 0x5c1   : > { %v10064_v12 = vor.u32 %v10063_v9, %v10060_v41  ;;  %v9442_v41 = vshll.u32 %v12943_v10, 16 }
 0x5c2   : > { %v9113_v13 = vpop.f32.mrf.mxu1  ;;  %v17816_v55 = vpop.f32.mrf.mxu0 }
 0x5c3   : > { %v17814_v7 = vadd.f32 %v9113_v13, %v8933_v58  ;;  %v8228_v52 = vpop.f32.mrf.mxu3  ;;  %v9437_v58 = vsel %vm3070_vm3, %v9432_v20, %v9436_v17  ;;  %v10065_v53 = vsel %vm2467_vm2, %v10055_v22, %v10064_v12  ;;  %v9438_v20 = vshrl.u32 %v12942_v32, 16 }
 0x5c4   : > { %v17818_v39 = vadd.f32 %v8228_v52, %v7655_v54  ;;  %v8935_v54 = vadd.f32 %v18999_v30, %v17601_v31  ;;  %v13873_v52 = vld [vmem:[#allocation2 + $0x30] sm:$0xff]   ;;  %v8936_v31 = vadd.f32 %v17597_v63, %v17620_v42 }
 0x5c5   : > { %v7656_v35 = vpop.f32.mrf.mxu2  ;;  %v10067_v9 = vshrl.u32 %v13873_v52, 16  ;;  %v14534_v63 = vld [vmem:[#allocation2 + $0x2c] sm:$0xff]  }
 0x5c6   : > { %v7657_v57 = vadd.f32 %v7656_v35, %v18998_v27  ;;  %v9444_v27 = vrot.slane %v9442_v41, 1  ;;  %v13874_v41 = vld [vmem:[#allocation2 + $0x38] sm:$0xff]  }
 0x5ca   : > { %v9116_v59 = vpop.f32.mrf.mxu1  ;;  %v17826_v48 = vpop.f32.mrf.mxu0  ;;  %12648 = vmatmul.msk.bf16.gmra.mxu2 %vm2234_vm1, %v9437_v58 }
 0x5cb   : > { %v17824_v61 = vadd.f32 %v9116_v59, %v8934_v5  ;;  %v8230_v47 = vpop.f32.mrf.mxu3  ;;  %v10070_v5 = vshll.u32 %v13873_v52, 16 }
 0x5cc   : > { %v17829_v13 = vadd.f32 %v8230_v47, %v7657_v57  ;;  %v10069_v57 = vrot.slane %v10067_v9, 3 }
 0x5cd   : > { %12542 = vmatmul.msk.bf16.gmra.mxu1 %vm2234_vm1, %v17574_v6  ;;  %12698 = vmatmul.msk.bf16.gmra.mxu0 %vm2234_vm1, %v14532_v43  ;;  %v7659_v26 = vpop.f32.mrf.mxu2  ;;  %v10072_v47 = vrot.slane %v10070_v5, 4  ;;  %v9440_v43 = vor.u32 %v9438_v20, %v9436_v17  ;;  %v12944_v17 = vld [vmem:[#allocation2 + $0x30] sm:$0xff]  ;;  %v19003_v5 = vld [vmem:[#allocation27_spill] sm:$0xff] }
 0x5ce   : > { %v7660_v14 = vadd.f32 %v7659_v26, %v19000_v36  ;;  %v19001_v26 = vld [vmem:[#allocation5_spill] sm:$0xff] }
 0x5cf   : > { %12673 = vmatmul.msk.bf16.gmra.mxu3 %vm2234_vm1, %v10065_v53  ;;  %v9445_v52 = vsel %vm3070_vm3, %v9440_v43, %v9444_v27  ;;  %v10073_v36 = vor.u32 %v10072_v47, %v10069_v57  ;;  %v9450_v47 = vshll.u32 %v12944_v17, 16 }
 0x5d1   : > { %v10074_v32 = vsel %vm2467_vm2, %v10064_v12, %v10073_v36 }
 0x5d2   : > { %v9118_v23 = vpop.f32.mrf.mxu1  ;;  %v17842_v29 = vpop.f32.mrf.mxu0 }
 0x5d3   : > { %v17840_v35 = vadd.f32 %v9118_v23, %v8935_v54  ;;  %v8233_v6 = vpop.f32.mrf.mxu3 }
 0x5d4   : > { %v17844_v59 = vadd.f32 %v8233_v6, %v7660_v14  ;;  %v8937_v6 = vadd.f32 %v17618_v8, %v17632_v51  ;;  %v8938_v8 = vadd.f32 %v17627_v38, %v17649_v18  ;;  %v14536_v38 = vld [vmem:[#allocation2 + $0x34] sm:$0xff]  }
 0x5d5   : > { %v7661_v22 = vpop.f32.mrf.mxu2 }
 0x5d6   : > { %v7662_v53 = vadd.f32 %v7661_v22, %v19001_v26  ;;  %v9446_v26 = vshrl.u32 %v12943_v10, 16 }
 0x5da   : > { %v9121_v58 = vpop.f32.mrf.mxu1  ;;  %v17851_v54 = vpop.f32.mrf.mxu0  ;;  %12649 = vmatmul.msk.bf16.gmra.mxu2 %vm2234_vm1, %v9445_v52 }
 0x5db   : > { %v17849_v30 = vadd.f32 %v9121_v58, %v8936_v31  ;;  %v8235_v23 = vpop.f32.mrf.mxu3  ;;  %v10076_v31 = vshrl.u32 %v13874_v41, 16  ;;  %v10079_v58 = vshll.u32 %v13874_v41, 16 }
 0x5dc   : > { %v17854_v14 = vadd.f32 %v8235_v23, %v7662_v53  ;;  %v9452_v53 = vrot.slane %v9450_v47, 1  ;;  %v8939_v47 = vadd.f32 %v17647_v1, %v17660_v28  ;;  %v8940_v1 = vadd.f32 %v17656_v50, %v17677_v0  ;;  %v14538_v50 = vld [vmem:[#allocation2 + $0x3c] sm:$0xff]  }
 0x5dd   : > { %19002 = vst [vmem:[#allocation29_spill] sm:$0xff] %v17849_v30  ;;  %12543 = vmatmul.msk.bf16.gmra.mxu1 %vm2234_vm1, %v17605_v16  ;;  %12699 = vmatmul.msk.bf16.gmra.mxu0 %vm2234_vm1, %v14534_v63  ;;  %v7664_v42 = vpop.f32.mrf.mxu2  ;;  %v10078_v23 = vrot.slane %v10076_v31, 3  ;;  %v10081_v52 = vrot.slane %v10079_v58, 4  ;;  %v9448_v63 = vor.u32 %v9446_v26, %v9444_v27  ;;  %v12945_v27 = vld [vmem:[#allocation2 + $0x38] sm:$0xff]  ;;  %v13875_v31 = vld [vmem:[#allocation2 + $0x40] sm:$0xff]  }
 0x5de   : > { %v7665_v22 = vadd.f32 %v7664_v42, %v19003_v5  ;;  %v19005_v42 = vld [vmem:[#allocation28_spill] sm:$0xff] }
 0x5df   : > { %12674 = vmatmul.msk.bf16.gmra.mxu3 %vm2234_vm1, %v10074_v32  ;;  %v9453_v41 = vsel %vm3070_vm3, %v9448_v63, %v9452_v53  ;;  %v10088_v63 = vshll.u32 %v13875_v31, 16 }
 0x5e2   : > { %v9123_v9 = vpop.f32.mrf.mxu1  ;;  %v17867_v57 = vpop.f32.mrf.mxu0 }
 0x5e3   : > { %v17865_v20 = vadd.f32 %v9123_v9, %v8937_v6  ;;  %v8238_v16 = vpop.f32.mrf.mxu3 }
 0x5e4   : > { %v17869_v43 = vadd.f32 %v8238_v16, %v7665_v22  ;;  %v10082_v22 = vor.u32 %v10081_v52, %v10078_v23 }
 0x5e5   : > { %19004 = vst [vmem:[#allocation23_spill] sm:$0xff] %v17865_v20  ;;  %v7666_v12 = vpop.f32.mrf.mxu2  ;;  %v8950_v20 = vadd.f32 %v17800_v19, %v17818_v39  ;;  %v19037_v19 = vld [vmem:[#allocation25_spill] sm:$0xff] }
 0x5e6   : > { %v7667_v32 = vadd.f32 %v7666_v12, %v19005_v42  ;;  %v10083_v10 = vsel %vm2467_vm2, %v10073_v36, %v10082_v22  ;;  %v19007_v12 = vld [vmem:[#allocation30_spill] sm:$0xff] }
 0x5ea   : > { %v9126_v51 = vpop.f32.mrf.mxu1  ;;  %v17876_v9 = vpop.f32.mrf.mxu0  ;;  %12650 = vmatmul.msk.bf16.gmra.mxu2 %vm2234_vm1, %v9453_v41 }
 0x5eb   : > { %v17874_v6 = vadd.f32 %v9126_v51, %v8938_v8  ;;  %v8240_v5 = vpop.f32.mrf.mxu3  ;;  %v9458_v8 = vshll.u32 %v12945_v27, 16  ;;  %v10085_v51 = vshrl.u32 %v13875_v31, 16 }
 0x5ec   : > { %v17879_v16 = vadd.f32 %v8240_v5, %v7667_v32  ;;  %v9454_v32 = vshrl.u32 %v12944_v17, 16 }
 0x5ed   : > { %19006 = vst [vmem:[#allocation24_spill] sm:$0xff] %v17874_v6  ;;  %12544 = vmatmul.msk.bf16.gmra.mxu1 %vm2234_vm1, %v17636_v3  ;;  %12700 = vmatmul.msk.bf16.gmra.mxu0 %vm2234_vm1, %v14536_v38  ;;  %v7669_v18 = vpop.f32.mrf.mxu2  ;;  %v9460_v5 = vrot.slane %v9458_v8, 1  ;;  %v10087_v41 = vrot.slane %v10085_v51, 3  ;;  %v10090_v38 = vrot.slane %v10088_v63, 4  ;;  %v8941_v8 = vadd.f32 %v17675_v37, %v17688_v25  ;;  %v13876_v51 = vld [vmem:[#allocation2 + $0x48] sm:$0xff]  }
 0x5ee   : > { %v7670_v26 = vadd.f32 %v7669_v18, %v19007_v12  ;;  %v9456_v18 = vor.u32 %v9454_v32, %v9452_v53  ;;  %v12946_v53 = vld [vmem:[#allocation2 + $0x40] sm:$0xff]  ;;  %v19011_v63 = vld [vmem:[#allocation35_spill] sm:$0xff]  ;;  %v8942_v37 = vadd.f32 %v17684_v21, %v17707_v4 }
 0x5ef   : > { %12675 = vmatmul.msk.bf16.gmra.mxu3 %vm2234_vm1, %v10083_v10  ;;  %v19009_v10 = vld [vmem:[#allocation31_spill] sm:$0xff] }
 0x5f0   : > { %v9461_v31 = vsel %vm3070_vm3, %v9456_v18, %v9460_v5  ;;  %v14540_v21 = vld [vmem:[#allocation2 + $0x44] sm:$0xff]  }
 0x5f2   : > { %v9128_v58 = vpop.f32.mrf.mxu1  ;;  %v17892_v52 = vpop.f32.mrf.mxu0 }
 0x5f3   : > { %v17890_v23 = vadd.f32 %v9128_v58, %v8939_v47  ;;  %v8243_v3 = vpop.f32.mrf.mxu3 }
 0x5f4   : > { %v17894_v42 = vadd.f32 %v8243_v3, %v7670_v26  ;;  %v10091_v26 = vor.u32 %v10090_v38, %v10087_v41  ;;  %v9466_v38 = vshll.u32 %v12946_v53, 16 }
 0x5f5   : > { %19008 = vst [vmem:[#allocation49_spill] sm:$0xff] %v17890_v23  ;;  %v7671_v36 = vpop.f32.mrf.mxu2 }
 0x5f6   : > { %v7672_v47 = vadd.f32 %v7671_v36, %v19009_v10  ;;  %v10092_v17 = vsel %vm2467_vm2, %v10082_v22, %v10091_v26  ;;  %v9462_v10 = vshrl.u32 %v12945_v27, 16 }
 0x5fa   : > { %v9131_v28 = vpop.f32.mrf.mxu1  ;;  %v17901_v12 = vpop.f32.mrf.mxu0  ;;  %12651 = vmatmul.msk.bf16.gmra.mxu2 %vm2234_vm1, %v9461_v31 }
 0x5fb   : > { %v17899_v58 = vadd.f32 %v9131_v28, %v8940_v1  ;;  %v8245_v23 = vpop.f32.mrf.mxu3  ;;  %v10094_v1 = vshrl.u32 %v13876_v51, 16  ;;  %v10097_v28 = vshll.u32 %v13876_v51, 16 }
 0x5fc   : > { %v17904_v3 = vadd.f32 %v8245_v23, %v7672_v47  ;;  %v9468_v47 = vrot.slane %v9466_v38, 1  ;;  %v8943_v38 = vadd.f32 %v17703_v60, %v17719_v34  ;;  %v8944_v60 = vadd.f32 %v17715_v24, %v17734_v46 }
 0x5fd   : > { %19010 = vst [vmem:[#allocation4_spill] sm:$0xff] %v17899_v58  ;;  %12545 = vmatmul.msk.bf16.gmra.mxu1 %vm2234_vm1, %v17664_v49  ;;  %12701 = vmatmul.msk.bf16.gmra.mxu0 %vm2234_vm1, %v14538_v50  ;;  %v7674_v0 = vpop.f32.mrf.mxu2  ;;  %v10096_v31 = vrot.slane %v10094_v1, 3  ;;  %v10099_v50 = vrot.slane %v10097_v28, 4  ;;  %v13877_v1 = vld [vmem:[#allocation2 + $0x50] sm:$0xff]  }
 0x5fe   : > { %v7675_v36 = vadd.f32 %v7674_v0, %v19011_v63  ;;  %v9464_v0 = vor.u32 %v9462_v10, %v9460_v5  ;;  %v12947_v5 = vld [vmem:[#allocation2 + $0x48] sm:$0xff] }
 0x5ff   : > { %12676 = vmatmul.msk.bf16.gmra.mxu3 %vm2234_vm1, %v10092_v17  ;;  %v19013_v17 = vld [vmem:[#allocation37_spill] sm:$0xff]  ;;  %v10100_v51 = vor.u32 %v10099_v50, %v10096_v31  ;;  %v10103_v50 = vshrl.u32 %v13877_v1, 16 }
 0x601   : > { %v10101_v27 = vsel %vm2467_vm2, %v10091_v26, %v10100_v51 }
 0x602   : > { %v9133_v23 = vpop.f32.mrf.mxu1  ;;  %v17917_v41 = vpop.f32.mrf.mxu0 }
 0x603   : > { %v17915_v32 = vadd.f32 %v9133_v23, %v8941_v8  ;;  %v8248_v49 = vpop.f32.mrf.mxu3 }
 0x604   : > { %v17919_v18 = vadd.f32 %v8248_v49, %v7675_v36 }
 0x605   : > { %19012 = vst [vmem:[#allocation5_spill] sm:$0xff] %v17915_v32  ;;  %v7676_v22 = vpop.f32.mrf.mxu2  ;;  %v9469_v32 = vsel %vm3070_vm3, %v9464_v0, %v9468_v47 }
 0x606   : > { %v7677_v8 = vadd.f32 %v7676_v22, %v19013_v17  ;;  %v19015_v22 = vld [vmem:[#allocation40_spill] sm:$0xff]  ;;  %v9470_v17 = vshrl.u32 %v12946_v53, 16 }
 0x607   : > { %v14542_v53 = vld [vmem:[#allocation2 + $0x4c] sm:$0xff]  }
 0x60a   : > { %v9136_v25 = vpop.f32.mrf.mxu1  ;;  %v17927_v36 = vpop.f32.mrf.mxu0  ;;  %12652 = vmatmul.msk.bf16.gmra.mxu2 %vm2234_vm1, %v9469_v32 }
 0x60b   : > { %v17924_v23 = vadd.f32 %v9136_v25, %v8942_v37  ;;  %v8250_v63 = vpop.f32.mrf.mxu3  ;;  %v10106_v37 = vshll.u32 %v13877_v1, 16 }
 0x60c   : > { %v17929_v49 = vadd.f32 %v8250_v63, %v7677_v8  ;;  %v10105_v63 = vrot.slane %v10103_v50, 3  ;;  %v8945_v50 = vadd.f32 %v17730_v62, %v17752_v11  ;;  %v8946_v62 = vadd.f32 %v17747_v15, %v17765_v56  ;;  %v14544_v15 = vld [vmem:[#allocation2 + $0x54] sm:$0xff]  }
 0x60d   : > { %19014 = vst [vmem:[#allocation27_spill] sm:$0xff] %v17924_v23  ;;  %12546 = vmatmul.msk.bf16.gmra.mxu1 %vm2234_vm1, %v17692_v44  ;;  %12702 = vmatmul.msk.bf16.gmra.mxu0 %vm2234_vm1, %v14540_v21  ;;  %v7679_v4 = vpop.f32.mrf.mxu2  ;;  %v9474_v44 = vshll.u32 %v12947_v5, 16  ;;  %v10108_v21 = vrot.slane %v10106_v37, 4  ;;  %v13878_v37 = vld [vmem:[#allocation2 + $0x58] sm:$0xff]  }
 0x60e   : > { %v7680_v10 = vadd.f32 %v7679_v4, %v19015_v22  ;;  %v9472_v4 = vor.u32 %v9470_v17, %v9468_v47  ;;  %v12948_v47 = vld [vmem:[#allocation2 + $0x50] sm:$0xff]  ;;  %v19019_v17 = vld [vmem:[#allocation45_spill] sm:$0xff] }
 0x60f   : > { %12677 = vmatmul.msk.bf16.gmra.mxu3 %vm2234_vm1, %v10101_v27  ;;  %v9476_v8 = vrot.slane %v9474_v44, 1  ;;  %v19017_v27 = vld [vmem:[#allocation41_spill] sm:$0xff] }
 0x611   : > { %v9477_v1 = vsel %vm3070_vm3, %v9472_v4, %v9476_v8  ;;  %v10112_v4 = vshrl.u32 %v13878_v37, 16 }
 0x612   : > { %v9138_v28 = vpop.f32.mrf.mxu1  ;;  %v17944_v0 = vpop.f32.mrf.mxu0 }
 0x613   : > { %v17940_v32 = vadd.f32 %v9138_v28, %v8943_v38  ;;  %v8253_v31 = vpop.f32.mrf.mxu3 }
 0x614   : > { %v17942_v25 = vadd.f32 %v8253_v31, %v7680_v10  ;;  %v13868_v10 = vld [vmem:[#allocation2 + $0xb8] sm:$0xff]   ;;  %v10109_v31 = vor.u32 %v10108_v21, %v10105_v63 }
 0x615   : > { %19016 = vst [vmem:[#allocation28_spill] sm:$0xff] %v17940_v32  ;;  %v7681_v26 = vpop.f32.mrf.mxu2 }
 0x616   : > { %v7682_v38 = vadd.f32 %v7681_v26, %v19017_v27  ;;  %v10110_v46 = vsel %vm2467_vm2, %v10100_v51, %v10109_v31  ;;  %v10115_v27 = vshll.u32 %v13878_v37, 16 }
 0x61a   : > { %v9141_v34 = vpop.f32.mrf.mxu1  ;;  %12653 = vmatmul.msk.bf16.gmra.mxu2 %vm2234_vm1, %v9477_v1  ;;  %v17958_v44 = vpop.f32.mrf.mxu0 }
 0x61b   : > { %v17949_v28 = vadd.f32 %v9141_v34, %v8944_v60  ;;  %v8255_v22 = vpop.f32.mrf.mxu3  ;;  %v9482_v34 = vshll.u32 %v12948_v47, 16 }
 0x61c   : > { %v17952_v32 = vadd.f32 %v8255_v22, %v7682_v38  ;;  %v9478_v22 = vshrl.u32 %v12947_v5, 16 }
 0x61d   : > { %19018 = vst [vmem:[#allocation30_spill] sm:$0xff] %v17949_v28  ;;  %12547 = vmatmul.msk.bf16.gmra.mxu1 %vm2234_vm1, %v13868_v10  ;;  %12703 = vmatmul.msk.bf16.gmra.mxu0 %vm2234_vm1, %v14542_v53  ;;  %v7684_v24 = vpop.f32.mrf.mxu2  ;;  %v9484_v1 = vrot.slane %v9482_v34, 1  ;;  %v10114_v10 = vrot.slane %v10112_v4, 3  ;;  %v10117_v53 = vrot.slane %v10115_v27, 4  ;;  %v17982_v34 = vld [vmem:[#allocation2 + $0x58] sm:$0xff] }
 0x61e   : > { %v7685_v63 = vadd.f32 %v7684_v24, %v19019_v17  ;;  %v19021_v24 = vld [vmem:[#allocation46_spill] sm:$0xff]  ;;  %v19023_v4 = vld [vmem:[#allocation9_spill] sm:$0xff] }
 0x61f   : > { %12678 = vmatmul.msk.bf16.gmra.mxu3 %vm2234_vm1, %v10110_v46  ;;  %v9480_v46 = vor.u32 %v9478_v22, %v9476_v8  ;;  %v8947_v27 = vadd.f32 %v19023_v4, %v17777_v33  ;;  %v19026_v4 = vld [vmem:[#allocation61_spill] sm:$0xff] }
 0x621   : > { %v9485_v37 = vsel %vm3070_vm3, %v9480_v46, %v9484_v1  ;;  %v9490_v46 = vshll.u32 %v17982_v34, 16 }
 0x622   : > { %v9143_v26 = vpop.f32.mrf.mxu1  ;;  %v17970_v28 = vpop.f32.mrf.mxu0 }
 0x623   : > { %v17964_v21 = vadd.f32 %v9143_v26, %v8945_v50  ;;  %v8258_v60 = vpop.f32.mrf.mxu3 }
 0x624   : > { %v17966_v38 = vadd.f32 %v8258_v60, %v7685_v63  ;;  %v13869_v63 = vld [vmem:[#allocation2 + $0xc0] sm:$0xff]   ;;  %v10118_v60 = vor.u32 %v10117_v53, %v10114_v10  ;;  %v19024_v10 = vld [vmem:[#allocation47_spill] sm:$0xff] }
 0x625   : > { %19020 = vst [vmem:[#allocation31_spill] sm:$0xff] %v17964_v21  ;;  %v7686_v51 = vpop.f32.mrf.mxu2 }
 0x626   : > { %v7687_v50 = vadd.f32 %v7686_v51, %v19021_v24  ;;  %v10119_v8 = vsel %vm2467_vm2, %v10109_v31, %v10118_v60  ;;  %v13879_v51 = vld [vmem:[#allocation2 + $0x60] sm:$0xff]  }
 0x627   : > { %v10121_v24 = vshrl.u32 %v13879_v51, 16 }
 0x62a   : > { %v9146_v11 = vpop.f32.mrf.mxu1  ;;  %12654 = vmatmul.msk.bf16.gmra.mxu2 %vm2234_vm1, %v9485_v37 }
 0x62b   : > { %v17973_v26 = vadd.f32 %v9146_v11, %v8946_v62  ;;  %v8260_v17 = vpop.f32.mrf.mxu3 }
 0x62c   : > { %v17976_v5 = vadd.f32 %v8260_v17, %v7687_v50  ;;  %v10124_v50 = vshll.u32 %v13879_v51, 16  ;;  %v17991_v17 = vpop.f32.mrf.mxu0 }
 0x62d   : > { %19022 = vst [vmem:[#allocation35_spill] sm:$0xff] %v17973_v26  ;;  %12548 = vmatmul.msk.bf16.gmra.mxu1 %vm2234_vm1, %v13869_v63  ;;  %12704 = vmatmul.msk.bf16.gmra.mxu0 %vm2234_vm1, %v14544_v15  ;;  %v7689_v56 = vpop.f32.mrf.mxu2  ;;  %v9486_v63 = vshrl.u32 %v12948_v47, 16  ;;  %v9492_v15 = vrot.slane %v9490_v46, 1  ;;  %v8948_v26 = vadd.f32 %v19026_v4, %v17793_v2  ;;  %v19029_v47 = vld [vmem:[#allocation8_spill] sm:$0xff]  ;;  %v12964_v46 = vld [vmem:[#allocation2 + $0x1c] sm:$0xff] }
 0x62e   : > { %v7690_v53 = vadd.f32 %v7689_v56, %v19024_v10  ;;  %v10126_v33 = vrot.slane %v10124_v50, 4  ;;  %v18012_v50 = vld [vmem:[#allocation2 + $0x60] sm:$0xff] }
 0x62f   : > { %12679 = vmatmul.msk.bf16.gmra.mxu3 %vm2234_vm1, %v10119_v8  ;;  %v10123_v8 = vrot.slane %v10121_v24, 3 }
 0x631   : > { %v10127_v23 = vor.u32 %v10126_v33, %v10123_v8  ;;  %v13880_v33 = vld [vmem:[#allocation2 + $0x68] sm:$0xff]  }
 0x632   : > { %v9148_v22 = vpop.f32.mrf.mxu1 }
 0x633   : > { %v17988_v62 = vadd.f32 %v9148_v22, %v8947_v27  ;;  %v8263_v11 = vpop.f32.mrf.mxu3  ;;  %v9488_v27 = vor.u32 %v9486_v63, %v9484_v1  ;;  %v19027_v22 = vld [vmem:[#allocation48_spill] sm:$0xff]  ;;  %v18009_v1 = vld [vmem:[#allocation2 + $0x24] sm:$0xff]  ;;  %v10128_v24 = vsel %vm2467_vm2, %v10118_v60, %v10127_v23  ;;  %v10130_v60 = vshrl.u32 %v13880_v33, 16 }
 0x634   : > { %v17993_v31 = vadd.f32 %v8263_v11, %v7690_v53  ;;  %v14546_v11 = vld [vmem:[#allocation2 + $0x5c] sm:$0xff]   ;;  %v18006_v2 = vpop.f32.mrf.mxu0 }
 0x635   : > { %19025 = vst [vmem:[#allocation37_spill] sm:$0xff] %v17988_v62  ;;  %v7691_v37 = vpop.f32.mrf.mxu2  ;;  %v9493_v51 = vsel %vm3070_vm3, %v9488_v27, %v9492_v15  ;;  %v19031_v63 = vld [vmem:[#allocation10_spill] sm:$0xff]  ;;  %v10132_v58 = vrot.slane %v10130_v60, 3  ;;  %v19036_v60 = vld [vmem:[#allocation16_spill] sm:$0xff] }
 0x636   : > { %v7692_v10 = vadd.f32 %v7691_v37, %v19027_v22  ;;  %v8949_v8 = vadd.f32 %v19031_v63, %v17803_v45  ;;  %v10976_v22 = vshll.u32 %v18009_v1, 16  ;;  %v9494_v45 = vshrl.u32 %v17982_v34, 16 }
 0x637   : > { %v7582_v39 = vadd.f32 %v19037_v19, %v19036_v60  ;;  %v19042_v60 = vld [vmem:[#allocation3_spill] sm:$0xff] }
 0x63a   : > { %v9151_v56 = vpop.f32.mrf.mxu1  ;;  %12655 = vmatmul.msk.bf16.gmra.mxu2 %vm2234_vm1, %v9493_v51  ;;  %v9498_v51 = vshll.u32 %v18012_v50, 16 }
 0x63b   : > { %v17998_v62 = vadd.f32 %v9151_v56, %v8948_v26  ;;  %v8265_v21 = vpop.f32.mrf.mxu3  ;;  %v10971_v56 = vshll.u32 %v12964_v46, 16 }
 0x63c   : > { %v18001_v53 = vadd.f32 %v8265_v21, %v7692_v10  ;;  %v19030_v21 = vld [vmem:[#allocation50_spill] sm:$0xff]  ;;  %v9500_v63 = vrot.slane %v9498_v51, 1 }
 0x63d   : > { %19028 = vst [vmem:[#allocation40_spill] sm:$0xff] %v17998_v62  ;;  %12549 = vmatmul.msk.bf16.gmra.mxu1 %vm2234_vm1, %v19029_v47  ;;  %12705 = vmatmul.msk.bf16.gmra.mxu0 %vm2234_vm1, %v14546_v11  ;;  %v9698_v26 = vpop.f32.mrf.mxu2  ;;  %v10133_v47 = vshll.u32 %v13880_v33, 16  ;;  %v9496_v33 = vor.u32 %v9494_v45, %v9492_v15  ;;  %v13881_v45 = vld [vmem:[#allocation2 + $0x70] sm:$0xff]  }
 0x63e   : > { %v9818_v37 = vadd.f32 %v9698_v26, %v19030_v21  ;;  %v10973_v26 = vrot.slane %v10971_v56, 1  ;;  %v10969_v21 = vshrl.u32 %v12964_v46, 16 }
 0x63f   : > { %12680 = vmatmul.msk.bf16.gmra.mxu3 %vm2234_vm1, %v10128_v24  ;;  %v10978_v24 = vrot.slane %v10976_v22, 1  ;;  %v10135_v6 = vrot.slane %v10133_v47, 4  ;;  %v9501_v46 = vsel %vm3070_vm3, %v9496_v33, %v9500_v63  ;;  %v18044_v47 = vld [vmem:[#allocation2 + $0x68] sm:$0xff] }
 0x641   : > { %v10136_v22 = vor.u32 %v10135_v6, %v10132_v58  ;;  %v19038_v6 = vld [vmem:[#allocation26_spill] sm:$0xff] }
 0x642   : > { %v9153_v4 = vpop.f32.mrf.mxu1  ;;  %v8271_v58 = vadd.f32 %v19038_v6, %v7582_v39 }
 0x643   : > { %v18018_v27 = vadd.f32 %v9153_v4, %v8949_v8  ;;  %v10348_v10 = vpop.f32.mrf.mxu3  ;;  %v18025_v8 = vpop.f32.mrf.mxu0  ;;  %v19033_v4 = vld [vmem:[#allocation51_spill] sm:$0xff]  ;;  %v10137_v15 = vsel %vm2467_vm2, %v10127_v23, %v10136_v22 }
 0x644   : > { %v18022_v11 = vadd.f32 %v10348_v10, %v9818_v37  ;;  %v10974_v37 = vor.u32 %v10973_v26, %v10969_v21  ;;  %v19039_v26 = vld [vmem:[#allocation52_spill] sm:$0xff]  ;;  %v8951_v21 = vadd.f32 %v17816_v55, %v17829_v13  ;;  %v8921_v19 = vadd.f32 %v19042_v60, %v8271_v58 }
 0x645   : > { %19032 = vst [vmem:[#allocation41_spill] sm:$0xff] %v18018_v27  ;;  %v9700_v62 = vpop.f32.mrf.mxu2  ;;  %v10980_v55 = vshrl.u32 %v18009_v1, 16 }
 0x646   : > { %v9819_v27 = vadd.f32 %v9700_v62, %v19033_v4  ;;  %v10979_v34 = vsel %vm3070_vm3, %v10974_v37, %v10978_v24  ;;  %v14548_v62 = vld [vmem:[#allocation2 + $0x64] sm:$0xff]  }
 0x647   : > { %v10982_v58 = vor.u32 %v10980_v55, %v10978_v24  ;;  %v13882_v55 = vld [vmem:[#allocation2 + $0x78] sm:$0xff]  }
 0x64a   : > { %v9156_v30 = vpop.f32.mrf.mxu1  ;;  %12656 = vmatmul.msk.bf16.gmra.mxu2 %vm2234_vm1, %v9501_v46 }
 0x64b   : > { %v18030_v10 = vadd.f32 %v9156_v30, %v8950_v20  ;;  %v10350_v56 = vpop.f32.mrf.mxu3  ;;  %v18041_v30 = vld [vmem:[#allocation2 + $0x2c] sm:$0xff]  ;;  %v18051_v33 = vpop.f32.mrf.mxu0 }
 0x64c   : > { %v18035_v51 = vadd.f32 %v10350_v56, %v9819_v27  ;;  %19040 = vst [vmem:[#allocation9_spill] sm:$0xff] %v18051_v33  ;;  %v10984_v46 = vshll.u32 %v18041_v30, 16  ;;  %v9506_v56 = vshll.u32 %v18044_v47, 16  ;;  %v8952_v33 = vadd.f32 %v17826_v48, %v17844_v59  ;;  %v14550_v48 = vld [vmem:[#allocation2 + $0x6c] sm:$0xff]   ;;  %v19044_v59 = vld [vmem:[#allocation17_spill] sm:$0xff] }
 0x64d   : > { %19034 = vst [vmem:[#allocation45_spill] sm:$0xff] %v18030_v10  ;;  %12818 = vmatmul.msk.bf16.vlgmr.msra.gmra.mxu1 %vm2234_vm1, %v10979_v34  ;;  %12706 = vmatmul.msk.bf16.gmra.mxu0 %vm2234_vm1, %v14548_v62  ;;  %v9703_v20 = vpop.f32.mrf.mxu2  ;;  %v10139_v34 = vshrl.u32 %v13881_v45, 16  ;;  %v10142_v62 = vshll.u32 %v13881_v45, 16 }
 0x64e   : > { %19035 = vst [vmem:[#allocation46_spill] sm:$0xff] %v18035_v51  ;;  %v9820_v27 = vadd.f32 %v9703_v20, %v19039_v26  ;;  %v19043_v20 = vld [vmem:[#allocation53_spill] sm:$0xff]  ;;  %v10986_v13 = vrot.slane %v10984_v46, 1  ;;  %v9502_v26 = vshrl.u32 %v18012_v50, 16 }
 0x64f   : > { %12681 = vmatmul.msk.bf16.gmra.mxu3 %vm2234_vm1, %v10137_v15  ;;  %v9199_v15 = vadd.f32 %v19043_v20, %v8921_v19  ;;  %v19047_v20 = vld [vmem:[#allocation54_spill] sm:$0xff] }
 0x650   : > { %v9504_v51 = vor.u32 %v9502_v26, %v9500_v63  ;;  %v10987_v1 = vsel %vm3070_vm3, %v10982_v58, %v10986_v13  ;;  %v19045_v63 = vld [vmem:[#allocation6_spill] sm:$0xff]  ;;  %v10148_v58 = vshrl.u32 %v13882_v55, 16 }
 0x651   : > { %v7587_v24 = vadd.f32 %v19045_v63, %v19044_v59  ;;  %v19050_v59 = vld [vmem:[#allocation55_spill] sm:$0xff] }
 0x652   : > { %v9158_v4 = vpop.f32.mrf.mxu1 }
 0x653   : > { %v18053_v37 = vadd.f32 %v9158_v4, %v8951_v21  ;;  %v10353_v23 = vpop.f32.mrf.mxu3  ;;  %v9508_v21 = vrot.slane %v9506_v56, 1  ;;  %v10141_v4 = vrot.slane %v10139_v34, 3  ;;  %v18069_v19 = vpop.f32.mrf.mxu0  ;;  %v19046_v34 = vld [vmem:[#allocation11_spill] sm:$0xff] }
 0x654   : > { %v18058_v39 = vadd.f32 %v10353_v23, %v9820_v27 }
 0x655   : > { %19041 = vst [vmem:[#allocation47_spill] sm:$0xff] %v18053_v37  ;;  %v9705_v6 = vpop.f32.mrf.mxu2  ;;  %v10144_v37 = vrot.slane %v10142_v62, 4  ;;  %v9509_v23 = vsel %vm3070_vm3, %v9504_v51, %v9508_v21  ;;  %v8273_v62 = vadd.f32 %v19046_v34, %v7587_v24 }
 0x656   : > { %v9821_v10 = vadd.f32 %v9705_v6, %v9199_v15  ;;  %v8953_v15 = vadd.f32 %v17842_v29, %v17854_v14  ;;  %v10988_v29 = vshrl.u32 %v18041_v30, 16 }
 0x657   : > { %v10145_v46 = vor.u32 %v10144_v37, %v10141_v4  ;;  %v18081_v37 = vld [vmem:[#allocation2 + $0x70] sm:$0xff] }
 0x659   : > { %v10146_v56 = vsel %vm2467_vm2, %v10136_v22, %v10145_v46  ;;  %v9514_v22 = vshll.u32 %v18081_v37, 16 }
 0x65a   : > { %v9161_v45 = vpop.f32.mrf.mxu1  ;;  %12657 = vmatmul.msk.bf16.gmra.mxu2 %vm2234_vm1, %v9509_v23  ;;  %v10151_v23 = vshll.u32 %v13882_v55, 16  ;;  %v8954_v55 = vadd.f32 %v17851_v54, %v17869_v43  ;;  %v19053_v54 = vld [vmem:[#allocation14_spill] sm:$0xff] }
 0x65b   : > { %v18065_v27 = vadd.f32 %v9161_v45, %v8952_v33  ;;  %v10355_v60 = vpop.f32.mrf.mxu3  ;;  %v18078_v33 = vld [vmem:[#allocation2 + $0x34] sm:$0xff]  ;;  %v18096_v24 = vpop.f32.mrf.mxu0  ;;  %v9516_v34 = vrot.slane %v9514_v22, 1 }
 0x65c   : > { %v18072_v50 = vadd.f32 %v10355_v60, %v9821_v10  ;;  %v10992_v4 = vshll.u32 %v18078_v33, 16  ;;  %v19049_v60 = vld [vmem:[#allocation12_spill] sm:$0xff] }
 0x65d   : > { %12819 = vmatmul.msk.bf16.gmra.mxu1 %vm2234_vm1, %v10987_v1  ;;  %12707 = vmatmul.msk.bf16.gmra.mxu0 %vm2234_vm1, %v14550_v48  ;;  %v9708_v51 = vpop.f32.mrf.mxu2  ;;  %v8923_v1 = vadd.f32 %v19049_v60, %v8273_v62  ;;  %v14552_v22 = vld [vmem:[#allocation2 + $0x74] sm:$0xff]  }
 0x65e   : > { %v9822_v10 = vadd.f32 %v9708_v51, %v19047_v20  ;;  %v10994_v14 = vrot.slane %v10992_v4, 1  ;;  %v10150_v20 = vrot.slane %v10148_v58, 3  ;;  %v19052_v58 = vld [vmem:[#allocation18_spill] sm:$0xff] }
 0x65f   : > { %12682 = vmatmul.msk.bf16.gmra.mxu3 %vm2234_vm1, %v10146_v56  ;;  %v9201_v63 = vadd.f32 %v19050_v59, %v8923_v1  ;;  %v9510_v56 = vshrl.u32 %v18044_v47, 16  ;;  %v7592_v43 = vadd.f32 %v19053_v54, %v19052_v58 }
 0x662   : > { %v9163_v6 = vpop.f32.mrf.mxu1 }
 0x663   : > { %v18088_v26 = vadd.f32 %v9163_v6, %v8953_v15  ;;  %v10358_v45 = vpop.f32.mrf.mxu3  ;;  %v10153_v15 = vrot.slane %v10151_v23, 4 }
 0x664   : > { %v18093_v48 = vadd.f32 %v10358_v45, %v9822_v10  ;;  %v9512_v10 = vor.u32 %v9510_v56, %v9508_v21  ;;  %v10990_v45 = vor.u32 %v10988_v29, %v10986_v13  ;;  %v18113_v13 = vld [vmem:[#allocation2 + $0x3c] sm:$0xff]  ;;  %v19054_v29 = vld [vmem:[#allocation15_spill] sm:$0xff]  ;;  %v18119_v56 = vpop.f32.mrf.mxu0 }
 0x665   : > { %19048 = vst [vmem:[#allocation61_spill] sm:$0xff] %v18088_v26  ;;  %v9710_v51 = vpop.f32.mrf.mxu2  ;;  %v10154_v4 = vor.u32 %v10153_v15, %v10150_v20  ;;  %v19055_v20 = vld [vmem:[#allocation56_spill] sm:$0xff] }
 0x666   : > { %v9823_v6 = vadd.f32 %v9710_v51, %v9201_v63  ;;  %v9517_v1 = vsel %vm3070_vm3, %v9512_v10, %v9516_v34  ;;  %v10995_v30 = vsel %vm3070_vm3, %v10990_v45, %v10994_v14  ;;  %v18116_v63 = vld [vmem:[#allocation2 + $0x78] sm:$0xff]  ;;  %v8275_v51 = vadd.f32 %v19054_v29, %v7592_v43 }
 0x667   : > { %v10155_v23 = vsel %vm2467_vm2, %v10145_v46, %v10154_v4  ;;  %v11000_v45 = vshll.u32 %v18113_v13, 16  ;;  %v19058_v43 = vld [vmem:[#allocation57_spill] sm:$0xff]  ;;  %v9518_v29 = vshrl.u32 %v18081_v37, 16 }
 0x669   : > { %v9520_v26 = vor.u32 %v9518_v29, %v9516_v34  ;;  %v19060_v34 = vld [vmem:[#allocation33_spill] sm:$0xff] }
 0x66a   : > { %v9166_v62 = vpop.f32.mrf.mxu1  ;;  %12658 = vmatmul.msk.bf16.gmra.mxu2 %vm2234_vm1, %v9517_v1  ;;  %v9522_v1 = vshll.u32 %v18116_v63, 16 }
 0x66b   : > { %v18102_v60 = vadd.f32 %v9166_v62, %v8954_v55  ;;  %v10360_v59 = vpop.f32.mrf.mxu3  ;;  %v13883_v55 = vld [vmem:[#allocation2 + $0x80] sm:$0xff]  }
 0x66c   : > { %v18107_v47 = vadd.f32 %v10360_v59, %v9823_v6  ;;  %v8955_v6 = vadd.f32 %v17867_v57, %v17879_v16  ;;  %v10157_v59 = vshrl.u32 %v13883_v55, 16  ;;  %v11002_v57 = vrot.slane %v11000_v45, 1 }
 0x66d   : > { %19051 = vst [vmem:[#allocation48_spill] sm:$0xff] %v18102_v60  ;;  %12820 = vmatmul.msk.bf16.gmra.mxu1 %vm2234_vm1, %v10995_v30  ;;  %12708 = vmatmul.msk.bf16.gmra.mxu0 %vm2234_vm1, %v14552_v22  ;;  %v9713_v21 = vpop.f32.mrf.mxu2  ;;  %v10160_v30 = vshll.u32 %v13883_v55, 16  ;;  %v19057_v22 = vld [vmem:[#allocation13_spill] sm:$0xff]  ;;  %v8956_v60 = vadd.f32 %v17876_v9, %v17894_v42  ;;  %v19059_v42 = vld [vmem:[#allocation19_spill] sm:$0xff] }
 0x66e   : > { %v9824_v15 = vadd.f32 %v9713_v21, %v19055_v20  ;;  %v8925_v58 = vadd.f32 %v19057_v22, %v8275_v51  ;;  %v9524_v20 = vrot.slane %v9522_v1, 1  ;;  %v14554_v9 = vld [vmem:[#allocation2 + $0x7c] sm:$0xff]  }
 0x66f   : > { %12683 = vmatmul.msk.bf16.gmra.mxu3 %vm2234_vm1, %v10155_v23  ;;  %v10996_v23 = vshrl.u32 %v18078_v33, 16 }
 0x670   : > { %v9203_v21 = vadd.f32 %v19058_v43, %v8925_v58  ;;  %v9525_v33 = vsel %vm3070_vm3, %v9520_v26, %v9524_v20  ;;  %v19061_v58 = vld [vmem:[#allocation34_spill] sm:$0xff] }
 0x671   : > { %v10998_v51 = vor.u32 %v10996_v23, %v10994_v14  ;;  %v7597_v14 = vadd.f32 %v19060_v34, %v19059_v42  ;;  %v8957_v23 = vadd.f32 %v17892_v52, %v17904_v3  ;;  %v19065_v34 = vld [vmem:[#allocation59_spill] sm:$0xff]  ;;  %v11004_v52 = vshrl.u32 %v18113_v13, 16 }
 0x672   : > { %v9168_v62 = vpop.f32.mrf.mxu1 }
 0x673   : > { %v18125_v10 = vadd.f32 %v9168_v62, %v8955_v6  ;;  %v10363_v46 = vpop.f32.mrf.mxu3  ;;  %v10159_v6 = vrot.slane %v10157_v59, 3  ;;  %v10162_v62 = vrot.slane %v10160_v30, 4  ;;  %v11003_v22 = vsel %vm3070_vm3, %v10998_v51, %v11002_v57  ;;  %v18153_v30 = vld [vmem:[#allocation2 + $0x80] sm:$0xff] }
 0x674   : > { %v18130_v54 = vadd.f32 %v10363_v46, %v9824_v15  ;;  %v18137_v15 = vpop.f32.mrf.mxu0  ;;  %v8277_v43 = vadd.f32 %v19061_v58, %v7597_v14 }
 0x675   : > { %19056 = vst [vmem:[#allocation8_spill] sm:$0xff] %v18125_v10  ;;  %v9715_v16 = vpop.f32.mrf.mxu2  ;;  %v10163_v37 = vor.u32 %v10162_v62, %v10159_v6 }
 0x676   : > { %v9825_v10 = vadd.f32 %v9715_v16, %v9203_v21  ;;  %v19062_v21 = vld [vmem:[#allocation58_spill] sm:$0xff]  ;;  %v13884_v16 = vld [vmem:[#allocation2 + $0x88] sm:$0xff]  }
 0x677   : > { %v10164_v26 = vsel %vm2467_vm2, %v10154_v4, %v10163_v37  ;;  %v9530_v4 = vshll.u32 %v18153_v30, 16  ;;  %v10166_v51 = vshrl.u32 %v13884_v16, 16 }
 0x679   : > { %v9532_v58 = vrot.slane %v9530_v4, 1  ;;  %v14556_v4 = vld [vmem:[#allocation2 + $0x84] sm:$0xff]  }
 0x67a   : > { %v9171_v55 = vpop.f32.mrf.mxu1  ;;  %12659 = vmatmul.msk.bf16.gmra.mxu2 %vm2234_vm1, %v9525_v33  ;;  %v10169_v33 = vshll.u32 %v13884_v16, 16  ;;  %v8958_v16 = vadd.f32 %v17901_v12, %v17919_v18  ;;  %v19068_v12 = vld [vmem:[#allocation36_spill] sm:$0xff] }
 0x67b   : > { %v18139_v46 = vadd.f32 %v9171_v55, %v8956_v60  ;;  %v10365_v45 = vpop.f32.mrf.mxu3  ;;  %v18150_v60 = vld [vmem:[#allocation2 + $0x44] sm:$0xff] }
 0x67c   : > { %v18144_v1 = vadd.f32 %v10365_v45, %v9825_v10  ;;  %v11008_v62 = vshll.u32 %v18150_v60, 16  ;;  %v19064_v45 = vld [vmem:[#allocation32_spill] sm:$0xff] }
 0x67d   : > { %12821 = vmatmul.msk.bf16.gmra.mxu1 %vm2234_vm1, %v11003_v22  ;;  %12709 = vmatmul.msk.bf16.gmra.mxu0 %vm2234_vm1, %v14554_v9  ;;  %v9718_v59 = vpop.f32.mrf.mxu2  ;;  %v8927_v22 = vadd.f32 %v19064_v45, %v8277_v43  ;;  %v18165_v9 = vpop.f32.mrf.mxu0 }
 0x67e   : > { %v9826_v10 = vadd.f32 %v9718_v59, %v19062_v21  ;;  %v11010_v3 = vrot.slane %v11008_v62, 1  ;;  %v10168_v21 = vrot.slane %v10166_v51, 3  ;;  %v19067_v51 = vld [vmem:[#allocation7_spill] sm:$0xff] }
 0x67f   : > { %12684 = vmatmul.msk.bf16.gmra.mxu3 %vm2234_vm1, %v10164_v26  ;;  %v9205_v14 = vadd.f32 %v19065_v34, %v8927_v22  ;;  %v9526_v26 = vshrl.u32 %v18116_v63, 16  ;;  %v7602_v18 = vadd.f32 %v19068_v12, %v19067_v51  ;;  %v18190_v34 = vld [vmem:[#allocation2 + $0x88] sm:$0xff]  ;;  %v19073_v12 = vld [vmem:[#allocation60_spill] sm:$0xff] }
 0x681   : > { %v9528_v45 = vor.u32 %v9526_v26, %v9524_v20 }
 0x682   : > { %v9173_v29 = vpop.f32.mrf.mxu1 }
 0x683   : > { %v18160_v6 = vadd.f32 %v9173_v29, %v8957_v23  ;;  %v10368_v55 = vpop.f32.mrf.mxu3  ;;  %v10171_v23 = vrot.slane %v10169_v33, 4 }
 0x684   : > { %v18167_v42 = vadd.f32 %v10368_v55, %v9826_v10  ;;  %v9533_v55 = vsel %vm3070_vm3, %v9528_v45, %v9532_v58 }
 0x685   : > { %19063 = vst [vmem:[#allocation50_spill] sm:$0xff] %v18160_v6  ;;  %v9720_v59 = vpop.f32.mrf.mxu2  ;;  %v11006_v6 = vor.u32 %v11004_v52, %v11002_v57  ;;  %v10172_v62 = vor.u32 %v10171_v23, %v10168_v21  ;;  %v18184_v20 = vpop.f32.mrf.mxu0  ;;  %v18187_v57 = vld [vmem:[#allocation2 + $0x4c] sm:$0xff]  ;;  %v8959_v21 = vadd.f32 %v17917_v41, %v17929_v49 }
 0x686   : > { %v9827_v29 = vadd.f32 %v9720_v59, %v9205_v14  ;;  %v19069_v14 = vld [vmem:[#allocation39_spill] sm:$0xff]  ;;  %v19070_v59 = vld [vmem:[#allocation21_spill] sm:$0xff]  ;;  %v13885_v23 = vld [vmem:[#allocation2 + $0x90] sm:$0xff]  }
 0x687   : > { %v11011_v13 = vsel %vm3070_vm3, %v11006_v6, %v11010_v3  ;;  %v10173_v6 = vsel %vm2467_vm2, %v10163_v37, %v10172_v62  ;;  %v8279_v52 = vadd.f32 %v19069_v14, %v7602_v18  ;;  %v9538_v37 = vshll.u32 %v18190_v34, 16 }
 0x689   : > { %v9540_v14 = vrot.slane %v9538_v37, 1 }
 0x68a   : > { %v9176_v43 = vpop.f32.mrf.mxu1  ;;  %12660 = vmatmul.msk.bf16.gmra.mxu2 %vm2234_vm1, %v9533_v55  ;;  %v10175_v55 = vshrl.u32 %v13885_v23, 16 }
 0x68b   : > { %v18174_v10 = vadd.f32 %v9176_v43, %v8958_v16  ;;  %v10370_v22 = vpop.f32.mrf.mxu3  ;;  %v11016_v43 = vshll.u32 %v18187_v57, 16 }
 0x68c   : > { %v18179_v63 = vadd.f32 %v10370_v22, %v9827_v29  ;;  %v10178_v22 = vshll.u32 %v13885_v23, 16  ;;  %v8960_v23 = vadd.f32 %v17927_v36, %v17942_v25  ;;  %v19076_v36 = vld [vmem:[#allocation43_spill] sm:$0xff] }
 0x68d   : > { %19066 = vst [vmem:[#allocation10_spill] sm:$0xff] %v18174_v10  ;;  %12822 = vmatmul.msk.bf16.gmra.mxu1 %vm2234_vm1, %v11011_v13  ;;  %12710 = vmatmul.msk.bf16.gmra.mxu0 %vm2234_vm1, %v14556_v4  ;;  %v9723_v33 = vpop.f32.mrf.mxu2  ;;  %v19072_v13 = vld [vmem:[#allocation38_spill] sm:$0xff]  ;;  %v11018_v41 = vrot.slane %v11016_v43, 1 }
 0x68e   : > { %v9828_v26 = vadd.f32 %v9723_v33, %v19070_v59  ;;  %v8929_v4 = vadd.f32 %v19072_v13, %v8279_v52  ;;  %v11012_v33 = vshrl.u32 %v18150_v60, 16  ;;  %v10177_v59 = vrot.slane %v10175_v55, 3  ;;  %v14558_v55 = vld [vmem:[#allocation2 + $0x8c] sm:$0xff]  }
 0x68f   : > { %12685 = vmatmul.msk.bf16.gmra.mxu3 %vm2234_vm1, %v10173_v6  ;;  %v9534_v6 = vshrl.u32 %v18153_v30, 16 }
 0x690   : > { %v9207_v18 = vadd.f32 %v19073_v12, %v8929_v4 }
 0x692   : > { %v9178_v29 = vpop.f32.mrf.mxu1 }
 0x693   : > { %v18197_v16 = vadd.f32 %v9178_v29, %v8959_v21  ;;  %v10373_v45 = vpop.f32.mrf.mxu3  ;;  %v10180_v21 = vrot.slane %v10178_v22, 4  ;;  %v18207_v29 = vpop.f32.mrf.mxu0  ;;  %v19075_v22 = vld [vmem:[#allocation20_spill] sm:$0xff] }
 0x694   : > { %v18202_v51 = vadd.f32 %v10373_v45, %v9828_v26  ;;  %v9536_v26 = vor.u32 %v9534_v6, %v9532_v58  ;;  %v11014_v45 = vor.u32 %v11012_v33, %v11010_v3  ;;  %v7607_v25 = vadd.f32 %v19076_v36, %v19075_v22  ;;  %v18222_v3 = vld [vmem:[#allocation2 + $0x54] sm:$0xff]  ;;  %v19078_v6 = vld [vmem:[#allocation22_spill] sm:$0xff] }
 0x695   : > { %19071 = vst [vmem:[#allocation51_spill] sm:$0xff] %v18197_v16  ;;  %v9725_v49 = vpop.f32.mrf.mxu2  ;;  %v10181_v30 = vor.u32 %v10180_v21, %v10177_v59  ;;  %v19077_v33 = vld [vmem:[#allocation44_spill] sm:$0xff]  ;;  %v8961_v59 = vadd.f32 %v17944_v0, %v17952_v32  ;;  %v13886_v21 = vld [vmem:[#allocation2 + $0x98] sm:$0xff]   ;;  %v11020_v32 = vshrl.u32 %v18187_v57, 16 }
 0x696   : > { %v9829_v16 = vadd.f32 %v9725_v49, %v9207_v18  ;;  %v9541_v60 = vsel %vm3070_vm3, %v9536_v26, %v9540_v14  ;;  %v11019_v4 = vsel %vm3070_vm3, %v11014_v45, %v11018_v41  ;;  %v18225_v18 = vld [vmem:[#allocation2 + $0x90] sm:$0xff]  ;;  %v8281_v49 = vadd.f32 %v19077_v33, %v7607_v25  ;;  %v19081_v25 = vld [vmem:[#allocation62_spill] sm:$0xff] }
 0x697   : > { %v10182_v12 = vsel %vm2467_vm2, %v10172_v62, %v10181_v30  ;;  %v11024_v45 = vshll.u32 %v18222_v3, 16  ;;  %v9542_v33 = vshrl.u32 %v18190_v34, 16 }
 0x699   : > { %v11026_v0 = vrot.slane %v11024_v45, 1  ;;  %v9544_v10 = vor.u32 %v9542_v33, %v9540_v14  ;;  %v18260_v14 = vld [vmem:[#allocation2 + $0x98] sm:$0xff] }
 0x69a   : > { %v9181_v52 = vpop.f32.mrf.mxu1  ;;  %12661 = vmatmul.msk.bf16.gmra.mxu2 %vm2234_vm1, %v9541_v60  ;;  %v9546_v60 = vshll.u32 %v18225_v18, 16 }
 0x69b   : > { %v18211_v13 = vadd.f32 %v9181_v52, %v8960_v23  ;;  %v10375_v43 = vpop.f32.mrf.mxu3  ;;  %v18232_v52 = vpop.f32.mrf.mxu0 }
 0x69c   : > { %v18216_v37 = vadd.f32 %v10375_v43, %v9829_v16  ;;  %v10184_v43 = vshrl.u32 %v13886_v21, 16 }
 0x69d   : > { %19074 = vst [vmem:[#allocation16_spill] sm:$0xff] %v18211_v13  ;;  %12823 = vmatmul.msk.bf16.gmra.mxu1 %vm2234_vm1, %v11019_v4  ;;  %12711 = vmatmul.msk.bf16.gmra.mxu0 %vm2234_vm1, %v14558_v55  ;;  %v9728_v58 = vpop.f32.mrf.mxu2  ;;  %v10187_v4 = vshll.u32 %v13886_v21, 16  ;;  %v19080_v55 = vld [vmem:[#allocation42_spill] sm:$0xff]  ;;  %v8962_v13 = vadd.f32 %v17958_v44, %v17966_v38  ;;  %v14560_v44 = vld [vmem:[#allocation2 + $0x94] sm:$0xff]  }
 0x69e   : > { %v9830_v16 = vadd.f32 %v9728_v58, %v19078_v6  ;;  %v8931_v22 = vadd.f32 %v19080_v55, %v8281_v49  ;;  %v9548_v6 = vrot.slane %v9546_v60, 1  ;;  %v11022_v49 = vor.u32 %v11020_v32, %v11018_v41  ;;  %v18257_v38 = vld [vmem:[#allocation2 + $0x5c] sm:$0xff] }
 0x69f   : > { %12686 = vmatmul.msk.bf16.gmra.mxu3 %vm2234_vm1, %v10182_v12  ;;  %v13887_v60 = vld [vmem:[#allocation2 + $0xa0] sm:$0xff]   ;;  %v9554_v32 = vshll.u32 %v18260_v14, 16 }
 0x6a0   : > { %v9209_v58 = vadd.f32 %v19081_v25, %v8931_v22  ;;  %v11027_v57 = vsel %vm3070_vm3, %v11022_v49, %v11026_v0  ;;  %v11032_v25 = vshll.u32 %v18257_v38, 16 }
 0x6a2   : > { %v9183_v23 = vpop.f32.mrf.mxu1 }
 0x6a3   : > { %v18234_v26 = vadd.f32 %v9183_v23, %v8961_v59  ;;  %v10378_v62 = vpop.f32.mrf.mxu3  ;;  %v10186_v59 = vrot.slane %v10184_v43, 3  ;;  %v10189_v23 = vrot.slane %v10187_v4, 4  ;;  %v18250_v22 = vpop.f32.mrf.mxu0 }
 0x6a4   : > { %v18239_v36 = vadd.f32 %v10378_v62, %v9830_v16  ;;  %v9549_v62 = vsel %vm3070_vm3, %v9544_v10, %v9548_v6 }
 0x6a5   : > { %19079 = vst [vmem:[#allocation25_spill] sm:$0xff] %v18234_v26  ;;  %v9730_v12 = vpop.f32.mrf.mxu2  ;;  %v10190_v45 = vor.u32 %v10189_v23, %v10186_v59  ;;  %v11034_v23 = vrot.slane %v11032_v25, 1 }
 0x6a6   : > { %v9831_v26 = vadd.f32 %v9730_v12, %v9209_v58  ;;  %v10193_v12 = vshrl.u32 %v13887_v60, 16 }
 0x6a7   : > { %v10191_v10 = vsel %vm2467_vm2, %v10181_v30, %v10190_v45  ;;  %v10196_v30 = vshll.u32 %v13887_v60, 16 }
 0x6a8   : > { %v10195_v49 = vrot.slane %v10193_v12, 3  ;;  %v13888_v12 = vld [vmem:[#allocation2 + $0xa8] sm:$0xff]  }
 0x6aa   : > { %v9186_v21 = vpop.f32.mrf.mxu1  ;;  %12662 = vmatmul.msk.bf16.gmra.mxu2 %vm2234_vm1, %v9549_v62  ;;  %v10198_v62 = vrot.slane %v10196_v30, 4 }
 0x6ab   : > { %v18246_v16 = vadd.f32 %v9186_v21, %v8962_v13  ;;  %v10380_v55 = vpop.f32.mrf.mxu3  ;;  %v18272_v59 = vpop.f32.mrf.mxu0 }
 0x6ac   : > { %v18253_v34 = vadd.f32 %v10380_v55, %v9831_v26  ;;  %v8963_v26 = vadd.f32 %v17970_v28, %v17976_v5  ;;  %v9550_v28 = vshrl.u32 %v18225_v18, 16  ;;  %v9556_v5 = vrot.slane %v9554_v32, 1 }
 0x6ad   : > { %12824 = vmatmul.msk.bf16.gmra.mxu1 %vm2234_vm1, %v11027_v57  ;;  %12712 = vmatmul.msk.bf16.gmra.mxu0 %vm2234_vm1, %v14560_v44  ;;  %v9733_v41 = vpop.f32.mrf.mxu2  ;;  %v8964_v57 = vadd.f32 %v17991_v17, %v17993_v31  ;;  %v18288_v17 = vld [vmem:[#allocation2 + $0x64] sm:$0xff]  ;;  %v8965_v32 = vadd.f32 %v18006_v2, %v18001_v53  ;;  %v14004_v53 = vld [vmem:[%s14854_s8 + $0x10] sm:$0xff]   ;;  %v9558_v2 = vshrl.u32 %v18260_v14, 16 }
 0x6ae   : > { %v9832_v13 = vadd.f32 %v9733_v41, %v17798_v40  ;;  %v11028_v40 = vshrl.u32 %v18222_v3, 16  ;;  %v9552_v41 = vor.u32 %v9550_v28, %v9548_v6  ;;  %v18291_v6 = vld [vmem:[#allocation2 + $0xa0] sm:$0xff]  ;;  %v13550_v14 = vunpack.c.l.bf16 %v14004_v53 }
 0x6af   : > { %12687 = vmatmul.msk.bf16.gmra.mxu3 %vm2234_vm1, %v10191_v10 }
 0x6b0   : > { %v11030_v10 = vor.u32 %v11028_v40, %v11026_v0 }
 0x6b2   : > { %v9188_v43 = vpop.f32.mrf.mxu1  ;;  %v11035_v60 = vsel %vm3070_vm3, %v11030_v10, %v11034_v23 }
 0x6b3   : > { %v18266_v4 = vadd.f32 %v9188_v43, %v8963_v26  ;;  %v10383_v58 = vpop.f32.mrf.mxu3  ;;  %v9557_v26 = vsel %vm3070_vm3, %v9552_v41, %v9556_v5  ;;  %v10199_v43 = vor.u32 %v10198_v62, %v10195_v49  ;;  %v18293_v25 = vpop.f32.mrf.mxu0  ;;  %v10202_v49 = vshrl.u32 %v13888_v12, 16 }
 0x6b4   : > { %v18270_v33 = vadd.f32 %v10383_v58, %v9832_v13  ;;  %v10205_v62 = vshll.u32 %v13888_v12, 16 }
 0x6b5   : > { %v9735_v21 = vpop.f32.mrf.mxu2  ;;  %v10200_v0 = vsel %vm2467_vm2, %v10190_v45, %v10199_v43  ;;  %v9562_v45 = vshll.u32 %v18291_v6, 16  ;;  %v10204_v10 = vrot.slane %v10202_v49, 3 }
 0x6b6   : > { %v9833_v55 = vadd.f32 %v9735_v21, %v17814_v7  ;;  %v14562_v7 = vld [vmem:[#allocation2 + $0x9c] sm:$0xff]   ;;  %v11040_v21 = vshll.u32 %v18288_v17, 16 }
 0x6b7   : > { %v9564_v41 = vrot.slane %v9562_v45, 1 }
 0x6ba   : > { %v9191_v44 = vpop.f32.mrf.mxu1  ;;  %12663 = vmatmul.msk.bf16.gmra.mxu2 %vm2234_vm1, %v9557_v26  ;;  %v10207_v26 = vrot.slane %v10205_v62, 4  ;;  %v18341_v62 = vld [vmem:[#allocation2 + $0xa8] sm:$0xff] }
 0x6bb   : > { %v18279_v13 = vadd.f32 %v9191_v44, %v8964_v57  ;;  %v10385_v3 = vpop.f32.mrf.mxu3  ;;  %v18306_v57 = vrot.slane %v11040_v21, 1 }
 0x6bc   : > { %v18284_v18 = vadd.f32 %v10385_v3, %v9833_v55 }
 0x6bd   : > { %12825 = vmatmul.msk.bf16.gmra.mxu1 %vm2234_vm1, %v11035_v60  ;;  %12713 = vmatmul.msk.bf16.gmra.mxu0 %vm2234_vm1, %v14562_v7  ;;  %v9738_v31 = vpop.f32.mrf.mxu2  ;;  %v10746_v60 = vadd.f32 %v18025_v8, %v18022_v11  ;;  %v18316_v7 = vld [vmem:[%s18821_s4] ss:$0 sm:$0xff]  ;;  %v18324_v11 = vor.u32 %v10207_v26, %v10204_v10  ;;  %v19085_v26 = vld [vmem:[#allocation9_spill] sm:$0xff] }
 0x6be   : > { %v9834_v58 = vadd.f32 %v9738_v31, %v17824_v61  ;;  %v11036_v61 = vshrl.u32 %v18257_v38, 16  ;;  %v9560_v31 = vor.u32 %v9558_v2, %v9556_v5  ;;  %v19084_v10 = vld [vmem:[#allocation46_spill] sm:$0xff] }
 0x6bf   : > { %12688 = vmatmul.msk.bf16.gmra.mxu3 %vm2234_vm1, %v10200_v0  ;;  %v10209_v49 = vsel %vm2467_vm2, %v10199_v43, %v18324_v11 }
 0x6c0   : > { %v11038_v0 = vor.u32 %v11036_v61, %v11034_v23  ;;  %v9565_v12 = vsel %vm3070_vm3, %v9560_v31, %v9564_v41  ;;  %v14564_v23 = vld [vmem:[#allocation2 + $0xa4] sm:$0xff]  }
 0x6c2   : > { %v9193_v30 = vpop.f32.mrf.mxu1 }
 0x6c3   : > { %v18299_v40 = vadd.f32 %v9193_v30, %v8965_v32  ;;  %v10388_v28 = vpop.f32.mrf.mxu3 }
 0x6c4   : > { %v18303_v55 = vadd.f32 %v10388_v28, %v9834_v58  ;;  %v18318_v58 = vpop.f32.mrf.mxu0  ;;  %v18332_v28 = vld [vmem:[#allocation2 + $0x6c] sm:$0xff] }
 0x6c5   : > { %19082 = vst [vmem:[#allocation26_spill] sm:$0xff] %v18299_v40  ;;  %v9740_v44 = vpop.f32.mrf.mxu2 }
 0x6c6   : > { %v9835_v3 = vadd.f32 %v9740_v44, %v17840_v35  ;;  %v11043_v35 = vsel %vm3070_vm3, %v11038_v0, %v18306_v57  ;;  %v19083_v44 = vld [vmem:[#allocation29_spill] sm:$0xff]  ;;  %v13551_v0 = vunpack.c.h.bf16 %v14004_v53 }
 0x6ca   : > { %v11248_v38 = vpop.f32.mrf.mxu1  ;;  %12664 = vmatmul.msk.bf16.gmra.mxu2 %vm2234_vm1, %v9565_v12 }
 0x6cb   : > { %v11368_v32 = vadd.f32 %v11248_v38, %v10746_v60  ;;  %v10390_v30 = vpop.f32.mrf.mxu3  ;;  %v13889_v60 = vld [vmem:[#allocation2 + $0xb0] sm:$0xff]  }
 0x6cc   : > { %v18328_v21 = vadd.f32 %v10390_v30, %v9835_v3  ;;  %v10747_v3 = vadd.f32 %v19085_v26, %v19084_v10  ;;  %v10211_v12 = vshrl.u32 %v13889_v60, 16  ;;  %v10214_v30 = vshll.u32 %v13889_v60, 16 }
 0x6cd   : > { %v11516_v8 = vadd.f32 %v18316_v7, %v11368_v32  ;;  %12826 = vmatmul.msk.bf16.gmra.mxu1 %vm2234_vm1, %v11043_v35  ;;  %12714 = vmatmul.msk.bf16.gmra.mxu0 %vm2234_vm1, %v14564_v23  ;;  %v9743_v45 = vpop.f32.mrf.mxu2  ;;  %v11048_v32 = vshll.u32 %v18332_v28, 16  ;;  %v18351_v35 = vpop.f32.mrf.mxu0 }
 0x6ce   : > { %v9836_v2 = vadd.f32 %v9743_v45, %v19083_v44  ;;  %v11044_v45 = vshrl.u32 %v18288_v17, 16  ;;  %v9566_v44 = vshrl.u32 %v18291_v6, 16  ;;  %v10213_v26 = vrot.slane %v10211_v12, 3 }
 0x6cf   : > { %v11564_v5 = vadd.f32 %v13550_v14, %v11516_v8  ;;  %12689 = vmatmul.msk.bf16.gmra.mxu3 %vm2234_vm1, %v10209_v49  ;;  %v9570_v14 = vshll.u32 %v18341_v62, 16  ;;  %v18357_v49 = vrot.slane %v11048_v32, 1 }
 0x6d1   : > { %v11612_v61 = vmax.f32 %v11564_v5, 0.0  ;;  %v9572_v10 = vrot.slane %v9570_v14, 1 }
 0x6d2   : > { %v11250_v38 = vpop.f32.mrf.mxu1 }
 0x6d3   : > { %11660 = vst.msk [vmem:[%s18337_s29] sm:$0xff] %vm2234_vm1, %v11612_v61  ;;  %v11369_v31 = vadd.f32 %v11250_v38, %v10747_v3  ;;  %v10393_v43 = vpop.f32.mrf.mxu3  ;;  %v14005_v61 = vld [vmem:[%s14854_s8 + $0x18] sm:$0xff]   ;;  %v10216_v3 = vrot.slane %v10214_v30, 4  ;;  %v19086_v38 = vld [vmem:[#allocation23_spill] sm:$0xff] }
 0x6d4   : > { %v18354_v23 = vadd.f32 %v10393_v43, %v9836_v2  ;;  %v10748_v2 = vadd.f32 %v18069_v19, %v18058_v39  ;;  %v9568_v43 = vor.u32 %v9566_v44, %v9564_v41  ;;  %v13554_v32 = vunpack.c.l.bf16 %v14005_v61  ;;  %v14566_v19 = vld [vmem:[#allocation2 + $0xac] sm:$0xff]  }
 0x6d5   : > { %v11517_v8 = vadd.f32 %v18316_v7, %v11369_v31  ;;  %v9745_v53 = vpop.f32.mrf.mxu2  ;;  %v10217_v12 = vor.u32 %v10216_v3, %v10213_v26  ;;  %v18382_v44 = vld [vmem:[#allocation2 + $0xb0] sm:$0xff] }
 0x6d6   : > { %v9837_v40 = vadd.f32 %v9745_v53, %v19086_v38  ;;  %v13890_v38 = vld [vmem:[#allocation2 + $0xb8] sm:$0xff]  }
 0x6d7   : > { %v11565_v5 = vadd.f32 %v13551_v0, %v11517_v8  ;;  %v11046_v0 = vor.u32 %v11044_v45, %v18306_v57  ;;  %v9573_v8 = vsel %vm3070_vm3, %v9568_v43, %v9572_v10  ;;  %v18375_v57 = vpop.f32.mrf.mxu0  ;;  %v10218_v53 = vsel %vm2467_vm2, %v18324_v11, %v10217_v12 }
 0x6d8   : > { %v13555_v43 = vunpack.c.h.bf16 %v14005_v61  ;;  %v9574_v61 = vshrl.u32 %v18341_v62, 16 }
 0x6d9   : > { %v11613_v60 = vmax.f32 %v11565_v5, 0.0  ;;  %v11051_v14 = vsel %vm3070_vm3, %v11046_v0, %v18357_v49  ;;  %v18378_v5 = vld [vmem:[#allocation2 + $0x74] sm:$0xff] }
 0x6da   : > { %v11253_v31 = vpop.f32.mrf.mxu1  ;;  %12665 = vmatmul.msk.bf16.gmra.mxu2 %vm2234_vm1, %v9573_v8  ;;  %v11056_v0 = vshll.u32 %v18378_v5, 16  ;;  %v10223_v8 = vshll.u32 %v13890_v38, 16 }
 0x6db   : > { %11661 = vst.msk [vmem:[%s18337_s29 + $0x8] sm:$0xff] %vm2234_vm1, %v11613_v60  ;;  %v11370_v17 = vadd.f32 %v11253_v31, %v10748_v2  ;;  %v10395_v6 = vpop.f32.mrf.mxu3  ;;  %v10749_v60 = vadd.f32 %v18096_v24, %v18072_v50  ;;  %v11052_v50 = vshrl.u32 %v18332_v28, 16 }
 0x6dc   : > { %v18372_v39 = vadd.f32 %v10395_v6, %v9837_v40  ;;  %v19087_v40 = vld [vmem:[#allocation24_spill] sm:$0xff]  ;;  %v18396_v24 = vrot.slane %v11056_v0, 1 }
 0x6dd   : > { %v11518_v30 = vadd.f32 %v18316_v7, %v11370_v17  ;;  %12827 = vmatmul.msk.bf16.gmra.mxu1 %vm2234_vm1, %v11051_v14  ;;  %12715 = vmatmul.msk.bf16.gmra.mxu0 %vm2234_vm1, %v14566_v19  ;;  %v9748_v45 = vpop.f32.mrf.mxu2  ;;  %v9578_v17 = vshll.u32 %v18382_v44, 16  ;;  %v11054_v28 = vor.u32 %v11052_v50, %v18357_v49 }
 0x6de   : > { %v9838_v3 = vadd.f32 %v9748_v45, %v19087_v40 }
 0x6df   : > { %v11566_v41 = vadd.f32 %v13554_v32, %v11518_v30  ;;  %12690 = vmatmul.msk.bf16.gmra.mxu3 %vm2234_vm1, %v10218_v53  ;;  %v10220_v32 = vshrl.u32 %v13890_v38, 16  ;;  %v9580_v45 = vrot.slane %v9578_v17, 1  ;;  %v18400_v40 = vpop.f32.mrf.mxu0  ;;  %v19088_v38 = vld [vmem:[#allocation49_spill] sm:$0xff] }
 0x6e1   : > { %v11614_v26 = vmax.f32 %v11566_v41, 0.0  ;;  %v14006_v41 = vld [vmem:[%s14854_s8 + $0x20] sm:$0xff]   ;;  %v10222_v53 = vrot.slane %v10220_v32, 3  ;;  %v11059_v32 = vsel %vm3070_vm3, %v11054_v28, %v18396_v24 }
 0x6e2   : > { %v11255_v2 = vpop.f32.mrf.mxu1 }
 0x6e3   : > { %11662 = vst.msk [vmem:[%s18337_s29 + $0x10] sm:$0xff] %vm2234_vm1, %v11614_v26  ;;  %v11371_v31 = vadd.f32 %v11255_v2, %v10749_v60  ;;  %v10398_v11 = vpop.f32.mrf.mxu3  ;;  %v10225_v26 = vrot.slane %v10223_v8, 4 }
 0x6e4   : > { %v18393_v14 = vadd.f32 %v10398_v11, %v9838_v3  ;;  %v10750_v3 = vadd.f32 %v18119_v56, %v18093_v48  ;;  %v13558_v11 = vunpack.c.l.bf16 %v14006_v41  ;;  %v14568_v56 = vld [vmem:[#allocation2 + $0xb4] sm:$0xff]  }
 0x6e5   : > { %v11519_v6 = vadd.f32 %v18316_v7, %v11371_v31  ;;  %v9750_v19 = vpop.f32.mrf.mxu2  ;;  %v10226_v8 = vor.u32 %v10225_v26, %v10222_v53  ;;  %v19089_v53 = vld [vmem:[#allocation4_spill] sm:$0xff] }
 0x6e6   : > { %v9839_v2 = vadd.f32 %v9750_v19, %v19088_v38  ;;  %v18420_v19 = vld [vmem:[#allocation2 + $0xb8] sm:$0xff]  ;;  %v13891_v38 = vld [vmem:[#allocation2 + $0xc0] sm:$0xff]  }
 0x6e7   : > { %v11567_v30 = vadd.f32 %v13555_v43, %v11519_v6  ;;  %v9576_v43 = vor.u32 %v9574_v61, %v9572_v10  ;;  %v18417_v10 = vld [vmem:[#allocation2 + $0x7c] sm:$0xff]  ;;  %v10227_v50 = vsel %vm2467_vm2, %v10217_v12, %v10226_v8 }
 0x6e8   : > { %v11064_v12 = vshll.u32 %v18417_v10, 16 }
 0x6e9   : > { %v11615_v60 = vmax.f32 %v11567_v30, 0.0  ;;  %v9581_v62 = vsel %vm3070_vm3, %v9576_v43, %v9580_v45  ;;  %v13559_v43 = vunpack.c.h.bf16 %v14006_v41  ;;  %v9582_v41 = vshrl.u32 %v18382_v44, 16 }
 0x6ea   : > { %v11258_v31 = vpop.f32.mrf.mxu1  ;;  %12666 = vmatmul.msk.bf16.gmra.mxu2 %vm2234_vm1, %v9581_v62  ;;  %v10232_v62 = vshll.u32 %v13891_v38, 16 }
 0x6eb   : > { %11663 = vst.msk [vmem:[%s18337_s29 + $0x18] sm:$0xff] %vm2234_vm1, %v11615_v60  ;;  %v11372_v0 = vadd.f32 %v11258_v31, %v10750_v3  ;;  %v10400_v17 = vpop.f32.mrf.mxu3  ;;  %v10751_v60 = vadd.f32 %v18137_v15, %v18107_v47  ;;  %v18426_v3 = vpop.f32.mrf.mxu0  ;;  %v11060_v15 = vshrl.u32 %v18378_v5, 16 }
 0x6ec   : > { %v18413_v48 = vadd.f32 %v10400_v17, %v9839_v2 }
 0x6ed   : > { %v11520_v6 = vadd.f32 %v18316_v7, %v11372_v0  ;;  %12828 = vmatmul.msk.bf16.gmra.mxu1 %vm2234_vm1, %v11059_v32  ;;  %12716 = vmatmul.msk.bf16.gmra.mxu0 %vm2234_vm1, %v14568_v56  ;;  %v9753_v30 = vpop.f32.mrf.mxu2  ;;  %v9586_v0 = vshll.u32 %v18420_v19, 16 }
 0x6ee   : > { %v9840_v26 = vadd.f32 %v9753_v30, %v19089_v53 }
 0x6ef   : > { %v11568_v49 = vadd.f32 %v13558_v11, %v11520_v6  ;;  %12691 = vmatmul.msk.bf16.gmra.mxu3 %vm2234_vm1, %v10227_v50  ;;  %v10229_v11 = vshrl.u32 %v13891_v38, 16  ;;  %v11066_v6 = vrot.slane %v11064_v12, 1  ;;  %v9588_v30 = vrot.slane %v9586_v0, 1 }
 0x6f0   : > { %v10752_v38 = vadd.f32 %v18165_v9, %v18130_v54  ;;  %v14570_v9 = vld [vmem:[#allocation2 + $0xbc] sm:$0xff]  }
 0x6f1   : > { %v11616_v61 = vmax.f32 %v11568_v49, 0.0  ;;  %v14007_v49 = vld [vmem:[%s14854_s8 + $0x28] sm:$0xff]   ;;  %v10231_v50 = vrot.slane %v10229_v11, 3 }
 0x6f2   : > { %v11260_v2 = vpop.f32.mrf.mxu1  ;;  %v13562_v12 = vunpack.c.l.bf16 %v14007_v49 }
 0x6f3   : > { %11664 = vst.msk [vmem:[%s18337_s29 + $0x20] sm:$0xff] %vm2234_vm1, %v11616_v61  ;;  %v11373_v31 = vadd.f32 %v11260_v2, %v10751_v60  ;;  %v10403_v28 = vpop.f32.mrf.mxu3  ;;  %v10234_v61 = vrot.slane %v10232_v62, 4  ;;  %v19090_v60 = vld [vmem:[#allocation5_spill] sm:$0xff]  ;;  %v18446_v62 = vpop.f32.mrf.mxu0 }
 0x6f4   : > { %v18433_v32 = vadd.f32 %v10403_v28, %v9840_v26 }
 0x6f5   : > { %v11521_v17 = vadd.f32 %v18316_v7, %v11373_v31  ;;  %v9755_v56 = vpop.f32.mrf.mxu2  ;;  %v9584_v31 = vor.u32 %v9582_v41, %v9580_v45  ;;  %v10235_v11 = vor.u32 %v10234_v61, %v10231_v50  ;;  %v18454_v45 = vld [vmem:[#allocation2 + $0x84] sm:$0xff]  ;;  %v10753_v41 = vadd.f32 %v18184_v20, %v18144_v1 }
 0x6f6   : > { %v9841_v2 = vadd.f32 %v9755_v56, %v19090_v60  ;;  %v13892_v50 = vld [vmem:[#allocation2 + $0xc8] sm:$0xff]   ;;  %v13563_v60 = vunpack.c.h.bf16 %v14007_v49  ;;  %v11068_v1 = vshrl.u32 %v18417_v10, 16 }
 0x6f7   : > { %v11569_v47 = vadd.f32 %v13559_v43, %v11521_v17  ;;  %v11062_v43 = vor.u32 %v11060_v15, %v18396_v24  ;;  %v9589_v28 = vsel %vm3070_vm3, %v9584_v31, %v9588_v30  ;;  %v18457_v15 = vld [vmem:[#allocation2 + $0xc0] sm:$0xff] }
 0x6f9   : > { %v11617_v53 = vmax.f32 %v11569_v47, 0.0  ;;  %v11067_v0 = vsel %vm3070_vm3, %v11062_v43, %v11066_v6  ;;  %v10236_v47 = vsel %vm2467_vm2, %v10226_v8, %v10235_v11  ;;  %v10238_v8 = vshrl.u32 %v13892_v50, 16 }
 0x6fa   : > { %v11263_v26 = vpop.f32.mrf.mxu1  ;;  %12667 = vmatmul.msk.bf16.gmra.mxu2 %vm2234_vm1, %v9589_v28  ;;  %v9590_v28 = vshrl.u32 %v18420_v19, 16 }
 0x6fb   : > { %11665 = vst.msk [vmem:[%s18337_s29 + $0x28] sm:$0xff] %vm2234_vm1, %v11617_v53  ;;  %v11374_v5 = vadd.f32 %v11263_v26, %v10752_v38  ;;  %v10405_v44 = vpop.f32.mrf.mxu3  ;;  %v9594_v38 = vshll.u32 %v18457_v15, 16  ;;  %v10241_v26 = vshll.u32 %v13892_v50, 16  ;;  %v18467_v43 = vpop.f32.mrf.mxu0  ;;  %v10240_v49 = vrot.slane %v10238_v8, 3 }
 0x6fc   : > { %v18450_v54 = vadd.f32 %v10405_v44, %v9841_v2  ;;  %v11072_v2 = vshll.u32 %v18454_v45, 16  ;;  %v10755_v8 = vadd.f32 %v18232_v52, %v18179_v63  ;;  %v11076_v63 = vshrl.u32 %v18454_v45, 16 }
 0x6fd   : > { %v11522_v17 = vadd.f32 %v18316_v7, %v11374_v5  ;;  %12829 = vmatmul.msk.bf16.gmra.mxu1 %vm2234_vm1, %v11067_v0  ;;  %12717 = vmatmul.msk.bf16.gmra.mxu0 %vm2234_vm1, %v14570_v9  ;;  %v9596_v44 = vrot.slane %v9594_v38, 1  ;;  %v10243_v0 = vrot.slane %v10241_v26, 4  ;;  %v10754_v9 = vadd.f32 %v18207_v29, %v18167_v42  ;;  %v14572_v42 = vld [vmem:[#allocation2 + $0xc4] sm:$0xff]   ;;  %v18492_v26 = vld [vmem:[#allocation2 + $0xd0] sm:$0xff]  }
 0x6fe   : > { %v11074_v20 = vrot.slane %v11072_v2, 1 }
 0x6ff   : > { %v11570_v24 = vadd.f32 %v13562_v12, %v11522_v17  ;;  %12692 = vmatmul.msk.bf16.gmra.mxu3 %vm2234_vm1, %v10236_v47  ;;  %v14008_v12 = vld [vmem:[%s14854_s8 + $0x30] sm:$0xff]   ;;  %v9592_v47 = vor.u32 %v9590_v28, %v9588_v30 }
 0x700   : > { %v13566_v50 = vunpack.c.l.bf16 %v14008_v12 }
 0x701   : > { %v11618_v56 = vmax.f32 %v11570_v24, 0.0  ;;  %v9597_v10 = vsel %vm3070_vm3, %v9592_v47, %v9596_v44  ;;  %v14009_v47 = vld [vmem:[%s14854_s8 + $0x38] sm:$0xff]  }
 0x702   : > { %v11265_v61 = vpop.f32.mrf.mxu1 }
 0x703   : > { %11666 = vst.msk [vmem:[%s18337_s29 + $0x30] sm:$0xff] %vm2234_vm1, %v11618_v56  ;;  %v11375_v53 = vadd.f32 %v11265_v61, %v10753_v41  ;;  %v11070_v56 = vor.u32 %v11068_v1, %v11066_v6  ;;  %v18482_v6 = vld [vmem:[#allocation2 + $0x8c] sm:$0xff]  ;;  %v18487_v2 = vpop.f32.mrf.mxu0  ;;  %v13567_v1 = vunpack.c.h.bf16 %v14008_v12 }
 0x705   : > { %v11523_v31 = vadd.f32 %v18316_v7, %v11375_v53  ;;  %v11075_v61 = vsel %vm3070_vm3, %v11070_v56, %v11074_v20  ;;  %v10244_v53 = vor.u32 %v10243_v0, %v10240_v49  ;;  %v10247_v49 = vshrl.u32 %v18492_v26, 16 }
 0x706   : > { %v10250_v0 = vshll.u32 %v18492_v26, 16  ;;  %v9598_v56 = vshrl.u32 %v18457_v15, 16 }
 0x707   : > { %v11571_v5 = vadd.f32 %v13563_v60, %v11523_v31  ;;  %v10245_v30 = vsel %vm2467_vm2, %v10235_v11, %v10244_v53  ;;  %v18485_v60 = vld [vmem:[#allocation2 + $0xc8] sm:$0xff]  ;;  %v11080_v11 = vshll.u32 %v18482_v6, 16 }
 0x708   : > { %v9602_v28 = vshll.u32 %v18485_v60, 16 }
 0x709   : > { %v11619_v17 = vmax.f32 %v11571_v5, 0.0  ;;  %v11082_v52 = vrot.slane %v11080_v11, 1 }
 0x70a   : > { %v11268_v24 = vpop.f32.mrf.mxu1  ;;  %12668 = vmatmul.msk.bf16.gmra.mxu2 %vm2234_vm1, %v9597_v10  ;;  %v9604_v12 = vrot.slane %v9602_v28, 1 }
 0x70b   : > { %11667 = vst.msk [vmem:[%s18337_s29 + $0x38] sm:$0xff] %vm2234_vm1, %v11619_v17  ;;  %v11376_v41 = vadd.f32 %v11268_v24, %v10754_v9  ;;  %v9914_v24 = vld [vmem:[#allocation2 + $0xd8] sm:$0xf] }
 0x70d   : > { %v11524_v19 = vadd.f32 %v18316_v7, %v11376_v41  ;;  %12830 = vmatmul.msk.bf16.gmra.mxu1 %vm2234_vm1, %v11075_v61  ;;  %12718 = vmatmul.msk.bf16.gmra.mxu0 %vm2234_vm1, %v14572_v42  ;;  %v10249_v41 = vrot.slane %v10247_v49, 3  ;;  %v10756_v61 = vadd.f32 %v18250_v22, %v18202_v51  ;;  %v14573_v51 = vld [vmem:[#allocation2 + $0xcc] sm:$0xff]  }
 0x70f   : > { %v11572_v29 = vadd.f32 %v13566_v50, %v11524_v19  ;;  %12693 = vmatmul.msk.bf16.gmra.mxu3 %vm2234_vm1, %v10245_v30  ;;  %v10252_v50 = vrot.slane %v10250_v0, 4  ;;  %v9292_v19 = vld [vmem:[#allocation2 + $0xd0] sm:$0x1]  ;;  %v11078_v30 = vor.u32 %v11076_v63, %v11074_v20  ;;  %v12979_v0 = vld [vmem:[#allocation2 + $0x94] sm:$0xff] }
 0x710   : > { %v9392_v11 = vunpack.c.l.b16 %v9292_v19 }
 0x711   : > { %v11620_v38 = vmax.f32 %v11572_v29, 0.0  ;;  %v9600_v29 = vor.u32 %v9598_v56, %v9596_v44 }
 0x712   : > { %v11270_v31 = vpop.f32.mrf.mxu1  ;;  %v9417_v49 = vpack.c.b16 %v9392_v11, %v9392_v11 }
 0x713   : > { %11668 = vst.msk [vmem:[%s18337_s29 + $0x40] sm:$0xff] %vm2234_vm1, %v11620_v38  ;;  %v11377_v5 = vadd.f32 %v11270_v31, %v10755_v8  ;;  %v10014_v38 = vunpack.c.l.b16 %v9914_v24  ;;  %v18506_v8 = vpop.f32.mrf.mxu0  ;;  %v13570_v31 = vunpack.c.l.bf16 %v14009_v47  ;;  %v9605_v15 = vsel %vm3070_vm3, %v9600_v29, %v9604_v12 }
 0x715   : > { %v11525_v17 = vadd.f32 %v18316_v7, %v11377_v5  ;;  %v11083_v5 = vsel %vm3070_vm3, %v11078_v30, %v11082_v52  ;;  %v10039_v22 = vpack.c.b16 %v10014_v38, %v10014_v38 }
 0x717   : > { %v11573_v9 = vadd.f32 %v13567_v1, %v11525_v17  ;;  %v10253_v1 = vor.u32 %v10252_v50, %v10249_v41  ;;  %v10256_v24 = vshrl.u32 %v10039_v22, 16  ;;  %v10259_v56 = vshll.u32 %v10039_v22, 16 }
 0x718   : > { %v13571_v50 = vunpack.c.h.bf16 %v14009_v47 }
 0x719   : > { %v11621_v10 = vmax.f32 %v11573_v9, 0.0  ;;  %v10254_v44 = vsel %vm2467_vm2, %v10244_v53, %v10253_v1  ;;  %v10757_v9 = vadd.f32 %v18272_v59, %v18216_v37  ;;  %v10258_v29 = vrot.slane %v10256_v24, 3 }
 0x71a   : > { %v11273_v42 = vpop.f32.mrf.mxu1  ;;  %12669 = vmatmul.msk.bf16.gmra.mxu2 %vm2234_vm1, %v9605_v15  ;;  %v10261_v30 = vrot.slane %v10259_v56, 4  ;;  %v13547_v59 = vunpack.c.h.b16 %v18492_v26 }
 0x71b   : > { %11669 = vst.msk [vmem:[%s18337_s29 + $0x48] sm:$0xff] %vm2234_vm1, %v11621_v10  ;;  %v11378_v45 = vadd.f32 %v11273_v42, %v10756_v61  ;;  %v9610_v10 = vshll.u32 %v9417_v49, 16  ;;  %v11088_v61 = vshll.u32 %v12979_v0, 16  ;;  %v18522_v19 = vpop.f32.mrf.mxu0  ;;  %v9606_v42 = vshrl.u32 %v18485_v60, 16 }
 0x71c   : > { %v10541_v49 = vpack.c.b16 %v10014_v38, %v13547_v59 }
 0x71d   : > { %v11526_v28 = vadd.f32 %v18316_v7, %v11378_v45  ;;  %12831 = vmatmul.msk.bf16.gmra.mxu1 %vm2234_vm1, %v11083_v5  ;;  %12719 = vmatmul.msk.bf16.gmra.mxu0 %vm2234_vm1, %v14573_v51  ;;  %v14010_v45 = vld [vmem:[%s14854_s8 + $0x40] sm:$0xff]   ;;  %v9612_v15 = vrot.slane %v9610_v10, 1  ;;  %v11084_v5 = vshrl.u32 %v18482_v6, 16  ;;  %v11090_v47 = vrot.slane %v11088_v61, 1  ;;  %v14011_v10 = vld [vmem:[%s14854_s8 + $0x48] sm:$0xff]  }
 0x71e   : > { %v13575_v56 = vunpack.c.h.bf16 %v14010_v45  ;;  %v11092_v61 = vshrl.u32 %v12979_v0, 16 }
 0x71f   : > { %v11574_v20 = vadd.f32 %v13570_v31, %v11526_v28  ;;  %12694 = vmatmul.msk.bf16.gmra.mxu3 %vm2234_vm1, %v10254_v44  ;;  %v9608_v31 = vor.u32 %v9606_v42, %v9604_v12  ;;  %v10758_v28 = vadd.f32 %v18293_v25, %v18239_v36  ;;  %v11086_v22 = vor.u32 %v11084_v5, %v11082_v52 }
 0x720   : > { %v13574_v44 = vunpack.c.l.bf16 %v14010_v45 }
 0x721   : > { %v11622_v17 = vmax.f32 %v11574_v20, 0.0  ;;  %v10262_v20 = vor.u32 %v10261_v30, %v10258_v29  ;;  %v9613_v26 = vsel %vm3070_vm3, %v9608_v31, %v9612_v15  ;;  %v11091_v12 = vsel %vm3070_vm3, %v11086_v22, %v11090_v47  ;;  %v12981_v31 = vld [vmem:[#allocation2 + $0xa4] sm:$0xff]  ;;  %v14012_v22 = vld [vmem:[%s14854_s8 + $0x50] sm:$0xff]  }
 0x722   : > { %v11275_v63 = vpop.f32.mrf.mxu1  ;;  %v10760_v29 = vadd.f32 %v18351_v35, %v18270_v33  ;;  %v10761_v33 = vadd.f32 %v18375_v57, %v18284_v18  ;;  %v13582_v57 = vunpack.c.l.bf16 %v14012_v22 }
 0x723   : > { %11670 = vst.msk [vmem:[%s18337_s29 + $0x50] sm:$0xff] %vm2234_vm1, %v11622_v17  ;;  %v11379_v41 = vadd.f32 %v11275_v63, %v10757_v9  ;;  %v10263_v36 = vsel %vm2467_vm2, %v10253_v1, %v10262_v20  ;;  %v18539_v25 = vpop.f32.mrf.mxu0  ;;  %v12980_v17 = vld [vmem:[#allocation2 + $0x9c] sm:$0xff]  ;;  %v10759_v9 = vadd.f32 %v18318_v58, %v18253_v34  ;;  %v13578_v58 = vunpack.c.l.bf16 %v14011_v10 }
 0x724   : > { %v11100_v20 = vshrl.u32 %v12980_v17, 16 }
 0x725   : > { %v11527_v53 = vadd.f32 %v18316_v7, %v11379_v41  ;;  %v11096_v41 = vshll.u32 %v12980_v17, 16  ;;  %v12982_v17 = vld [vmem:[#allocation2 + $0xac] sm:$0xff] }
 0x727   : > { %v11575_v37 = vadd.f32 %v13571_v50, %v11527_v53  ;;  %v11098_v53 = vrot.slane %v11096_v41, 1  ;;  %v11112_v41 = vshll.u32 %v12982_v17, 16 }
 0x729   : > { %v11623_v11 = vmax.f32 %v11575_v37, 0.0  ;;  %v11094_v37 = vor.u32 %v11092_v61, %v11090_v47  ;;  %v13579_v47 = vunpack.c.h.bf16 %v14011_v10  ;;  %v14013_v10 = vld [vmem:[%s14854_s8 + $0x58] sm:$0xff]   ;;  %v11108_v61 = vshrl.u32 %v12981_v31, 16 }
 0x72a   : > { %v11278_v51 = vpop.f32.mrf.mxu1  ;;  %12670 = vmatmul.msk.bf16.gmra.mxu2 %vm2234_vm1, %v9613_v26 }
 0x72b   : > { %11671 = vst.msk [vmem:[%s18337_s29 + $0x58] sm:$0xff] %vm2234_vm1, %v11623_v11  ;;  %v11380_v60 = vadd.f32 %v11278_v51, %v10758_v28  ;;  %v11099_v59 = vsel %vm3070_vm3, %v11094_v37, %v11098_v53  ;;  %v11104_v11 = vshll.u32 %v12981_v31, 16 }
 0x72d   : > { %v11528_v6 = vadd.f32 %v18316_v7, %v11380_v60  ;;  %12832 = vmatmul.msk.bf16.gmra.mxu1 %vm2234_vm1, %v11091_v12  ;;  %12720 = vmatmul.msk.bf16.gmra.mxu0 %vm2234_vm1, %v10541_v49  ;;  %v11106_v60 = vrot.slane %v11104_v11, 1  ;;  %v10762_v49 = vadd.f32 %v18400_v40, %v18303_v55  ;;  %v11102_v12 = vor.u32 %v11100_v20, %v11098_v53  ;;  %v18571_v55 = vpop.f32.mrf.mxu2 }
 0x72e   : > { %v11114_v53 = vrot.slane %v11112_v41, 1 }
 0x72f   : > { %v11576_v52 = vadd.f32 %v13574_v44, %v11528_v6  ;;  %12695 = vmatmul.msk.bf16.gmra.mxu3 %vm2234_vm1, %v10263_v36  ;;  %v11107_v6 = vsel %vm3070_vm3, %v11102_v12, %v11106_v60 }
 0x731   : > { %v11624_v38 = vmax.f32 %v11576_v52, 0.0 }
 0x732   : > { %v11280_v63 = vpop.f32.mrf.mxu1 }
 0x733   : > { %11672 = vst.msk [vmem:[%s18337_s29 + $0x60] sm:$0xff] %vm2234_vm1, %v11624_v38  ;;  %v11381_v24 = vadd.f32 %v11280_v63, %v10759_v9  ;;  %v10763_v9 = vadd.f32 %v18426_v3, %v18328_v21  ;;  %v10764_v21 = vadd.f32 %v18446_v62, %v18354_v23  ;;  %v18581_v3 = vpop.f32.mrf.mxu0  ;;  %v12983_v62 = vld [vmem:[#allocation2 + $0xb4] sm:$0xff] }
 0x734   : > { %v11120_v11 = vshll.u32 %v12983_v62, 16 }
 0x735   : > { %v11529_v1 = vadd.f32 %v18316_v7, %v11381_v24  ;;  %v13583_v24 = vunpack.c.h.bf16 %v14012_v22 }
 0x737   : > { %v11577_v50 = vadd.f32 %v13575_v56, %v11529_v1  ;;  %v18575_v56 = vpop.f32.mrf.mxu3 }
 0x739   : > { %v11625_v42 = vmax.f32 %v11577_v50, 0.0 }
 0x73a   : > { %v11283_v30 = vpop.f32.mrf.mxu1 }
 0x73b   : > { %11673 = vst.msk [vmem:[%s18337_s29 + $0x68] sm:$0xff] %vm2234_vm1, %v11625_v42  ;;  %v11382_v34 = vadd.f32 %v11283_v30, %v10760_v29  ;;  %v11110_v30 = vor.u32 %v11108_v61, %v11106_v60  ;;  %v14014_v60 = vld [vmem:[%s14854_s8 + $0x60] sm:$0xff]  }
 0x73c   : > { %v13591_v41 = vunpack.c.h.bf16 %v14014_v60 }
 0x73d   : > { %v11530_v45 = vadd.f32 %v18316_v7, %v11382_v34  ;;  %12833 = vmatmul.msk.bf16.gmra.mxu1 %vm2234_vm1, %v11099_v59  ;;  %v13586_v34 = vunpack.c.l.bf16 %v14013_v10  ;;  %v11115_v59 = vsel %vm3070_vm3, %v11110_v30, %v11114_v53 }
 0x73f   : > { %v11578_v0 = vadd.f32 %v13578_v58, %v11530_v45  ;;  %v18585_v58 = vpop.f32.mrf.mxu2 }
 0x741   : > { %v11626_v15 = vmax.f32 %v11578_v0, 0.0  ;;  %v18590_v0 = vpop.f32.mrf.mxu3 }
 0x742   : > { %v11285_v35 = vpop.f32.mrf.mxu1 }
 0x743   : > { %11674 = vst.msk [vmem:[%s18337_s29 + $0x70] sm:$0xff] %vm2234_vm1, %v11626_v15  ;;  %v11383_v5 = vadd.f32 %v11285_v35, %v10761_v33  ;;  %v10765_v15 = vadd.f32 %v18467_v43, %v18372_v39  ;;  %v10766_v43 = vadd.f32 %v18487_v2, %v18393_v14  ;;  %v12984_v14 = vld [vmem:[#allocation2 + $0xbc] sm:$0xff] }
 0x745   : > { %v11531_v28 = vadd.f32 %v18316_v7, %v11383_v5  ;;  %v13587_v5 = vunpack.c.h.bf16 %v14013_v10 }
 0x747   : > { %v11579_v51 = vadd.f32 %v13579_v47, %v11531_v28  ;;  %v18596_v47 = vpop.f32.mrf.mxu0 }
 0x749   : > { %v11627_v44 = vmax.f32 %v11579_v51, 0.0  ;;  %v18599_v51 = vpop.f32.mrf.mxu2  ;;  %v18601_v20 = vpop.f32.mrf.mxu3 }
 0x74a   : > { %v11288_v26 = vpop.f32.mrf.mxu1 }
 0x74b   : > { %11675 = vst.msk [vmem:[%s18337_s29 + $0x78] sm:$0xff] %vm2234_vm1, %v11627_v44  ;;  %v11384_v18 = vadd.f32 %v11288_v26, %v10762_v49  ;;  %v11116_v44 = vshrl.u32 %v12982_v17, 16  ;;  %v11122_v49 = vrot.slane %v11120_v11, 1 }
 0x74d   : > { %v11532_v36 = vadd.f32 %v18316_v7, %v11384_v18  ;;  %12834 = vmatmul.msk.bf16.gmra.mxu1 %vm2234_vm1, %v11107_v6  ;;  %v11118_v12 = vor.u32 %v11116_v44, %v11114_v53  ;;  %v14015_v53 = vld [vmem:[%s14854_s8 + $0x68] sm:$0xff]  }
 0x74f   : > { %v11580_v52 = vadd.f32 %v13582_v57, %v11532_v36  ;;  %v13590_v57 = vunpack.c.l.bf16 %v14014_v60  ;;  %v11123_v6 = vsel %vm3070_vm3, %v11118_v12, %v11122_v49 }
 0x751   : > { %v11628_v38 = vmax.f32 %v11580_v52, 0.0  ;;  %v18611_v52 = vpop.f32.mrf.mxu0 }
 0x752   : > { %v11290_v40 = vpop.f32.mrf.mxu1 }
 0x753   : > { %11676 = vst.msk [vmem:[%s18337_s29 + $0x80] sm:$0xff] %vm2234_vm1, %v11628_v38  ;;  %v11385_v63 = vadd.f32 %v11290_v40, %v10763_v9  ;;  %v18613_v38 = vpop.f32.mrf.mxu2  ;;  %v10767_v9 = vadd.f32 %v18506_v8, %v18413_v48  ;;  %v18617_v40 = vpop.f32.mrf.mxu3  ;;  %v10768_v48 = vadd.f32 %v18522_v19, %v18433_v32  ;;  %v12985_v32 = vld [vmem:[#allocation2 + $0xc4] sm:$0xff] }
 0x754   : > { %v11136_v44 = vshll.u32 %v12985_v32, 16 }
 0x755   : > { %v11533_v1 = vadd.f32 %v18316_v7, %v11385_v63 }
 0x756   : > { %v11138_v12 = vrot.slane %v11136_v44, 1 }
 0x757   : > { %v11581_v50 = vadd.f32 %v13583_v24, %v11533_v1  ;;  %v11128_v1 = vshll.u32 %v12984_v14, 16 }
 0x759   : > { %v11629_v42 = vmax.f32 %v11581_v50, 0.0  ;;  %v18622_v61 = vpop.f32.mrf.mxu0 }
 0x75a   : > { %v11293_v29 = vpop.f32.mrf.mxu1 }
 0x75b   : > { %11677 = vst.msk [vmem:[%s18337_s29 + $0x88] sm:$0xff] %vm2234_vm1, %v11629_v42  ;;  %v11386_v37 = vadd.f32 %v11293_v29, %v10764_v21  ;;  %v11124_v42 = vshrl.u32 %v12983_v62, 16  ;;  %v11130_v21 = vrot.slane %v11128_v1, 1  ;;  %v18627_v8 = vpop.f32.mrf.mxu2  ;;  %v12986_v1 = vld [vmem:[#allocation2 + $0xcc] sm:$0xff] }
 0x75d   : > { %v11534_v45 = vadd.f32 %v18316_v7, %v11386_v37  ;;  %12835 = vmatmul.msk.bf16.gmra.mxu1 %vm2234_vm1, %v11115_v59  ;;  %v11126_v37 = vor.u32 %v11124_v42, %v11122_v49  ;;  %v13594_v59 = vunpack.c.l.bf16 %v14015_v53  ;;  %v19093_v42 = vld [vmem:[#allocation30_spill] sm:$0xff] }
 0x75f   : > { %v11582_v23 = vadd.f32 %v13586_v34, %v11534_v45  ;;  %v18631_v45 = vpop.f32.mrf.mxu3 }
 0x761   : > { %v11630_v31 = vmax.f32 %v11582_v23, 0.0  ;;  %v11131_v23 = vsel %vm3070_vm3, %v11126_v37, %v11130_v21 }
 0x762   : > { %v11295_v33 = vpop.f32.mrf.mxu1 }
 0x763   : > { %11678 = vst.msk [vmem:[%s18337_s29 + $0x90] sm:$0xff] %vm2234_vm1, %v11630_v31  ;;  %v11387_v35 = vadd.f32 %v11295_v33, %v10765_v15  ;;  %v10769_v15 = vadd.f32 %v18539_v25, %v18450_v54  ;;  %v18638_v33 = vpop.f32.mrf.mxu0  ;;  %v18644_v60 = vpop.f32.mrf.mxu2  ;;  %v14016_v25 = vld [vmem:[%s14854_s8 + $0x70] sm:$0xff]  }
 0x765   : > { %v11535_v28 = vadd.f32 %v18316_v7, %v11387_v35 }
 0x767   : > { %v11583_v22 = vadd.f32 %v13587_v5, %v11535_v28  ;;  %v19091_v5 = vld [vmem:[#allocation27_spill] sm:$0xff] }
 0x768   : > { %v9842_v11 = vadd.f32 %v18571_v55, %v19091_v5 }
 0x769   : > { %v11631_v39 = vmax.f32 %v11583_v22, 0.0  ;;  %v13595_v22 = vunpack.c.h.bf16 %v14015_v53 }
 0x76a   : > { %v11298_v26 = vpop.f32.mrf.mxu1  ;;  %v10492_v49 = vadd.f32 %v18575_v56, %v9842_v11  ;;  %v19094_v11 = vld [vmem:[#allocation31_spill] sm:$0xff] }
 0x76b   : > { %11679 = vst.msk [vmem:[%s18337_s29 + $0x98] sm:$0xff] %vm2234_vm1, %v11631_v39  ;;  %v11388_v18 = vadd.f32 %v11298_v26, %v10766_v43  ;;  %v18648_v43 = vpop.f32.mrf.mxu3  ;;  %v11132_v26 = vshrl.u32 %v12984_v14, 16 }
 0x76c   : > { %v10770_v55 = vadd.f32 %v18581_v3, %v10492_v49  ;;  %v18662_v3 = vpop.f32.mrf.mxu2 }
 0x76d   : > { %v11536_v36 = vadd.f32 %v18316_v7, %v11388_v18  ;;  %12836 = vmatmul.msk.bf16.gmra.mxu1 %vm2234_vm1, %v11123_v6  ;;  %v11134_v6 = vor.u32 %v11132_v26, %v11130_v21  ;;  %v9844_v21 = vadd.f32 %v18599_v51, %v19093_v42 }
 0x76f   : > { %v11584_v17 = vadd.f32 %v13590_v57, %v11536_v36  ;;  %v19092_v36 = vld [vmem:[#allocation28_spill] sm:$0xff] }
 0x771   : > { %v11632_v2 = vmax.f32 %v11584_v17, 0.0  ;;  %v9843_v17 = vadd.f32 %v18585_v58, %v19092_v36 }
 0x772   : > { %v11300_v63 = vpop.f32.mrf.mxu1 }
 0x773   : > { %11680 = vst.msk [vmem:[%s18337_s29 + $0xa0] sm:$0xff] %vm2234_vm1, %v11632_v2  ;;  %v11389_v24 = vadd.f32 %v11300_v63, %v10767_v9  ;;  %v13598_v2 = vunpack.c.l.bf16 %v14016_v25  ;;  %v18656_v9 = vpop.f32.mrf.mxu0  ;;  %v11139_v63 = vsel %vm3070_vm3, %v11134_v6, %v11138_v12  ;;  %v10493_v14 = vadd.f32 %v18590_v0, %v9843_v17  ;;  %v18664_v58 = vpop.f32.mrf.mxu3 }
 0x775   : > { %v11537_v50 = vadd.f32 %v18316_v7, %v11389_v24 }
 0x777   : > { %v11585_v10 = vadd.f32 %v13591_v41, %v11537_v50 }
 0x779   : > { %v11633_v29 = vmax.f32 %v11585_v10, 0.0  ;;  %v10771_v10 = vadd.f32 %v18596_v47, %v10493_v14  ;;  %v14017_v47 = vld [vmem:[%s14854_s8 + $0x78] sm:$0xff]  }
 0x77a   : > { %v11303_v30 = vpop.f32.mrf.mxu1 }
 0x77b   : > { %11681 = vst.msk [vmem:[%s18337_s29 + $0xa8] sm:$0xff] %vm2234_vm1, %v11633_v29  ;;  %v11390_v34 = vadd.f32 %v11303_v30, %v10768_v48  ;;  %v13599_v29 = vunpack.c.h.bf16 %v14016_v25  ;;  %v11144_v48 = vshll.u32 %v12986_v1, 16  ;;  %v10494_v30 = vadd.f32 %v18601_v20, %v9844_v21 }
 0x77c   : > { %v9845_v20 = vadd.f32 %v18613_v38, %v19094_v11 }
 0x77d   : > { %v11538_v62 = vadd.f32 %v18316_v7, %v11390_v34  ;;  %12837 = vmatmul.msk.bf16.gmra.mxu1 %vm2234_vm1, %v11131_v23  ;;  %v18673_v34 = vpop.f32.mrf.mxu0  ;;  %v18675_v23 = vpop.f32.mrf.mxu2  ;;  %v10772_v51 = vadd.f32 %v18611_v52, %v10494_v30 }
 0x77f   : > { %v11586_v31 = vadd.f32 %v13594_v59, %v11538_v62  ;;  %v11140_v62 = vshrl.u32 %v12985_v32, 16  ;;  %v10495_v32 = vadd.f32 %v18617_v40, %v9845_v20 }
 0x781   : > { %v11634_v19 = vmax.f32 %v11586_v31, 0.0  ;;  %v11146_v31 = vrot.slane %v11144_v48, 1  ;;  %v11142_v5 = vor.u32 %v11140_v62, %v11138_v12  ;;  %v10773_v38 = vadd.f32 %v18622_v61, %v10495_v32  ;;  %v18704_v61 = vld [vmem:[%s18821_s4] ss:$0 sm:$0xff] }
 0x782   : > { %v11305_v35 = vpop.f32.mrf.mxu1 }
 0x783   : > { %11682 = vst.msk [vmem:[%s18337_s29 + $0xb0] sm:$0xff] %vm2234_vm1, %v11634_v19  ;;  %v11391_v28 = vadd.f32 %v11305_v35, %v10769_v15  ;;  %v18679_v15 = vpop.f32.mrf.mxu3  ;;  %v11147_v44 = vsel %vm3070_vm3, %v11142_v5, %v11146_v31 }
 0x785   : > { %v11539_v39 = vadd.f32 %v18316_v7, %v11391_v28  ;;  %v18692_v26 = vpop.f32.mrf.mxu2 }
 0x787   : > { %v11587_v54 = vadd.f32 %v13595_v22, %v11539_v39  ;;  %v13602_v22 = vunpack.c.l.bf16 %v14017_v47  ;;  %v18689_v39 = vpop.f32.mrf.mxu0 }
 0x789   : > { %v11635_v18 = vmax.f32 %v11587_v54, 0.0  ;;  %v12987_v54 = vld [vmem:[#allocation2 + $0xd4] sm:$0xff] }
 0x78a   : > { %v11308_v57 = vpop.f32.mrf.mxu1  ;;  %v11152_v6 = vshll.u32 %v12987_v54, 16 }
 0x78b   : > { %11683 = vst.msk [vmem:[%s18337_s29 + $0xb8] sm:$0xff] %vm2234_vm1, %v11635_v18  ;;  %v11392_v56 = vadd.f32 %v11308_v57, %v10770_v55  ;;  %v19095_v18 = vld [vmem:[#allocation35_spill] sm:$0xff]  ;;  %v18698_v57 = vpop.f32.mrf.mxu3 }
 0x78c   : > { %v9846_v55 = vadd.f32 %v18627_v8, %v19095_v18  ;;  %v10842_v8 = vld [vmem:[#allocation2 + $0xdc] sm:$0x1] }
 0x78d   : > { %v11540_v24 = vadd.f32 %v18316_v7, %v11392_v56  ;;  %12838 = vmatmul.msk.bf16.gmra.mxu1 %vm2234_vm1, %v11139_v63  ;;  %v11148_v56 = vshrl.u32 %v12986_v1, 16  ;;  %v14018_v63 = vld [vmem:[%s14854_s8 + $0x80] sm:$0xff]   ;;  %v10942_v42 = vunpack.c.l.b16 %v10842_v8  ;;  %v9780_v1 = vpop.f32.mrf.mxu2  ;;  %v19098_v18 = vld [vmem:[#allocation41_spill] sm:$0xff] }
 0x78e   : > { %v10496_v36 = vadd.f32 %v18631_v45, %v9846_v55  ;;  %v19096_v45 = vld [vmem:[#allocation37_spill] sm:$0xff]  ;;  %v13607_v11 = vunpack.c.h.bf16 %v14018_v63  ;;  %v9849_v55 = vadd.f32 %v18675_v23, %v19098_v18 }
 0x78f   : > { %v11588_v41 = vadd.f32 %v13598_v2, %v11540_v24  ;;  %v11150_v14 = vor.u32 %v11148_v56, %v11146_v31  ;;  %v11154_v24 = vrot.slane %v11152_v6, 1  ;;  %v9847_v21 = vadd.f32 %v18644_v60, %v19096_v45  ;;  %v14020_v45 = vld [vmem:[%s14854_s8 + $0x90] sm:$0xff]  }
 0x791   : > { %v11636_v50 = vmax.f32 %v11588_v41, 0.0  ;;  %v11155_v48 = vsel %vm3070_vm3, %v11150_v14, %v11154_v24  ;;  %v10497_v30 = vadd.f32 %v18648_v43, %v9847_v21 }
 0x792   : > { %v11310_v53 = vpop.f32.mrf.mxu1 }
 0x793   : > { %11684 = vst.msk [vmem:[%s18337_s29 + $0xc0] sm:$0xff] %vm2234_vm1, %v11636_v50  ;;  %v11393_v0 = vadd.f32 %v11310_v53, %v10771_v10  ;;  %v10774_v50 = vadd.f32 %v18638_v33, %v10496_v36  ;;  %v10706_v10 = vpop.f32.mrf.mxu0  ;;  %v10430_v33 = vpop.f32.mrf.mxu3  ;;  %v10775_v60 = vadd.f32 %v18656_v9, %v10497_v30 }
 0x795   : > { %v11541_v37 = vadd.f32 %v18316_v7, %v11393_v0 }
 0x797   : > { %v11589_v59 = vadd.f32 %v13599_v29, %v11541_v37  ;;  %v13606_v29 = vunpack.c.l.bf16 %v14018_v63  ;;  %v19099_v63 = vld [vmem:[#allocation45_spill] sm:$0xff] }
 0x798   : > { %v9850_v14 = vadd.f32 %v18692_v26, %v19099_v63  ;;  %v14022_v63 = vld [vmem:[%s14854_s8 + $0xa0] sm:$0xff]  }
 0x799   : > { %v11637_v19 = vmax.f32 %v11589_v59, 0.0  ;;  %v10967_v59 = vpack.c.b16 %v10942_v42, %v10942_v42 }
 0x79a   : > { %v11313_v35 = vpop.f32.mrf.mxu1 }
 0x79b   : > { %11685 = vst.msk [vmem:[%s18337_s29 + $0xc8] sm:$0xff] %vm2234_vm1, %v11637_v19  ;;  %v11394_v28 = vadd.f32 %v11313_v35, %v10772_v51  ;;  %v11156_v19 = vshrl.u32 %v12987_v54, 16  ;;  %v11160_v51 = vshll.u32 %v10967_v59, 16  ;;  %v19097_v35 = vld [vmem:[#allocation40_spill] sm:$0xff]  ;;  %v10708_v20 = vpop.f32.mrf.mxu0  ;;  %v14019_v54 = vld [vmem:[%s14854_s8 + $0x88] sm:$0xff]  }
 0x79c   : > { %v9848_v5 = vadd.f32 %v18662_v3, %v19097_v35  ;;  %v13615_v35 = vunpack.c.h.bf16 %v14020_v45 }
 0x79d   : > { %v11542_v49 = vadd.f32 %v18316_v7, %v11394_v28  ;;  %12839 = vmatmul.msk.bf16.gmra.mxu1 %vm2234_vm1, %v11147_v44  ;;  %v13603_v7 = vunpack.c.h.bf16 %v14017_v47  ;;  %v9783_v44 = vpop.f32.mrf.mxu2  ;;  %v11158_v32 = vor.u32 %v11156_v19, %v11154_v24  ;;  %v11162_v9 = vrot.slane %v11160_v51, 1 }
 0x79e   : > { %v10498_v28 = vadd.f32 %v18664_v58, %v9848_v5  ;;  %v13611_v24 = vunpack.c.h.bf16 %v14019_v54  ;;  %v9852_v51 = vadd.f32 %v9783_v44, %v18065_v27 }
 0x79f   : > { %v11590_v52 = vadd.f32 %v13602_v22, %v11542_v49 }
 0x7a1   : > { %v11638_v25 = vmax.f32 %v11590_v52, 0.0  ;;  %v10433_v52 = vpop.f32.mrf.mxu3 }
 0x7a2   : > { %v11315_v12 = vpop.f32.mrf.mxu1 }
 0x7a3   : > { %11686 = vst.msk [vmem:[%s18337_s29 + $0xd0] sm:$0xff] %vm2234_vm1, %v11638_v25  ;;  %v11395_v40 = vadd.f32 %v11315_v12, %v10773_v38  ;;  %v10776_v38 = vadd.f32 %v18673_v34, %v10498_v28  ;;  %v11163_v12 = vsel %vm3070_vm3, %v11158_v32, %v11162_v9  ;;  %v10711_v36 = vpop.f32.mrf.mxu0 }
 0x7a5   : > { %v11543_v17 = vadd.f32 %v18704_v61, %v11395_v40  ;;  %v13610_v40 = vunpack.c.l.bf16 %v14019_v54 }
 0x7a7   : > { %v11591_v2 = vadd.f32 %v13603_v7, %v11543_v17  ;;  %v10499_v7 = vadd.f32 %v18679_v15, %v9849_v55  ;;  %v9785_v17 = vpop.f32.mrf.mxu2 }
 0x7a9   : > { %v11639_v41 = vmax.f32 %v11591_v2, 0.0  ;;  %v10777_v2 = vadd.f32 %v18689_v39, %v10499_v7  ;;  %v10435_v8 = vpop.f32.mrf.mxu3  ;;  %v19102_v7 = vld [vmem:[#allocation48_spill] sm:$0xff] }
 0x7aa   : > { %v11318_v53 = vpop.f32.mrf.mxu1 }
 0x7ab   : > { %11687 = vst.msk [vmem:[%s18337_s29 + $0xd8] sm:$0xff] %vm2234_vm1, %v11639_v41  ;;  %v11396_v0 = vadd.f32 %v11318_v53, %v10774_v50  ;;  %v10500_v41 = vadd.f32 %v18698_v57, %v9850_v14  ;;  %v10713_v42 = vpop.f32.mrf.mxu0 }
 0x7ad   : > { %v11544_v37 = vadd.f32 %v18704_v61, %v11396_v0  ;;  %12840 = vmatmul.msk.bf16.gmra.mxu1 %vm2234_vm1, %v11155_v48  ;;  %v10778_v0 = vadd.f32 %v10706_v10, %v10500_v41  ;;  %v19100_v48 = vld [vmem:[#allocation47_spill] sm:$0xff] }
 0x7ae   : > { %v9851_v30 = vadd.f32 %v9780_v1, %v19100_v48 }
 0x7af   : > { %v11592_v47 = vadd.f32 %v13606_v29, %v11544_v37  ;;  %v9788_v39 = vpop.f32.mrf.mxu2  ;;  %v13614_v37 = vunpack.c.l.bf16 %v14020_v45  ;;  %v13622_v45 = vunpack.c.l.bf16 %v14022_v63 }
 0x7b1   : > { %v11640_v62 = vmax.f32 %v11592_v47, 0.0  ;;  %v10438_v59 = vpop.f32.mrf.mxu3  ;;  %v10501_v47 = vadd.f32 %v10430_v33, %v9851_v30 }
 0x7b2   : > { %v11320_v31 = vpop.f32.mrf.mxu1 }
 0x7b3   : > { %11688 = vst.msk [vmem:[%s18337_s29 + $0xe0] sm:$0xff] %vm2234_vm1, %v11640_v62  ;;  %v11397_v43 = vadd.f32 %v11320_v31, %v10775_v60  ;;  %v10779_v31 = vadd.f32 %v10708_v20, %v10501_v47  ;;  %v10716_v19 = vpop.f32.mrf.mxu0 }
 0x7b5   : > { %v11545_v22 = vadd.f32 %v18704_v61, %v11397_v43  ;;  %v10502_v43 = vadd.f32 %v10433_v52, %v9852_v51 }
 0x7b7   : > { %v11593_v49 = vadd.f32 %v13607_v11, %v11545_v22  ;;  %v9790_v5 = vpop.f32.mrf.mxu2  ;;  %v14021_v22 = vld [vmem:[%s14854_s8 + $0x98] sm:$0xff]   ;;  %v10780_v9 = vadd.f32 %v10711_v36, %v10502_v43  ;;  %v19104_v43 = vld [vmem:[#allocation50_spill] sm:$0xff] }
 0x7b8   : > { %v13618_v44 = vunpack.c.l.bf16 %v14021_v22 }
 0x7b9   : > { %v11641_v25 = vmax.f32 %v11593_v49, 0.0  ;;  %v10440_v33 = vpop.f32.mrf.mxu3  ;;  %v19101_v49 = vld [vmem:[#allocation61_spill] sm:$0xff] }
 0x7ba   : > { %v11323_v3 = vpop.f32.mrf.mxu1  ;;  %v9853_v54 = vadd.f32 %v9785_v17, %v19101_v49 }
 0x7bb   : > { %11689 = vst.msk [vmem:[%s18337_s29 + $0xe8] sm:$0xff] %vm2234_vm1, %v11641_v25  ;;  %v11398_v58 = vadd.f32 %v11323_v3, %v10776_v38  ;;  %v10718_v25 = vpop.f32.mrf.mxu0 }
 0x7bc   : > { %v10503_v38 = vadd.f32 %v10435_v8, %v9853_v54 }
 0x7bd   : > { %v11546_v6 = vadd.f32 %v18704_v61, %v11398_v58  ;;  %12841 = vmatmul.msk.bf16.gmra.mxu1 %vm2234_vm1, %v11163_v12 }
 0x7be   : > { %v10781_v58 = vadd.f32 %v10713_v42, %v10503_v38 }
 0x7bf   : > { %v11594_v34 = vadd.f32 %v13610_v40, %v11546_v6  ;;  %v9793_v52 = vpop.f32.mrf.mxu2  ;;  %v9854_v6 = vadd.f32 %v9788_v39, %v19102_v7  ;;  %v14024_v7 = vld [vmem:[%s14854_s8 + $0xb0] sm:$0xff]  }
 0x7c1   : > { %v11642_v56 = vmax.f32 %v11594_v34, 0.0  ;;  %v10443_v18 = vpop.f32.mrf.mxu3  ;;  %v13619_v34 = vunpack.c.h.bf16 %v14021_v22  ;;  %v10504_v17 = vadd.f32 %v10438_v59, %v9854_v6  ;;  %v9856_v59 = vadd.f32 %v9793_v52, %v18139_v46 }
 0x7c2   : > { %v11325_v23 = vpop.f32.mrf.mxu1 }
 0x7c3   : > { %11690 = vst.msk [vmem:[%s18337_s29 + $0xf0] sm:$0xff] %vm2234_vm1, %v11642_v56  ;;  %v11399_v15 = vadd.f32 %v11325_v23, %v10777_v2  ;;  %v10721_v2 = vpop.f32.mrf.mxu0 }
 0x7c5   : > { %v11547_v50 = vadd.f32 %v18704_v61, %v11399_v15  ;;  %v10782_v15 = vadd.f32 %v10716_v19, %v10504_v17  ;;  %v19106_v17 = vld [vmem:[#allocation51_spill] sm:$0xff] }
 0x7c7   : > { %v11595_v53 = vadd.f32 %v13611_v24, %v11547_v50  ;;  %v9795_v23 = vpop.f32.mrf.mxu2  ;;  %v19103_v50 = vld [vmem:[#allocation8_spill] sm:$0xff] }
 0x7c9   : > { %v11643_v21 = vmax.f32 %v11595_v53, 0.0  ;;  %v10445_v24 = vpop.f32.mrf.mxu3  ;;  %v9855_v53 = vadd.f32 %v9790_v5, %v19103_v50 }
 0x7ca   : > { %v11328_v29 = vpop.f32.mrf.mxu1 }
 0x7cb   : > { %11691 = vst.msk [vmem:[%s18337_s29 + $0xf8] sm:$0xff] %vm2234_vm1, %v11643_v21  ;;  %v11400_v26 = vadd.f32 %v11328_v29, %v10778_v0  ;;  %v10505_v21 = vadd.f32 %v10440_v33, %v9855_v53  ;;  %v10723_v29 = vpop.f32.mrf.mxu0 }
 0x7cd   : > { %v11548_v57 = vadd.f32 %v18704_v61, %v11400_v26  ;;  %v10783_v30 = vadd.f32 %v10718_v25, %v10505_v21 }
 0x7cf   : > { %v11596_v62 = vadd.f32 %v13614_v37, %v11548_v57  ;;  %v9798_v26 = vpop.f32.mrf.mxu2  ;;  %v13623_v57 = vunpack.c.h.bf16 %v14022_v63 }
 0x7d1   : > { %v11644_v60 = vmax.f32 %v11596_v62, 0.0  ;;  %v10448_v62 = vpop.f32.mrf.mxu3 }
 0x7d2   : > { %v11330_v10 = vpop.f32.mrf.mxu1 }
 0x7d3   : > { %11692 = vst.msk [vmem:[%s18337_s29 + $0x100] sm:$0xff] %vm2234_vm1, %v11644_v60  ;;  %v11401_v1 = vadd.f32 %v11330_v10, %v10779_v31  ;;  %v10506_v60 = vadd.f32 %v10443_v18, %v9856_v59  ;;  %v14023_v10 = vld [vmem:[%s14854_s8 + $0xa8] sm:$0xff]  }
 0x7d4   : > { %v13626_v33 = vunpack.c.l.bf16 %v14023_v10 }
 0x7d5   : > { %v11549_v11 = vadd.f32 %v18704_v61, %v11401_v1  ;;  %v10784_v1 = vadd.f32 %v10721_v2, %v10506_v60  ;;  %v19108_v60 = vld [vmem:[#allocation25_spill] sm:$0xff] }
 0x7d7   : > { %v11597_v28 = vadd.f32 %v13615_v35, %v11549_v11  ;;  %v10726_v35 = vpop.f32.mrf.mxu0  ;;  %v9857_v11 = vadd.f32 %v9795_v23, %v19104_v43 }
 0x7d9   : > { %v11645_v32 = vmax.f32 %v11597_v28, 0.0  ;;  %v9800_v28 = vpop.f32.mrf.mxu2  ;;  %v10507_v22 = vadd.f32 %v10445_v24, %v9857_v11 }
 0x7da   : > { %v11333_v20 = vpop.f32.mrf.mxu1 }
 0x7db   : > { %11693 = vst.msk [vmem:[%s18337_s29 + $0x108] sm:$0xff] %vm2234_vm1, %v11645_v32  ;;  %v11402_v27 = vadd.f32 %v11333_v20, %v10780_v9  ;;  %v10450_v9 = vpop.f32.mrf.mxu3  ;;  %v10785_v54 = vadd.f32 %v10723_v29, %v10507_v22 }
 0x7dd   : > { %v11550_v3 = vadd.f32 %v18704_v61, %v11402_v27 }
 0x7df   : > { %v11598_v12 = vadd.f32 %v13618_v44, %v11550_v3  ;;  %v19105_v44 = vld [vmem:[#allocation10_spill] sm:$0xff]  ;;  %v13627_v3 = vunpack.c.h.bf16 %v14023_v10  ;;  %v10728_v52 = vpop.f32.mrf.mxu0 }
 0x7e0   : > { %v9858_v25 = vadd.f32 %v9798_v26, %v19105_v44  ;;  %v14026_v44 = vld [vmem:[%s14854_s8 + $0xc0] sm:$0xff]  }
 0x7e1   : > { %v11646_v55 = vmax.f32 %v11598_v12, 0.0 }
 0x7e2   : > { %v11335_v40 = vpop.f32.mrf.mxu1  ;;  %v10508_v12 = vadd.f32 %v10448_v62, %v9858_v25 }
 0x7e3   : > { %11694 = vst.msk [vmem:[%s18337_s29 + $0x110] sm:$0xff] %vm2234_vm1, %v11646_v55  ;;  %v11403_v36 = vadd.f32 %v11335_v40, %v10781_v58  ;;  %v9803_v55 = vpop.f32.mrf.mxu2  ;;  %v10453_v40 = vpop.f32.mrf.mxu3 }
 0x7e5   : > { %v11551_v56 = vadd.f32 %v18704_v61, %v11403_v36  ;;  %v10786_v36 = vadd.f32 %v10726_v35, %v10508_v12  ;;  %v13638_v12 = vunpack.c.l.bf16 %v14026_v44 }
 0x7e7   : > { %v11599_v8 = vadd.f32 %v13619_v34, %v11551_v56  ;;  %v9859_v56 = vadd.f32 %v9800_v28, %v19106_v17 }
 0x7e9   : > { %v11647_v14 = vmax.f32 %v11599_v8, 0.0  ;;  %v13630_v8 = vunpack.c.l.bf16 %v14024_v7  ;;  %v10509_v23 = vadd.f32 %v10450_v9, %v9859_v56 }
 0x7ea   : > { %v11338_v41 = vpop.f32.mrf.mxu1 }
 0x7eb   : > { %11695 = vst.msk [vmem:[%s18337_s29 + $0x118] sm:$0xff] %vm2234_vm1, %v11647_v14  ;;  %v11404_v42 = vadd.f32 %v11338_v41, %v10782_v15  ;;  %v10731_v14 = vpop.f32.mrf.mxu0  ;;  %v9805_v24 = vpop.f32.mrf.mxu2  ;;  %v10787_v50 = vadd.f32 %v10728_v52, %v10509_v23 }
 0x7ec   : > { %v10455_v53 = vpop.f32.mrf.mxu3 }
 0x7ed   : > { %v11552_v0 = vadd.f32 %v18704_v61, %v11404_v42 }
 0x7ef   : > { %v11600_v39 = vadd.f32 %v13622_v45, %v11552_v0  ;;  %v19107_v45 = vld [vmem:[#allocation16_spill] sm:$0xff] }
 0x7f0   : > { %v9860_v21 = vadd.f32 %v9803_v55, %v19107_v45  ;;  %v19109_v45 = vld [vmem:[#allocation26_spill] sm:$0xff] }
 0x7f1   : > { %v11648_v48 = vmax.f32 %v11600_v39, 0.0  ;;  %v13631_v39 = vunpack.c.h.bf16 %v14024_v7 }
 0x7f2   : > { %v11340_v37 = vpop.f32.mrf.mxu1  ;;  %v10510_v29 = vadd.f32 %v10453_v40, %v9860_v21 }
 0x7f3   : > { %11696 = vst.msk [vmem:[%s18337_s29 + $0x120] sm:$0xff] %vm2234_vm1, %v11648_v48  ;;  %v11405_v47 = vadd.f32 %v11340_v37, %v10783_v30  ;;  %v10733_v26 = vpop.f32.mrf.mxu0  ;;  %v14025_v37 = vld [vmem:[%s14854_s8 + $0xb8] sm:$0xff]  }
 0x7f4   : > { %v13634_v10 = vunpack.c.l.bf16 %v14025_v37 }
 0x7f5   : > { %v11553_v31 = vadd.f32 %v18704_v61, %v11405_v47  ;;  %v10788_v47 = vadd.f32 %v10731_v14, %v10510_v29 }
 0x7f7   : > { %v11601_v19 = vadd.f32 %v13623_v57, %v11553_v31  ;;  %v9808_v57 = vpop.f32.mrf.mxu2  ;;  %v9861_v31 = vadd.f32 %v9805_v24, %v19108_v60  ;;  %v14027_v24 = vld [vmem:[%s14854_s8 + $0xc8] sm:$0xff]  }
 0x7f8   : > { %v9862_v28 = vadd.f32 %v9808_v57, %v18246_v16  ;;  %v13643_v57 = vunpack.c.h.bf16 %v14027_v24 }
 0x7f9   : > { %v11649_v51 = vmax.f32 %v11601_v19, 0.0 }
 0x7fa   : > { %v11343_v5 = vpop.f32.mrf.mxu1 }
 0x7fb   : > { %11697 = vst.msk [vmem:[%s18337_s29 + $0x128] sm:$0xff] %vm2234_vm1, %v11649_v51  ;;  %v11406_v46 = vadd.f32 %v11343_v5, %v10784_v1  ;;  %v10458_v51 = vpop.f32.mrf.mxu3  ;;  %v10511_v1 = vadd.f32 %v10455_v53, %v9861_v31 }
 0x7fd   : > { %v11554_v32 = vadd.f32 %v18704_v61, %v11406_v46  ;;  %v10789_v11 = vadd.f32 %v10733_v26, %v10511_v1  ;;  %v10736_v46 = vpop.f32.mrf.mxu0 }
 0x7ff   : > { %v11602_v20 = vadd.f32 %v13626_v33, %v11554_v32  ;;  %v13635_v32 = vunpack.c.h.bf16 %v14025_v37  ;;  %v9810_v9 = vpop.f32.mrf.mxu2 }
 0x800   : > { %v9863_v52 = vadd.f32 %v9810_v9, %v18266_v4 }
 0x801   : > { %v11650_v49 = vmax.f32 %v11602_v20, 0.0  ;;  %v10512_v20 = vadd.f32 %v10458_v51, %v9862_v28 }
 0x802   : > { %v11345_v27 = vpop.f32.mrf.mxu1 }
 0x803   : > { %11698 = vst.msk [vmem:[%s18337_s29 + $0x130] sm:$0xff] %vm2234_vm1, %v11650_v49  ;;  %v11407_v38 = vadd.f32 %v11345_v27, %v10785_v54  ;;  %v10460_v54 = vpop.f32.mrf.mxu3 }
 0x804   : > { %v10513_v55 = vadd.f32 %v10460_v54, %v9863_v52 }
 0x805   : > { %v11555_v18 = vadd.f32 %v18704_v61, %v11407_v38  ;;  %v10790_v38 = vadd.f32 %v10736_v46, %v10512_v20 }
 0x807   : > { %v11603_v58 = vadd.f32 %v13627_v3, %v11555_v18  ;;  %v10738_v18 = vpop.f32.mrf.mxu0  ;;  %v9813_v40 = vpop.f32.mrf.mxu2 }
 0x808   : > { %v9864_v56 = vadd.f32 %v9813_v40, %v18279_v13 }
 0x809   : > { %v11651_v6 = vmax.f32 %v11603_v58, 0.0 }
 0x80a   : > { %v11348_v34 = vpop.f32.mrf.mxu1 }
 0x80b   : > { %11699 = vst.msk [vmem:[%s18337_s29 + $0x138] sm:$0xff] %vm2234_vm1, %v11651_v6  ;;  %v11408_v2 = vadd.f32 %v11348_v34, %v10786_v36  ;;  %v10463_v6 = vpop.f32.mrf.mxu3  ;;  %v10791_v34 = vadd.f32 %v10738_v18, %v10513_v55 }
 0x80c   : > { %v10514_v23 = vadd.f32 %v10463_v6, %v9864_v56 }
 0x80d   : > { %v11556_v63 = vadd.f32 %v18704_v61, %v11408_v2  ;;  %v13639_v2 = vunpack.c.h.bf16 %v14026_v44 }
 0x80f   : > { %v11604_v15 = vadd.f32 %v13630_v8, %v11556_v63  ;;  %v10741_v8 = vpop.f32.mrf.mxu0 }
 0x811   : > { %v11652_v41 = vmax.f32 %v11604_v15, 0.0  ;;  %v9815_v15 = vpop.f32.mrf.mxu2 }
 0x812   : > { %v11350_v42 = vpop.f32.mrf.mxu1  ;;  %v9865_v21 = vadd.f32 %v9815_v15, %v19109_v45 }
 0x813   : > { %11700 = vst.msk [vmem:[%s18337_s29 + $0x140] sm:$0xff] %vm2234_vm1, %v11652_v41  ;;  %v11409_v0 = vadd.f32 %v11350_v42, %v10787_v50  ;;  %v10792_v41 = vadd.f32 %v10741_v8, %v10514_v23  ;;  %v10465_v53 = vpop.f32.mrf.mxu3 }
 0x815   : > { %v11557_v48 = vadd.f32 %v18704_v61, %v11409_v0  ;;  %v13642_v0 = vunpack.c.l.bf16 %v14027_v24 }
 0x817   : > { %v11605_v30 = vadd.f32 %v13631_v39, %v11557_v48  ;;  %v10515_v39 = vadd.f32 %v10465_v53, %v9865_v21  ;;  %v10743_v48 = vpop.f32.mrf.mxu0 }
 0x819   : > { %v11653_v59 = vmax.f32 %v11605_v30, 0.0  ;;  %v10793_v26 = vadd.f32 %v10743_v48, %v10515_v39 }
 0x81a   : > { %v11353_v62 = vpop.f32.mrf.mxu1 }
 0x81b   : > { %11701 = vst.msk [vmem:[%s18337_s29 + $0x148] sm:$0xff] %vm2234_vm1, %v11653_v59  ;;  %v11410_v19 = vadd.f32 %v11353_v62, %v10788_v47 }
 0x81d   : > { %v11558_v35 = vadd.f32 %v18704_v61, %v11410_v19 }
 0x81f   : > { %v11606_v5 = vadd.f32 %v13634_v10, %v11558_v35 }
 0x821   : > { %v11654_v43 = vmax.f32 %v11606_v5, 0.0 }
 0x822   : > { %v11355_v33 = vpop.f32.mrf.mxu1 }
 0x823   : > { %11702 = vst.msk [vmem:[%s18337_s29 + $0x150] sm:$0xff] %vm2234_vm1, %v11654_v43  ;;  %v11411_v22 = vadd.f32 %v11355_v33, %v10789_v11 }
 0x825   : > { %v11559_v49 = vadd.f32 %v18704_v61, %v11411_v22 }
 0x827   : > { %v11607_v27 = vadd.f32 %v13635_v32, %v11559_v49 }
 0x829   : > { %v11655_v25 = vmax.f32 %v11607_v27, 0.0 }
 0x82a   : > { %v11358_v3 = vpop.f32.mrf.mxu1 }
 0x82b   : > { %11703 = vst.msk [vmem:[%s18337_s29 + $0x158] sm:$0xff] %vm2234_vm1, %v11655_v25  ;;  %v11412_v16 = vadd.f32 %v11358_v3, %v10790_v38 }
 0x82d   : > { %v11560_v58 = vadd.f32 %v18704_v61, %v11412_v16 }
 0x82f   : > { %v11608_v7 = vadd.f32 %v13638_v12, %v11560_v58 }
 0x831   : > { %v11656_v36 = vmax.f32 %v11608_v7, 0.0 }
 0x832   : > { %v11360_v17 = vpop.f32.mrf.mxu1 }
 0x833   : > { %11704 = vst.msk [vmem:[%s18337_s29 + $0x160] sm:$0xff] %vm2234_vm1, %v11656_v36  ;;  %v11413_v4 = vadd.f32 %v11360_v17, %v10791_v34 }
 0x835   : > { %v11561_v63 = vadd.f32 %v18704_v61, %v11413_v4 }
 0x837   : > { %v11609_v14 = vadd.f32 %v13639_v2, %v11561_v63 }
 0x839   : > { %v11657_v50 = vmax.f32 %v11609_v14, 0.0 }
 0x83a   : > { %v11363_v42 = vpop.f32.mrf.mxu1 }
 0x83b   : > { %11705 = vst.msk [vmem:[%s18337_s29 + $0x168] sm:$0xff] %vm2234_vm1, %v11657_v50  ;;  %v11414_v13 = vadd.f32 %v11363_v42, %v10792_v41 }
 0x83d   : > { %v11562_v29 = vadd.f32 %v18704_v61, %v11414_v13 }
 0x83f   : > { %v11610_v30 = vadd.f32 %v13642_v0, %v11562_v29 }
 0x841   : > { %v11658_v37 = vmax.f32 %v11610_v30, 0.0 }
 0x842   : > { %v11365_v59 = vpop.f32.mrf.mxu1 }
 0x843   : > { %11706 = vst.msk [vmem:[%s18337_s29 + $0x170] sm:$0xff] %vm2234_vm1, %v11658_v37  ;;  %v11415_v47 = vadd.f32 %v11365_v59, %v10793_v26 }
 0x845   : > { %v11563_v62 = vadd.f32 %v18704_v61, %v11415_v47 }
 0x847   : > { %v11611_v60 = vadd.f32 %v13643_v57, %v11563_v62 }
 0x849   : > { %v11659_v31 = vmax.f32 %v11611_v60, 0.0 }
 0x84b   : > { %11707 = vst.msk [vmem:[%s18337_s29 + $0x178] sm:$0xff] %vm2234_vm1, %v11659_v31 }
 0x84c PF: > { %s15_s18 = sadd.s32 1, %s14786_s18  }
 0x84d   : > { %p12_p4 = scmp.ge.s32.totalorder %s15_s18, 4  }
 0x84f   :  { %14 = sbr.rel (!%p12_p4) target bundleno = 1 (0x1), region = 86 }

</bundles_post_ra>
